<compile_context>
chip_gen: v7x
topology: tpu7x:2x2x1
jax: 0.10.0
libtpu: 0.0.40
codegen_flags: <defaults>
</compile_context>

<pallas_src>
import functools

import numpy as np
import jax
import jax.numpy as jnp
from jax.experimental import pallas as pl
from jax.experimental.pallas import tpu as pltpu


# -----------------------------------------------------------------------------
# Kernel: one grid step == one image: 4x(conv+BN+ReLU+pool) + global max + fc
# -----------------------------------------------------------------------------
def _convnet_kernel(x_ref, *refs, geoms, compute_dtype):
    nb = len(geoms)
    blk_refs = refs[: 3 * nb]                         # (w_taps, shift, select) per block
    wfc_ref, bfc_ref = refs[3 * nb: 3 * nb + 2]
    emb_ref, logits_ref = refs[3 * nb + 2:]

    act = x_ref[0]                                    # (n0 + 2*margin0, Cin), padded-flat
    for l, (H, W) in enumerate(geoms):
        w_ref = blk_refs[3 * l]                       # (9, Cin_l, Cout) scale-folded
        s_ref = blk_refs[3 * l + 1]                   # (1, Cout)       folded BN shift
        sel_ref = blk_refs[3 * l + 2]                 # (rows_next, L_l) 0/1 selection
        Wp = W + 2
        n = (H + 2) * Wp
        margin = Wp + 1

        # Conv 3x3 (pad=1): 9 accumulating MXU dots over shifted static slices.
        acc = None
        for i in range(3):
            for j in range(3):
                d = (i - 1) * Wp + (j - 1)
                xs = act[margin + d: margin + d + n, :]
                contrib = jnp.dot(xs, w_ref[i * 3 + j],
                                  preferred_element_type=jnp.float32)
                acc = contrib if acc is None else acc + contrib

        # Folded-BN shift + ReLU (VPU); scale already folded into the weights.
        y = jnp.maximum(acc + s_ref[...], 0.0)

        # 2x2 max-pool: max of 4 shifted views of the padded-flat conv output.
        L = n - Wp - 1
        m = jnp.maximum(jnp.maximum(y[0:L], y[1:1 + L]),
                        jnp.maximum(y[Wp:Wp + L], y[Wp + 1:Wp + 1 + L]))

        # 0/1 selection matmul (MXU): re-embed pooled rows into the next block's
        # zero-padded flat slab (zero rows recreate the ring + margins), or, for
        # the last block, gather the valid pooled rows (row-major).
        act = jnp.dot(sel_ref[...], m, preferred_element_type=jnp.float32)
        if l < nb - 1:
            act = act.astype(compute_dtype)

    # Global spatial max over the remaining feature-map positions (1x1 for 16x16
    # input, so this is a no-op there).
    emb = act if act.shape[0] == 1 else jnp.max(act, axis=0, keepdims=True)
    emb_ref[0] = emb.astype(emb_ref.dtype)

    # Fused fc head (avoids a separate, launch-overhead-dominated pallas_call).
    logits = jnp.dot(emb.astype(compute_dtype), wfc_ref[...],
                     preferred_element_type=jnp.float32) + bfc_ref[...]
    logits_ref[0] = logits.astype(logits_ref.dtype)


# -----------------------------------------------------------------------------
# Wrapper-side (trace-time) constant construction
# -----------------------------------------------------------------------------
def _fold_bn_into_conv(p, eps=1e-5):
    """Fold eval-mode BatchNorm (and the conv bias) into the conv weights."""
    w = p["w"]                                        # (Cout, Cin, 3, 3), torch layout
    cout, cin = w.shape[0], w.shape[1]
    inv_std = 1.0 / jnp.sqrt(p["var"] + eps)
    scale = p["gamma"] * inv_std                      # (Cout,)
    shift = p["beta"] + (p["b"] - p["mean"]) * scale  # (Cout,)
    w_taps = jnp.transpose(w, (2, 3, 1, 0)).reshape(9, cin, cout) * scale[None, None, :]
    return w_taps, shift.reshape(1, cout)


def _selection_matrix(H, W, last):
    """0/1 matrix mapping this block's pooled vector (length L) to either the
    next block's zero-padded + margined flat slab (last=False) or the list of
    valid pooled positions in row-major order (last=True)."""
    Wp = W + 2
    L = (H + 2) * Wp - Wp - 1
    Ho, Wo = H // 2, W // 2
    if last:
        S = np.zeros((Ho * Wo, L), np.float32)
        for ho in range(Ho):
            for wo in range(Wo):
                S[ho * Wo + wo, (2 * ho + 1) * Wp + (2 * wo + 1)] = 1.0
    else:
        Wpo = Wo + 2
        margin_o = Wpo + 1
        S = np.zeros(((Ho + 2) * Wpo + 2 * margin_o, L), np.float32)
        for ho in range(Ho):
            for wo in range(Wo):
                r = margin_o + (ho + 1) * Wpo + (wo + 1)
                S[r, (2 * ho + 1) * Wp + (2 * wo + 1)] = 1.0
    return jnp.asarray(S)


def classifier_forward(data_nchw, enc_params, fc_params, is_emb=False,
                       compute_dtype=jnp.float32):
    """Equivalent of Classifier.forward(data, is_emb=...) with ConvNet backbone.

    compute_dtype=jnp.bfloat16 enables the native bf16 MXU path on v6e/v7x
    (matmul operands in bf16, f32 accumulation + f32 epilogue)."""
    N, Cin, H, W = data_nchw.shape
    nb = len(enc_params)
    w_fc, b_fc = fc_params                            # (num_class, hdim), (num_class,)
    num_class, hdim = w_fc.shape

    # ---- trace-time constants: folded weights, shifts, selection matrices ----
    geoms, consts = [], []
    h, w = H, W
    for l, p in enumerate(enc_params):
        assert h % 2 == 0 and w % 2 == 0, "MaxPool2d(2) needs even spatial dims"
        geoms.append((h, w))
        w_taps, shift = _fold_bn_into_conv(p)
        sel = _selection_matrix(h, w, last=(l == nb - 1))
        consts += [w_taps.astype(compute_dtype), shift.astype(jnp.float32), sel]
        h //= 2
        w //= 2
    consts += [jnp.transpose(w_fc, (1, 0)).astype(compute_dtype),
               b_fc.reshape(1, num_class).astype(jnp.float32)]

    # ---- input: NHWC + 1-px zero ring (conv pad), flattened, zero row margin --
    x = jnp.transpose(data_nchw, (0, 2, 3, 1))        # NCHW -> NHWC
    xp = jnp.pad(x, ((0, 0), (1, 1), (1, 1), (0, 0)))
    Wp0 = W + 2
    margin0 = Wp0 + 1
    x_big = jnp.pad(xp.reshape(N, (H + 2) * Wp0, Cin),
                    ((0, 0), (margin0, margin0), (0, 0))).astype(compute_dtype)

    def _const_spec(a):
        return pl.BlockSpec(a.shape, lambda b, nd=a.ndim: (0,) * nd)

    kernel = functools.partial(_convnet_kernel, geoms=tuple(geoms),
                               compute_dtype=compute_dtype)
    emb, logits = pl.pallas_call(
        kernel,
        out_shape=(jax.ShapeDtypeStruct((N, 1, hdim), jnp.float32),
                   jax.ShapeDtypeStruct((N, 1, num_class), jnp.float32)),
        grid_spec=pltpu.PrefetchScalarGridSpec(
            num_scalar_prefetch=0,
            grid=(N,),
            in_specs=[pl.BlockSpec((1,) + x_big.shape[1:], lambda b: (b, 0, 0))]
                     + [_const_spec(a) for a in consts],
            out_specs=[pl.BlockSpec((1, 1, hdim), lambda b: (b, 0, 0)),
                       pl.BlockSpec((1, 1, num_class), lambda b: (b, 0, 0))],
        ),
        compiler_params=pltpu.CompilerParams(
            dimension_semantics=("parallel",)),
    )(x_big, *consts)

    emb = emb.reshape(N, hdim)
    logits = logits.reshape(N, num_class)
    return emb if is_emb else logits


# -----------------------------------------------------------------------------
# Pure-JAX reference (im2col formulation) for a numerical self-check
# -----------------------------------------------------------------------------
def _reference_forward(data_nchw, enc_params, fc_params, eps=1e-5):
    x = jnp.transpose(data_nchw, (0, 2, 3, 1))
    for p in enc_params:
        N, H, W, Cin = x.shape
        w = p["w"]
        Cout = w.shape[0]
        xp = jnp.pad(x, ((0, 0), (1, 1), (1, 1), (0, 0)))
        patches = jnp.concatenate(
            [xp[:, dy:dy + H, dx:dx + W, :] for dy in range(3) for dx in range(3)],
            axis=-1).reshape(N * H * W, 9 * Cin)
        wmat = jnp.transpose(w, (2, 3, 1, 0)).reshape(9 * Cin, Cout)
        inv_std = 1.0 / jnp.sqrt(p["var"] + eps)
        scale = p["gamma"] * inv_std
        shift = p["beta"] + (p["b"] - p["mean"]) * scale
        y = jnp.maximum(patches @ wmat * scale + shift, 0.0).reshape(N, H, W, Cout)
        x = y.reshape(N, H // 2, 2, W // 2, 2, Cout).max(axis=(2, 4))
    emb = jnp.max(x, axis=(1, 2))
    w_fc, b_fc = fc_params
    return emb @ w_fc.T + b_fc


if __name__ == "__main__":
    key = jax.random.PRNGKey(0)
    keys = jax.random.split(key, 32)

    num_class = 10
    hdim = 64
    chans = [3, 64, 64, 64, 64]

    # Deterministic parameters (nn.Conv2d / nn.BatchNorm2d(eval) / nn.Linear
    # shapes of the ConvNet backbone + fc head), with non-trivial BN statistics
    # so the scale/shift folding is genuinely exercised.
    enc_params = []
    kidx = 0
    for li in range(4):
        cin, cout = chans[li], chans[li + 1]
        w = jax.random.normal(keys[kidx], (cout, cin, 3, 3), jnp.float32)
        w = w * (2.0 / (9 * cin)) ** 0.5
        enc_params.append(dict(
            w=w,
            b=0.1 * jax.random.normal(keys[kidx + 1], (cout,), jnp.float32),
            gamma=jax.random.uniform(keys[kidx + 2], (cout,), jnp.float32, 0.5, 1.5),
            beta=0.1 * jax.random.normal(keys[kidx + 3], (cout,), jnp.float32),
            mean=0.1 * jax.random.normal(keys[kidx + 4], (cout,), jnp.float32),
            var=jax.random.uniform(keys[kidx + 5], (cout,), jnp.float32, 0.5, 1.5),
        ))
        kidx += 6
    w_fc = jax.random.normal(keys[kidx], (num_class, hdim), jnp.float32)
    w_fc = w_fc * (1.0 / hdim) ** 0.5
    b_fc = 0.1 * jax.random.normal(keys[kidx + 1], (num_class,), jnp.float32)

    # PyTorch-convention NCHW input: batch=2, channels=3, spatial=16x16.
    data = jax.random.normal(keys[kidx + 2], (2, 3, 16, 16), jnp.float32)

    logits = classifier_forward(data, enc_params, (w_fc, b_fc))
    logits = jax.block_until_ready(logits)
    assert logits.shape == (2, num_class)
    assert bool(jnp.all(jnp.isfinite(logits)))

    ref = _reference_forward(data, enc_params, (w_fc, b_fc))
    np.testing.assert_allclose(np.asarray(logits), np.asarray(ref),
                               rtol=1e-3, atol=1e-3)
    print("KERNEL_OK")
</pallas_src>

<mosaic_0001>
module attributes {stable_mosaic.version = 11 : i64} {
  func.func @_convnet_kernel(%arg0: i32, %arg1: memref<1x362x3xf32, #tpu.memory_space<vmem>>, %arg2: memref<9x3x64xf32, #tpu.memory_space<vmem>>, %arg3: memref<1x64xf32, #tpu.memory_space<vmem>>, %arg4: memref<122x305xf32, #tpu.memory_space<vmem>>, %arg5: memref<9x64x64xf32, #tpu.memory_space<vmem>>, %arg6: memref<1x64xf32, #tpu.memory_space<vmem>>, %arg7: memref<50x89xf32, #tpu.memory_space<vmem>>, %arg8: memref<9x64x64xf32, #tpu.memory_space<vmem>>, %arg9: memref<1x64xf32, #tpu.memory_space<vmem>>, %arg10: memref<26x29xf32, #tpu.memory_space<vmem>>, %arg11: memref<9x64x64xf32, #tpu.memory_space<vmem>>, %arg12: memref<1x64xf32, #tpu.memory_space<vmem>>, %arg13: memref<1x11xf32, #tpu.memory_space<vmem>>, %arg14: memref<64x10xf32, #tpu.memory_space<vmem>>, %arg15: memref<1x10xf32, #tpu.memory_space<vmem>>, %arg16: memref<1x1x64xf32, #tpu.memory_space<vmem>>, %arg17: memref<1x1x10xf32, #tpu.memory_space<vmem>>) attributes {dimension_semantics = [#tpu.dimension_semantics<parallel>], iteration_bounds = array<i64: 2>, scalar_prefetch = 0 : i64, scratch_operands = 0 : i64, tpu.core_type = #tpu.core_type<tc>, window_params = [{transform_indices = @transform_0, window_bounds = array<i64: 1, 362, 3>}, {pipeline_mode = #tpu.pipeline_mode<synchronous>, transform_indices = @transform_1, window_bounds = array<i64: 9, 3, 64>}, {pipeline_mode = #tpu.pipeline_mode<synchronous>, transform_indices = @transform_2, window_bounds = array<i64: 1, 64>}, {pipeline_mode = #tpu.pipeline_mode<synchronous>, transform_indices = @transform_3, window_bounds = array<i64: 122, 305>}, {pipeline_mode = #tpu.pipeline_mode<synchronous>, transform_indices = @transform_4, window_bounds = array<i64: 9, 64, 64>}, {pipeline_mode = #tpu.pipeline_mode<synchronous>, transform_indices = @transform_5, window_bounds = array<i64: 1, 64>}, {pipeline_mode = #tpu.pipeline_mode<synchronous>, transform_indices = @transform_6, window_bounds = array<i64: 50, 89>}, {pipeline_mode = #tpu.pipeline_mode<synchronous>, transform_indices = @transform_7, window_bounds = array<i64: 9, 64, 64>}, {pipeline_mode = #tpu.pipeline_mode<synchronous>, transform_indices = @transform_8, window_bounds = array<i64: 1, 64>}, {pipeline_mode = #tpu.pipeline_mode<synchronous>, transform_indices = @transform_9, window_bounds = array<i64: 26, 29>}, {pipeline_mode = #tpu.pipeline_mode<synchronous>, transform_indices = @transform_10, window_bounds = array<i64: 9, 64, 64>}, {pipeline_mode = #tpu.pipeline_mode<synchronous>, transform_indices = @transform_11, window_bounds = array<i64: 1, 64>}, {pipeline_mode = #tpu.pipeline_mode<synchronous>, transform_indices = @transform_12, window_bounds = array<i64: 1, 11>}, {pipeline_mode = #tpu.pipeline_mode<synchronous>, transform_indices = @transform_13, window_bounds = array<i64: 64, 10>}, {pipeline_mode = #tpu.pipeline_mode<synchronous>, transform_indices = @transform_14, window_bounds = array<i64: 1, 10>}, {transform_indices = @transform_15, window_bounds = array<i64: 1, 1, 64>}, {transform_indices = @transform_16, window_bounds = array<i64: 1, 1, 10>}]} {
    %c0 = arith.constant 0 : index
    %c0_0 = arith.constant 0 : index
    %c0_1 = arith.constant 0 : index
    %0 = vector.load %arg1[%c0, %c0_0, %c0_1] : memref<1x362x3xf32, #tpu.memory_space<vmem>>, vector<1x362x3xf32>
    %1 = vector.shape_cast %0 : vector<1x362x3xf32> to vector<362x3xf32>
    %2 = vector.extract_strided_slice %1 {offsets = [0, 0], sizes = [324, 3], strides = [1, 1]} : vector<362x3xf32> to vector<324x3xf32>
    %c0_2 = arith.constant 0 : index
    %c0_3 = arith.constant 0 : index
    %c0_4 = arith.constant 0 : index
    %3 = vector.load %arg2[%c0_2, %c0_3, %c0_4] : memref<9x3x64xf32, #tpu.memory_space<vmem>>, vector<1x3x64xf32>
    %4 = vector.shape_cast %3 : vector<1x3x64xf32> to vector<3x64xf32>
    %cst = arith.constant dense<0.000000e+00> : vector<324x64xf32>
    %5 = tpu.matmul %2, %4, %cst {dimension_numbers = #tpu.dot_dimension_numbers<[1], [0], [0], [1], [0, 0, 1, 1], [], []>} : vector<324x3xf32>, vector<3x64xf32>, vector<324x64xf32> -> vector<324x64xf32>
    %6 = vector.extract_strided_slice %1 {offsets = [1, 0], sizes = [324, 3], strides = [1, 1]} : vector<362x3xf32> to vector<324x3xf32>
    %c1 = arith.constant 1 : index
    %c0_5 = arith.constant 0 : index
    %c0_6 = arith.constant 0 : index
    %7 = vector.load %arg2[%c1, %c0_5, %c0_6] : memref<9x3x64xf32, #tpu.memory_space<vmem>>, vector<1x3x64xf32>
    %8 = vector.shape_cast %7 : vector<1x3x64xf32> to vector<3x64xf32>
    %cst_7 = arith.constant dense<0.000000e+00> : vector<324x64xf32>
    %9 = tpu.matmul %6, %8, %cst_7 {dimension_numbers = #tpu.dot_dimension_numbers<[1], [0], [0], [1], [0, 0, 1, 1], [], []>} : vector<324x3xf32>, vector<3x64xf32>, vector<324x64xf32> -> vector<324x64xf32>
    %10 = arith.addf %5, %9 : vector<324x64xf32>
    %11 = vector.extract_strided_slice %1 {offsets = [2, 0], sizes = [324, 3], strides = [1, 1]} : vector<362x3xf32> to vector<324x3xf32>
    %c2 = arith.constant 2 : index
    %c0_8 = arith.constant 0 : index
    %c0_9 = arith.constant 0 : index
    %12 = vector.load %arg2[%c2, %c0_8, %c0_9] : memref<9x3x64xf32, #tpu.memory_space<vmem>>, vector<1x3x64xf32>
    %13 = vector.shape_cast %12 : vector<1x3x64xf32> to vector<3x64xf32>
    %cst_10 = arith.constant dense<0.000000e+00> : vector<324x64xf32>
    %14 = tpu.matmul %11, %13, %cst_10 {dimension_numbers = #tpu.dot_dimension_numbers<[1], [0], [0], [1], [0, 0, 1, 1], [], []>} : vector<324x3xf32>, vector<3x64xf32>, vector<324x64xf32> -> vector<324x64xf32>
    %15 = arith.addf %10, %14 : vector<324x64xf32>
    %16 = vector.extract_strided_slice %1 {offsets = [18, 0], sizes = [324, 3], strides = [1, 1]} : vector<362x3xf32> to vector<324x3xf32>
    %c3 = arith.constant 3 : index
    %c0_11 = arith.constant 0 : index
    %c0_12 = arith.constant 0 : index
    %17 = vector.load %arg2[%c3, %c0_11, %c0_12] : memref<9x3x64xf32, #tpu.memory_space<vmem>>, vector<1x3x64xf32>
    %18 = vector.shape_cast %17 : vector<1x3x64xf32> to vector<3x64xf32>
    %cst_13 = arith.constant dense<0.000000e+00> : vector<324x64xf32>
    %19 = tpu.matmul %16, %18, %cst_13 {dimension_numbers = #tpu.dot_dimension_numbers<[1], [0], [0], [1], [0, 0, 1, 1], [], []>} : vector<324x3xf32>, vector<3x64xf32>, vector<324x64xf32> -> vector<324x64xf32>
    %20 = arith.addf %15, %19 : vector<324x64xf32>
    %21 = vector.extract_strided_slice %1 {offsets = [19, 0], sizes = [324, 3], strides = [1, 1]} : vector<362x3xf32> to vector<324x3xf32>
    %c4 = arith.constant 4 : index
    %c0_14 = arith.constant 0 : index
    %c0_15 = arith.constant 0 : index
    %22 = vector.load %arg2[%c4, %c0_14, %c0_15] : memref<9x3x64xf32, #tpu.memory_space<vmem>>, vector<1x3x64xf32>
    %23 = vector.shape_cast %22 : vector<1x3x64xf32> to vector<3x64xf32>
    %cst_16 = arith.constant dense<0.000000e+00> : vector<324x64xf32>
    %24 = tpu.matmul %21, %23, %cst_16 {dimension_numbers = #tpu.dot_dimension_numbers<[1], [0], [0], [1], [0, 0, 1, 1], [], []>} : vector<324x3xf32>, vector<3x64xf32>, vector<324x64xf32> -> vector<324x64xf32>
    %25 = arith.addf %20, %24 : vector<324x64xf32>
    %26 = vector.extract_strided_slice %1 {offsets = [20, 0], sizes = [324, 3], strides = [1, 1]} : vector<362x3xf32> to vector<324x3xf32>
    %c5 = arith.constant 5 : index
    %c0_17 = arith.constant 0 : index
    %c0_18 = arith.constant 0 : index
    %27 = vector.load %arg2[%c5, %c0_17, %c0_18] : memref<9x3x64xf32, #tpu.memory_space<vmem>>, vector<1x3x64xf32>
    %28 = vector.shape_cast %27 : vector<1x3x64xf32> to vector<3x64xf32>
    %cst_19 = arith.constant dense<0.000000e+00> : vector<324x64xf32>
    %29 = tpu.matmul %26, %28, %cst_19 {dimension_numbers = #tpu.dot_dimension_numbers<[1], [0], [0], [1], [0, 0, 1, 1], [], []>} : vector<324x3xf32>, vector<3x64xf32>, vector<324x64xf32> -> vector<324x64xf32>
    %30 = arith.addf %25, %29 : vector<324x64xf32>
    %31 = vector.extract_strided_slice %1 {offsets = [36, 0], sizes = [324, 3], strides = [1, 1]} : vector<362x3xf32> to vector<324x3xf32>
    %c6 = arith.constant 6 : index
    %c0_20 = arith.constant 0 : index
    %c0_21 = arith.constant 0 : index
    %32 = vector.load %arg2[%c6, %c0_20, %c0_21] : memref<9x3x64xf32, #tpu.memory_space<vmem>>, vector<1x3x64xf32>
    %33 = vector.shape_cast %32 : vector<1x3x64xf32> to vector<3x64xf32>
    %cst_22 = arith.constant dense<0.000000e+00> : vector<324x64xf32>
    %34 = tpu.matmul %31, %33, %cst_22 {dimension_numbers = #tpu.dot_dimension_numbers<[1], [0], [0], [1], [0, 0, 1, 1], [], []>} : vector<324x3xf32>, vector<3x64xf32>, vector<324x64xf32> -> vector<324x64xf32>
    %35 = arith.addf %30, %34 : vector<324x64xf32>
    %36 = vector.extract_strided_slice %1 {offsets = [37, 0], sizes = [324, 3], strides = [1, 1]} : vector<362x3xf32> to vector<324x3xf32>
    %c7 = arith.constant 7 : index
    %c0_23 = arith.constant 0 : index
    %c0_24 = arith.constant 0 : index
    %37 = vector.load %arg2[%c7, %c0_23, %c0_24] : memref<9x3x64xf32, #tpu.memory_space<vmem>>, vector<1x3x64xf32>
    %38 = vector.shape_cast %37 : vector<1x3x64xf32> to vector<3x64xf32>
    %cst_25 = arith.constant dense<0.000000e+00> : vector<324x64xf32>
    %39 = tpu.matmul %36, %38, %cst_25 {dimension_numbers = #tpu.dot_dimension_numbers<[1], [0], [0], [1], [0, 0, 1, 1], [], []>} : vector<324x3xf32>, vector<3x64xf32>, vector<324x64xf32> -> vector<324x64xf32>
    %40 = arith.addf %35, %39 : vector<324x64xf32>
    %41 = vector.extract_strided_slice %1 {offsets = [38, 0], sizes = [324, 3], strides = [1, 1]} : vector<362x3xf32> to vector<324x3xf32>
    %c8 = arith.constant 8 : index
    %c0_26 = arith.constant 0 : index
    %c0_27 = arith.constant 0 : index
    %42 = vector.load %arg2[%c8, %c0_26, %c0_27] : memref<9x3x64xf32, #tpu.memory_space<vmem>>, vector<1x3x64xf32>
    %43 = vector.shape_cast %42 : vector<1x3x64xf32> to vector<3x64xf32>
    %cst_28 = arith.constant dense<0.000000e+00> : vector<324x64xf32>
    %44 = tpu.matmul %41, %43, %cst_28 {dimension_numbers = #tpu.dot_dimension_numbers<[1], [0], [0], [1], [0, 0, 1, 1], [], []>} : vector<324x3xf32>, vector<3x64xf32>, vector<324x64xf32> -> vector<324x64xf32>
    %45 = arith.addf %40, %44 : vector<324x64xf32>
    %c0_29 = arith.constant 0 : index
    %c0_30 = arith.constant 0 : index
    %46 = vector.load %arg3[%c0_29, %c0_30] : memref<1x64xf32, #tpu.memory_space<vmem>>, vector<1x64xf32>
    %47 = vector.broadcast %46 : vector<1x64xf32> to vector<324x64xf32>
    %48 = arith.addf %45, %47 : vector<324x64xf32>
    %cst_31 = arith.constant 0.000000e+00 : f32
    %49 = vector.broadcast %cst_31 : f32 to vector<324x64xf32>
    %50 = arith.maximumf %48, %49 : vector<324x64xf32>
    %51 = vector.extract_strided_slice %50 {offsets = [0, 0], sizes = [305, 64], strides = [1, 1]} : vector<324x64xf32> to vector<305x64xf32>
    %52 = vector.extract_strided_slice %50 {offsets = [1, 0], sizes = [305, 64], strides = [1, 1]} : vector<324x64xf32> to vector<305x64xf32>
    %53 = arith.maximumf %51, %52 : vector<305x64xf32>
    %54 = vector.extract_strided_slice %50 {offsets = [18, 0], sizes = [305, 64], strides = [1, 1]} : vector<324x64xf32> to vector<305x64xf32>
    %55 = vector.extract_strided_slice %50 {offsets = [19, 0], sizes = [305, 64], strides = [1, 1]} : vector<324x64xf32> to vector<305x64xf32>
    %56 = arith.maximumf %54, %55 : vector<305x64xf32>
    %57 = arith.maximumf %53, %56 : vector<305x64xf32>
    %c0_32 = arith.constant 0 : index
    %c0_33 = arith.constant 0 : index
    %58 = vector.load %arg4[%c0_32, %c0_33] : memref<122x305xf32, #tpu.memory_space<vmem>>, vector<122x305xf32>
    %cst_34 = arith.constant dense<0.000000e+00> : vector<122x64xf32>
    %59 = tpu.matmul %58, %57, %cst_34 {dimension_numbers = #tpu.dot_dimension_numbers<[1], [0], [0], [1], [0, 0, 1, 1], [], []>} : vector<122x305xf32>, vector<305x64xf32>, vector<122x64xf32> -> vector<122x64xf32>
    %60 = vector.extract_strided_slice %59 {offsets = [0, 0], sizes = [100, 64], strides = [1, 1]} : vector<122x64xf32> to vector<100x64xf32>
    %c0_35 = arith.constant 0 : index
    %c0_36 = arith.constant 0 : index
    %c0_37 = arith.constant 0 : index
    %61 = vector.load %arg5[%c0_35, %c0_36, %c0_37] : memref<9x64x64xf32, #tpu.memory_space<vmem>>, vector<1x64x64xf32>
    %62 = vector.shape_cast %61 : vector<1x64x64xf32> to vector<64x64xf32>
    %cst_38 = arith.constant dense<0.000000e+00> : vector<100x64xf32>
    %63 = tpu.matmul %60, %62, %cst_38 {dimension_numbers = #tpu.dot_dimension_numbers<[1], [0], [0], [1], [0, 0, 1, 1], [], []>} : vector<100x64xf32>, vector<64x64xf32>, vector<100x64xf32> -> vector<100x64xf32>
    %64 = vector.extract_strided_slice %59 {offsets = [1, 0], sizes = [100, 64], strides = [1, 1]} : vector<122x64xf32> to vector<100x64xf32>
    %c1_39 = arith.constant 1 : index
    %c0_40 = arith.constant 0 : index
    %c0_41 = arith.constant 0 : index
    %65 = vector.load %arg5[%c1_39, %c0_40, %c0_41] : memref<9x64x64xf32, #tpu.memory_space<vmem>>, vector<1x64x64xf32>
    %66 = vector.shape_cast %65 : vector<1x64x64xf32> to vector<64x64xf32>
    %cst_42 = arith.constant dense<0.000000e+00> : vector<100x64xf32>
    %67 = tpu.matmul %64, %66, %cst_42 {dimension_numbers = #tpu.dot_dimension_numbers<[1], [0], [0], [1], [0, 0, 1, 1], [], []>} : vector<100x64xf32>, vector<64x64xf32>, vector<100x64xf32> -> vector<100x64xf32>
    %68 = arith.addf %63, %67 : vector<100x64xf32>
    %69 = vector.extract_strided_slice %59 {offsets = [2, 0], sizes = [100, 64], strides = [1, 1]} : vector<122x64xf32> to vector<100x64xf32>
    %c2_43 = arith.constant 2 : index
    %c0_44 = arith.constant 0 : index
    %c0_45 = arith.constant 0 : index
    %70 = vector.load %arg5[%c2_43, %c0_44, %c0_45] : memref<9x64x64xf32, #tpu.memory_space<vmem>>, vector<1x64x64xf32>
    %71 = vector.shape_cast %70 : vector<1x64x64xf32> to vector<64x64xf32>
    %cst_46 = arith.constant dense<0.000000e+00> : vector<100x64xf32>
    %72 = tpu.matmul %69, %71, %cst_46 {dimension_numbers = #tpu.dot_dimension_numbers<[1], [0], [0], [1], [0, 0, 1, 1], [], []>} : vector<100x64xf32>, vector<64x64xf32>, vector<100x64xf32> -> vector<100x64xf32>
    %73 = arith.addf %68, %72 : vector<100x64xf32>
    %74 = vector.extract_strided_slice %59 {offsets = [10, 0], sizes = [100, 64], strides = [1, 1]} : vector<122x64xf32> to vector<100x64xf32>
    %c3_47 = arith.constant 3 : index
    %c0_48 = arith.constant 0 : index
    %c0_49 = arith.constant 0 : index
    %75 = vector.load %arg5[%c3_47, %c0_48, %c0_49] : memref<9x64x64xf32, #tpu.memory_space<vmem>>, vector<1x64x64xf32>
    %76 = vector.shape_cast %75 : vector<1x64x64xf32> to vector<64x64xf32>
    %cst_50 = arith.constant dense<0.000000e+00> : vector<100x64xf32>
    %77 = tpu.matmul %74, %76, %cst_50 {dimension_numbers = #tpu.dot_dimension_numbers<[1], [0], [0], [1], [0, 0, 1, 1], [], []>} : vector<100x64xf32>, vector<64x64xf32>, vector<100x64xf32> -> vector<100x64xf32>
    %78 = arith.addf %73, %77 : vector<100x64xf32>
    %79 = vector.extract_strided_slice %59 {offsets = [11, 0], sizes = [100, 64], strides = [1, 1]} : vector<122x64xf32> to vector<100x64xf32>
    %c4_51 = arith.constant 4 : index
    %c0_52 = arith.constant 0 : index
    %c0_53 = arith.constant 0 : index
    %80 = vector.load %arg5[%c4_51, %c0_52, %c0_53] : memref<9x64x64xf32, #tpu.memory_space<vmem>>, vector<1x64x64xf32>
    %81 = vector.shape_cast %80 : vector<1x64x64xf32> to vector<64x64xf32>
    %cst_54 = arith.constant dense<0.000000e+00> : vector<100x64xf32>
    %82 = tpu.matmul %79, %81, %cst_54 {dimension_numbers = #tpu.dot_dimension_numbers<[1], [0], [0], [1], [0, 0, 1, 1], [], []>} : vector<100x64xf32>, vector<64x64xf32>, vector<100x64xf32> -> vector<100x64xf32>
    %83 = arith.addf %78, %82 : vector<100x64xf32>
    %84 = vector.extract_strided_slice %59 {offsets = [12, 0], sizes = [100, 64], strides = [1, 1]} : vector<122x64xf32> to vector<100x64xf32>
    %c5_55 = arith.constant 5 : index
    %c0_56 = arith.constant 0 : index
    %c0_57 = arith.constant 0 : index
    %85 = vector.load %arg5[%c5_55, %c0_56, %c0_57] : memref<9x64x64xf32, #tpu.memory_space<vmem>>, vector<1x64x64xf32>
    %86 = vector.shape_cast %85 : vector<1x64x64xf32> to vector<64x64xf32>
    %cst_58 = arith.constant dense<0.000000e+00> : vector<100x64xf32>
    %87 = tpu.matmul %84, %86, %cst_58 {dimension_numbers = #tpu.dot_dimension_numbers<[1], [0], [0], [1], [0, 0, 1, 1], [], []>} : vector<100x64xf32>, vector<64x64xf32>, vector<100x64xf32> -> vector<100x64xf32>
    %88 = arith.addf %83, %87 : vector<100x64xf32>
    %89 = vector.extract_strided_slice %59 {offsets = [20, 0], sizes = [100, 64], strides = [1, 1]} : vector<122x64xf32> to vector<100x64xf32>
    %c6_59 = arith.constant 6 : index
    %c0_60 = arith.constant 0 : index
    %c0_61 = arith.constant 0 : index
    %90 = vector.load %arg5[%c6_59, %c0_60, %c0_61] : memref<9x64x64xf32, #tpu.memory_space<vmem>>, vector<1x64x64xf32>
    %91 = vector.shape_cast %90 : vector<1x64x64xf32> to vector<64x64xf32>
    %cst_62 = arith.constant dense<0.000000e+00> : vector<100x64xf32>
    %92 = tpu.matmul %89, %91, %cst_62 {dimension_numbers = #tpu.dot_dimension_numbers<[1], [0], [0], [1], [0, 0, 1, 1], [], []>} : vector<100x64xf32>, vector<64x64xf32>, vector<100x64xf32> -> vector<100x64xf32>
    %93 = arith.addf %88, %92 : vector<100x64xf32>
    %94 = vector.extract_strided_slice %59 {offsets = [21, 0], sizes = [100, 64], strides = [1, 1]} : vector<122x64xf32> to vector<100x64xf32>
    %c7_63 = arith.constant 7 : index
    %c0_64 = arith.constant 0 : index
    %c0_65 = arith.constant 0 : index
    %95 = vector.load %arg5[%c7_63, %c0_64, %c0_65] : memref<9x64x64xf32, #tpu.memory_space<vmem>>, vector<1x64x64xf32>
    %96 = vector.shape_cast %95 : vector<1x64x64xf32> to vector<64x64xf32>
    %cst_66 = arith.constant dense<0.000000e+00> : vector<100x64xf32>
    %97 = tpu.matmul %94, %96, %cst_66 {dimension_numbers = #tpu.dot_dimension_numbers<[1], [0], [0], [1], [0, 0, 1, 1], [], []>} : vector<100x64xf32>, vector<64x64xf32>, vector<100x64xf32> -> vector<100x64xf32>
    %98 = arith.addf %93, %97 : vector<100x64xf32>
    %99 = vector.extract_strided_slice %59 {offsets = [22, 0], sizes = [100, 64], strides = [1, 1]} : vector<122x64xf32> to vector<100x64xf32>
    %c8_67 = arith.constant 8 : index
    %c0_68 = arith.constant 0 : index
    %c0_69 = arith.constant 0 : index
    %100 = vector.load %arg5[%c8_67, %c0_68, %c0_69] : memref<9x64x64xf32, #tpu.memory_space<vmem>>, vector<1x64x64xf32>
    %101 = vector.shape_cast %100 : vector<1x64x64xf32> to vector<64x64xf32>
    %cst_70 = arith.constant dense<0.000000e+00> : vector<100x64xf32>
    %102 = tpu.matmul %99, %101, %cst_70 {dimension_numbers = #tpu.dot_dimension_numbers<[1], [0], [0], [1], [0, 0, 1, 1], [], []>} : vector<100x64xf32>, vector<64x64xf32>, vector<100x64xf32> -> vector<100x64xf32>
    %103 = arith.addf %98, %102 : vector<100x64xf32>
    %c0_71 = arith.constant 0 : index
    %c0_72 = arith.constant 0 : index
    %104 = vector.load %arg6[%c0_71, %c0_72] : memref<1x64xf32, #tpu.memory_space<vmem>>, vector<1x64xf32>
    %105 = vector.broadcast %104 : vector<1x64xf32> to vector<100x64xf32>
    %106 = arith.addf %103, %105 : vector<100x64xf32>
    %cst_73 = arith.constant 0.000000e+00 : f32
    %107 = vector.broadcast %cst_73 : f32 to vector<100x64xf32>
    %108 = arith.maximumf %106, %107 : vector<100x64xf32>
    %109 = vector.extract_strided_slice %108 {offsets = [0, 0], sizes = [89, 64], strides = [1, 1]} : vector<100x64xf32> to vector<89x64xf32>
    %110 = vector.extract_strided_slice %108 {offsets = [1, 0], sizes = [89, 64], strides = [1, 1]} : vector<100x64xf32> to vector<89x64xf32>
    %111 = arith.maximumf %109, %110 : vector<89x64xf32>
    %112 = vector.extract_strided_slice %108 {offsets = [10, 0], sizes = [89, 64], strides = [1, 1]} : vector<100x64xf32> to vector<89x64xf32>
    %113 = vector.extract_strided_slice %108 {offsets = [11, 0], sizes = [89, 64], strides = [1, 1]} : vector<100x64xf32> to vector<89x64xf32>
    %114 = arith.maximumf %112, %113 : vector<89x64xf32>
    %115 = arith.maximumf %111, %114 : vector<89x64xf32>
    %c0_74 = arith.constant 0 : index
    %c0_75 = arith.constant 0 : index
    %116 = vector.load %arg7[%c0_74, %c0_75] : memref<50x89xf32, #tpu.memory_space<vmem>>, vector<50x89xf32>
    %cst_76 = arith.constant dense<0.000000e+00> : vector<50x64xf32>
    %117 = tpu.matmul %116, %115, %cst_76 {dimension_numbers = #tpu.dot_dimension_numbers<[1], [0], [0], [1], [0, 0, 1, 1], [], []>} : vector<50x89xf32>, vector<89x64xf32>, vector<50x64xf32> -> vector<50x64xf32>
    %118 = vector.extract_strided_slice %117 {offsets = [0, 0], sizes = [36, 64], strides = [1, 1]} : vector<50x64xf32> to vector<36x64xf32>
    %c0_77 = arith.constant 0 : index
    %c0_78 = arith.constant 0 : index
    %c0_79 = arith.constant 0 : index
    %119 = vector.load %arg8[%c0_77, %c0_78, %c0_79] : memref<9x64x64xf32, #tpu.memory_space<vmem>>, vector<1x64x64xf32>
    %120 = vector.shape_cast %119 : vector<1x64x64xf32> to vector<64x64xf32>
    %cst_80 = arith.constant dense<0.000000e+00> : vector<36x64xf32>
    %121 = tpu.matmul %118, %120, %cst_80 {dimension_numbers = #tpu.dot_dimension_numbers<[1], [0], [0], [1], [0, 0, 1, 1], [], []>} : vector<36x64xf32>, vector<64x64xf32>, vector<36x64xf32> -> vector<36x64xf32>
    %122 = vector.extract_strided_slice %117 {offsets = [1, 0], sizes = [36, 64], strides = [1, 1]} : vector<50x64xf32> to vector<36x64xf32>
    %c1_81 = arith.constant 1 : index
    %c0_82 = arith.constant 0 : index
    %c0_83 = arith.constant 0 : index
    %123 = vector.load %arg8[%c1_81, %c0_82, %c0_83] : memref<9x64x64xf32, #tpu.memory_space<vmem>>, vector<1x64x64xf32>
    %124 = vector.shape_cast %123 : vector<1x64x64xf32> to vector<64x64xf32>
    %cst_84 = arith.constant dense<0.000000e+00> : vector<36x64xf32>
    %125 = tpu.matmul %122, %124, %cst_84 {dimension_numbers = #tpu.dot_dimension_numbers<[1], [0], [0], [1], [0, 0, 1, 1], [], []>} : vector<36x64xf32>, vector<64x64xf32>, vector<36x64xf32> -> vector<36x64xf32>
    %126 = arith.addf %121, %125 : vector<36x64xf32>
    %127 = vector.extract_strided_slice %117 {offsets = [2, 0], sizes = [36, 64], strides = [1, 1]} : vector<50x64xf32> to vector<36x64xf32>
    %c2_85 = arith.constant 2 : index
    %c0_86 = arith.constant 0 : index
    %c0_87 = arith.constant 0 : index
    %128 = vector.load %arg8[%c2_85, %c0_86, %c0_87] : memref<9x64x64xf32, #tpu.memory_space<vmem>>, vector<1x64x64xf32>
    %129 = vector.shape_cast %128 : vector<1x64x64xf32> to vector<64x64xf32>
    %cst_88 = arith.constant dense<0.000000e+00> : vector<36x64xf32>
    %130 = tpu.matmul %127, %129, %cst_88 {dimension_numbers = #tpu.dot_dimension_numbers<[1], [0], [0], [1], [0, 0, 1, 1], [], []>} : vector<36x64xf32>, vector<64x64xf32>, vector<36x64xf32> -> vector<36x64xf32>
    %131 = arith.addf %126, %130 : vector<36x64xf32>
    %132 = vector.extract_strided_slice %117 {offsets = [6, 0], sizes = [36, 64], strides = [1, 1]} : vector<50x64xf32> to vector<36x64xf32>
    %c3_89 = arith.constant 3 : index
    %c0_90 = arith.constant 0 : index
    %c0_91 = arith.constant 0 : index
    %133 = vector.load %arg8[%c3_89, %c0_90, %c0_91] : memref<9x64x64xf32, #tpu.memory_space<vmem>>, vector<1x64x64xf32>
    %134 = vector.shape_cast %133 : vector<1x64x64xf32> to vector<64x64xf32>
    %cst_92 = arith.constant dense<0.000000e+00> : vector<36x64xf32>
    %135 = tpu.matmul %132, %134, %cst_92 {dimension_numbers = #tpu.dot_dimension_numbers<[1], [0], [0], [1], [0, 0, 1, 1], [], []>} : vector<36x64xf32>, vector<64x64xf32>, vector<36x64xf32> -> vector<36x64xf32>
    %136 = arith.addf %131, %135 : vector<36x64xf32>
    %137 = vector.extract_strided_slice %117 {offsets = [7, 0], sizes = [36, 64], strides = [1, 1]} : vector<50x64xf32> to vector<36x64xf32>
    %c4_93 = arith.constant 4 : index
    %c0_94 = arith.constant 0 : index
    %c0_95 = arith.constant 0 : index
    %138 = vector.load %arg8[%c4_93, %c0_94, %c0_95] : memref<9x64x64xf32, #tpu.memory_space<vmem>>, vector<1x64x64xf32>
    %139 = vector.shape_cast %138 : vector<1x64x64xf32> to vector<64x64xf32>
    %cst_96 = arith.constant dense<0.000000e+00> : vector<36x64xf32>
    %140 = tpu.matmul %137, %139, %cst_96 {dimension_numbers = #tpu.dot_dimension_numbers<[1], [0], [0], [1], [0, 0, 1, 1], [], []>} : vector<36x64xf32>, vector<64x64xf32>, vector<36x64xf32> -> vector<36x64xf32>
    %141 = arith.addf %136, %140 : vector<36x64xf32>
    %142 = vector.extract_strided_slice %117 {offsets = [8, 0], sizes = [36, 64], strides = [1, 1]} : vector<50x64xf32> to vector<36x64xf32>
    %c5_97 = arith.constant 5 : index
    %c0_98 = arith.constant 0 : index
    %c0_99 = arith.constant 0 : index
    %143 = vector.load %arg8[%c5_97, %c0_98, %c0_99] : memref<9x64x64xf32, #tpu.memory_space<vmem>>, vector<1x64x64xf32>
    %144 = vector.shape_cast %143 : vector<1x64x64xf32> to vector<64x64xf32>
    %cst_100 = arith.constant dense<0.000000e+00> : vector<36x64xf32>
    %145 = tpu.matmul %142, %144, %cst_100 {dimension_numbers = #tpu.dot_dimension_numbers<[1], [0], [0], [1], [0, 0, 1, 1], [], []>} : vector<36x64xf32>, vector<64x64xf32>, vector<36x64xf32> -> vector<36x64xf32>
    %146 = arith.addf %141, %145 : vector<36x64xf32>
    %147 = vector.extract_strided_slice %117 {offsets = [12, 0], sizes = [36, 64], strides = [1, 1]} : vector<50x64xf32> to vector<36x64xf32>
    %c6_101 = arith.constant 6 : index
    %c0_102 = arith.constant 0 : index
    %c0_103 = arith.constant 0 : index
    %148 = vector.load %arg8[%c6_101, %c0_102, %c0_103] : memref<9x64x64xf32, #tpu.memory_space<vmem>>, vector<1x64x64xf32>
    %149 = vector.shape_cast %148 : vector<1x64x64xf32> to vector<64x64xf32>
    %cst_104 = arith.constant dense<0.000000e+00> : vector<36x64xf32>
    %150 = tpu.matmul %147, %149, %cst_104 {dimension_numbers = #tpu.dot_dimension_numbers<[1], [0], [0], [1], [0, 0, 1, 1], [], []>} : vector<36x64xf32>, vector<64x64xf32>, vector<36x64xf32> -> vector<36x64xf32>
    %151 = arith.addf %146, %150 : vector<36x64xf32>
    %152 = vector.extract_strided_slice %117 {offsets = [13, 0], sizes = [36, 64], strides = [1, 1]} : vector<50x64xf32> to vector<36x64xf32>
    %c7_105 = arith.constant 7 : index
    %c0_106 = arith.constant 0 : index
    %c0_107 = arith.constant 0 : index
    %153 = vector.load %arg8[%c7_105, %c0_106, %c0_107] : memref<9x64x64xf32, #tpu.memory_space<vmem>>, vector<1x64x64xf32>
    %154 = vector.shape_cast %153 : vector<1x64x64xf32> to vector<64x64xf32>
    %cst_108 = arith.constant dense<0.000000e+00> : vector<36x64xf32>
    %155 = tpu.matmul %152, %154, %cst_108 {dimension_numbers = #tpu.dot_dimension_numbers<[1], [0], [0], [1], [0, 0, 1, 1], [], []>} : vector<36x64xf32>, vector<64x64xf32>, vector<36x64xf32> -> vector<36x64xf32>
    %156 = arith.addf %151, %155 : vector<36x64xf32>
    %157 = vector.extract_strided_slice %117 {offsets = [14, 0], sizes = [36, 64], strides = [1, 1]} : vector<50x64xf32> to vector<36x64xf32>
    %c8_109 = arith.constant 8 : index
    %c0_110 = arith.constant 0 : index
    %c0_111 = arith.constant 0 : index
    %158 = vector.load %arg8[%c8_109, %c0_110, %c0_111] : memref<9x64x64xf32, #tpu.memory_space<vmem>>, vector<1x64x64xf32>
    %159 = vector.shape_cast %158 : vector<1x64x64xf32> to vector<64x64xf32>
    %cst_112 = arith.constant dense<0.000000e+00> : vector<36x64xf32>
    %160 = tpu.matmul %157, %159, %cst_112 {dimension_numbers = #tpu.dot_dimension_numbers<[1], [0], [0], [1], [0, 0, 1, 1], [], []>} : vector<36x64xf32>, vector<64x64xf32>, vector<36x64xf32> -> vector<36x64xf32>
    %161 = arith.addf %156, %160 : vector<36x64xf32>
    %c0_113 = arith.constant 0 : index
    %c0_114 = arith.constant 0 : index
    %162 = vector.load %arg9[%c0_113, %c0_114] : memref<1x64xf32, #tpu.memory_space<vmem>>, vector<1x64xf32>
    %163 = vector.broadcast %162 : vector<1x64xf32> to vector<36x64xf32>
    %164 = arith.addf %161, %163 : vector<36x64xf32>
    %cst_115 = arith.constant 0.000000e+00 : f32
    %165 = vector.broadcast %cst_115 : f32 to vector<36x64xf32>
    %166 = arith.maximumf %164, %165 : vector<36x64xf32>
    %167 = vector.extract_strided_slice %166 {offsets = [0, 0], sizes = [29, 64], strides = [1, 1]} : vector<36x64xf32> to vector<29x64xf32>
    %168 = vector.extract_strided_slice %166 {offsets = [1, 0], sizes = [29, 64], strides = [1, 1]} : vector<36x64xf32> to vector<29x64xf32>
    %169 = arith.maximumf %167, %168 : vector<29x64xf32>
    %170 = vector.extract_strided_slice %166 {offsets = [6, 0], sizes = [29, 64], strides = [1, 1]} : vector<36x64xf32> to vector<29x64xf32>
    %171 = vector.extract_strided_slice %166 {offsets = [7, 0], sizes = [29, 64], strides = [1, 1]} : vector<36x64xf32> to vector<29x64xf32>
    %172 = arith.maximumf %170, %171 : vector<29x64xf32>
    %173 = arith.maximumf %169, %172 : vector<29x64xf32>
    %c0_116 = arith.constant 0 : index
    %c0_117 = arith.constant 0 : index
    %174 = vector.load %arg10[%c0_116, %c0_117] : memref<26x29xf32, #tpu.memory_space<vmem>>, vector<26x29xf32>
    %cst_118 = arith.constant dense<0.000000e+00> : vector<26x64xf32>
    %175 = tpu.matmul %174, %173, %cst_118 {dimension_numbers = #tpu.dot_dimension_numbers<[1], [0], [0], [1], [0, 0, 1, 1], [], []>} : vector<26x29xf32>, vector<29x64xf32>, vector<26x64xf32> -> vector<26x64xf32>
    %176 = vector.extract_strided_slice %175 {offsets = [0, 0], sizes = [16, 64], strides = [1, 1]} : vector<26x64xf32> to vector<16x64xf32>
    %c0_119 = arith.constant 0 : index
    %c0_120 = arith.constant 0 : index
    %c0_121 = arith.constant 0 : index
    %177 = vector.load %arg11[%c0_119, %c0_120, %c0_121] : memref<9x64x64xf32, #tpu.memory_space<vmem>>, vector<1x64x64xf32>
    %178 = vector.shape_cast %177 : vector<1x64x64xf32> to vector<64x64xf32>
    %cst_122 = arith.constant dense<0.000000e+00> : vector<16x64xf32>
    %179 = tpu.matmul %176, %178, %cst_122 {dimension_numbers = #tpu.dot_dimension_numbers<[1], [0], [0], [1], [0, 0, 1, 1], [], []>} : vector<16x64xf32>, vector<64x64xf32>, vector<16x64xf32> -> vector<16x64xf32>
    %180 = vector.extract_strided_slice %175 {offsets = [1, 0], sizes = [16, 64], strides = [1, 1]} : vector<26x64xf32> to vector<16x64xf32>
    %c1_123 = arith.constant 1 : index
    %c0_124 = arith.constant 0 : index
    %c0_125 = arith.constant 0 : index
    %181 = vector.load %arg11[%c1_123, %c0_124, %c0_125] : memref<9x64x64xf32, #tpu.memory_space<vmem>>, vector<1x64x64xf32>
    %182 = vector.shape_cast %181 : vector<1x64x64xf32> to vector<64x64xf32>
    %cst_126 = arith.constant dense<0.000000e+00> : vector<16x64xf32>
    %183 = tpu.matmul %180, %182, %cst_126 {dimension_numbers = #tpu.dot_dimension_numbers<[1], [0], [0], [1], [0, 0, 1, 1], [], []>} : vector<16x64xf32>, vector<64x64xf32>, vector<16x64xf32> -> vector<16x64xf32>
    %184 = arith.addf %179, %183 : vector<16x64xf32>
    %185 = vector.extract_strided_slice %175 {offsets = [2, 0], sizes = [16, 64], strides = [1, 1]} : vector<26x64xf32> to vector<16x64xf32>
    %c2_127 = arith.constant 2 : index
    %c0_128 = arith.constant 0 : index
    %c0_129 = arith.constant 0 : index
    %186 = vector.load %arg11[%c2_127, %c0_128, %c0_129] : memref<9x64x64xf32, #tpu.memory_space<vmem>>, vector<1x64x64xf32>
    %187 = vector.shape_cast %186 : vector<1x64x64xf32> to vector<64x64xf32>
    %cst_130 = arith.constant dense<0.000000e+00> : vector<16x64xf32>
    %188 = tpu.matmul %185, %187, %cst_130 {dimension_numbers = #tpu.dot_dimension_numbers<[1], [0], [0], [1], [0, 0, 1, 1], [], []>} : vector<16x64xf32>, vector<64x64xf32>, vector<16x64xf32> -> vector<16x64xf32>
    %189 = arith.addf %184, %188 : vector<16x64xf32>
    %190 = vector.extract_strided_slice %175 {offsets = [4, 0], sizes = [16, 64], strides = [1, 1]} : vector<26x64xf32> to vector<16x64xf32>
    %c3_131 = arith.constant 3 : index
    %c0_132 = arith.constant 0 : index
    %c0_133 = arith.constant 0 : index
    %191 = vector.load %arg11[%c3_131, %c0_132, %c0_133] : memref<9x64x64xf32, #tpu.memory_space<vmem>>, vector<1x64x64xf32>
    %192 = vector.shape_cast %191 : vector<1x64x64xf32> to vector<64x64xf32>
    %cst_134 = arith.constant dense<0.000000e+00> : vector<16x64xf32>
    %193 = tpu.matmul %190, %192, %cst_134 {dimension_numbers = #tpu.dot_dimension_numbers<[1], [0], [0], [1], [0, 0, 1, 1], [], []>} : vector<16x64xf32>, vector<64x64xf32>, vector<16x64xf32> -> vector<16x64xf32>
    %194 = arith.addf %189, %193 : vector<16x64xf32>
    %195 = vector.extract_strided_slice %175 {offsets = [5, 0], sizes = [16, 64], strides = [1, 1]} : vector<26x64xf32> to vector<16x64xf32>
    %c4_135 = arith.constant 4 : index
    %c0_136 = arith.constant 0 : index
    %c0_137 = arith.constant 0 : index
    %196 = vector.load %arg11[%c4_135, %c0_136, %c0_137] : memref<9x64x64xf32, #tpu.memory_space<vmem>>, vector<1x64x64xf32>
    %197 = vector.shape_cast %196 : vector<1x64x64xf32> to vector<64x64xf32>
    %cst_138 = arith.constant dense<0.000000e+00> : vector<16x64xf32>
    %198 = tpu.matmul %195, %197, %cst_138 {dimension_numbers = #tpu.dot_dimension_numbers<[1], [0], [0], [1], [0, 0, 1, 1], [], []>} : vector<16x64xf32>, vector<64x64xf32>, vector<16x64xf32> -> vector<16x64xf32>
    %199 = arith.addf %194, %198 : vector<16x64xf32>
    %200 = vector.extract_strided_slice %175 {offsets = [6, 0], sizes = [16, 64], strides = [1, 1]} : vector<26x64xf32> to vector<16x64xf32>
    %c5_139 = arith.constant 5 : index
    %c0_140 = arith.constant 0 : index
    %c0_141 = arith.constant 0 : index
    %201 = vector.load %arg11[%c5_139, %c0_140, %c0_141] : memref<9x64x64xf32, #tpu.memory_space<vmem>>, vector<1x64x64xf32>
    %202 = vector.shape_cast %201 : vector<1x64x64xf32> to vector<64x64xf32>
    %cst_142 = arith.constant dense<0.000000e+00> : vector<16x64xf32>
    %203 = tpu.matmul %200, %202, %cst_142 {dimension_numbers = #tpu.dot_dimension_numbers<[1], [0], [0], [1], [0, 0, 1, 1], [], []>} : vector<16x64xf32>, vector<64x64xf32>, vector<16x64xf32> -> vector<16x64xf32>
    %204 = arith.addf %199, %203 : vector<16x64xf32>
    %205 = vector.extract_strided_slice %175 {offsets = [8, 0], sizes = [16, 64], strides = [1, 1]} : vector<26x64xf32> to vector<16x64xf32>
    %c6_143 = arith.constant 6 : index
    %c0_144 = arith.constant 0 : index
    %c0_145 = arith.constant 0 : index
    %206 = vector.load %arg11[%c6_143, %c0_144, %c0_145] : memref<9x64x64xf32, #tpu.memory_space<vmem>>, vector<1x64x64xf32>
    %207 = vector.shape_cast %206 : vector<1x64x64xf32> to vector<64x64xf32>
    %cst_146 = arith.constant dense<0.000000e+00> : vector<16x64xf32>
    %208 = tpu.matmul %205, %207, %cst_146 {dimension_numbers = #tpu.dot_dimension_numbers<[1], [0], [0], [1], [0, 0, 1, 1], [], []>} : vector<16x64xf32>, vector<64x64xf32>, vector<16x64xf32> -> vector<16x64xf32>
    %209 = arith.addf %204, %208 : vector<16x64xf32>
    %210 = vector.extract_strided_slice %175 {offsets = [9, 0], sizes = [16, 64], strides = [1, 1]} : vector<26x64xf32> to vector<16x64xf32>
    %c7_147 = arith.constant 7 : index
    %c0_148 = arith.constant 0 : index
    %c0_149 = arith.constant 0 : index
    %211 = vector.load %arg11[%c7_147, %c0_148, %c0_149] : memref<9x64x64xf32, #tpu.memory_space<vmem>>, vector<1x64x64xf32>
    %212 = vector.shape_cast %211 : vector<1x64x64xf32> to vector<64x64xf32>
    %cst_150 = arith.constant dense<0.000000e+00> : vector<16x64xf32>
    %213 = tpu.matmul %210, %212, %cst_150 {dimension_numbers = #tpu.dot_dimension_numbers<[1], [0], [0], [1], [0, 0, 1, 1], [], []>} : vector<16x64xf32>, vector<64x64xf32>, vector<16x64xf32> -> vector<16x64xf32>
    %214 = arith.addf %209, %213 : vector<16x64xf32>
    %215 = vector.extract_strided_slice %175 {offsets = [10, 0], sizes = [16, 64], strides = [1, 1]} : vector<26x64xf32> to vector<16x64xf32>
    %c8_151 = arith.constant 8 : index
    %c0_152 = arith.constant 0 : index
    %c0_153 = arith.constant 0 : index
    %216 = vector.load %arg11[%c8_151, %c0_152, %c0_153] : memref<9x64x64xf32, #tpu.memory_space<vmem>>, vector<1x64x64xf32>
    %217 = vector.shape_cast %216 : vector<1x64x64xf32> to vector<64x64xf32>
    %cst_154 = arith.constant dense<0.000000e+00> : vector<16x64xf32>
    %218 = tpu.matmul %215, %217, %cst_154 {dimension_numbers = #tpu.dot_dimension_numbers<[1], [0], [0], [1], [0, 0, 1, 1], [], []>} : vector<16x64xf32>, vector<64x64xf32>, vector<16x64xf32> -> vector<16x64xf32>
    %219 = arith.addf %214, %218 : vector<16x64xf32>
    %c0_155 = arith.constant 0 : index
    %c0_156 = arith.constant 0 : index
    %220 = vector.load %arg12[%c0_155, %c0_156] : memref<1x64xf32, #tpu.memory_space<vmem>>, vector<1x64xf32>
    %221 = vector.broadcast %220 : vector<1x64xf32> to vector<16x64xf32>
    %222 = arith.addf %219, %221 : vector<16x64xf32>
    %cst_157 = arith.constant 0.000000e+00 : f32
    %223 = vector.broadcast %cst_157 : f32 to vector<16x64xf32>
    %224 = arith.maximumf %222, %223 : vector<16x64xf32>
    %225 = vector.extract_strided_slice %224 {offsets = [0, 0], sizes = [11, 64], strides = [1, 1]} : vector<16x64xf32> to vector<11x64xf32>
    %226 = vector.extract_strided_slice %224 {offsets = [1, 0], sizes = [11, 64], strides = [1, 1]} : vector<16x64xf32> to vector<11x64xf32>
    %227 = arith.maximumf %225, %226 : vector<11x64xf32>
    %228 = vector.extract_strided_slice %224 {offsets = [4, 0], sizes = [11, 64], strides = [1, 1]} : vector<16x64xf32> to vector<11x64xf32>
    %229 = vector.extract_strided_slice %224 {offsets = [5, 0], sizes = [11, 64], strides = [1, 1]} : vector<16x64xf32> to vector<11x64xf32>
    %230 = arith.maximumf %228, %229 : vector<11x64xf32>
    %231 = arith.maximumf %227, %230 : vector<11x64xf32>
    %c0_158 = arith.constant 0 : index
    %c0_159 = arith.constant 0 : index
    %232 = vector.load %arg13[%c0_158, %c0_159] : memref<1x11xf32, #tpu.memory_space<vmem>>, vector<1x11xf32>
    %cst_160 = arith.constant dense<0.000000e+00> : vector<1x64xf32>
    %233 = tpu.matmul %232, %231, %cst_160 {dimension_numbers = #tpu.dot_dimension_numbers<[1], [0], [0], [1], [0, 0, 1, 1], [], []>} : vector<1x11xf32>, vector<11x64xf32>, vector<1x64xf32> -> vector<1x64xf32>
    %c0_161 = arith.constant 0 : index
    %c0_162 = arith.constant 0 : index
    %c0_163 = arith.constant 0 : index
    %234 = vector.load %arg16[%c0_161, %c0_162, %c0_163] : memref<1x1x64xf32, #tpu.memory_space<vmem>>, vector<1x1x64xf32>
    %235 = vector.shape_cast %234 : vector<1x1x64xf32> to vector<1x64xf32>
    %236 = vector.shape_cast %233 : vector<1x64xf32> to vector<1x1x64xf32>
    tpu.vector_store %arg16[%c0_161, %c0_162, %c0_163], %236 {strides = array<i32>} : memref<1x1x64xf32, #tpu.memory_space<vmem>>, vector<1x1x64xf32>,
    %c0_164 = arith.constant 0 : index
    %c0_165 = arith.constant 0 : index
    %237 = vector.load %arg14[%c0_164, %c0_165] : memref<64x10xf32, #tpu.memory_space<vmem>>, vector<64x10xf32>
    %cst_166 = arith.constant dense<0.000000e+00> : vector<1x10xf32>
    %238 = tpu.matmul %233, %237, %cst_166 {dimension_numbers = #tpu.dot_dimension_numbers<[1], [0], [0], [1], [0, 0, 1, 1], [], []>} : vector<1x64xf32>, vector<64x10xf32>, vector<1x10xf32> -> vector<1x10xf32>
    %c0_167 = arith.constant 0 : index
    %c0_168 = arith.constant 0 : index
    %239 = vector.load %arg15[%c0_167, %c0_168] : memref<1x10xf32, #tpu.memory_space<vmem>>, vector<1x10xf32>
    %240 = arith.addf %238, %239 : vector<1x10xf32>
    %c0_169 = arith.constant 0 : index
    %c0_170 = arith.constant 0 : index
    %c0_171 = arith.constant 0 : index
    %241 = vector.load %arg17[%c0_169, %c0_170, %c0_171] : memref<1x1x10xf32, #tpu.memory_space<vmem>>, vector<1x1x10xf32>
    %242 = vector.shape_cast %241 : vector<1x1x10xf32> to vector<1x10xf32>
    %243 = vector.shape_cast %240 : vector<1x10xf32> to vector<1x1x10xf32>
    tpu.vector_store %arg17[%c0_169, %c0_170, %c0_171], %243 {strides = array<i32>} : memref<1x1x10xf32, #tpu.memory_space<vmem>>, vector<1x1x10xf32>,
    return
  }
  func.func @transform_0(%arg0: i32) -> (i32, i32, i32) {
    %c0_i32 = arith.constant 0 : i32
    %c0_i32_0 = arith.constant 0 : i32
    %c0_i32_1 = arith.constant 0 : i32
    return %arg0, %c0_i32, %c0_i32_0 : i32, i32, i32
  }
  func.func @transform_1(%arg0: i32) -> (i32, i32, i32) {
    %c0_i32 = arith.constant 0 : i32
    %c0_i32_0 = arith.constant 0 : i32
    %c0_i32_1 = arith.constant 0 : i32
    %c0_i32_2 = arith.constant 0 : i32
    return %c0_i32, %c0_i32_0, %c0_i32_1 : i32, i32, i32
  }
  func.func @transform_2(%arg0: i32) -> (i32, i32) {
    %c0_i32 = arith.constant 0 : i32
    %c0_i32_0 = arith.constant 0 : i32
    %c0_i32_1 = arith.constant 0 : i32
    return %c0_i32, %c0_i32_0 : i32, i32
  }
  func.func @transform_3(%arg0: i32) -> (i32, i32) {
    %c0_i32 = arith.constant 0 : i32
    %c0_i32_0 = arith.constant 0 : i32
    %c0_i32_1 = arith.constant 0 : i32
    return %c0_i32, %c0_i32_0 : i32, i32
  }
  func.func @transform_4(%arg0: i32) -> (i32, i32, i32) {
    %c0_i32 = arith.constant 0 : i32
    %c0_i32_0 = arith.constant 0 : i32
    %c0_i32_1 = arith.constant 0 : i32
    %c0_i32_2 = arith.constant 0 : i32
    return %c0_i32, %c0_i32_0, %c0_i32_1 : i32, i32, i32
  }
  func.func @transform_5(%arg0: i32) -> (i32, i32) {
    %c0_i32 = arith.constant 0 : i32
    %c0_i32_0 = arith.constant 0 : i32
    %c0_i32_1 = arith.constant 0 : i32
    return %c0_i32, %c0_i32_0 : i32, i32
  }
  func.func @transform_6(%arg0: i32) -> (i32, i32) {
    %c0_i32 = arith.constant 0 : i32
    %c0_i32_0 = arith.constant 0 : i32
    %c0_i32_1 = arith.constant 0 : i32
    return %c0_i32, %c0_i32_0 : i32, i32
  }
  func.func @transform_7(%arg0: i32) -> (i32, i32, i32) {
    %c0_i32 = arith.constant 0 : i32
    %c0_i32_0 = arith.constant 0 : i32
    %c0_i32_1 = arith.constant 0 : i32
    %c0_i32_2 = arith.constant 0 : i32
    return %c0_i32, %c0_i32_0, %c0_i32_1 : i32, i32, i32
  }
  func.func @transform_8(%arg0: i32) -> (i32, i32) {
    %c0_i32 = arith.constant 0 : i32
    %c0_i32_0 = arith.constant 0 : i32
    %c0_i32_1 = arith.constant 0 : i32
    return %c0_i32, %c0_i32_0 : i32, i32
  }
  func.func @transform_9(%arg0: i32) -> (i32, i32) {
    %c0_i32 = arith.constant 0 : i32
    %c0_i32_0 = arith.constant 0 : i32
    %c0_i32_1 = arith.constant 0 : i32
    return %c0_i32, %c0_i32_0 : i32, i32
  }
  func.func @transform_10(%arg0: i32) -> (i32, i32, i32) {
    %c0_i32 = arith.constant 0 : i32
    %c0_i32_0 = arith.constant 0 : i32
    %c0_i32_1 = arith.constant 0 : i32
    %c0_i32_2 = arith.constant 0 : i32
    return %c0_i32, %c0_i32_0, %c0_i32_1 : i32, i32, i32
  }
  func.func @transform_11(%arg0: i32) -> (i32, i32) {
    %c0_i32 = arith.constant 0 : i32
    %c0_i32_0 = arith.constant 0 : i32
    %c0_i32_1 = arith.constant 0 : i32
    return %c0_i32, %c0_i32_0 : i32, i32
  }
  func.func @transform_12(%arg0: i32) -> (i32, i32) {
    %c0_i32 = arith.constant 0 : i32
    %c0_i32_0 = arith.constant 0 : i32
    %c0_i32_1 = arith.constant 0 : i32
    return %c0_i32, %c0_i32_0 : i32, i32
  }
  func.func @transform_13(%arg0: i32) -> (i32, i32) {
    %c0_i32 = arith.constant 0 : i32
    %c0_i32_0 = arith.constant 0 : i32
    %c0_i32_1 = arith.constant 0 : i32
    return %c0_i32, %c0_i32_0 : i32, i32
  }
  func.func @transform_14(%arg0: i32) -> (i32, i32) {
    %c0_i32 = arith.constant 0 : i32
    %c0_i32_0 = arith.constant 0 : i32
    %c0_i32_1 = arith.constant 0 : i32
    return %c0_i32, %c0_i32_0 : i32, i32
  }
  func.func @transform_15(%arg0: i32) -> (i32, i32, i32) {
    %c0_i32 = arith.constant 0 : i32
    %c0_i32_0 = arith.constant 0 : i32
    %c0_i32_1 = arith.constant 0 : i32
    return %arg0, %c0_i32, %c0_i32_0 : i32, i32, i32
  }
  func.func @transform_16(%arg0: i32) -> (i32, i32, i32) {
    %c0_i32 = arith.constant 0 : i32
    %c0_i32_0 = arith.constant 0 : i32
    %c0_i32_1 = arith.constant 0 : i32
    return %arg0, %c0_i32, %c0_i32_0 : i32, i32, i32
  }
}

</mosaic_0001>

<bundles_post_ra>
// kernel: tpu_custom_call.1
= control target key start
LH: loop header
LB: loop body
LE: loop exit
PB: predicated region body
PF: predicated region fallthrough
CT: control target
= control target key end

     0   :  { %s20563_s0 = inlined_call_operand.vmem [shape: f32[2,362,3], index: 0, kind: input, shape index: {}]   ;;  %s20564_s1 = inlined_call_operand.vmem [shape: f32[9,3,64], index: 1, kind: input, shape index: {}]   ;;  %s20565_s2 = inlined_call_operand.vmem [shape: f32[1,64], index: 2, kind: input, shape index: {}]   ;;  %s20566_s3 = inlined_call_operand.vmem [shape: f32[122,305], index: 3, kind: input, shape index: {}]   ;;  %s20567_s4 = inlined_call_operand.vmem [shape: f32[9,64,64], index: 4, kind: input, shape index: {}]   ;;  %s20568_s5 = inlined_call_operand.vmem [shape: f32[1,64], index: 5, kind: input, shape index: {}]   ;;  %s20569_s6 = inlined_call_operand.vmem [shape: f32[50,89], index: 6, kind: input, shape index: {}]   ;;  %s20570_s7 = inlined_call_operand.vmem [shape: f32[9,64,64], index: 7, kind: input, shape index: {}]   ;;  %s20571_s8 = inlined_call_operand.vmem [shape: f32[1,64], index: 8, kind: input, shape index: {}]   ;;  %s20572_s9 = inlined_call_operand.vmem [shape: f32[26,29], index: 9, kind: input, shape index: {}]   ;;  %s20573_s10 = inlined_call_operand.hbm [shape: f32[9,64,64], index: 10, kind: input, shape index: {}]   ;;  %s20574_s11 = inlined_call_operand.vmem [shape: f32[1,64], index: 11, kind: input, shape index: {}]   ;;  %s20575_s12 = inlined_call_operand.vmem [shape: f32[1,11], index: 12, kind: input, shape index: {}]   ;;  %s20576_s13 = inlined_call_operand.vmem [shape: f32[64,10], index: 13, kind: input, shape index: {}]   ;;  %s20577_s14 = inlined_call_operand.vmem [shape: f32[1,10], index: 14, kind: input, shape index: {}]   ;;  %s20578_s15 = inlined_call_operand.hbm [shape: f32[2,1,64], index: 15, kind: output, shape index: {0}]   ;;  %s20579_s16 = inlined_call_operand.hbm [shape: f32[2,1,10], index: 16, kind: output, shape index: {1}]  }
   0x1   :  { %20613 = sst [smem:[#allocation46_spill]] %s20563_s0 }
   0x2   :  { %20614 = sst [smem:[#allocation47_spill]] %s20564_s1 }
   0x3   :  { %22 = vsyncpa [#allocation3], 0 }
   0x4   :  { %23 = vsyncpa [#allocation4], 0 }
   0x5   :  { %25 = vsyncpa [#allocation4 + $0x1], 0 }
   0x6   :  { %26 = vsyncpa [#allocation7], 0 }
   0x7   :  { %28 = vsyncpa [#allocation7 + $0x1], 0  ;;  %s14437_s21 = smov 0   ;;  %s14439_s22 = smov 0  }
   0x8   :  { %s14441_s23 = smov 0   ;;  %s14443_s24 = smov 0  }
   0x9 LB: > { %20615 = sst [smem:[#allocation11_spill]] %s14329_s21  ;;  %s14458_s25 = sadd.s32 4294967295, %s14341_s24   ;;  %s14341_s24 = sphi %s14443_s24, %s20743_s24   ;;  %s14337_s23 = sphi %s14441_s23, %s20745_s23   ;;  %s14333_s22 = sphi %s14439_s22, %s20747_s22   ;;  %s14329_s21 = sphi %s14437_s21, %s20746_s21  }
   0xa   : > { %20616 = sst [smem:[#allocation12_spill]] %s14337_s23  ;;  %s9752_s26 = sadd.s32 4294967294, %s14341_s24  }
   0xb   : > { %s14462_s27 = sadd.s32 1, %s14341_s24   ;;  %s361_s28 = sadd.s32 1, %s14337_s23 }
   0xc   : > { %20617 = sst [smem:[#allocation13_spill]] %s14462_s27  ;;  %s358_s29 = ssub.s32 %s14341_s24, %s14462_s27 }
   0xd   : > { %p371_p0 = scmp.ne.s32.totalorder %s14337_s23, %s14333_s22  ;;  %p359_p1 = scmp.eq.s32.totalorder %s358_s29, 0 }
   0xe   : > { %p372_p2 = scmp.eq.s32.totalorder %s14458_s25, 1  ;;  %p377_p3 = scmp.ne.s32.totalorder %s14333_s22, %s14329_s21 }
   0xf   : > { %p378_p4 = scmp.eq.s32.totalorder %s9752_s26, 1  ;;  %p9753_p7 = scmp.ge.s32.totalorder %s14341_s24, 1 }
  0x10   : > { %s14473_s30 = scalar_select %p359_p1, %s14337_s23, %s361_s28  }
  0x11   : > { %p14475_p5 = por %p372_p2, %p371_p0  ;;  %p14479_p6 = por %p378_p4, %p377_p3 }
  0x12   : > { %20618 = sst [smem:[#allocation14_spill]] %s14473_s30  ;;  %p411_p8 = scmp.lt.s32.totalorder %s14341_s24, 3 }
  0x13   : > { %s20619_s0 = scalar_select %p14475_p5, 1, 0 }
  0x14   : > { %s20620_s17 = scalar_select %p14479_p6, 1, 0 }
  0x15   : > { %p20585_p9 = scmp.eq.s32.totalorder %s14458_s25, 0  ;;  %p14486_p10 = pnand %p9753_p7, %p411_p8 }
  0x16   : > { %20621 = sst [smem:[#allocation15_spill]] %s20620_s17  ;;  %s14343_s19 = smov [#allocation2]  }
  0x17   : > { %s20622_s18 = scalar_select %p14486_p10, 1, 0 }
  0x18   : > { %s450_s20 = sshll.u32 %s14343_s19, 4  ;;  %p14079_p11 = pneg %p14486_p10  ;;  %s451_s20 = int_to_ptr.vmem [resolvable:$true] %s450_s20 }
  0x19   : > { %s14215_s30 = scalar_lea.hbm %s20573_s10, 9216 }
  0x1a   : > { %p14494_p12 = pnand %p20585_p9, %p14079_p11  ;;  %p14216_p13 = scmp.ne.s32.totalorder %s20573_s10, %s14215_s30 }
  0x1b   : > { %p14222_p3 = scmp.lt.u32.totalorder %s14215_s30, %s20573_s10 }
  0x1c   : > { %p14217_p0 = pneg %p14494_p12 }
  0x1e   : > { %p14218_p1 = pnand %p14217_p0, %p14216_p13 }
  0x20   : > { %p14219_p2 = pneg %p14218_p1 }
  0x22   : > { %p14224_p4 = pnand %p14222_p3, %p14219_p2 }
  0x24   : > { %14227 = shalt.err (!%p14224_p4)
}
  0x25   : > { %s14228_s21 = scalar_lea.vmem %s451_s20, 9216  ;;  %p14236_p9 = scmp.lt.s32.totalorder %s451_s20, %s451_s20 }
  0x26   : > { %p14229_p7 = scmp.ne.s32.totalorder %s451_s20, %s14228_s21  ;;  %p14237_p6 = scmp.lt.s32.totalorder %s14228_s21, %s14228_s21 }
  0x28   : > { %p14231_p8 = pnand %p14229_p7, %p14217_p0  ;;  %p14238_p5 = por %p14237_p6, %p14236_p9 }
  0x2a   : > { %p14232_p11 = pneg %p14231_p8 }
  0x2c   : > { %p14239_p10 = pnand %p14238_p5, %p14232_p11 }
  0x2e   : > { %14242 = shalt.err (!%p14239_p10)
}
  0x2f   : > { %s14344_s23 = smov 128   ;;  %s14345_s27 = smov 8  }
  0x30   : > { %14082 = dma.hbm_to_vmem [thread:$0]  (!%p14494_p12), %s20573_s10, 9216, %s451_s20, [#allocation3], %s14344_s23, %s14344_s23, %s14345_s27  }
  0x31   : > { %p20624_p13 = scmp.ne.s32.totalorder %s20622_s18, 0 }
  0x33   : > { %486 = sbr.rel (%p20624_p13) target bundleno = 3393 (0xd41), region = 80 }
  0x3a   : > { %p20625_p1 = scmp.eq.s32.totalorder %s14458_s25, 0 }
  0x3c   : > { %14316 = dma.done.wait (%p20625_p1), [#allocation3], 9216   ;;  %p20626_p0 = pmov %p20625_p1 }
  0x3d   : > { %p539_p5 = scmp.lt.s32.totalorder %s14458_s25, 1  ;;  %v20600_v0 = vmov 0.0   ;;  %vm14347_vm0 = vmmov 0   ;;  %vm799_vm1 = vcmask 1042432   ;;  %s20627_s20 = sld [smem:[#allocation46_spill]]  ;;  %vm634_vm2 = vcmask 1046528  }
  0x3e   : > { %14318 = vsyncadd (%p20626_p0), [#allocation3], 4294958080  ;;  %11410 = vmatprep.subr.mxu0 %v20600_v0  ;;  %14052 = vmatprep.subr.mxu1 %v20600_v0  ;;  %s20628_s1 = sld [smem:[#allocation47_spill]]  ;;  %vm716_vm3 = vcmask 23552   ;;  %vm1430_vm4 = vcmask 1045504   ;;  %vm2238_vm5 = vcmask 1044480  }
  0x3f   : > { %11412 = vmatprep.mubr.msk.f32.mxu0 %vm14347_vm0, %v20600_v0  ;;  %11493 = vmatprep.mubr.msk.f32.mxu1 %vm14347_vm0, %v20600_v0  ;;  %s540_s21 = scalar_select %p539_p5, %s14458_s25, 1  ;;  %vm2718_vm6 = vcmask 1043456   ;;  %vm4008_vm7 = vcmask 1041408   ;;  %vm5074_vm8 = vcmask 1040384   ;;  %vm5025_vm9 = vcmask 400384  }
  0x40   : > { %vm5423_vm10 = vcmask 523264   ;;  %vm14349_vm11 = vmmov 1   ;;  %vm7239_vm13 = vcmask 728064   ;;  %vm8501_vm14 = vcmask 236544   ;;  %s20481_s27 = sand.u32 1, %s14333_s22   ;;  %s20612_s29 = sshll.u32 %s14458_s25, 4 }
  0x41   : > { %s14070_s30 = smul.u32 368, %s540_s21  ;;  %vm13772_vm12 = vmpackc.low %vm5074_vm8, %vm14349_vm11  ;;  %s532_s28 = scalar_lea.vmem [#allocation5], %s20481_s27 }
  0x42   : > { %vm13887_vm15 = vmpackc.low %vm2238_vm5, %vm14349_vm11  ;;  %s20491_s17 = scalar_lea.hbm %s20578_s15, %s20612_s29  ;;  %s9628_s18 = scalar_lea.sflag [#allocation4], %s20481_s27 }
  0x43   : > { %s14531_s26 = scalar_lea.vmem %s20627_s20, %s14070_s30  ;;  %p20738_p9 = scmp.ne.s32.totalorder %s20619_s0, 0 }
  0x44   : > { %v9759_v1 = vld [vmem:[%s20628_s1 + $0x4] sm:$0x7]  ;;  %v14540_v3 = vld [vmem:[%s14531_s26 + $0x8] sm:$0xff]  ;;  %v14547_v6 = vld [vmem:[%s14531_s26 + $0xd8] sm:$0xff]  ;;  %s14350_s19 = smov [#allocation5]  }
  0x45   : > { %v14537_v2 = vld [vmem:[%s14531_s26] sm:$0xff]  ;;  %11411 = vmatpush3.msk.msra.mxu0 %vm799_vm1, %v9759_v1  ;;  %14053 = vmatpush3.msk.msra.mxu1 %vm799_vm1, %v9759_v1  ;;  %v636_v5 = vrot.slane %v14540_v3, 1  ;;  %v688_v8 = vrot.slane %v14547_v6, 1  ;;  %v14555_v10 = vld [vmem:[%s14531_s26 + $0x10] sm:$0xff]  ;;  %v14558_v11 = vld [vmem:[%s14531_s26 + $0xe8] sm:$0xff]  ;;  %v1432_v39 = vrot.slane %v14540_v3, 2 }
  0x46   : > { %v635_v4 = vrot.slane %v14537_v2, 1  ;;  %v14550_v7 = vld [vmem:[%s14531_s26 + $0xe0] sm:$0xff]  ;;  %v14561_v12 = vld [vmem:[%s14531_s26 + $0x18] sm:$0xff]  ;;  %11535 = vmatprep.subr.mxu1 %v20600_v0  ;;  %11660 = vmatprep.subr.mxu0 %v20600_v0  ;;  %v638_v14 = vrot.slane %v14555_v10, 1  ;;  %v692_v15 = vrot.slane %v14558_v11, 1  ;;  %v14569_v16 = vld [vmem:[%s14531_s26 + $0xf0] sm:$0xff] }
  0x47   : > { %v690_v9 = vrot.slane %v14550_v7, 1  ;;  %v640_v19 = vrot.slane %v14561_v12, 1  ;;  %v694_v21 = vrot.slane %v14569_v16, 1  ;;  %v14585_v22 = vld [vmem:[%s14531_s26 + $0x20] sm:$0xff]  ;;  %v14588_v23 = vld [vmem:[%s14531_s26 + $0xf8] sm:$0xff]  ;;  %v14601_v28 = vld [vmem:[%s14531_s26 + $0x28] sm:$0xff] }
  0x48   : > { %v637_v13 = vsel %vm634_vm2, %v635_v4, %v636_v5  ;;  %v639_v18 = vsel %vm634_vm2, %v636_v5, %v638_v14  ;;  %v642_v25 = vrot.slane %v14585_v22, 1  ;;  %v696_v27 = vrot.slane %v14588_v23, 1  ;;  %v590_v29 = vld [vmem:[%s20628_s1] sm:$0x7]  ;;  %v14622_v35 = vld [vmem:[%s14531_s26 + $0x30] sm:$0xff]  ;;  %v14628_v37 = vld [vmem:[%s14531_s26 + $0x108] sm:$0xff] }
  0x49   : > { %11413 = vmatmul.mubr.msk.f32.vlgmr.msra.gmra.mrb[0].mxu0 %vm716_vm3, %v637_v13  ;;  %v691_v17 = vsel %vm634_vm2, %v688_v8, %v690_v9  ;;  %v693_v20 = vsel %vm634_vm2, %v690_v9, %v692_v15  ;;  %v641_v24 = vsel %vm634_vm2, %v638_v14, %v640_v19  ;;  %v695_v26 = vsel %vm634_vm2, %v692_v15, %v694_v21  ;;  %v14607_v30 = vld [vmem:[%s14531_s26 + $0x100] sm:$0xff]  ;;  %v9844_v36 = vld [vmem:[%s20628_s1 + $0x8] sm:$0x7]  ;;  %v14645_v44 = vld [vmem:[%s14531_s26 + $0x38] sm:$0xff]  ;;  %s14247_s23 = sshll.u32 %s14350_s19, 4  ;;  %s14248_s23 = int_to_ptr.vmem [resolvable:$false] %s14247_s23 }
  0x4a   : > { %11494 = vmatmul.mubr.msk.f32.vlgmr.msra.gmra.mrb[0].mxu1 %vm716_vm3, %v691_v17  ;;  %11415 = vmatprep.mubr.msk.f32.mxu0 %vm14347_vm0, %v20600_v0  ;;  %v643_v31 = vsel %vm634_vm2, %v640_v19, %v642_v25  ;;  %v644_v32 = vrot.slane %v14601_v28, 1  ;;  %v697_v33 = vsel %vm634_vm2, %v694_v21, %v696_v27  ;;  %v698_v34 = vrot.slane %v14607_v30, 1  ;;  %v14648_v45 = vld [vmem:[%s14531_s26 + $0x110] sm:$0xff]  ;;  %v14666_v51 = vld [vmem:[%s14531_s26 + $0x40] sm:$0xff]  ;;  %v14669_v52 = vld [vmem:[%s14531_s26 + $0x118] sm:$0xff] }
  0x4b   : > { %11496 = vmatprep.mubr.msk.f32.mxu1 %vm14347_vm0, %v20600_v0  ;;  %11536 = vmatpush3.msk.msra.mxu1 %vm799_vm1, %v590_v29  ;;  %v1431_v38 = vrot.slane %v14537_v2, 2  ;;  %v646_v41 = vrot.slane %v14622_v35, 1  ;;  %v700_v43 = vrot.slane %v14628_v37, 1  ;;  %v648_v48 = vrot.slane %v14645_v44, 1  ;;  %v14682_v57 = vld [vmem:[%s14531_s26 + $0x48] sm:$0xff]  ;;  %v14685_v58 = vld [vmem:[%s14531_s26 + $0x120] sm:$0xff] }
  0x4c   : > { %11785 = vmatprep.subr.mxu1 %v20600_v0  ;;  %11661 = vmatpush3.msk.msra.mxu0 %vm799_vm1, %v9844_v36  ;;  %v645_v40 = vsel %vm634_vm2, %v642_v25, %v644_v32  ;;  %v699_v42 = vsel %vm634_vm2, %v696_v27, %v698_v34  ;;  %v702_v50 = vrot.slane %v14648_v45, 1  ;;  %v650_v54 = vrot.slane %v14666_v51, 1  ;;  %v14698_v63 = vld [vmem:[%s14531_s26 + $0x50] sm:$0xff]  ;;  %v14701_v1 = vld [vmem:[%s14531_s26 + $0x128] sm:$0xff]  ;;  %v14714_v14 = vld [vmem:[%s14531_s26 + $0x58] sm:$0xff] }
  0x4d   : > { %11416 = vmatmul.mubr.msk.f32.gmra.mrb[2].mxu0 %vm716_vm3, %v639_v18  ;;  %11910 = vmatprep.subr.mxu0 %v20600_v0  ;;  %v14654_v46 = vsel %vm1430_vm4, %v1431_v38, %v1432_v39  ;;  %v647_v47 = vsel %vm634_vm2, %v644_v32, %v646_v41  ;;  %v701_v49 = vsel %vm634_vm2, %v698_v34, %v700_v43  ;;  %v704_v56 = vrot.slane %v14669_v52, 1  ;;  %v14717_v15 = vld [vmem:[%s14531_s26 + $0x130] sm:$0xff]  ;;  %v14730_v21 = vld [vmem:[%s14531_s26 + $0x60] sm:$0xff] }
  0x4e   : > { %11497 = vmatmul.mubr.msk.f32.gmra.mrb[2].mxu1 %vm716_vm3, %v693_v20  ;;  %11418 = vmatprep.mubr.msk.f32.mxu0 %vm14347_vm0, %v20600_v0  ;;  %v649_v53 = vsel %vm634_vm2, %v646_v41, %v648_v48  ;;  %v703_v55 = vsel %vm634_vm2, %v700_v43, %v702_v50  ;;  %v651_v59 = vsel %vm634_vm2, %v648_v48, %v650_v54  ;;  %v652_v60 = vrot.slane %v14682_v57, 1  ;;  %v14749_v32 = vld [vmem:[%s14531_s26 + $0x140] sm:$0xff] }
  0x4f   : > { %11499 = vmatprep.mubr.msk.f32.mxu1 %vm14347_vm0, %v20600_v0  ;;  %v705_v61 = vsel %vm634_vm2, %v702_v50, %v704_v56  ;;  %v706_v62 = vrot.slane %v14685_v58, 1  ;;  %v654_v5 = vrot.slane %v14698_v63, 1  ;;  %v708_v13 = vrot.slane %v14701_v1, 1  ;;  %v14785_v50 = vld [vmem:[%s14531_s26 + $0x80] sm:$0xff] }
  0x50   : > { %v653_v4 = vsel %vm634_vm2, %v650_v54, %v652_v60  ;;  %v656_v18 = vrot.slane %v14714_v14, 1  ;;  %v710_v20 = vrot.slane %v14717_v15, 1  ;;  %v714_v38 = vrot.slane %v14749_v32, 1 }
  0x51   : > { %11419 = vmatmul.mubr.msk.f32.gmra.mrb[4].mxu0 %vm716_vm3, %v641_v24  ;;  %v707_v9 = vsel %vm634_vm2, %v704_v56, %v706_v62  ;;  %v655_v17 = vsel %vm634_vm2, %v652_v60, %v654_v5  ;;  %v709_v19 = vsel %vm634_vm2, %v706_v62, %v708_v13  ;;  %v14733_v24 = vld [vmem:[%s14531_s26 + $0x138] sm:$0xff]  ;;  %v666_v54 = vrot.slane %v14785_v50, 1  ;;  %v14808_v60 = vld [vmem:[%s14531_s26 + $0x90] sm:$0xff] }
  0x52   : > { %11500 = vmatmul.mubr.msk.f32.gmra.mrb[4].mxu1 %vm716_vm3, %v695_v26  ;;  %11421 = vmatprep.mubr.msk.f32.mxu0 %vm14347_vm0, %v20600_v0  ;;  %v657_v25 = vsel %vm634_vm2, %v654_v5, %v656_v18  ;;  %v658_v26 = vrot.slane %v14730_v21, 1  ;;  %v711_v27 = vsel %vm634_vm2, %v708_v13, %v710_v20  ;;  %v712_v29 = vrot.slane %v14733_v24, 1  ;;  %v14820_v62 = vld [vmem:[%s14531_s26 + $0x98] sm:$0xff] }
  0x53   : > { %11502 = vmatprep.mubr.msk.f32.mxu1 %vm14347_vm0, %v20600_v0  ;;  %v672_v5 = vrot.slane %v14820_v62, 1 }
  0x54   : > { %v713_v36 = vsel %vm634_vm2, %v710_v20, %v712_v29  ;;  %v715_v43 = vsel %vm634_vm2, %v712_v29, %v714_v38  ;;  %v14868_v29 = vld [vmem:[%s14531_s26 + $0xb8] sm:$0xff] }
  0x55   : > { %11422 = vmatmul.mubr.msk.f32.gmra.mrb[6].mxu0 %vm716_vm3, %v643_v31  ;;  %v14746_v31 = vld [vmem:[%s14531_s26 + $0x68] sm:$0xff] }
  0x56   : > { %11503 = vmatmul.mubr.msk.f32.gmra.mrb[6].mxu1 %vm716_vm3, %v697_v33  ;;  %11424 = vmatprep.mubr.msk.f32.mxu0 %vm14347_vm0, %v20600_v0  ;;  %v659_v33 = vsel %vm634_vm2, %v656_v18, %v658_v26  ;;  %v660_v34 = vrot.slane %v14746_v31, 1  ;;  %v14844_v18 = vld [vmem:[%s14531_s26 + $0xa8] sm:$0xff] }
  0x57   : > { %11505 = vmatprep.mubr.msk.f32.mxu1 %vm14347_vm0, %v20600_v0  ;;  %v676_v20 = vrot.slane %v14844_v18, 1 }
  0x58   : > { %v661_v41 = vsel %vm634_vm2, %v658_v26, %v660_v34 }
  0x59   : > { %11425 = vmatmul.mubr.msk.f32.gmra.mrb[8].mxu0 %vm716_vm3, %v645_v40  ;;  %v14762_v40 = vld [vmem:[%s14531_s26 + $0x70] sm:$0xff] }
  0x5a   : > { %11506 = vmatmul.mubr.msk.f32.gmra.mrb[8].mxu1 %vm716_vm3, %v699_v42  ;;  %11427 = vmatprep.mubr.msk.f32.mxu0 %vm14347_vm0, %v20600_v0  ;;  %v662_v42 = vrot.slane %v14762_v40, 1 }
  0x5b   : > { %11508 = vmatprep.mubr.msk.f32.mxu1 %vm14347_vm0, %v20600_v0 }
  0x5c   : > { %v663_v48 = vsel %vm634_vm2, %v660_v34, %v662_v42  ;;  %v680_v34 = vrot.slane %v14868_v29, 1 }
  0x5d   : > { %11428 = vmatmul.mubr.msk.f32.gmra.mrb[10].mxu0 %vm716_vm3, %v647_v47  ;;  %v14774_v47 = vld [vmem:[%s14531_s26 + $0x78] sm:$0xff] }
  0x5e   : > { %11509 = vmatmul.mubr.msk.f32.gmra.mrb[10].mxu1 %vm716_vm3, %v701_v49  ;;  %11430 = vmatprep.mubr.msk.f32.mxu0 %vm14347_vm0, %v20600_v0  ;;  %v664_v49 = vrot.slane %v14774_v47, 1 }
  0x5f   : > { %11511 = vmatprep.mubr.msk.f32.mxu1 %vm14347_vm0, %v20600_v0 }
  0x60   : > { %v667_v56 = vsel %vm634_vm2, %v664_v49, %v666_v54 }
  0x61   : > { %11431 = vmatmul.mubr.msk.f32.gmra.mrb[12].mxu0 %vm716_vm3, %v649_v53  ;;  %v665_v53 = vsel %vm634_vm2, %v662_v42, %v664_v49 }
  0x62   : > { %11512 = vmatmul.mubr.msk.f32.gmra.mrb[12].mxu1 %vm716_vm3, %v703_v55  ;;  %11433 = vmatprep.mubr.msk.f32.mxu0 %vm14347_vm0, %v20600_v0  ;;  %v14796_v55 = vld [vmem:[%s14531_s26 + $0x88] sm:$0xff] }
  0x63   : > { %11514 = vmatprep.mubr.msk.f32.mxu1 %vm14347_vm0, %v20600_v0 }
  0x65   : > { %11434 = vmatmul.mubr.msk.f32.gmra.mrb[14].mxu0 %vm716_vm3, %v651_v59  ;;  %v668_v59 = vrot.slane %v14796_v55, 1 }
  0x66   : > { %11515 = vmatmul.mubr.msk.f32.gmra.mrb[14].mxu1 %vm716_vm3, %v705_v61  ;;  %11436 = vmatprep.mubr.msk.f32.mxu0 %vm14347_vm0, %v20600_v0  ;;  %v670_v61 = vrot.slane %v14808_v60, 1 }
  0x67   : > { %11517 = vmatprep.mubr.msk.f32.mxu1 %vm14347_vm0, %v20600_v0 }
  0x68   : > { %v673_v13 = vsel %vm634_vm2, %v670_v61, %v672_v5 }
  0x69   : > { %11437 = vmatmul.mubr.msk.f32.gmra.mrb[16].mxu0 %vm716_vm3, %v653_v4  ;;  %v671_v4 = vsel %vm634_vm2, %v668_v59, %v670_v61  ;;  %v1434_v61 = vrot.slane %v14555_v10, 2 }
  0x6a   : > { %11518 = vmatmul.mubr.msk.f32.gmra.mrb[16].mxu1 %vm716_vm3, %v707_v9  ;;  %11439 = vmatprep.mubr.msk.f32.mxu0 %vm14347_vm0, %v20600_v0  ;;  %v14832_v9 = vld [vmem:[%s14531_s26 + $0xa0] sm:$0xff] }
  0x6b   : > { %11520 = vmatprep.mubr.msk.f32.mxu1 %vm14347_vm0, %v20600_v0 }
  0x6d   : > { %11440 = vmatmul.mubr.msk.f32.gmra.mrb[18].mxu0 %vm716_vm3, %v655_v17  ;;  %v674_v17 = vrot.slane %v14832_v9, 1 }
  0x6e   : > { %11521 = vmatmul.mubr.msk.f32.gmra.mrb[18].mxu1 %vm716_vm3, %v709_v19  ;;  %11442 = vmatprep.mubr.msk.f32.mxu0 %vm14347_vm0, %v20600_v0 }
  0x6f   : > { %11523 = vmatprep.mubr.msk.f32.mxu1 %vm14347_vm0, %v20600_v0  ;;  %v675_v19 = vsel %vm634_vm2, %v672_v5, %v674_v17  ;;  %v677_v26 = vsel %vm634_vm2, %v674_v17, %v676_v20  ;;  %v1442_v5 = vrot.slane %v14622_v35, 2  ;;  %v1446_v17 = vrot.slane %v14666_v51, 2 }
  0x71   : > { %11443 = vmatmul.mubr.msk.f32.gmra.mrb[20].mxu0 %vm716_vm3, %v657_v25  ;;  %v14856_v25 = vld [vmem:[%s14531_s26 + $0xb0] sm:$0xff] }
  0x72   : > { %11524 = vmatmul.mubr.msk.f32.gmra.mrb[20].mxu1 %vm716_vm3, %v711_v27  ;;  %11445 = vmatprep.mubr.msk.f32.mxu0 %vm14347_vm0, %v20600_v0  ;;  %v678_v27 = vrot.slane %v14856_v25, 1 }
  0x73   : > { %11526 = vmatprep.mubr.msk.f32.mxu1 %vm14347_vm0, %v20600_v0 }
  0x75   : > { %11446 = vmatmul.mubr.msk.f32.gmra.mrb[22].mxu0 %vm716_vm3, %v659_v33  ;;  %v679_v33 = vsel %vm634_vm2, %v676_v20, %v678_v27  ;;  %v1450_v20 = vrot.slane %v14698_v63, 2 }
  0x76   : > { %11527 = vmatmul.mubr.msk.f32.gmra.mrb[22].mxu1 %vm716_vm3, %v713_v36  ;;  %11448 = vmatprep.mubr.msk.f32.mxu0 %vm14347_vm0, %v20600_v0  ;;  %v14880_v36 = vld [vmem:[%s14531_s26 + $0xc0] sm:$0xff] }
  0x77   : > { %11529 = vmatprep.mubr.msk.f32.mxu1 %vm14347_vm0, %v20600_v0  ;;  %v682_v42 = vrot.slane %v14880_v36, 1 }
  0x79   : > { %11449 = vmatmul.mubr.msk.f32.gmra.mrb[24].mxu0 %vm716_vm3, %v661_v41  ;;  %v681_v41 = vsel %vm634_vm2, %v678_v27, %v680_v34  ;;  %v1454_v27 = vrot.slane %v14730_v21, 2 }
  0x7a   : > { %11530 = vmatmul.mubr.msk.f32.gmra.mrb[24].mxu1 %vm716_vm3, %v715_v43  ;;  %11451 = vmatprep.mubr.msk.f32.mxu0 %vm14347_vm0, %v20600_v0  ;;  %v14896_v43 = vld [vmem:[%s14531_s26 + $0xc8] sm:$0xff] }
  0x7b   : > { %11532 = vmatprep.mubr.msk.f32.mxu1 %vm14347_vm0, %v20600_v0  ;;  %v684_v49 = vrot.slane %v14896_v43, 1 }
  0x7d   : > { %11452 = vmatmul.mubr.msk.f32.gmra.mrb[26].mxu0 %vm716_vm3, %v663_v48  ;;  %v683_v48 = vsel %vm634_vm2, %v680_v34, %v682_v42  ;;  %v1458_v34 = vrot.slane %v14762_v40, 2 }
  0x7e   : > { %11533 = vmatmul.mubr.msk.f32.gmra.mrb[26].mxu1 %vm716_vm3, %v714_v38  ;;  %11454 = vmatprep.mubr.msk.f32.mxu0 %vm14347_vm0, %v20600_v0  ;;  %v9887_v38 = vld [vmem:[%s20628_s1 + $0xc] sm:$0x7] }
  0x7f   : > { %11537 = vmatprep.mubr.msk.f32.mxu1 %vm14347_vm0, %v20600_v0 }
  0x81   : > { %11455 = vmatmul.mubr.msk.f32.gmra.mrb[28].mxu0 %vm716_vm3, %v665_v53  ;;  %v14909_v53 = vld [vmem:[%s14531_s26 + $0xd0] sm:$0xff] }
  0x82   : > { %11538 = vmatmul.mubr.msk.f32.vlgmr.msra.gmra.mrb[28].mxu1 %vm716_vm3, %v14537_v2  ;;  %11457 = vmatprep.mubr.msk.f32.mxu0 %vm14347_vm0, %v20600_v0  ;;  %v669_v2 = vsel %vm634_vm2, %v666_v54, %v668_v59  ;;  %v685_v54 = vsel %vm634_vm2, %v682_v42, %v684_v49  ;;  %v1464_v42 = vrot.slane %v14796_v55, 2 }
  0x83   : > { %11540 = vmatprep.mubr.msk.f32.mxu1 %vm14347_vm0, %v20600_v0  ;;  %11786 = vmatpush3.msk.msra.mxu1 %vm799_vm1, %v9887_v38  ;;  %v1460_v38 = vrot.slane %v14774_v47, 2 }
  0x84   : > { %12035 = vmatprep.subr.mxu1 %v20600_v0 }
  0x85   : > { %11458 = vmatmul.mubr.msk.f32.gmra.mrb[30].mxu0 %vm716_vm3, %v667_v56  ;;  %v686_v56 = vrot.slane %v14909_v53, 1 }
  0x86   : > { %11541 = vmatmul.mubr.msk.f32.gmra.mrb[30].mxu1 %vm716_vm3, %v14540_v3  ;;  %11460 = vmatprep.mubr.msk.f32.mxu0 %vm14347_vm0, %v20600_v0 }
  0x87   : > { %11543 = vmatprep.mubr.msk.f32.mxu1 %vm14347_vm0, %v20600_v0  ;;  %v687_v59 = vsel %vm634_vm2, %v684_v49, %v686_v56  ;;  %v1468_v49 = vrot.slane %v14820_v62, 2 }
  0x89   : > { %11461 = vmatmul.mubr.msk.f32.gmra.mrb[32].mxu0 %vm716_vm3, %v669_v2  ;;  %v689_v2 = vsel %vm634_vm2, %v686_v56, %v688_v8  ;;  %v9930_v8 = vld [vmem:[%s20628_s1 + $0x10] sm:$0x7]  ;;  %v1472_v56 = vrot.slane %v14844_v18, 2 }
  0x8a   : > { %11544 = vmatmul.mubr.msk.f32.gmra.mrb[32].mxu1 %vm716_vm3, %v14555_v10  ;;  %11463 = vmatprep.mubr.msk.f32.mxu0 %vm14347_vm0, %v20600_v0  ;;  %v1435_v10 = vsel %vm1430_vm4, %v1432_v39, %v1434_v61 }
  0x8b   : > { %11546 = vmatprep.mubr.msk.f32.mxu1 %vm14347_vm0, %v20600_v0 }
  0x8d   : > { %11464 = vmatmul.mubr.msk.f32.gmra.mrb[34].mxu0 %vm716_vm3, %v671_v4  ;;  %v1436_v4 = vrot.slane %v14561_v12, 2 }
  0x8e   : > { %11547 = vmatmul.mubr.msk.f32.gmra.mrb[34].mxu1 %vm716_vm3, %v14561_v12  ;;  %11466 = vmatprep.mubr.msk.f32.mxu0 %vm14347_vm0, %v20600_v0  ;;  %v1438_v12 = vrot.slane %v14585_v22, 2 }
  0x8f   : > { %11549 = vmatprep.mubr.msk.f32.mxu1 %vm14347_vm0, %v20600_v0  ;;  %v14969_v3 = vsel %vm1430_vm4, %v1434_v61, %v1436_v4  ;;  %v1478_v61 = vrot.slane %v14880_v36, 2 }
  0x90   : > { %v14981_v39 = vsel %vm1430_vm4, %v1436_v4, %v1438_v12  ;;  %v1484_v4 = vrot.slane %v14547_v6, 2 }
  0x91   : > { %11467 = vmatmul.mubr.msk.f32.gmra.mrb[36].mxu0 %vm716_vm3, %v673_v13  ;;  %v1444_v13 = vrot.slane %v14645_v44, 2 }
  0x92   : > { %11550 = vmatmul.mubr.msk.f32.gmra.mrb[36].mxu1 %vm716_vm3, %v14585_v22  ;;  %11469 = vmatprep.mubr.msk.f32.mxu0 %vm14347_vm0, %v20600_v0 }
  0x93   : > { %11552 = vmatprep.mubr.msk.f32.mxu1 %vm14347_vm0, %v20600_v0 }
  0x95   : > { %11470 = vmatmul.mubr.msk.f32.gmra.mrb[38].mxu0 %vm716_vm3, %v675_v19  ;;  %v1448_v19 = vrot.slane %v14682_v57, 2 }
  0x96   : > { %11553 = vmatmul.mubr.msk.f32.gmra.mrb[38].mxu1 %vm716_vm3, %v14601_v28  ;;  %11472 = vmatprep.mubr.msk.f32.mxu0 %vm14347_vm0, %v20600_v0 }
  0x97   : > { %11555 = vmatprep.mubr.msk.f32.mxu1 %vm14347_vm0, %v20600_v0 }
  0x99   : > { %11473 = vmatmul.mubr.msk.f32.gmra.mrb[40].mxu0 %vm716_vm3, %v677_v26  ;;  %v1452_v26 = vrot.slane %v14714_v14, 2 }
  0x9a   : > { %11556 = vmatmul.mubr.msk.f32.gmra.mrb[40].mxu1 %vm716_vm3, %v14622_v35  ;;  %11475 = vmatprep.mubr.msk.f32.mxu0 %vm14347_vm0, %v20600_v0  ;;  %v15017_v35 = vsel %vm1430_vm4, %v1442_v5, %v1444_v13 }
  0x9b   : > { %11558 = vmatprep.mubr.msk.f32.mxu1 %vm14347_vm0, %v20600_v0 }
  0x9d   : > { %11476 = vmatmul.mubr.msk.f32.gmra.mrb[42].mxu0 %vm716_vm3, %v679_v33  ;;  %v1456_v33 = vrot.slane %v14746_v31, 2 }
  0x9e   : > { %11559 = vmatmul.mubr.msk.f32.gmra.mrb[42].mxu1 %vm716_vm3, %v14645_v44  ;;  %11478 = vmatprep.mubr.msk.f32.mxu0 %vm14347_vm0, %v20600_v0  ;;  %v15029_v44 = vsel %vm1430_vm4, %v1444_v13, %v1446_v17 }
  0x9f   : > { %11561 = vmatprep.mubr.msk.f32.mxu1 %vm14347_vm0, %v20600_v0 }
  0xa1   : > { %11479 = vmatmul.mubr.msk.f32.gmra.mrb[44].mxu0 %vm716_vm3, %v681_v41  ;;  %v1462_v41 = vrot.slane %v14785_v50, 2 }
  0xa2   : > { %11562 = vmatmul.mubr.msk.f32.gmra.mrb[44].mxu1 %vm716_vm3, %v14666_v51  ;;  %11481 = vmatprep.mubr.msk.f32.mxu0 %vm14347_vm0, %v20600_v0  ;;  %v15041_v51 = vsel %vm1430_vm4, %v1446_v17, %v1448_v19 }
  0xa3   : > { %11564 = vmatprep.mubr.msk.f32.mxu1 %vm14347_vm0, %v20600_v0 }
  0xa5   : > { %11482 = vmatmul.mubr.msk.f32.gmra.mrb[46].mxu0 %vm716_vm3, %v683_v48  ;;  %v1466_v48 = vrot.slane %v14808_v60, 2 }
  0xa6   : > { %11565 = vmatmul.mubr.msk.f32.gmra.mrb[46].mxu1 %vm716_vm3, %v14682_v57  ;;  %11484 = vmatprep.mubr.msk.f32.mxu0 %vm14347_vm0, %v20600_v0  ;;  %v15053_v57 = vsel %vm1430_vm4, %v1448_v19, %v1450_v20 }
  0xa7   : > { %11567 = vmatprep.mubr.msk.f32.mxu1 %vm14347_vm0, %v20600_v0 }
  0xa9   : > { %11485 = vmatmul.mubr.msk.f32.gmra.mrb[48].mxu0 %vm716_vm3, %v685_v54  ;;  %v1470_v54 = vrot.slane %v14832_v9, 2 }
  0xaa   : > { %11568 = vmatmul.mubr.msk.f32.gmra.mrb[48].mxu1 %vm716_vm3, %v14698_v63  ;;  %11487 = vmatprep.mubr.msk.f32.mxu0 %vm14347_vm0, %v20600_v0  ;;  %v15065_v63 = vsel %vm1430_vm4, %v1450_v20, %v1452_v26 }
  0xab   : > { %11570 = vmatprep.mubr.msk.f32.mxu1 %vm14347_vm0, %v20600_v0 }
  0xad   : > { %11488 = vmatmul.mubr.msk.f32.gmra.mrb[50].mxu0 %vm716_vm3, %v687_v59  ;;  %v1474_v59 = vrot.slane %v14856_v25, 2 }
  0xae   : > { %11571 = vmatmul.mubr.msk.f32.gmra.mrb[50].mxu1 %vm716_vm3, %v14714_v14  ;;  %11490 = vmatprep.mubr.msk.f32.mxu0 %vm14347_vm0, %v20600_v0  ;;  %v15077_v14 = vsel %vm1430_vm4, %v1452_v26, %v1454_v27 }
  0xaf   : > { %11573 = vmatprep.mubr.msk.f32.mxu1 %vm14347_vm0, %v20600_v0 }
  0xb1   : > { %11491 = vmatmul.mubr.msk.f32.gmra.mrb[52].mxu0 %vm716_vm3, %v689_v2  ;;  %v1476_v2 = vrot.slane %v14868_v29, 2 }
  0xb2   : > { %11574 = vmatmul.mubr.msk.f32.gmra.mrb[52].mxu1 %vm716_vm3, %v14730_v21  ;;  %11662 = vmatprep.mubr.msk.f32.mxu0 %vm14347_vm0, %v20600_v0  ;;  %v15089_v21 = vsel %vm1430_vm4, %v1454_v27, %v1456_v33  ;;  %v1490_v27 = vrot.slane %v14569_v16, 2 }
  0xb3   : > { %11576 = vmatprep.mubr.msk.f32.mxu1 %vm14347_vm0, %v20600_v0 }
  0xb5   : > { %11663 = vmatmul.mubr.msk.f32.vlgmr.msra.gmra.mrb[54].mxu0 %vm716_vm3, %v14654_v46  ;;  %v1440_v46 = vrot.slane %v14601_v28, 2 }
  0xb6   : > { %11577 = vmatmul.mubr.msk.f32.gmra.mrb[54].mxu1 %vm716_vm3, %v14746_v31  ;;  %11665 = vmatprep.mubr.msk.f32.mxu0 %vm14347_vm0, %v20600_v0  ;;  %v15101_v31 = vsel %vm1430_vm4, %v1456_v33, %v1458_v34 }
  0xb7   : > { %11579 = vmatprep.mubr.msk.f32.mxu1 %vm14347_vm0, %v20600_v0  ;;  %11911 = vmatpush3.msk.msra.mxu0 %vm799_vm1, %v9930_v8  ;;  %v14993_v22 = vsel %vm1430_vm4, %v1438_v12, %v1440_v46  ;;  %v15005_v28 = vsel %vm1430_vm4, %v1440_v46, %v1442_v5  ;;  %v1480_v8 = vrot.slane %v14896_v43, 2  ;;  %v1486_v12 = vrot.slane %v14550_v7, 2 }
  0xb8   : > { %12160 = vmatprep.subr.mxu0 %v20600_v0 }
  0xb9   : > { %11666 = vmatmul.mubr.msk.f32.gmra.mrb[56].mxu0 %vm716_vm3, %v1435_v10  ;;  %v1482_v10 = vrot.slane %v14909_v53, 2  ;;  %v15273_v13 = vsel %vm1430_vm4, %v1484_v4, %v1486_v12 }
  0xba   : > { %11580 = vmatmul.mubr.msk.f32.gmra.mrb[56].mxu1 %vm716_vm3, %v14762_v40  ;;  %11668 = vmatprep.mubr.msk.f32.mxu0 %vm14347_vm0, %v20600_v0  ;;  %v15113_v40 = vsel %vm1430_vm4, %v1458_v34, %v1460_v38 }
  0xbb   : > { %11582 = vmatprep.mubr.msk.f32.mxu1 %vm14347_vm0, %v20600_v0 }
  0xbd   : > { %11669 = vmatmul.mubr.msk.f32.gmra.mrb[58].mxu0 %vm716_vm3, %v14969_v3 }
  0xbe   : > { %11583 = vmatmul.mubr.msk.f32.gmra.mrb[58].mxu1 %vm716_vm3, %v14774_v47  ;;  %11671 = vmatprep.mubr.msk.f32.mxu0 %vm14347_vm0, %v20600_v0  ;;  %v15125_v47 = vsel %vm1430_vm4, %v1460_v38, %v1462_v41 }
  0xbf   : > { %11585 = vmatprep.mubr.msk.f32.mxu1 %vm14347_vm0, %v20600_v0 }
  0xc1   : > { %11672 = vmatmul.mubr.msk.f32.gmra.mrb[60].mxu0 %vm716_vm3, %v14981_v39 }
  0xc2   : > { %11586 = vmatmul.mubr.msk.f32.gmra.mrb[60].mxu1 %vm716_vm3, %v14785_v50  ;;  %11674 = vmatprep.mubr.msk.f32.mxu0 %vm14347_vm0, %v20600_v0  ;;  %v15137_v50 = vsel %vm1430_vm4, %v1462_v41, %v1464_v42 }
  0xc3   : > { %11588 = vmatprep.mubr.msk.f32.mxu1 %vm14347_vm0, %v20600_v0 }
  0xc5   : > { %11675 = vmatmul.mubr.msk.f32.gmra.mrb[62].mxu0 %vm716_vm3, %v14993_v22 }
  0xc6   : > { %11589 = vmatmul.mubr.msk.f32.gmra.mrb[62].mxu1 %vm716_vm3, %v14796_v55  ;;  %11677 = vmatprep.mubr.msk.f32.mxu0 %vm14347_vm0, %v20600_v0  ;;  %v15149_v55 = vsel %vm1430_vm4, %v1464_v42, %v1466_v48  ;;  %v1492_v42 = vrot.slane %v14588_v23, 2 }
  0xc7   : > { %11591 = vmatprep.mubr.msk.f32.mxu1 %vm14347_vm0, %v20600_v0 }
  0xc9   : > { %11678 = vmatmul.mubr.msk.f32.gmra.mrb[64].mxu0 %vm716_vm3, %v15005_v28 }
  0xca   : > { %11592 = vmatmul.mubr.msk.f32.gmra.mrb[64].mxu1 %vm716_vm3, %v14808_v60  ;;  %11680 = vmatprep.mubr.msk.f32.mxu0 %vm14347_vm0, %v20600_v0  ;;  %v15161_v60 = vsel %vm1430_vm4, %v1466_v48, %v1468_v49 }
  0xcb   : > { %11594 = vmatprep.mubr.msk.f32.mxu1 %vm14347_vm0, %v20600_v0 }
  0xcd   : > { %11681 = vmatmul.mubr.msk.f32.gmra.mrb[66].mxu0 %vm716_vm3, %v15017_v35 }
  0xce   : > { %11595 = vmatmul.mubr.msk.f32.gmra.mrb[66].mxu1 %vm716_vm3, %v14820_v62  ;;  %11683 = vmatprep.mubr.msk.f32.mxu0 %vm14347_vm0, %v20600_v0  ;;  %v15173_v62 = vsel %vm1430_vm4, %v1468_v49, %v1470_v54 }
  0xcf   : > { %11597 = vmatprep.mubr.msk.f32.mxu1 %vm14347_vm0, %v20600_v0 }
  0xd1   : > { %11684 = vmatmul.mubr.msk.f32.gmra.mrb[68].mxu0 %vm716_vm3, %v15029_v44 }
  0xd2   : > { %11598 = vmatmul.mubr.msk.f32.gmra.mrb[68].mxu1 %vm716_vm3, %v14832_v9  ;;  %11686 = vmatprep.mubr.msk.f32.mxu0 %vm14347_vm0, %v20600_v0  ;;  %v15185_v9 = vsel %vm1430_vm4, %v1470_v54, %v1472_v56 }
  0xd3   : > { %11600 = vmatprep.mubr.msk.f32.mxu1 %vm14347_vm0, %v20600_v0 }
  0xd5   : > { %11687 = vmatmul.mubr.msk.f32.gmra.mrb[70].mxu0 %vm716_vm3, %v15041_v51 }
  0xd6   : > { %11601 = vmatmul.mubr.msk.f32.gmra.mrb[70].mxu1 %vm716_vm3, %v14844_v18  ;;  %11689 = vmatprep.mubr.msk.f32.mxu0 %vm14347_vm0, %v20600_v0  ;;  %v15197_v18 = vsel %vm1430_vm4, %v1472_v56, %v1474_v59 }
  0xd7   : > { %11603 = vmatprep.mubr.msk.f32.mxu1 %vm14347_vm0, %v20600_v0 }
  0xd9   : > { %11690 = vmatmul.mubr.msk.f32.gmra.mrb[72].mxu0 %vm716_vm3, %v15053_v57 }
  0xda   : > { %11604 = vmatmul.mubr.msk.f32.gmra.mrb[72].mxu1 %vm716_vm3, %v14856_v25  ;;  %11692 = vmatprep.mubr.msk.f32.mxu0 %vm14347_vm0, %v20600_v0  ;;  %v15209_v25 = vsel %vm1430_vm4, %v1474_v59, %v1476_v2 }
  0xdb   : > { %11606 = vmatprep.mubr.msk.f32.mxu1 %vm14347_vm0, %v20600_v0 }
  0xdd   : > { %11693 = vmatmul.mubr.msk.f32.gmra.mrb[74].mxu0 %vm716_vm3, %v15065_v63 }
  0xde   : > { %11607 = vmatmul.mubr.msk.f32.gmra.mrb[74].mxu1 %vm716_vm3, %v14868_v29  ;;  %11695 = vmatprep.mubr.msk.f32.mxu0 %vm14347_vm0, %v20600_v0  ;;  %v15221_v29 = vsel %vm1430_vm4, %v1476_v2, %v1478_v61 }
  0xdf   : > { %11609 = vmatprep.mubr.msk.f32.mxu1 %vm14347_vm0, %v20600_v0 }
  0xe1   : > { %11696 = vmatmul.mubr.msk.f32.gmra.mrb[76].mxu0 %vm716_vm3, %v15077_v14 }
  0xe2   : > { %11610 = vmatmul.mubr.msk.f32.gmra.mrb[76].mxu1 %vm716_vm3, %v14880_v36  ;;  %11698 = vmatprep.mubr.msk.f32.mxu0 %vm14347_vm0, %v20600_v0  ;;  %v15233_v36 = vsel %vm1430_vm4, %v1478_v61, %v1480_v8 }
  0xe3   : > { %11612 = vmatprep.mubr.msk.f32.mxu1 %vm14347_vm0, %v20600_v0 }
  0xe5   : > { %11699 = vmatmul.mubr.msk.f32.gmra.mrb[78].mxu0 %vm716_vm3, %v15089_v21 }
  0xe6   : > { %11613 = vmatmul.mubr.msk.f32.gmra.mrb[78].mxu1 %vm716_vm3, %v14896_v43  ;;  %11701 = vmatprep.mubr.msk.f32.mxu0 %vm14347_vm0, %v20600_v0  ;;  %v15245_v43 = vsel %vm1430_vm4, %v1480_v8, %v1482_v10 }
  0xe7   : > { %11615 = vmatprep.mubr.msk.f32.mxu1 %vm14347_vm0, %v20600_v0 }
  0xe9   : > { %11702 = vmatmul.mubr.msk.f32.gmra.mrb[80].mxu0 %vm716_vm3, %v15101_v31 }
  0xea   : > { %11616 = vmatmul.mubr.msk.f32.gmra.mrb[80].mxu1 %vm716_vm3, %v14909_v53  ;;  %11704 = vmatprep.mubr.msk.f32.mxu0 %vm14347_vm0, %v20600_v0  ;;  %v15257_v53 = vsel %vm1430_vm4, %v1482_v10, %v1484_v4 }
  0xeb   : > { %11618 = vmatprep.mubr.msk.f32.mxu1 %vm14347_vm0, %v20600_v0 }
  0xed   : > { %11705 = vmatmul.mubr.msk.f32.gmra.mrb[82].mxu0 %vm716_vm3, %v15113_v40 }
  0xee   : > { %11619 = vmatmul.mubr.msk.f32.gmra.mrb[82].mxu1 %vm716_vm3, %v14547_v6  ;;  %11707 = vmatprep.mubr.msk.f32.mxu0 %vm14347_vm0, %v20600_v0 }
  0xef   : > { %11621 = vmatprep.mubr.msk.f32.mxu1 %vm14347_vm0, %v20600_v0 }
  0xf1   : > { %11708 = vmatmul.mubr.msk.f32.gmra.mrb[84].mxu0 %vm716_vm3, %v15125_v47 }
  0xf2   : > { %11622 = vmatmul.mubr.msk.f32.gmra.mrb[84].mxu1 %vm716_vm3, %v14550_v7  ;;  %11710 = vmatprep.mubr.msk.f32.mxu0 %vm14347_vm0, %v20600_v0  ;;  %v1488_v7 = vrot.slane %v14558_v11, 2 }
  0xf3   : > { %11624 = vmatprep.mubr.msk.f32.mxu1 %vm14347_vm0, %v20600_v0 }
  0xf5   : > { %11711 = vmatmul.mubr.msk.f32.gmra.mrb[86].mxu0 %vm716_vm3, %v15137_v50 }
  0xf6   : > { %11625 = vmatmul.mubr.msk.f32.gmra.mrb[86].mxu1 %vm716_vm3, %v14558_v11  ;;  %11713 = vmatprep.mubr.msk.f32.mxu0 %vm14347_vm0, %v20600_v0  ;;  %v15289_v11 = vsel %vm1430_vm4, %v1486_v12, %v1488_v7 }
  0xf7   : > { %11627 = vmatprep.mubr.msk.f32.mxu1 %vm14347_vm0, %v20600_v0 }
  0xf9   : > { %11714 = vmatmul.mubr.msk.f32.gmra.mrb[88].mxu0 %vm716_vm3, %v15149_v55 }
  0xfa   : > { %11628 = vmatmul.mubr.msk.f32.gmra.mrb[88].mxu1 %vm716_vm3, %v14569_v16  ;;  %11716 = vmatprep.mubr.msk.f32.mxu0 %vm14347_vm0, %v20600_v0  ;;  %v15305_v16 = vsel %vm1430_vm4, %v1488_v7, %v1490_v27 }
  0xfb   : > { %11630 = vmatprep.mubr.msk.f32.mxu1 %vm14347_vm0, %v20600_v0 }
  0xfd   : > { %11717 = vmatmul.mubr.msk.f32.gmra.mrb[90].mxu0 %vm716_vm3, %v15161_v60 }
  0xfe   : > { %11631 = vmatmul.mubr.msk.f32.gmra.mrb[90].mxu1 %vm716_vm3, %v14588_v23  ;;  %11719 = vmatprep.mubr.msk.f32.mxu0 %vm14347_vm0, %v20600_v0  ;;  %v15321_v23 = vsel %vm1430_vm4, %v1490_v27, %v1492_v42 }
  0xff   : > { %11633 = vmatprep.mubr.msk.f32.mxu1 %vm14347_vm0, %v20600_v0 }
 0x101   : > { %11720 = vmatmul.mubr.msk.f32.gmra.mrb[92].mxu0 %vm716_vm3, %v15173_v62 }
 0x102   : > { %11634 = vmatmul.mubr.msk.f32.gmra.mrb[92].mxu1 %vm716_vm3, %v14607_v30  ;;  %11722 = vmatprep.mubr.msk.f32.mxu0 %vm14347_vm0, %v20600_v0 }
 0x103   : > { %11636 = vmatprep.mubr.msk.f32.mxu1 %vm14347_vm0, %v20600_v0 }
 0x105   : > { %11723 = vmatmul.mubr.msk.f32.gmra.mrb[94].mxu0 %vm716_vm3, %v15185_v9 }
 0x106   : > { %11637 = vmatmul.mubr.msk.f32.gmra.mrb[94].mxu1 %vm716_vm3, %v14628_v37  ;;  %11725 = vmatprep.mubr.msk.f32.mxu0 %vm14347_vm0, %v20600_v0 }
 0x107   : > { %11639 = vmatprep.mubr.msk.f32.mxu1 %vm14347_vm0, %v20600_v0 }
 0x109   : > { %11726 = vmatmul.mubr.msk.f32.gmra.mrb[96].mxu0 %vm716_vm3, %v15197_v18 }
 0x10a   : > { %11640 = vmatmul.mubr.msk.f32.gmra.mrb[96].mxu1 %vm716_vm3, %v14648_v45  ;;  %11728 = vmatprep.mubr.msk.f32.mxu0 %vm14347_vm0, %v20600_v0 }
 0x10b   : > { %11642 = vmatprep.mubr.msk.f32.mxu1 %vm14347_vm0, %v20600_v0 }
 0x10d   : > { %11729 = vmatmul.mubr.msk.f32.gmra.mrb[98].mxu0 %vm716_vm3, %v15209_v25 }
 0x10e   : > { %11643 = vmatmul.mubr.msk.f32.gmra.mrb[98].mxu1 %vm716_vm3, %v14669_v52  ;;  %11731 = vmatprep.mubr.msk.f32.mxu0 %vm14347_vm0, %v20600_v0 }
 0x10f   : > { %11645 = vmatprep.mubr.msk.f32.mxu1 %vm14347_vm0, %v20600_v0 }
 0x111   : > { %11732 = vmatmul.mubr.msk.f32.gmra.mrb[100].mxu0 %vm716_vm3, %v15221_v29 }
 0x112   : > { %11646 = vmatmul.mubr.msk.f32.gmra.mrb[100].mxu1 %vm716_vm3, %v14685_v58  ;;  %11734 = vmatprep.mubr.msk.f32.mxu0 %vm14347_vm0, %v20600_v0 }
 0x113   : > { %11648 = vmatprep.mubr.msk.f32.mxu1 %vm14347_vm0, %v20600_v0 }
 0x115   : > { %11735 = vmatmul.mubr.msk.f32.gmra.mrb[102].mxu0 %vm716_vm3, %v15233_v36 }
 0x116   : > { %11649 = vmatmul.mubr.msk.f32.gmra.mrb[102].mxu1 %vm716_vm3, %v14701_v1  ;;  %11737 = vmatprep.mubr.msk.f32.mxu0 %vm14347_vm0, %v20600_v0 }
 0x117   : > { %11651 = vmatprep.mubr.msk.f32.mxu1 %vm14347_vm0, %v20600_v0 }
 0x119   : > { %11738 = vmatmul.mubr.msk.f32.gmra.mrb[104].mxu0 %vm716_vm3, %v15245_v43 }
 0x11a   : > { %11652 = vmatmul.mubr.msk.f32.gmra.mrb[104].mxu1 %vm716_vm3, %v14717_v15  ;;  %11740 = vmatprep.mubr.msk.f32.mxu0 %vm14347_vm0, %v20600_v0 }
 0x11b   : > { %11654 = vmatprep.mubr.msk.f32.mxu1 %vm14347_vm0, %v20600_v0 }
 0x11c   : > { %v15262_v6 = vpop.f32.mrb[0].mxu0 }
 0x11d   : > { %v11414_v46 = vpop.f32.mrb[1].mxu0  ;;  %11741 = vmatmul.mubr.msk.f32.gmra.mrb[106].mxu0 %vm716_vm3, %v15257_v53  ;;  %v15266_v5 = vpop.f32.mrb[0].mxu1 }
 0x11e   : > { %11655 = vmatmul.mubr.msk.f32.gmra.mrb[106].mxu1 %vm716_vm3, %v14733_v24  ;;  %11743 = vmatprep.mubr.msk.f32.mxu0 %vm14347_vm0, %v20600_v0  ;;  %v11495_v17 = vpop.f32.mrb[1].mxu1 }
 0x11f   : > { %11657 = vmatprep.mubr.msk.f32.mxu1 %vm14347_vm0, %v20600_v0 }
 0x120   : > { %v15278_v19 = vpop.f32.mrb[2].mxu0 }
 0x121   : > { %v11417_v20 = vpop.f32.mrb[3].mxu0  ;;  %11744 = vmatmul.mubr.msk.f32.gmra.mrb[108].mxu0 %vm716_vm3, %v15273_v13  ;;  %v15282_v26 = vpop.f32.mrb[2].mxu1 }
 0x122   : > { %11658 = vmatmul.mubr.msk.f32.gmra.mrb[108].mxu1 %vm716_vm3, %v14749_v32  ;;  %11746 = vmatprep.mubr.msk.f32.mxu0 %vm14347_vm0, %v20600_v0  ;;  %v11498_v33 = vpop.f32.mrb[3].mxu1 }
 0x123   : > { %11787 = vmatprep.mubr.msk.f32.mxu1 %vm14347_vm0, %v20600_v0 }
 0x124   : > { %v15294_v34 = vpop.f32.mrb[4].mxu0 }
 0x125   : > { %v11420_v38 = vpop.f32.mrb[5].mxu0  ;;  %11747 = vmatmul.mubr.msk.f32.gmra.mrb[110].mxu0 %vm716_vm3, %v15289_v11  ;;  %v15298_v41 = vpop.f32.mrb[4].mxu1 }
 0x126   : > { %11788 = vmatmul.mubr.msk.f32.vlgmr.msra.gmra.mrb[110].mxu1 %vm716_vm3, %v14969_v3  ;;  %11749 = vmatprep.mubr.msk.f32.mxu0 %vm14347_vm0, %v20600_v0  ;;  %v11501_v48 = vpop.f32.mrb[5].mxu1  ;;  %v1494_v3 = vrot.slane %v14607_v30, 2 }
 0x127   : > { %11790 = vmatprep.mubr.msk.f32.mxu1 %vm14347_vm0, %v20600_v0 }
 0x128   : > { %v15310_v49 = vpop.f32.mrb[6].mxu0  ;;  %v15337_v30 = vsel %vm1430_vm4, %v1492_v42, %v1494_v3 }
 0x129   : > { %v11423_v54 = vpop.f32.mrb[7].mxu0  ;;  %11750 = vmatmul.mubr.msk.f32.gmra.mrb[112].mxu0 %vm716_vm3, %v15305_v16  ;;  %v15314_v56 = vpop.f32.mrb[6].mxu1 }
 0x12a   : > { %11791 = vmatmul.mubr.msk.f32.gmra.mrb[112].mxu1 %vm716_vm3, %v14981_v39  ;;  %11752 = vmatprep.mubr.msk.f32.mxu0 %vm14347_vm0, %v20600_v0  ;;  %v11504_v59 = vpop.f32.mrb[7].mxu1  ;;  %v1496_v39 = vrot.slane %v14628_v37, 2 }
 0x12b   : > { %11793 = vmatprep.mubr.msk.f32.mxu1 %vm14347_vm0, %v20600_v0 }
 0x12c   : > { %v15326_v2 = vpop.f32.mrb[8].mxu0  ;;  %v15353_v37 = vsel %vm1430_vm4, %v1494_v3, %v1496_v39 }
 0x12d   : > { %v11426_v61 = vpop.f32.mrb[9].mxu0  ;;  %11753 = vmatmul.mubr.msk.f32.gmra.mrb[114].mxu0 %vm716_vm3, %v15321_v23  ;;  %v15330_v8 = vpop.f32.mrb[8].mxu1 }
 0x12e   : > { %11794 = vmatmul.mubr.msk.f32.gmra.mrb[114].mxu1 %vm716_vm3, %v14993_v22  ;;  %11755 = vmatprep.mubr.msk.f32.mxu0 %vm14347_vm0, %v20600_v0  ;;  %v11507_v10 = vpop.f32.mrb[9].mxu1  ;;  %v1498_v22 = vrot.slane %v14648_v45, 2 }
 0x12f   : > { %11796 = vmatprep.mubr.msk.f32.mxu1 %vm14347_vm0, %v20600_v0 }
 0x130   : > { %v15342_v4 = vpop.f32.mrb[10].mxu0  ;;  %v15369_v45 = vsel %vm1430_vm4, %v1496_v39, %v1498_v22 }
 0x131   : > { %v11429_v12 = vpop.f32.mrb[11].mxu0  ;;  %11756 = vmatmul.mubr.msk.f32.gmra.mrb[116].mxu0 %vm716_vm3, %v15337_v30  ;;  %v15346_v46 = vpop.f32.mrb[10].mxu1 }
 0x132   : > { %20629 = vst [vmem:[#allocation16_spill] sm:$0xff] %v15346_v46  ;;  %11797 = vmatmul.mubr.msk.f32.gmra.mrb[116].mxu1 %vm716_vm3, %v15005_v28  ;;  %11758 = vmatprep.mubr.msk.f32.mxu0 %vm14347_vm0, %v20600_v0  ;;  %v11510_v7 = vpop.f32.mrb[11].mxu1  ;;  %v1500_v28 = vrot.slane %v14669_v52, 2 }
 0x133   : > { %11799 = vmatprep.mubr.msk.f32.mxu1 %vm14347_vm0, %v20600_v0 }
 0x134   : > { %v15358_v17 = vpop.f32.mrb[12].mxu0  ;;  %v15385_v52 = vsel %vm1430_vm4, %v1498_v22, %v1500_v28 }
 0x135   : > { %v11432_v20 = vpop.f32.mrb[13].mxu0  ;;  %11759 = vmatmul.mubr.msk.f32.gmra.mrb[118].mxu0 %vm716_vm3, %v15353_v37  ;;  %v15362_v27 = vpop.f32.mrb[12].mxu1 }
 0x136   : > { %20630 = vst [vmem:[#allocation17_spill] sm:$0xff] %v15362_v27  ;;  %11800 = vmatmul.mubr.msk.f32.gmra.mrb[118].mxu1 %vm716_vm3, %v15017_v35  ;;  %11761 = vmatprep.mubr.msk.f32.mxu0 %vm14347_vm0, %v20600_v0  ;;  %v11513_v33 = vpop.f32.mrb[13].mxu1  ;;  %v1502_v35 = vrot.slane %v14685_v58, 2  ;;  %v9973_v20 = vld [vmem:[%s20628_s1 + $0x14] sm:$0x7] }
 0x137   : > { %11802 = vmatprep.mubr.msk.f32.mxu1 %vm14347_vm0, %v20600_v0  ;;  %12036 = vmatpush3.msk.msra.mxu1 %vm799_vm1, %v9973_v20 }
 0x138   : > { %v15374_v38 = vpop.f32.mrb[14].mxu0  ;;  %v15401_v58 = vsel %vm1430_vm4, %v1500_v28, %v1502_v35  ;;  %12285 = vmatprep.subr.mxu1 %v20600_v0 }
 0x139   : > { %v11435_v42 = vpop.f32.mrb[15].mxu0  ;;  %11762 = vmatmul.mubr.msk.f32.gmra.mrb[120].mxu0 %vm716_vm3, %v15369_v45  ;;  %v15378_v48 = vpop.f32.mrb[14].mxu1 }
 0x13a   : > { %20631 = vst [vmem:[#allocation18_spill] sm:$0xff] %v15378_v48  ;;  %11803 = vmatmul.mubr.msk.f32.gmra.mrb[120].mxu1 %vm716_vm3, %v15029_v44  ;;  %11764 = vmatprep.mubr.msk.f32.mxu0 %vm14347_vm0, %v20600_v0  ;;  %v11516_v54 = vpop.f32.mrb[15].mxu1  ;;  %v1504_v44 = vrot.slane %v14701_v1, 2 }
 0x13b   : > { %11805 = vmatprep.mubr.msk.f32.mxu1 %vm14347_vm0, %v20600_v0 }
 0x13c   : > { %v15390_v3 = vpop.f32.mrb[16].mxu0  ;;  %v15417_v1 = vsel %vm1430_vm4, %v1502_v35, %v1504_v44  ;;  %v1508_v35 = vrot.slane %v14733_v24, 2 }
 0x13d   : > { %v11438_v59 = vpop.f32.mrb[17].mxu0  ;;  %11765 = vmatmul.mubr.msk.f32.gmra.mrb[122].mxu0 %vm716_vm3, %v15385_v52  ;;  %v15394_v61 = vpop.f32.mrb[16].mxu1 }
 0x13e   : > { %20632 = vst [vmem:[#allocation19_spill] sm:$0xff] %v15394_v61  ;;  %11806 = vmatmul.mubr.msk.f32.gmra.mrb[122].mxu1 %vm716_vm3, %v15041_v51  ;;  %11767 = vmatprep.mubr.msk.f32.mxu0 %vm14347_vm0, %v20600_v0  ;;  %v11519_v39 = vpop.f32.mrb[17].mxu1  ;;  %v1506_v51 = vrot.slane %v14717_v15, 2  ;;  %v15530_v61 = vld [vmem:[%s14531_s26 + $0x28] sm:$0xff] }
 0x13f   : > { %11808 = vmatprep.mubr.msk.f32.mxu1 %vm14347_vm0, %v20600_v0  ;;  %v2244_v48 = vrot.slane %v15530_v61, 3 }
 0x140   : > { %v15406_v10 = vpop.f32.mrb[18].mxu0  ;;  %v15438_v15 = vsel %vm1430_vm4, %v1504_v44, %v1506_v51  ;;  %v15457_v44 = vrot.slane %v14749_v32, 2 }
 0x141   : > { %v11441_v12 = vpop.f32.mrb[19].mxu0  ;;  %11768 = vmatmul.mubr.msk.f32.gmra.mrb[124].mxu0 %vm716_vm3, %v15401_v58  ;;  %v15410_v22 = vpop.f32.mrb[18].mxu1 }
 0x142   : > { %20633 = vst [vmem:[#allocation20_spill] sm:$0xff] %v15410_v22  ;;  %11809 = vmatmul.mubr.msk.f32.gmra.mrb[124].mxu1 %vm716_vm3, %v15053_v57  ;;  %11770 = vmatprep.mubr.msk.f32.mxu0 %vm14347_vm0, %v20600_v0  ;;  %v11522_v7 = vpop.f32.mrb[19].mxu1 }
 0x143   : > { %11811 = vmatprep.mubr.msk.f32.mxu1 %vm14347_vm0, %v20600_v0 }
 0x144   : > { %v15426_v28 = vpop.f32.mrb[20].mxu0 }
 0x145   : > { %v11444_v57 = vpop.f32.mrb[21].mxu0  ;;  %11771 = vmatmul.mubr.msk.f32.gmra.mrb[126].mxu0 %vm716_vm3, %v15417_v1  ;;  %v15431_v33 = vpop.f32.mrb[20].mxu1 }
 0x146   : > { %20634 = vst [vmem:[#allocation21_spill] sm:$0xff] %v15431_v33  ;;  %11812 = vmatmul.mubr.msk.f32.gmra.mrb[126].mxu1 %vm716_vm3, %v15065_v63  ;;  %11773 = vmatprep.mubr.msk.f32.mxu0 %vm14347_vm0, %v20600_v0  ;;  %v11525_v42 = vpop.f32.mrb[21].mxu1  ;;  %v15454_v63 = vsel %vm1430_vm4, %v1506_v51, %v1508_v35  ;;  %v15473_v51 = vsel %vm1430_vm4, %v1508_v35, %v15457_v44  ;;  %v15488_v35 = vld [vmem:[%s14531_s26 + $0x10] sm:$0xff] }
 0x147   : > { %11814 = vmatprep.mubr.msk.f32.mxu1 %vm14347_vm0, %v20600_v0 }
 0x148   : > { %v15443_v54 = vpop.f32.mrb[22].mxu0 }
 0x149   : > { %v11447_v59 = vpop.f32.mrb[23].mxu0  ;;  %11774 = vmatmul.mubr.msk.f32.gmra.mrb[128].mxu0 %vm716_vm3, %v15438_v15  ;;  %v15447_v39 = vpop.f32.mrb[22].mxu1 }
 0x14a   : > { %20635 = vst [vmem:[#allocation22_spill] sm:$0xff] %v15447_v39  ;;  %11815 = vmatmul.mubr.msk.f32.gmra.mrb[128].mxu1 %vm716_vm3, %v15077_v14  ;;  %11776 = vmatprep.mubr.msk.f32.mxu0 %vm14347_vm0, %v20600_v0  ;;  %v11528_v24 = vpop.f32.mrb[23].mxu1  ;;  %v2239_v59 = vrot.slane %v15488_v35, 3  ;;  %v15510_v39 = vld [vmem:[%s14531_s26 + $0x20] sm:$0xff] }
 0x14b   : > { %11817 = vmatprep.mubr.msk.f32.mxu1 %vm14347_vm0, %v20600_v0  ;;  %v15492_v24 = vld [vmem:[%s14531_s26 + $0x18] sm:$0xff] }
 0x14c   : > { %v15461_v12 = vpop.f32.mrb[24].mxu0 }
 0x14d   : > { %v11450_v7 = vpop.f32.mrb[25].mxu0  ;;  %11777 = vmatmul.mubr.msk.f32.gmra.mrb[130].mxu0 %vm716_vm3, %v15454_v63  ;;  %v15465_v14 = vpop.f32.mrb[24].mxu1 }
 0x14e   : > { %20636 = vst [vmem:[#allocation23_spill] sm:$0xff] %v15465_v14  ;;  %11818 = vmatmul.mubr.msk.f32.gmra.mrb[130].mxu1 %vm716_vm3, %v15089_v21  ;;  %11779 = vmatprep.mubr.msk.f32.mxu0 %vm14347_vm0, %v20600_v0  ;;  %v11531_v32 = vpop.f32.mrb[25].mxu1  ;;  %v2240_v7 = vrot.slane %v15492_v24, 3 }
 0x14f   : > { %11820 = vmatprep.mubr.msk.f32.mxu1 %vm14347_vm0, %v20600_v0 }
 0x150   : > { %v15477_v20 = vpop.f32.mrb[26].mxu0  ;;  %v2241_v14 = vsel %vm2238_vm5, %v2239_v59, %v2240_v7 }
 0x151   : > { %v11453_v57 = vpop.f32.mrb[27].mxu0  ;;  %11780 = vmatmul.mubr.msk.f32.gmra.mrb[132].mxu0 %vm716_vm3, %v15473_v51  ;;  %v15481_v42 = vpop.f32.mrb[26].mxu1 }
 0x152   : > { %20637 = vst [vmem:[#allocation24_spill] sm:$0xff] %v15481_v42  ;;  %11821 = vmatmul.mubr.msk.f32.gmra.mrb[132].mxu1 %vm716_vm3, %v15101_v31  ;;  %v11534_v21 = vpop.f32.mrb[27].mxu1  ;;  %11782 = vmatprep.mubr.msk.f32.mxu0 %vm14347_vm0, %v20600_v0 }
 0x153   : > { %11823 = vmatprep.mubr.msk.f32.mxu1 %vm14347_vm0, %v20600_v0 }
 0x154   : > { %v15497_v32 = vpop.f32.mrb[28].mxu0 }
 0x155   : > { %v1224_v31 = vpop.f32.mrb[28].mxu1  ;;  %v11456_v57 = vpop.f32.mrb[29].mxu0  ;;  %11783 = vmatmul.mubr.msk.f32.gmra.mrb[134].mxu0 %vm716_vm3, %v15457_v44 }
 0x156   : > { %v15502_v21 = vadd.f32 %v1224_v31, %v15262_v6  ;;  %11824 = vmatmul.mubr.msk.f32.gmra.mrb[134].mxu1 %vm716_vm3, %v15113_v40  ;;  %v11539_v42 = vpop.f32.mrb[29].mxu1  ;;  %11912 = vmatprep.mubr.msk.f32.mxu0 %vm14347_vm0, %v20600_v0  ;;  %v2242_v57 = vrot.slane %v15510_v39, 3  ;;  %v10016_v40 = vld [vmem:[%s20628_s1 + $0x18] sm:$0x7] }
 0x157   : > { %11826 = vmatprep.mubr.msk.f32.mxu1 %vm14347_vm0, %v20600_v0 }
 0x158   : > { %v15515_v33 = vpop.f32.mrb[30].mxu0  ;;  %v2243_v22 = vsel %vm2238_vm5, %v2240_v7, %v2242_v57 }
 0x159   : > { %v1229_v6 = vpop.f32.mrb[30].mxu1  ;;  %v11459_v42 = vpop.f32.mrb[31].mxu0  ;;  %11913 = vmatmul.mubr.msk.f32.vlgmr.msra.gmra.mrb[136].mxu0 %vm716_vm3, %v2241_v14 }
 0x15a   : > { %v15522_v31 = vadd.f32 %v1229_v6, %v15278_v19  ;;  %11827 = vmatmul.mubr.msk.f32.gmra.mrb[136].mxu1 %vm716_vm3, %v15125_v47  ;;  %v11542_v59 = vpop.f32.mrb[31].mxu1  ;;  %11915 = vmatprep.mubr.msk.f32.mxu0 %vm14347_vm0, %v20600_v0  ;;  %v15549_v42 = vld [vmem:[%s14531_s26 + $0x30] sm:$0xff] }
 0x15b   : > { %11829 = vmatprep.mubr.msk.f32.mxu1 %vm14347_vm0, %v20600_v0  ;;  %12161 = vmatpush3.msk.msra.mxu0 %vm799_vm1, %v10016_v40  ;;  %v2245_v40 = vsel %vm2238_vm5, %v2242_v57, %v2244_v48  ;;  %v2246_v59 = vrot.slane %v15549_v42, 3 }
 0x15c   : > { %v15536_v19 = vpop.f32.mrb[32].mxu0  ;;  %12410 = vmatprep.subr.mxu0 %v20600_v0 }
 0x15d   : > { %v1234_v47 = vpop.f32.mrb[32].mxu1  ;;  %v11462_v14 = vpop.f32.mrb[33].mxu0  ;;  %11916 = vmatmul.mubr.msk.f32.gmra.mrb[138].mxu0 %vm716_vm3, %v2243_v22 }
 0x15e   : > { %v15541_v6 = vadd.f32 %v1234_v47, %v15294_v34  ;;  %11830 = vmatmul.mubr.msk.f32.gmra.mrb[138].mxu1 %vm716_vm3, %v15137_v50  ;;  %v11545_v7 = vpop.f32.mrb[33].mxu1  ;;  %11918 = vmatprep.mubr.msk.f32.mxu0 %vm14347_vm0, %v20600_v0  ;;  %v2247_v14 = vsel %vm2238_vm5, %v2244_v48, %v2246_v59 }
 0x15f   : > { %11832 = vmatprep.mubr.msk.f32.mxu1 %vm14347_vm0, %v20600_v0  ;;  %v15566_v7 = vld [vmem:[%s14531_s26 + $0x38] sm:$0xff] }
 0x160   : > { %v15554_v22 = vpop.f32.mrb[34].mxu0  ;;  %v2248_v27 = vrot.slane %v15566_v7, 3 }
 0x161   : > { %v1239_v34 = vpop.f32.mrb[34].mxu1  ;;  %v11465_v47 = vpop.f32.mrb[35].mxu0  ;;  %11919 = vmatmul.mubr.msk.f32.gmra.mrb[140].mxu0 %vm716_vm3, %v2245_v40 }
 0x162   : > { %v15558_v50 = vadd.f32 %v1239_v34, %v15310_v49  ;;  %11833 = vmatmul.mubr.msk.f32.gmra.mrb[140].mxu1 %vm716_vm3, %v15149_v55  ;;  %v11548_v57 = vpop.f32.mrb[35].mxu1  ;;  %11921 = vmatprep.mubr.msk.f32.mxu0 %vm14347_vm0, %v20600_v0  ;;  %v2249_v47 = vsel %vm2238_vm5, %v2246_v59, %v2248_v27 }
 0x163   : > { %11835 = vmatprep.mubr.msk.f32.mxu1 %vm14347_vm0, %v20600_v0  ;;  %v15583_v57 = vld [vmem:[%s14531_s26 + $0x40] sm:$0xff] }
 0x164   : > { %v15571_v40 = vpop.f32.mrb[36].mxu0  ;;  %20638 = vst [vmem:[#allocation25_spill] sm:$0xff] %v15583_v57  ;;  %v2250_v46 = vrot.slane %v15583_v57, 3 }
 0x165   : > { %v1244_v49 = vpop.f32.mrb[36].mxu1  ;;  %v11468_v34 = vpop.f32.mrb[37].mxu0  ;;  %11922 = vmatmul.mubr.msk.f32.gmra.mrb[142].mxu0 %vm716_vm3, %v2247_v14 }
 0x166   : > { %v15575_v55 = vadd.f32 %v1244_v49, %v15326_v2  ;;  %11836 = vmatmul.mubr.msk.f32.gmra.mrb[142].mxu1 %vm716_vm3, %v15161_v60  ;;  %v11551_v48 = vpop.f32.mrb[37].mxu1  ;;  %11924 = vmatprep.mubr.msk.f32.mxu0 %vm14347_vm0, %v20600_v0  ;;  %v2251_v34 = vsel %vm2238_vm5, %v2248_v27, %v2250_v46 }
 0x167   : > { %11838 = vmatprep.mubr.msk.f32.mxu1 %vm14347_vm0, %v20600_v0  ;;  %v15600_v48 = vld [vmem:[%s14531_s26 + $0x48] sm:$0xff] }
 0x168   : > { %v15588_v14 = vpop.f32.mrb[38].mxu0  ;;  %20639 = vst [vmem:[#allocation26_spill] sm:$0xff] %v15600_v48  ;;  %v2252_v57 = vrot.slane %v15600_v48, 3 }
 0x169   : > { %v1249_v2 = vpop.f32.mrb[38].mxu1  ;;  %v11471_v49 = vpop.f32.mrb[39].mxu0  ;;  %11925 = vmatmul.mubr.msk.f32.gmra.mrb[144].mxu0 %vm716_vm3, %v2249_v47 }
 0x16a   : > { %v15592_v60 = vadd.f32 %v1249_v2, %v15342_v4  ;;  %11839 = vmatmul.mubr.msk.f32.gmra.mrb[144].mxu1 %vm716_vm3, %v15173_v62  ;;  %v11554_v59 = vpop.f32.mrb[39].mxu1  ;;  %11927 = vmatprep.mubr.msk.f32.mxu0 %vm14347_vm0, %v20600_v0  ;;  %v2253_v49 = vsel %vm2238_vm5, %v2250_v46, %v2252_v57 }
 0x16b   : > { %11841 = vmatprep.mubr.msk.f32.mxu1 %vm14347_vm0, %v20600_v0  ;;  %v15617_v59 = vld [vmem:[%s14531_s26 + $0x50] sm:$0xff] }
 0x16c   : > { %v15605_v47 = vpop.f32.mrb[40].mxu0  ;;  %20640 = vst [vmem:[#allocation27_spill] sm:$0xff] %v15617_v59  ;;  %v2254_v48 = vrot.slane %v15617_v59, 3 }
 0x16d   : > { %v1254_v4 = vpop.f32.mrb[40].mxu1  ;;  %v11474_v2 = vpop.f32.mrb[41].mxu0  ;;  %11928 = vmatmul.mubr.msk.f32.gmra.mrb[146].mxu0 %vm716_vm3, %v2251_v34 }
 0x16e   : > { %v15609_v62 = vadd.f32 %v1254_v4, %v15358_v17  ;;  %11842 = vmatmul.mubr.msk.f32.gmra.mrb[146].mxu1 %vm716_vm3, %v15185_v9  ;;  %v11557_v27 = vpop.f32.mrb[41].mxu1  ;;  %11930 = vmatprep.mubr.msk.f32.mxu0 %vm14347_vm0, %v20600_v0  ;;  %v2255_v2 = vsel %vm2238_vm5, %v2252_v57, %v2254_v48 }
 0x16f   : > { %11844 = vmatprep.mubr.msk.f32.mxu1 %vm14347_vm0, %v20600_v0  ;;  %v15634_v27 = vld [vmem:[%s14531_s26 + $0x58] sm:$0xff] }
 0x170   : > { %v15622_v34 = vpop.f32.mrb[42].mxu0  ;;  %20641 = vst [vmem:[#allocation28_spill] sm:$0xff] %v15634_v27  ;;  %v2256_v59 = vrot.slane %v15634_v27, 3 }
 0x171   : > { %v1259_v17 = vpop.f32.mrb[42].mxu1  ;;  %v11477_v4 = vpop.f32.mrb[43].mxu0  ;;  %11931 = vmatmul.mubr.msk.f32.gmra.mrb[148].mxu0 %vm716_vm3, %v2253_v49 }
 0x172   : > { %v15626_v9 = vadd.f32 %v1259_v17, %v15374_v38  ;;  %11845 = vmatmul.mubr.msk.f32.gmra.mrb[148].mxu1 %vm716_vm3, %v15197_v18  ;;  %v11560_v46 = vpop.f32.mrb[43].mxu1  ;;  %11933 = vmatprep.mubr.msk.f32.mxu0 %vm14347_vm0, %v20600_v0  ;;  %v2257_v4 = vsel %vm2238_vm5, %v2254_v48, %v2256_v59 }
 0x173   : > { %11847 = vmatprep.mubr.msk.f32.mxu1 %vm14347_vm0, %v20600_v0  ;;  %v15651_v46 = vld [vmem:[%s14531_s26 + $0x60] sm:$0xff] }
 0x174   : > { %v15639_v49 = vpop.f32.mrb[44].mxu0  ;;  %20642 = vst [vmem:[#allocation29_spill] sm:$0xff] %v15651_v46  ;;  %v2258_v27 = vrot.slane %v15651_v46, 3 }
 0x175   : > { %v1264_v38 = vpop.f32.mrb[44].mxu1  ;;  %v11480_v17 = vpop.f32.mrb[45].mxu0  ;;  %11934 = vmatmul.mubr.msk.f32.gmra.mrb[150].mxu0 %vm716_vm3, %v2255_v2 }
 0x176   : > { %v15643_v18 = vadd.f32 %v1264_v38, %v15390_v3  ;;  %11848 = vmatmul.mubr.msk.f32.gmra.mrb[150].mxu1 %vm716_vm3, %v15209_v25  ;;  %v11563_v57 = vpop.f32.mrb[45].mxu1  ;;  %11936 = vmatprep.mubr.msk.f32.mxu0 %vm14347_vm0, %v20600_v0  ;;  %v2259_v17 = vsel %vm2238_vm5, %v2256_v59, %v2258_v27 }
 0x177   : > { %11850 = vmatprep.mubr.msk.f32.mxu1 %vm14347_vm0, %v20600_v0  ;;  %v15668_v57 = vld [vmem:[%s14531_s26 + $0x68] sm:$0xff] }
 0x178   : > { %v15656_v2 = vpop.f32.mrb[46].mxu0  ;;  %20643 = vst [vmem:[#allocation30_spill] sm:$0xff] %v15668_v57  ;;  %v2260_v46 = vrot.slane %v15668_v57, 3 }
 0x179   : > { %v1269_v3 = vpop.f32.mrb[46].mxu1  ;;  %v11483_v38 = vpop.f32.mrb[47].mxu0  ;;  %11937 = vmatmul.mubr.msk.f32.gmra.mrb[152].mxu0 %vm716_vm3, %v2257_v4 }
 0x17a   : > { %v15660_v25 = vadd.f32 %v1269_v3, %v15406_v10  ;;  %11851 = vmatmul.mubr.msk.f32.gmra.mrb[152].mxu1 %vm716_vm3, %v15221_v29  ;;  %v11566_v48 = vpop.f32.mrb[47].mxu1  ;;  %11939 = vmatprep.mubr.msk.f32.mxu0 %vm14347_vm0, %v20600_v0  ;;  %v2261_v38 = vsel %vm2238_vm5, %v2258_v27, %v2260_v46 }
 0x17b   : > { %11853 = vmatprep.mubr.msk.f32.mxu1 %vm14347_vm0, %v20600_v0  ;;  %v15685_v48 = vld [vmem:[%s14531_s26 + $0x70] sm:$0xff] }
 0x17c   : > { %v15673_v4 = vpop.f32.mrb[48].mxu0  ;;  %20644 = vst [vmem:[#allocation31_spill] sm:$0xff] %v15685_v48  ;;  %v2262_v57 = vrot.slane %v15685_v48, 3 }
 0x17d   : > { %v1274_v10 = vpop.f32.mrb[48].mxu1  ;;  %v11486_v3 = vpop.f32.mrb[49].mxu0  ;;  %11940 = vmatmul.mubr.msk.f32.gmra.mrb[154].mxu0 %vm716_vm3, %v2259_v17 }
 0x17e   : > { %v15677_v29 = vadd.f32 %v1274_v10, %v15426_v28  ;;  %11854 = vmatmul.mubr.msk.f32.gmra.mrb[154].mxu1 %vm716_vm3, %v15233_v36  ;;  %v11569_v59 = vpop.f32.mrb[49].mxu1  ;;  %11942 = vmatprep.mubr.msk.f32.mxu0 %vm14347_vm0, %v20600_v0  ;;  %v2263_v3 = vsel %vm2238_vm5, %v2260_v46, %v2262_v57 }
 0x17f   : > { %11856 = vmatprep.mubr.msk.f32.mxu1 %vm14347_vm0, %v20600_v0  ;;  %v15702_v59 = vld [vmem:[%s14531_s26 + $0x78] sm:$0xff] }
 0x180   : > { %v15690_v17 = vpop.f32.mrb[50].mxu0  ;;  %20645 = vst [vmem:[#allocation32_spill] sm:$0xff] %v15702_v59  ;;  %v2264_v48 = vrot.slane %v15702_v59, 3 }
 0x181   : > { %v1279_v28 = vpop.f32.mrb[50].mxu1  ;;  %v11489_v10 = vpop.f32.mrb[51].mxu0  ;;  %11943 = vmatmul.mubr.msk.f32.gmra.mrb[156].mxu0 %vm716_vm3, %v2261_v38 }
 0x182   : > { %v15694_v36 = vadd.f32 %v1279_v28, %v15443_v54  ;;  %11857 = vmatmul.mubr.msk.f32.gmra.mrb[156].mxu1 %vm716_vm3, %v15245_v43  ;;  %v11572_v27 = vpop.f32.mrb[51].mxu1  ;;  %11945 = vmatprep.mubr.msk.f32.mxu0 %vm14347_vm0, %v20600_v0  ;;  %v2265_v10 = vsel %vm2238_vm5, %v2262_v57, %v2264_v48 }
 0x183   : > { %11859 = vmatprep.mubr.msk.f32.mxu1 %vm14347_vm0, %v20600_v0  ;;  %v15719_v27 = vld [vmem:[%s14531_s26 + $0x80] sm:$0xff] }
 0x184   : > { %v15707_v38 = vpop.f32.mrb[52].mxu0  ;;  %20646 = vst [vmem:[#allocation33_spill] sm:$0xff] %v15719_v27  ;;  %v2266_v59 = vrot.slane %v15719_v27, 3  ;;  %v15737_v27 = vld [vmem:[%s14531_s26 + $0x88] sm:$0xff] }
 0x185   : > { %v1284_v54 = vpop.f32.mrb[52].mxu1  ;;  %v11492_v28 = vpop.f32.mrb[53].mxu0  ;;  %11946 = vmatmul.mubr.msk.f32.gmra.mrb[158].mxu0 %vm716_vm3, %v2263_v3 }
 0x186   : > { %v15711_v43 = vadd.f32 %v1284_v54, %v15461_v12  ;;  %11860 = vmatmul.mubr.msk.f32.gmra.mrb[158].mxu1 %vm716_vm3, %v15257_v53  ;;  %v11575_v46 = vpop.f32.mrb[53].mxu1  ;;  %11948 = vmatprep.mubr.msk.f32.mxu0 %vm14347_vm0, %v20600_v0 }
 0x187   : > { %11862 = vmatprep.mubr.msk.f32.mxu1 %vm14347_vm0, %v20600_v0  ;;  %v2267_v46 = vsel %vm2238_vm5, %v2264_v48, %v2266_v59 }
 0x188   : > { %v1663_v3 = vpop.f32.mrb[54].mxu0 }
 0x189   : > { %v1289_v12 = vpop.f32.mrb[54].mxu1  ;;  %v15725_v54 = vadd.f32 %v1663_v3, %v15502_v21  ;;  %v11664_v53 = vpop.f32.mrb[55].mxu0  ;;  %11949 = vmatmul.mubr.msk.f32.gmra.mrb[160].mxu0 %vm716_vm3, %v2265_v10  ;;  %v2268_v21 = vrot.slane %v15737_v27, 3 }
 0x18a   : > { %v15729_v28 = vadd.f32 %v1289_v12, %v15477_v20  ;;  %11863 = vmatmul.mubr.msk.f32.gmra.mrb[160].mxu1 %vm716_vm3, %v15273_v13  ;;  %v11578_v57 = vpop.f32.mrb[55].mxu1  ;;  %11951 = vmatprep.mubr.msk.f32.mxu0 %vm14347_vm0, %v20600_v0 }
 0x18b   : > { %11865 = vmatprep.mubr.msk.f32.mxu1 %vm14347_vm0, %v20600_v0  ;;  %v2269_v53 = vsel %vm2238_vm5, %v2266_v59, %v2268_v21  ;;  %v15755_v57 = vld [vmem:[%s14531_s26 + $0x90] sm:$0xff] }
 0x18c   : > { %v1668_v10 = vpop.f32.mrb[56].mxu0 }
 0x18d   : > { %v1294_v20 = vpop.f32.mrb[56].mxu1  ;;  %v15743_v3 = vadd.f32 %v1668_v10, %v15522_v31  ;;  %v11667_v13 = vpop.f32.mrb[57].mxu0  ;;  %11952 = vmatmul.mubr.msk.f32.gmra.mrb[162].mxu0 %vm716_vm3, %v2267_v46  ;;  %v2270_v31 = vrot.slane %v15755_v57, 3 }
 0x18e   : > { %v15747_v12 = vadd.f32 %v1294_v20, %v15497_v32  ;;  %11866 = vmatmul.mubr.msk.f32.gmra.mrb[162].mxu1 %vm716_vm3, %v15289_v11  ;;  %v11581_v48 = vpop.f32.mrb[57].mxu1  ;;  %11954 = vmatprep.mubr.msk.f32.mxu0 %vm14347_vm0, %v20600_v0 }
 0x18f   : > { %11868 = vmatprep.mubr.msk.f32.mxu1 %vm14347_vm0, %v20600_v0  ;;  %v2271_v13 = vsel %vm2238_vm5, %v2268_v21, %v2270_v31  ;;  %v15773_v48 = vld [vmem:[%s14531_s26 + $0x98] sm:$0xff] }
 0x190   : > { %v1673_v46 = vpop.f32.mrb[58].mxu0 }
 0x191   : > { %v1299_v32 = vpop.f32.mrb[58].mxu1  ;;  %v15761_v10 = vadd.f32 %v1673_v46, %v15541_v6  ;;  %v11670_v11 = vpop.f32.mrb[59].mxu0  ;;  %11955 = vmatmul.mubr.msk.f32.gmra.mrb[164].mxu0 %vm716_vm3, %v2269_v53  ;;  %v2272_v6 = vrot.slane %v15773_v48, 3 }
 0x192   : > { %v15765_v20 = vadd.f32 %v1299_v32, %v15515_v33  ;;  %11869 = vmatmul.mubr.msk.f32.gmra.mrb[164].mxu1 %vm716_vm3, %v15305_v16  ;;  %v11584_v59 = vpop.f32.mrb[59].mxu1  ;;  %11957 = vmatprep.mubr.msk.f32.mxu0 %vm14347_vm0, %v20600_v0 }
 0x193   : > { %11871 = vmatprep.mubr.msk.f32.mxu1 %vm14347_vm0, %v20600_v0  ;;  %v2273_v11 = vsel %vm2238_vm5, %v2270_v31, %v2272_v6  ;;  %v15791_v59 = vld [vmem:[%s14531_s26 + $0xa0] sm:$0xff] }
 0x194   : > { %v1678_v53 = vpop.f32.mrb[60].mxu0 }
 0x195   : > { %v1304_v33 = vpop.f32.mrb[60].mxu1  ;;  %v15779_v46 = vadd.f32 %v1678_v53, %v15558_v50  ;;  %v11673_v16 = vpop.f32.mrb[61].mxu0  ;;  %11958 = vmatmul.mubr.msk.f32.gmra.mrb[166].mxu0 %vm716_vm3, %v2271_v13  ;;  %v2274_v50 = vrot.slane %v15791_v59, 3 }
 0x196   : > { %v15783_v32 = vadd.f32 %v1304_v33, %v15536_v19  ;;  %11872 = vmatmul.mubr.msk.f32.gmra.mrb[166].mxu1 %vm716_vm3, %v15321_v23  ;;  %v11587_v21 = vpop.f32.mrb[61].mxu1  ;;  %11960 = vmatprep.mubr.msk.f32.mxu0 %vm14347_vm0, %v20600_v0 }
 0x197   : > { %11874 = vmatprep.mubr.msk.f32.mxu1 %vm14347_vm0, %v20600_v0  ;;  %v2275_v16 = vsel %vm2238_vm5, %v2272_v6, %v2274_v50  ;;  %v15809_v21 = vld [vmem:[%s14531_s26 + $0xa8] sm:$0xff] }
 0x198   : > { %v1683_v13 = vpop.f32.mrb[62].mxu0 }
 0x199   : > { %v1309_v19 = vpop.f32.mrb[62].mxu1  ;;  %v15797_v53 = vadd.f32 %v1683_v13, %v15575_v55  ;;  %v11676_v23 = vpop.f32.mrb[63].mxu0  ;;  %11961 = vmatmul.mubr.msk.f32.gmra.mrb[168].mxu0 %vm716_vm3, %v2273_v11  ;;  %v2276_v55 = vrot.slane %v15809_v21, 3 }
 0x19a   : > { %v15801_v33 = vadd.f32 %v1309_v19, %v15554_v22  ;;  %11875 = vmatmul.mubr.msk.f32.gmra.mrb[168].mxu1 %vm716_vm3, %v15337_v30  ;;  %v11590_v31 = vpop.f32.mrb[63].mxu1  ;;  %11963 = vmatprep.mubr.msk.f32.mxu0 %vm14347_vm0, %v20600_v0 }
 0x19b   : > { %11877 = vmatprep.mubr.msk.f32.mxu1 %vm14347_vm0, %v20600_v0  ;;  %v2277_v23 = vsel %vm2238_vm5, %v2274_v50, %v2276_v55  ;;  %v15827_v31 = vld [vmem:[%s14531_s26 + $0xb0] sm:$0xff] }
 0x19c   : > { %v1688_v11 = vpop.f32.mrb[64].mxu0 }
 0x19d   : > { %v1314_v22 = vpop.f32.mrb[64].mxu1  ;;  %v15815_v13 = vadd.f32 %v1688_v11, %v15592_v60  ;;  %v11679_v30 = vpop.f32.mrb[65].mxu0  ;;  %11964 = vmatmul.mubr.msk.f32.gmra.mrb[170].mxu0 %vm716_vm3, %v2275_v16  ;;  %v2278_v60 = vrot.slane %v15827_v31, 3 }
 0x19e   : > { %v15819_v19 = vadd.f32 %v1314_v22, %v15571_v40  ;;  %11878 = vmatmul.mubr.msk.f32.gmra.mrb[170].mxu1 %vm716_vm3, %v15353_v37  ;;  %v11593_v6 = vpop.f32.mrb[65].mxu1  ;;  %11966 = vmatprep.mubr.msk.f32.mxu0 %vm14347_vm0, %v20600_v0 }
 0x19f   : > { %11880 = vmatprep.mubr.msk.f32.mxu1 %vm14347_vm0, %v20600_v0  ;;  %v2279_v30 = vsel %vm2238_vm5, %v2276_v55, %v2278_v60  ;;  %v15845_v6 = vld [vmem:[%s14531_s26 + $0xb8] sm:$0xff] }
 0x1a0   : > { %v1693_v16 = vpop.f32.mrb[66].mxu0 }
 0x1a1   : > { %v1319_v40 = vpop.f32.mrb[66].mxu1  ;;  %v15833_v11 = vadd.f32 %v1693_v16, %v15609_v62  ;;  %v11682_v37 = vpop.f32.mrb[67].mxu0  ;;  %11967 = vmatmul.mubr.msk.f32.gmra.mrb[172].mxu0 %vm716_vm3, %v2277_v23  ;;  %v2280_v62 = vrot.slane %v15845_v6, 3 }
 0x1a2   : > { %v15837_v22 = vadd.f32 %v1319_v40, %v15588_v14  ;;  %11881 = vmatmul.mubr.msk.f32.gmra.mrb[172].mxu1 %vm716_vm3, %v15369_v45  ;;  %v11596_v50 = vpop.f32.mrb[67].mxu1  ;;  %11969 = vmatprep.mubr.msk.f32.mxu0 %vm14347_vm0, %v20600_v0 }
 0x1a3   : > { %11883 = vmatprep.mubr.msk.f32.mxu1 %vm14347_vm0, %v20600_v0  ;;  %v2281_v37 = vsel %vm2238_vm5, %v2278_v60, %v2280_v62  ;;  %v15863_v50 = vld [vmem:[%s14531_s26 + $0xc0] sm:$0xff] }
 0x1a4   : > { %v1698_v23 = vpop.f32.mrb[68].mxu0 }
 0x1a5   : > { %v1324_v14 = vpop.f32.mrb[68].mxu1  ;;  %v15851_v16 = vadd.f32 %v1698_v23, %v15626_v9  ;;  %v11685_v45 = vpop.f32.mrb[69].mxu0  ;;  %11970 = vmatmul.mubr.msk.f32.gmra.mrb[174].mxu0 %vm716_vm3, %v2279_v30  ;;  %v2282_v9 = vrot.slane %v15863_v50, 3 }
 0x1a6   : > { %v15855_v40 = vadd.f32 %v1324_v14, %v15605_v47  ;;  %11884 = vmatmul.mubr.msk.f32.gmra.mrb[174].mxu1 %vm716_vm3, %v15385_v52  ;;  %v11599_v55 = vpop.f32.mrb[69].mxu1  ;;  %11972 = vmatprep.mubr.msk.f32.mxu0 %vm14347_vm0, %v20600_v0 }
 0x1a7   : > { %11886 = vmatprep.mubr.msk.f32.mxu1 %vm14347_vm0, %v20600_v0  ;;  %v2283_v45 = vsel %vm2238_vm5, %v2280_v62, %v2282_v9  ;;  %v15881_v55 = vld [vmem:[%s14531_s26 + $0xc8] sm:$0xff] }
 0x1a8   : > { %v1703_v30 = vpop.f32.mrb[70].mxu0 }
 0x1a9   : > { %v1329_v47 = vpop.f32.mrb[70].mxu1  ;;  %v15869_v23 = vadd.f32 %v1703_v30, %v15643_v18  ;;  %v11688_v52 = vpop.f32.mrb[71].mxu0  ;;  %11973 = vmatmul.mubr.msk.f32.gmra.mrb[176].mxu0 %vm716_vm3, %v2281_v37  ;;  %v2284_v18 = vrot.slane %v15881_v55, 3 }
 0x1aa   : > { %v15873_v14 = vadd.f32 %v1329_v47, %v15622_v34  ;;  %11887 = vmatmul.mubr.msk.f32.gmra.mrb[176].mxu1 %vm716_vm3, %v15401_v58  ;;  %v11602_v60 = vpop.f32.mrb[71].mxu1  ;;  %11975 = vmatprep.mubr.msk.f32.mxu0 %vm14347_vm0, %v20600_v0 }
 0x1ab   : > { %11889 = vmatprep.mubr.msk.f32.mxu1 %vm14347_vm0, %v20600_v0  ;;  %v2285_v52 = vsel %vm2238_vm5, %v2282_v9, %v2284_v18  ;;  %v15899_v60 = vld [vmem:[%s14531_s26 + $0xd0] sm:$0xff] }
 0x1ac   : > { %v1708_v37 = vpop.f32.mrb[72].mxu0 }
 0x1ad   : > { %v1334_v34 = vpop.f32.mrb[72].mxu1  ;;  %v15887_v30 = vadd.f32 %v1708_v37, %v15660_v25  ;;  %v11691_v58 = vpop.f32.mrb[73].mxu0  ;;  %11976 = vmatmul.mubr.msk.f32.gmra.mrb[178].mxu0 %vm716_vm3, %v2283_v45  ;;  %v2286_v25 = vrot.slane %v15899_v60, 3 }
 0x1ae   : > { %v15891_v47 = vadd.f32 %v1334_v34, %v15639_v49  ;;  %11890 = vmatmul.mubr.msk.f32.gmra.mrb[178].mxu1 %vm716_vm3, %v15417_v1  ;;  %v11605_v62 = vpop.f32.mrb[73].mxu1  ;;  %11978 = vmatprep.mubr.msk.f32.mxu0 %vm14347_vm0, %v20600_v0 }
 0x1af   : > { %11892 = vmatprep.mubr.msk.f32.mxu1 %vm14347_vm0, %v20600_v0  ;;  %v2287_v58 = vsel %vm2238_vm5, %v2284_v18, %v2286_v25  ;;  %v15917_v62 = vld [vmem:[%s14531_s26 + $0xd8] sm:$0xff] }
 0x1b0   : > { %v1713_v49 = vpop.f32.mrb[74].mxu0  ;;  %20647 = vst [vmem:[#allocation34_spill] sm:$0xff] %v15917_v62 }
 0x1b1   : > { %v1339_v45 = vpop.f32.mrb[74].mxu1  ;;  %v15905_v37 = vadd.f32 %v1713_v49, %v15677_v29  ;;  %v11694_v1 = vpop.f32.mrb[75].mxu0  ;;  %11979 = vmatmul.mubr.msk.f32.gmra.mrb[180].mxu0 %vm716_vm3, %v2285_v52  ;;  %v2288_v29 = vrot.slane %v15917_v62, 3  ;;  %v15938_v62 = vld [vmem:[%s14531_s26 + $0xe0] sm:$0xff] }
 0x1b2   : > { %v15909_v34 = vadd.f32 %v1339_v45, %v15656_v2  ;;  %11893 = vmatmul.mubr.msk.f32.gmra.mrb[180].mxu1 %vm716_vm3, %v15438_v15  ;;  %v11608_v9 = vpop.f32.mrb[75].mxu1  ;;  %11981 = vmatprep.mubr.msk.f32.mxu0 %vm14347_vm0, %v20600_v0  ;;  %v15923_v2 = vld [vmem:[%s14531_s26 + $0x148] sm:$0xff]  ;;  %20649 = vst [vmem:[#allocation36_spill] sm:$0xff] %v15938_v62 }
 0x1b3   : > { %11895 = vmatprep.mubr.msk.f32.mxu1 %vm14347_vm0, %v20600_v0  ;;  %v2289_v9 = vsel %vm2238_vm5, %v2286_v25, %v2288_v29 }
 0x1b4   : > { %v1718_v52 = vpop.f32.mrb[76].mxu0 }
 0x1b5   : > { %v1344_v49 = vpop.f32.mrb[76].mxu1  ;;  %v15926_v15 = vadd.f32 %v1718_v52, %v15694_v36  ;;  %v11697_v45 = vpop.f32.mrb[77].mxu0  ;;  %11982 = vmatmul.mubr.msk.f32.gmra.mrb[182].mxu0 %vm716_vm3, %v2287_v58  ;;  %v2290_v36 = vrot.slane %v15938_v62, 3  ;;  %v15945_v52 = vld [vmem:[%s14531_s26 + $0x150] sm:$0xff] }
 0x1b6   : > { %v15930_v18 = vadd.f32 %v1344_v49, %v15673_v4  ;;  %11896 = vmatmul.mubr.msk.f32.gmra.mrb[182].mxu1 %vm716_vm3, %v15454_v63  ;;  %v11611_v1 = vpop.f32.mrb[77].mxu1  ;;  %11984 = vmatprep.mubr.msk.f32.mxu0 %vm14347_vm0, %v20600_v0  ;;  %v1912_v4 = vrot.slane %v15923_v2, 2 }
 0x1b7   : > { %20648 = vst [vmem:[#allocation35_spill] sm:$0xff] %v15926_v15  ;;  %11898 = vmatprep.mubr.msk.f32.mxu1 %vm14347_vm0, %v20600_v0  ;;  %v2291_v62 = vsel %vm2238_vm5, %v2288_v29, %v2290_v36  ;;  %v15960_v15 = vld [vmem:[%s14531_s26 + $0xe8] sm:$0xff] }
 0x1b8   : > { %v1723_v58 = vpop.f32.mrb[78].mxu0  ;;  %20650 = vst [vmem:[#allocation37_spill] sm:$0xff] %v15960_v15 }
 0x1b9   : > { %v1349_v63 = vpop.f32.mrb[78].mxu1  ;;  %v15948_v49 = vadd.f32 %v1723_v58, %v15711_v43  ;;  %v11700_v45 = vpop.f32.mrb[79].mxu0  ;;  %11985 = vmatmul.mubr.msk.f32.gmra.mrb[184].mxu0 %vm716_vm3, %v2289_v9  ;;  %v2292_v43 = vrot.slane %v15960_v15, 3  ;;  %v1914_v9 = vrot.slane %v15945_v52, 2  ;;  %v15980_v15 = vld [vmem:[%s14531_s26 + $0xf0] sm:$0xff] }
 0x1ba   : > { %v15952_v25 = vadd.f32 %v1349_v63, %v15690_v17  ;;  %11899 = vmatmul.mubr.msk.f32.gmra.mrb[184].mxu1 %vm716_vm3, %v15473_v51  ;;  %v11614_v1 = vpop.f32.mrb[79].mxu1  ;;  %11987 = vmatprep.mubr.msk.f32.mxu0 %vm14347_vm0, %v20600_v0  ;;  %v1913_v17 = vsel %vm1430_vm4, %v15457_v44, %v1912_v4 }
 0x1bb   : > { %11901 = vmatprep.mubr.msk.f32.mxu1 %vm14347_vm0, %v20600_v0  ;;  %v2293_v44 = vsel %vm2238_vm5, %v2290_v36, %v2292_v43 }
 0x1bc   : > { %v1728_v51 = vpop.f32.mrb[80].mxu0 }
 0x1bd   : > { %v1354_v58 = vpop.f32.mrb[80].mxu1  ;;  %v15969_v63 = vadd.f32 %v1728_v51, %v15729_v28  ;;  %v11703_v45 = vpop.f32.mrb[81].mxu0  ;;  %11988 = vmatmul.mubr.msk.f32.gmra.mrb[186].mxu0 %vm716_vm3, %v2291_v62  ;;  %v2294_v28 = vrot.slane %v15980_v15, 3  ;;  %v1915_v62 = vsel %vm1430_vm4, %v1912_v4, %v1914_v9  ;;  %v15998_v4 = vld [vmem:[%s14531_s26 + $0xf8] sm:$0xff] }
 0x1be   : > { %v15973_v29 = vadd.f32 %v1354_v58, %v15707_v38  ;;  %11902 = vmatmul.mubr.msk.f32.gmra.mrb[186].mxu1 %vm716_vm3, %v1913_v17  ;;  %v11617_v1 = vpop.f32.mrb[81].mxu1  ;;  %11990 = vmatprep.mubr.msk.f32.mxu0 %vm14347_vm0, %v20600_v0 }
 0x1bf   : > { %11904 = vmatprep.mubr.msk.f32.mxu1 %vm14347_vm0, %v20600_v0  ;;  %v2295_v1 = vsel %vm2238_vm5, %v2292_v43, %v2294_v28 }
 0x1c0   : > { %v1733_v38 = vpop.f32.mrb[82].mxu0 }
 0x1c1   : > { %v1359_v51 = vpop.f32.mrb[82].mxu1  ;;  %v15987_v17 = vadd.f32 %v1733_v38, %v15747_v12  ;;  %v11706_v58 = vpop.f32.mrb[83].mxu0  ;;  %11991 = vmatmul.mubr.msk.f32.gmra.mrb[188].mxu0 %vm716_vm3, %v2293_v44  ;;  %v2296_v12 = vrot.slane %v15998_v4, 3  ;;  %v2719_v44 = vrot.slane %v15488_v35, 4 }
 0x1c2   : > { %v15991_v45 = vadd.f32 %v1359_v51, %v15266_v5  ;;  %11905 = vmatmul.mubr.msk.f32.gmra.mrb[188].mxu1 %vm716_vm3, %v1915_v62  ;;  %v11620_v36 = vpop.f32.mrb[83].mxu1  ;;  %11993 = vmatprep.mubr.msk.f32.mxu0 %vm14347_vm0, %v20600_v0  ;;  %v2720_v5 = vrot.slane %v15492_v24, 4  ;;  %v16017_v24 = vld [vmem:[%s14531_s26 + $0x100] sm:$0xff] }
 0x1c3   : > { %11907 = vmatprep.mubr.msk.f32.mxu1 %vm14347_vm0, %v20600_v0  ;;  %v2297_v35 = vsel %vm2238_vm5, %v2294_v28, %v2296_v12  ;;  %20651 = vst [vmem:[#allocation38_spill] sm:$0xff] %v16017_v24 }
 0x1c4   : > { %v1738_v38 = vpop.f32.mrb[84].mxu0 }
 0x1c5   : > { %v1364_v62 = vpop.f32.mrb[84].mxu1  ;;  %v16006_v51 = vadd.f32 %v1738_v38, %v15765_v20  ;;  %v11709_v58 = vpop.f32.mrb[85].mxu0  ;;  %11994 = vmatmul.mubr.msk.f32.gmra.mrb[190].mxu0 %vm716_vm3, %v2295_v1  ;;  %v2298_v20 = vrot.slane %v16017_v24, 3  ;;  %v2721_v1 = vsel %vm2718_vm6, %v2719_v44, %v2720_v5 }
 0x1c6   : > { %v16010_v43 = vadd.f32 %v1364_v62, %v15282_v26  ;;  %11908 = vmatmul.mubr.msk.f32.gmra.mrb[190].mxu1 %vm716_vm3, %v1914_v9  ;;  %v11623_v36 = vpop.f32.mrb[85].mxu1  ;;  %11996 = vmatprep.mubr.msk.f32.mxu0 %vm14347_vm0, %v20600_v0  ;;  %v2722_v26 = vrot.slane %v15510_v39, 4  ;;  %v16036_v39 = vld [vmem:[%s14531_s26 + $0x108] sm:$0xff] }
 0x1c7   : > { %12037 = vmatprep.mubr.msk.f32.mxu1 %vm14347_vm0, %v20600_v0  ;;  %v2299_v44 = vsel %vm2238_vm5, %v2296_v12, %v2298_v20  ;;  %20653 = vst [vmem:[#allocation40_spill] sm:$0xff] %v16036_v39 }
 0x1c8   : > { %v1743_v38 = vpop.f32.mrb[86].mxu0 }
 0x1c9   : > { %v1369_v9 = vpop.f32.mrb[86].mxu1  ;;  %v16025_v62 = vadd.f32 %v1743_v38, %v15783_v32  ;;  %v11712_v58 = vpop.f32.mrb[87].mxu0  ;;  %11997 = vmatmul.mubr.msk.f32.gmra.mrb[192].mxu0 %vm716_vm3, %v2297_v35  ;;  %v2300_v32 = vrot.slane %v16036_v39, 3  ;;  %v2723_v35 = vsel %vm2718_vm6, %v2720_v5, %v2722_v26 }
 0x1ca   : > { %v16029_v28 = vadd.f32 %v1369_v9, %v15298_v41  ;;  %12038 = vmatmul.mubr.msk.f32.vlgmr.msra.gmra.mrb[192].mxu1 %vm716_vm3, %v2721_v1  ;;  %v11626_v36 = vpop.f32.mrb[87].mxu1  ;;  %11999 = vmatprep.mubr.msk.f32.mxu0 %vm14347_vm0, %v20600_v0  ;;  %v2724_v41 = vrot.slane %v15530_v61, 4  ;;  %v16055_v61 = vld [vmem:[%s14531_s26 + $0x110] sm:$0xff] }
 0x1cb   : > { %20652 = vst [vmem:[#allocation39_spill] sm:$0xff] %v16025_v62  ;;  %12040 = vmatprep.mubr.msk.f32.mxu1 %vm14347_vm0, %v20600_v0  ;;  %v2301_v5 = vsel %vm2238_vm5, %v2298_v20, %v2300_v32  ;;  %20655 = vst [vmem:[#allocation42_spill] sm:$0xff] %v16055_v61 }
 0x1cc   : > { %v1748_v38 = vpop.f32.mrb[88].mxu0 }
 0x1cd   : > { %v1374_v1 = vpop.f32.mrb[88].mxu1  ;;  %v16044_v9 = vadd.f32 %v1748_v38, %v15801_v33  ;;  %v11715_v58 = vpop.f32.mrb[89].mxu0  ;;  %12000 = vmatmul.mubr.msk.f32.gmra.mrb[194].mxu0 %vm716_vm3, %v2299_v44  ;;  %v2302_v33 = vrot.slane %v16055_v61, 3  ;;  %v16061_v44 = vsel %vm2718_vm6, %v2722_v26, %v2724_v41  ;;  %v16077_v26 = vld [vmem:[%s14531_s26 + $0x118] sm:$0xff] }
 0x1ce   : > { %v16048_v12 = vadd.f32 %v1374_v1, %v15314_v56  ;;  %12041 = vmatmul.mubr.msk.f32.gmra.mrb[194].mxu1 %vm716_vm3, %v2723_v35  ;;  %v11629_v36 = vpop.f32.mrb[89].mxu1  ;;  %12002 = vmatprep.mubr.msk.f32.mxu0 %vm14347_vm0, %v20600_v0  ;;  %v2726_v56 = vrot.slane %v15549_v42, 4  ;;  %20657 = vst [vmem:[#allocation44_spill] sm:$0xff] %v16077_v26 }
 0x1cf   : > { %20654 = vst [vmem:[#allocation41_spill] sm:$0xff] %v16044_v9  ;;  %12043 = vmatprep.mubr.msk.f32.mxu1 %vm14347_vm0, %v20600_v0  ;;  %v2303_v42 = vsel %vm2238_vm5, %v2300_v32, %v2302_v33  ;;  %v20659_v32 = vld [vmem:[#allocation16_spill] sm:$0xff] }
 0x1d0   : > { %v1753_v35 = vpop.f32.mrb[90].mxu0 }
 0x1d1   : > { %v1379_v38 = vpop.f32.mrb[90].mxu1  ;;  %v16065_v1 = vadd.f32 %v1753_v35, %v15819_v19  ;;  %v11718_v58 = vpop.f32.mrb[91].mxu0  ;;  %12003 = vmatmul.mubr.msk.f32.gmra.mrb[196].mxu0 %vm716_vm3, %v2301_v5  ;;  %v2304_v19 = vrot.slane %v16077_v26, 3  ;;  %v2728_v5 = vrot.slane %v15566_v7, 4  ;;  %v20660_v26 = vmov 0.0  }
 0x1d2   : > { %v16069_v20 = vadd.f32 %v1379_v38, %v15330_v8  ;;  %12044 = vmatmul.mubr.msk.f32.gmra.mrb[196].mxu1 %vm716_vm3, %v16061_v44  ;;  %v11632_v36 = vpop.f32.mrb[91].mxu1  ;;  %12005 = vmatprep.mubr.msk.f32.mxu0 %vm14347_vm0, %v20600_v0  ;;  %v16083_v8 = vsel %vm2718_vm6, %v2724_v41, %v2726_v56  ;;  %v16099_v41 = vld [vmem:[%s14531_s26 + $0x120] sm:$0xff] }
 0x1d3   : > { %20656 = vst [vmem:[#allocation43_spill] sm:$0xff] %v16065_v1  ;;  %12046 = vmatprep.mubr.msk.f32.mxu1 %vm14347_vm0, %v20600_v0  ;;  %v2305_v7 = vsel %vm2238_vm5, %v2302_v33, %v2304_v19  ;;  %20661 = vst [vmem:[#allocation16_spill] sm:$0xff] %v16099_v41  ;;  %v20664_v33 = vld [vmem:[#allocation17_spill] sm:$0xff] }
 0x1d4   : > { %v1758_v35 = vpop.f32.mrb[92].mxu0 }
 0x1d5   : > { %v1384_v38 = vpop.f32.mrb[92].mxu1  ;;  %v16087_v58 = vadd.f32 %v1758_v35, %v15837_v22  ;;  %v11721_v36 = vpop.f32.mrb[93].mxu0  ;;  %12006 = vmatmul.mubr.msk.f32.gmra.mrb[198].mxu0 %vm716_vm3, %v2303_v42  ;;  %v2306_v22 = vrot.slane %v16099_v41, 3  ;;  %v16105_v42 = vsel %vm2718_vm6, %v2726_v56, %v2728_v5  ;;  %v20662_v35 = vld [vmem:[#allocation25_spill] sm:$0xff] }
 0x1d6   : > { %v16091_v1 = vadd.f32 %v1384_v38, %v20659_v32  ;;  %12047 = vmatmul.mubr.msk.f32.gmra.mrb[198].mxu1 %vm716_vm3, %v16083_v8  ;;  %v11635_v0 = vpop.f32.mrb[93].mxu1  ;;  %12008 = vmatprep.mubr.msk.f32.mxu0 %vm14347_vm0, %v20660_v26  ;;  %v2730_v38 = vrot.slane %v20662_v35, 4  ;;  %v16121_v35 = vld [vmem:[%s14531_s26 + $0x128] sm:$0xff] }
 0x1d7   : > { %20658 = vst [vmem:[#allocation45_spill] sm:$0xff] %v16087_v58  ;;  %12049 = vmatprep.mubr.msk.f32.mxu1 %vm14347_vm0, %v20660_v26  ;;  %v2307_v56 = vsel %vm2238_vm5, %v2304_v19, %v2306_v22  ;;  %20665 = vst [vmem:[#allocation17_spill] sm:$0xff] %v16121_v35  ;;  %v20668_v19 = vld [vmem:[#allocation18_spill] sm:$0xff] }
 0x1d8   : > { %v1763_v36 = vpop.f32.mrb[94].mxu0 }
 0x1d9   : > { %v1389_v0 = vpop.f32.mrb[94].mxu1  ;;  %v16109_v32 = vadd.f32 %v1763_v36, %v15855_v40  ;;  %v11724_v58 = vpop.f32.mrb[95].mxu0  ;;  %12009 = vmatmul.mubr.msk.f32.gmra.mrb[200].mxu0 %vm716_vm3, %v2305_v7  ;;  %v2308_v40 = vrot.slane %v16121_v35, 3  ;;  %v20666_v7 = vld [vmem:[#allocation26_spill] sm:$0xff] }
 0x1da   : > { %v16113_v61 = vadd.f32 %v1389_v0, %v20664_v33  ;;  %12050 = vmatmul.mubr.msk.f32.gmra.mrb[200].mxu1 %vm716_vm3, %v16105_v42  ;;  %v11638_v41 = vpop.f32.mrb[95].mxu1  ;;  %12011 = vmatprep.mubr.msk.f32.mxu0 %vm14347_vm0, %v20660_v26  ;;  %v16127_v58 = vsel %vm2718_vm6, %v2728_v5, %v2730_v38  ;;  %v2732_v36 = vrot.slane %v20666_v7, 4  ;;  %v16143_v7 = vld [vmem:[%s14531_s26 + $0x130] sm:$0xff] }
 0x1db   : > { %20663 = vst [vmem:[#allocation25_spill] sm:$0xff] %v16109_v32  ;;  %12052 = vmatprep.mubr.msk.f32.mxu1 %vm14347_vm0, %v20660_v26  ;;  %v2309_v5 = vsel %vm2238_vm5, %v2306_v22, %v2308_v40  ;;  %20669 = vst [vmem:[#allocation18_spill] sm:$0xff] %v16143_v7  ;;  %v20672_v22 = vld [vmem:[#allocation19_spill] sm:$0xff] }
 0x1dc   : > { %v1768_v0 = vpop.f32.mrb[96].mxu0 }
 0x1dd   : > { %v1394_v41 = vpop.f32.mrb[96].mxu1  ;;  %v16131_v33 = vadd.f32 %v1768_v0, %v15873_v14  ;;  %v11727_v32 = vpop.f32.mrb[97].mxu0  ;;  %12012 = vmatmul.mubr.msk.f32.gmra.mrb[202].mxu0 %vm716_vm3, %v2307_v56  ;;  %v2310_v14 = vrot.slane %v16143_v7, 3  ;;  %v20670_v56 = vld [vmem:[#allocation27_spill] sm:$0xff] }
 0x1de   : > { %v16135_v9 = vadd.f32 %v1394_v41, %v20668_v19  ;;  %12053 = vmatmul.mubr.msk.f32.gmra.mrb[202].mxu1 %vm716_vm3, %v16127_v58  ;;  %v11641_v35 = vpop.f32.mrb[97].mxu1  ;;  %12014 = vmatprep.mubr.msk.f32.mxu0 %vm14347_vm0, %v20660_v26  ;;  %v16149_v32 = vsel %vm2718_vm6, %v2730_v38, %v2732_v36  ;;  %v2734_v0 = vrot.slane %v20670_v56, 4  ;;  %v16165_v56 = vld [vmem:[%s14531_s26 + $0x138] sm:$0xff] }
 0x1df   : > { %20667 = vst [vmem:[#allocation26_spill] sm:$0xff] %v16131_v33  ;;  %12055 = vmatprep.mubr.msk.f32.mxu1 %vm14347_vm0, %v20660_v26  ;;  %v2311_v38 = vsel %vm2238_vm5, %v2308_v40, %v2310_v14  ;;  %20673 = vst [vmem:[#allocation19_spill] sm:$0xff] %v16165_v56  ;;  %v20676_v40 = vld [vmem:[#allocation20_spill] sm:$0xff] }
 0x1e0   : > { %v1773_v41 = vpop.f32.mrb[98].mxu0 }
 0x1e1   : > { %v1399_v35 = vpop.f32.mrb[98].mxu1  ;;  %v16153_v19 = vadd.f32 %v1773_v41, %v15891_v47  ;;  %v11730_v33 = vpop.f32.mrb[99].mxu0  ;;  %12015 = vmatmul.mubr.msk.f32.gmra.mrb[204].mxu0 %vm716_vm3, %v2309_v5  ;;  %v2312_v47 = vrot.slane %v16165_v56, 3  ;;  %v20674_v5 = vld [vmem:[#allocation28_spill] sm:$0xff] }
 0x1e2   : > { %v16157_v39 = vadd.f32 %v1399_v35, %v20672_v22  ;;  %12056 = vmatmul.mubr.msk.f32.gmra.mrb[204].mxu1 %vm716_vm3, %v16149_v32  ;;  %v11644_v7 = vpop.f32.mrb[99].mxu1  ;;  %12017 = vmatprep.mubr.msk.f32.mxu0 %vm14347_vm0, %v20660_v26  ;;  %v16171_v33 = vsel %vm2718_vm6, %v2732_v36, %v2734_v0  ;;  %v2736_v41 = vrot.slane %v20674_v5, 4  ;;  %v16187_v5 = vld [vmem:[%s14531_s26 + $0x140] sm:$0xff] }
 0x1e3   : > { %20671 = vst [vmem:[#allocation27_spill] sm:$0xff] %v16153_v19  ;;  %12058 = vmatprep.mubr.msk.f32.mxu1 %vm14347_vm0, %v20660_v26  ;;  %v2313_v36 = vsel %vm2238_vm5, %v2310_v14, %v2312_v47  ;;  %20677 = vst [vmem:[#allocation20_spill] sm:$0xff] %v16187_v5 }
 0x1e4   : > { %v1778_v35 = vpop.f32.mrb[100].mxu0 }
 0x1e5   : > { %v1404_v7 = vpop.f32.mrb[100].mxu1  ;;  %v16175_v22 = vadd.f32 %v1778_v35, %v15909_v34  ;;  %v11733_v19 = vpop.f32.mrb[101].mxu0  ;;  %12018 = vmatmul.mubr.msk.f32.gmra.mrb[206].mxu0 %vm716_vm3, %v2311_v38  ;;  %v2314_v34 = vrot.slane %v16187_v5, 3  ;;  %v16196_v38 = vsel %vm2718_vm6, %v2734_v0, %v2736_v41 }
 0x1e6   : > { %v16179_v62 = vadd.f32 %v1404_v7, %v20676_v40  ;;  %12059 = vmatmul.mubr.msk.f32.gmra.mrb[206].mxu1 %vm716_vm3, %v16171_v33  ;;  %v11647_v56 = vpop.f32.mrb[101].mxu1  ;;  %12020 = vmatprep.mubr.msk.f32.mxu0 %vm14347_vm0, %v20660_v26  ;;  %v10059_v19 = vld [vmem:[%s20628_s1 + $0x1c] sm:$0x7] }
 0x1e7   : > { %20675 = vst [vmem:[#allocation28_spill] sm:$0xff] %v16175_v22  ;;  %12061 = vmatprep.mubr.msk.f32.mxu1 %vm14347_vm0, %v20660_v26  ;;  %v20678_v56 = vld [vmem:[#allocation29_spill] sm:$0xff]  ;;  %12286 = vmatpush3.msk.msra.mxu1 %vm799_vm1, %v10059_v19  ;;  %v2315_v19 = vsel %vm2238_vm5, %v2312_v47, %v2314_v34 }
 0x1e8   : > { %v2738_v35 = vrot.slane %v20678_v56, 4  ;;  %v1783_v7 = vpop.f32.mrb[102].mxu0  ;;  %v20680_v22 = vld [vmem:[#allocation21_spill] sm:$0xff]  ;;  %v2316_v56 = vrot.slane %v15923_v2, 3 }
 0x1e9   : > { %v1409_v14 = vpop.f32.mrb[102].mxu1  ;;  %v16201_v40 = vadd.f32 %v1783_v7, %v15930_v18  ;;  %v11736_v5 = vpop.f32.mrb[103].mxu0  ;;  %12021 = vmatmul.mubr.msk.f32.gmra.mrb[208].mxu0 %vm716_vm3, %v2313_v36  ;;  %v20681_v36 = vld [vmem:[#allocation30_spill] sm:$0xff] }
 0x1ea   : > { %v16205_v24 = vadd.f32 %v1409_v14, %v20680_v22  ;;  %12062 = vmatmul.mubr.msk.f32.gmra.mrb[208].mxu1 %vm716_vm3, %v16196_v38  ;;  %v11650_v0 = vpop.f32.mrb[103].mxu1  ;;  %12023 = vmatprep.mubr.msk.f32.mxu0 %vm14347_vm0, %v20660_v26  ;;  %v16216_v18 = vsel %vm2718_vm6, %v2736_v41, %v2738_v35  ;;  %v2740_v22 = vrot.slane %v20681_v36, 4  ;;  %v2317_v41 = vsel %vm2238_vm5, %v2314_v34, %v2316_v56 }
 0x1eb   : > { %20679 = vst [vmem:[#allocation29_spill] sm:$0xff] %v16201_v40  ;;  %12064 = vmatprep.mubr.msk.f32.mxu1 %vm14347_vm0, %v20660_v26  ;;  %v20683_v40 = vld [vmem:[#allocation22_spill] sm:$0xff]  ;;  %v2318_v36 = vrot.slane %v15945_v52, 3 }
 0x1ec   : > { %v1788_v5 = vpop.f32.mrb[104].mxu0 }
 0x1ed   : > { %v1414_v7 = vpop.f32.mrb[104].mxu1  ;;  %v16220_v14 = vadd.f32 %v1788_v5, %v15952_v25  ;;  %v11739_v0 = vpop.f32.mrb[105].mxu0  ;;  %12024 = vmatmul.mubr.msk.f32.gmra.mrb[210].mxu0 %vm716_vm3, %v2315_v19  ;;  %v16235_v25 = vsel %vm2718_vm6, %v2738_v35, %v2740_v22  ;;  %v20684_v19 = vld [vmem:[#allocation31_spill] sm:$0xff]  ;;  %v2319_v35 = vsel %vm2238_vm5, %v2316_v56, %v2318_v36 }
 0x1ee   : > { %v16224_v47 = vadd.f32 %v1414_v7, %v20683_v40  ;;  %12065 = vmatmul.mubr.msk.f32.gmra.mrb[210].mxu1 %vm716_vm3, %v16216_v18  ;;  %v11653_v2 = vpop.f32.mrb[105].mxu1  ;;  %12026 = vmatprep.mubr.msk.f32.mxu0 %vm14347_vm0, %v20660_v26  ;;  %v2742_v40 = vrot.slane %v20684_v19, 4  ;;  %v20687_v19 = vld [vmem:[#allocation32_spill] sm:$0xff] }
 0x1ef   : > { %20682 = vst [vmem:[#allocation21_spill] sm:$0xff] %v16220_v14  ;;  %12067 = vmatprep.mubr.msk.f32.mxu1 %vm14347_vm0, %v20660_v26  ;;  %v20686_v14 = vld [vmem:[#allocation23_spill] sm:$0xff] }
 0x1f0   : > { %v1793_v5 = vpop.f32.mrb[106].mxu0 }
 0x1f1   : > { %v1419_v7 = vpop.f32.mrb[106].mxu1  ;;  %v16239_v0 = vadd.f32 %v1793_v5, %v15973_v29  ;;  %v11742_v2 = vpop.f32.mrb[107].mxu0  ;;  %12027 = vmatmul.mubr.msk.f32.gmra.mrb[212].mxu0 %vm716_vm3, %v2317_v41  ;;  %v16253_v29 = vsel %vm2718_vm6, %v2740_v22, %v2742_v40  ;;  %v2744_v41 = vrot.slane %v20687_v19, 4 }
 0x1f2   : > { %v16243_v34 = vadd.f32 %v1419_v7, %v20686_v14  ;;  %12068 = vmatmul.mubr.msk.f32.gmra.mrb[212].mxu1 %vm716_vm3, %v16235_v25  ;;  %v11656_v52 = vpop.f32.mrb[107].mxu1  ;;  %12029 = vmatprep.mubr.msk.f32.mxu0 %vm14347_vm0, %v20660_v26 }
 0x1f3   : > { %20685 = vst [vmem:[#allocation30_spill] sm:$0xff] %v16239_v0  ;;  %12070 = vmatprep.mubr.msk.f32.mxu1 %vm14347_vm0, %v20660_v26  ;;  %v20688_v52 = vld [vmem:[#allocation24_spill] sm:$0xff]  ;;  %v16270_v22 = vsel %vm2718_vm6, %v2742_v40, %v2744_v41  ;;  %v2748_v40 = vrot.slane %v15737_v27, 4 }
 0x1f4   : > { %v1798_v5 = vpop.f32.mrb[108].mxu0 }
 0x1f5   : > { %v1424_v14 = vpop.f32.mrb[108].mxu1  ;;  %v16257_v7 = vadd.f32 %v1798_v5, %v15991_v45  ;;  %v11745_v2 = vpop.f32.mrb[109].mxu0  ;;  %12030 = vmatmul.mubr.msk.f32.gmra.mrb[214].mxu0 %vm716_vm3, %v2319_v35  ;;  %v20689_v45 = vld [vmem:[#allocation33_spill] sm:$0xff] }
 0x1f6   : > { %v16261_v0 = vadd.f32 %v1424_v14, %v20688_v52  ;;  %12071 = vmatmul.mubr.msk.f32.gmra.mrb[214].mxu1 %vm716_vm3, %v16253_v29  ;;  %v11659_v56 = vpop.f32.mrb[109].mxu1  ;;  %12032 = vmatprep.mubr.msk.f32.mxu0 %vm14347_vm0, %v20660_v26  ;;  %v2746_v19 = vrot.slane %v20689_v45, 4 }
 0x1f7   : > { %12073 = vmatprep.mubr.msk.f32.mxu1 %vm14347_vm0, %v20660_v26 }
 0x1f8   : > { %v1803_v5 = vpop.f32.mrb[110].mxu0 }
 0x1f9   : > { %v16274_v35 = vadd.f32 %v1803_v5, %v16010_v43  ;;  %v1991_v14 = vpop.f32.mrb[110].mxu1  ;;  %v11748_v2 = vpop.f32.mrb[111].mxu0  ;;  %12033 = vmatmul.mubr.msk.f32.gmra.mrb[216].mxu0 %vm716_vm3, %v2318_v36  ;;  %v16287_v43 = vsel %vm2718_vm6, %v2744_v41, %v2746_v19  ;;  %v2750_v41 = vrot.slane %v15755_v57, 4 }
 0x1fa   : > { %v16278_v52 = vadd.f32 %v1991_v14, %v15725_v54  ;;  %12074 = vmatmul.mubr.msk.f32.gmra.mrb[216].mxu1 %vm716_vm3, %v16270_v22  ;;  %v11789_v56 = vpop.f32.mrb[111].mxu1  ;;  %12162 = vmatprep.mubr.msk.f32.mxu0 %vm14347_vm0, %v20660_v26  ;;  %v10102_v54 = vld [vmem:[%s20628_s1 + $0x20] sm:$0x7]  ;;  %s14249_s1 = scalar_lea.vmem %s14248_s23, 32 }
 0x1fb   : > { %12076 = vmatprep.mubr.msk.f32.mxu1 %vm14347_vm0, %v20660_v26  ;;  %v16327_v57 = vsel %vm2718_vm6, %v2748_v40, %v2750_v41 }
 0x1fc   : > { %v1808_v45 = vpop.f32.mrb[112].mxu0 }
 0x1fd   : > { %v16294_v36 = vadd.f32 %v1808_v45, %v16029_v28  ;;  %v1996_v5 = vpop.f32.mrb[112].mxu1  ;;  %v11751_v14 = vpop.f32.mrb[113].mxu0  ;;  %12163 = vmatmul.mubr.msk.f32.vlgmr.msra.gmra.mrb[218].mxu0 %vm716_vm3, %v16061_v44  ;;  %v16308_v28 = vsel %vm2718_vm6, %v2746_v19, %v2748_v40 }
 0x1fe   : > { %v16299_v2 = vadd.f32 %v1996_v5, %v15743_v3  ;;  %12077 = vmatmul.mubr.msk.f32.gmra.mrb[218].mxu1 %vm716_vm3, %v16287_v43  ;;  %v11792_v27 = vpop.f32.mrb[113].mxu1  ;;  %12165 = vmatprep.mubr.msk.f32.mxu0 %vm14347_vm0, %v20660_v26 }
 0x1ff   : > { %12079 = vmatprep.mubr.msk.f32.mxu1 %vm14347_vm0, %v20660_v26  ;;  %12411 = vmatpush3.msk.msra.mxu0 %vm799_vm1, %v10102_v54 }
 0x200   : > { %v1813_v44 = vpop.f32.mrb[114].mxu0 }
 0x201   : > { %v16313_v3 = vadd.f32 %v1813_v44, %v16048_v12  ;;  %v2001_v56 = vpop.f32.mrb[114].mxu1  ;;  %v11754_v45 = vpop.f32.mrb[115].mxu0  ;;  %12166 = vmatmul.mubr.msk.f32.gmra.mrb[220].mxu0 %vm716_vm3, %v16083_v8  ;;  %v2752_v12 = vrot.slane %v15773_v48, 4 }
 0x202   : > { %v16318_v5 = vadd.f32 %v2001_v56, %v15761_v10  ;;  %12080 = vmatmul.mubr.msk.f32.gmra.mrb[220].mxu1 %vm716_vm3, %v16308_v28  ;;  %v11795_v19 = vpop.f32.mrb[115].mxu1  ;;  %12168 = vmatprep.mubr.msk.f32.mxu0 %vm14347_vm0, %v20660_v26 }
 0x203   : > { %12082 = vmatprep.mubr.msk.f32.mxu1 %vm14347_vm0, %v20660_v26  ;;  %v16345_v48 = vsel %vm2718_vm6, %v2750_v41, %v2752_v12 }
 0x204   : > { %v1818_v54 = vpop.f32.mrb[116].mxu0 }
 0x205   : > { %v16331_v8 = vadd.f32 %v1818_v54, %v16069_v20  ;;  %v2006_v10 = vpop.f32.mrb[116].mxu1  ;;  %v11757_v14 = vpop.f32.mrb[117].mxu0  ;;  %12169 = vmatmul.mubr.msk.f32.gmra.mrb[222].mxu0 %vm716_vm3, %v16105_v42  ;;  %v2754_v20 = vrot.slane %v15791_v59, 4 }
 0x206   : > { %v16336_v27 = vadd.f32 %v2006_v10, %v15779_v46  ;;  %12083 = vmatmul.mubr.msk.f32.gmra.mrb[222].mxu1 %vm716_vm3, %v16327_v57  ;;  %v11798_v44 = vpop.f32.mrb[117].mxu1  ;;  %12171 = vmatprep.mubr.msk.f32.mxu0 %vm14347_vm0, %v20660_v26 }
 0x207   : > { %12085 = vmatprep.mubr.msk.f32.mxu1 %vm14347_vm0, %v20660_v26  ;;  %v16363_v59 = vsel %vm2718_vm6, %v2752_v12, %v2754_v20 }
 0x208   : > { %v1823_v40 = vpop.f32.mrb[118].mxu0 }
 0x209   : > { %v16349_v42 = vadd.f32 %v1823_v40, %v16091_v1  ;;  %v2011_v46 = vpop.f32.mrb[118].mxu1  ;;  %v11760_v56 = vpop.f32.mrb[119].mxu0  ;;  %12172 = vmatmul.mubr.msk.f32.gmra.mrb[224].mxu0 %vm716_vm3, %v16127_v58  ;;  %v2756_v1 = vrot.slane %v15809_v21, 4 }
 0x20a   : > { %v16354_v45 = vadd.f32 %v2011_v46, %v15797_v53  ;;  %12086 = vmatmul.mubr.msk.f32.gmra.mrb[224].mxu1 %vm716_vm3, %v16345_v48  ;;  %v11801_v19 = vpop.f32.mrb[119].mxu1  ;;  %12174 = vmatprep.mubr.msk.f32.mxu0 %vm14347_vm0, %v20660_v26 }
 0x20b   : > { %12088 = vmatprep.mubr.msk.f32.mxu1 %vm14347_vm0, %v20660_v26  ;;  %v16381_v21 = vsel %vm2718_vm6, %v2754_v20, %v2756_v1 }
 0x20c   : > { %v1828_v41 = vpop.f32.mrb[120].mxu0 }
 0x20d   : > { %v16367_v58 = vadd.f32 %v1828_v41, %v16113_v61  ;;  %v2016_v53 = vpop.f32.mrb[120].mxu1  ;;  %v11763_v54 = vpop.f32.mrb[121].mxu0  ;;  %12175 = vmatmul.mubr.msk.f32.gmra.mrb[226].mxu0 %vm716_vm3, %v16149_v32  ;;  %v2758_v61 = vrot.slane %v15827_v31, 4 }
 0x20e   : > { %v16372_v10 = vadd.f32 %v2016_v53, %v15815_v13  ;;  %12089 = vmatmul.mubr.msk.f32.gmra.mrb[226].mxu1 %vm716_vm3, %v16363_v59  ;;  %v11804_v14 = vpop.f32.mrb[121].mxu1  ;;  %12177 = vmatprep.mubr.msk.f32.mxu0 %vm14347_vm0, %v20660_v26 }
 0x20f   : > { %12091 = vmatprep.mubr.msk.f32.mxu1 %vm14347_vm0, %v20660_v26  ;;  %v16399_v31 = vsel %vm2718_vm6, %v2756_v1, %v2758_v61 }
 0x210   : > { %v1833_v12 = vpop.f32.mrb[122].mxu0 }
 0x211   : > { %v16385_v32 = vadd.f32 %v1833_v12, %v16135_v9  ;;  %v2021_v13 = vpop.f32.mrb[122].mxu1  ;;  %v11766_v44 = vpop.f32.mrb[123].mxu0  ;;  %12178 = vmatmul.mubr.msk.f32.gmra.mrb[228].mxu0 %vm716_vm3, %v16171_v33  ;;  %v2760_v9 = vrot.slane %v15845_v6, 4 }
 0x212   : > { %v16390_v40 = vadd.f32 %v2021_v13, %v15833_v11  ;;  %12092 = vmatmul.mubr.msk.f32.gmra.mrb[228].mxu1 %vm716_vm3, %v16381_v21  ;;  %v11807_v46 = vpop.f32.mrb[123].mxu1  ;;  %12180 = vmatprep.mubr.msk.f32.mxu0 %vm14347_vm0, %v20660_v26 }
 0x213   : > { %12094 = vmatprep.mubr.msk.f32.mxu1 %vm14347_vm0, %v20660_v26  ;;  %v16417_v6 = vsel %vm2718_vm6, %v2758_v61, %v2760_v9 }
 0x214   : > { %v1838_v20 = vpop.f32.mrb[124].mxu0 }
 0x215   : > { %v16403_v33 = vadd.f32 %v1838_v20, %v16157_v39  ;;  %v2026_v11 = vpop.f32.mrb[124].mxu1  ;;  %v11769_v56 = vpop.f32.mrb[125].mxu0  ;;  %12181 = vmatmul.mubr.msk.f32.gmra.mrb[230].mxu0 %vm716_vm3, %v16196_v38  ;;  %v2762_v39 = vrot.slane %v15863_v50, 4 }
 0x216   : > { %v16408_v19 = vadd.f32 %v2026_v11, %v15851_v16  ;;  %12095 = vmatmul.mubr.msk.f32.gmra.mrb[230].mxu1 %vm716_vm3, %v16399_v31  ;;  %v11810_v41 = vpop.f32.mrb[125].mxu1  ;;  %12183 = vmatprep.mubr.msk.f32.mxu0 %vm14347_vm0, %v20660_v26 }
 0x217   : > { %12097 = vmatprep.mubr.msk.f32.mxu1 %vm14347_vm0, %v20660_v26  ;;  %v16435_v50 = vsel %vm2718_vm6, %v2760_v9, %v2762_v39 }
 0x218   : > { %v1843_v1 = vpop.f32.mrb[126].mxu0 }
 0x219   : > { %v16421_v38 = vadd.f32 %v1843_v1, %v16179_v62  ;;  %v2031_v16 = vpop.f32.mrb[126].mxu1  ;;  %v11772_v53 = vpop.f32.mrb[127].mxu0  ;;  %12184 = vmatmul.mubr.msk.f32.gmra.mrb[232].mxu0 %vm716_vm3, %v16216_v18  ;;  %v2764_v62 = vrot.slane %v15881_v55, 4  ;;  %v20691_v1 = vld [vmem:[#allocation35_spill] sm:$0xff] }
 0x21a   : > { %v16426_v54 = vadd.f32 %v2031_v16, %v15869_v23  ;;  %12098 = vmatmul.mubr.msk.f32.gmra.mrb[232].mxu1 %vm716_vm3, %v16417_v6  ;;  %v11813_v14 = vpop.f32.mrb[127].mxu1  ;;  %12186 = vmatprep.mubr.msk.f32.mxu0 %vm14347_vm0, %v20660_v26 }
 0x21b   : > { %12100 = vmatprep.mubr.msk.f32.mxu1 %vm14347_vm0, %v20660_v26  ;;  %v16453_v55 = vsel %vm2718_vm6, %v2762_v39, %v2764_v62  ;;  %v20692_v14 = vld [vmem:[#allocation36_spill] sm:$0xff] }
 0x21c   : > { %v1848_v61 = vpop.f32.mrb[128].mxu0 }
 0x21d   : > { %v16439_v18 = vadd.f32 %v1848_v61, %v16205_v24  ;;  %v2036_v23 = vpop.f32.mrb[128].mxu1  ;;  %v11775_v12 = vpop.f32.mrb[129].mxu0  ;;  %12187 = vmatmul.mubr.msk.f32.gmra.mrb[234].mxu0 %vm716_vm3, %v16235_v25  ;;  %v2766_v24 = vrot.slane %v15899_v60, 4 }
 0x21e   : > { %v16444_v13 = vadd.f32 %v2036_v23, %v15887_v30  ;;  %12101 = vmatmul.mubr.msk.f32.gmra.mrb[234].mxu1 %vm716_vm3, %v16435_v50  ;;  %v11816_v44 = vpop.f32.mrb[129].mxu1  ;;  %12189 = vmatprep.mubr.msk.f32.mxu0 %vm14347_vm0, %v20660_v26 }
 0x21f   : > { %12103 = vmatprep.mubr.msk.f32.mxu1 %vm14347_vm0, %v20660_v26  ;;  %v16471_v60 = vsel %vm2718_vm6, %v2764_v62, %v2766_v24  ;;  %v2770_v62 = vrot.slane %v20692_v14, 4 }
 0x220   : > { %v1853_v46 = vpop.f32.mrb[130].mxu0 }
 0x221   : > { %v16457_v25 = vadd.f32 %v1853_v46, %v16224_v47  ;;  %v2041_v30 = vpop.f32.mrb[130].mxu1  ;;  %v11778_v9 = vpop.f32.mrb[131].mxu0  ;;  %12190 = vmatmul.mubr.msk.f32.gmra.mrb[236].mxu0 %vm716_vm3, %v16253_v29  ;;  %v20690_v47 = vld [vmem:[#allocation34_spill] sm:$0xff] }
 0x222   : > { %v16462_v20 = vadd.f32 %v2041_v30, %v15905_v37  ;;  %12104 = vmatmul.mubr.msk.f32.gmra.mrb[236].mxu1 %vm716_vm3, %v16453_v55  ;;  %v11819_v11 = vpop.f32.mrb[131].mxu1  ;;  %12192 = vmatprep.mubr.msk.f32.mxu0 %vm14347_vm0, %v20660_v26  ;;  %v2768_v56 = vrot.slane %v20690_v47, 4 }
 0x223   : > { %12106 = vmatprep.mubr.msk.f32.mxu1 %vm14347_vm0, %v20660_v26 }
 0x224   : > { %v1858_v41 = vpop.f32.mrb[132].mxu0 }
 0x225   : > { %v16475_v29 = vadd.f32 %v1858_v41, %v16243_v34  ;;  %v2046_v37 = vpop.f32.mrb[132].mxu1  ;;  %v11781_v39 = vpop.f32.mrb[133].mxu0  ;;  %12193 = vmatmul.mubr.msk.f32.gmra.mrb[238].mxu0 %vm716_vm3, %v16270_v22  ;;  %v16489_v34 = vsel %vm2718_vm6, %v2766_v24, %v2768_v56  ;;  %v20693_v24 = vld [vmem:[#allocation37_spill] sm:$0xff] }
 0x226   : > { %v16480_v16 = vadd.f32 %v2046_v37, %v20691_v1  ;;  %12107 = vmatmul.mubr.msk.f32.gmra.mrb[238].mxu1 %vm716_vm3, %v16471_v60  ;;  %v11822_v53 = vpop.f32.mrb[133].mxu1  ;;  %12195 = vmatprep.mubr.msk.f32.mxu0 %vm14347_vm0, %v20660_v26  ;;  %v2772_v30 = vrot.slane %v20693_v24, 4 }
 0x227   : > { %12109 = vmatprep.mubr.msk.f32.mxu1 %vm14347_vm0, %v20660_v26 }
 0x228   : > { %v1863_v61 = vpop.f32.mrb[134].mxu0 }
 0x229   : > { %v16493_v22 = vadd.f32 %v1863_v61, %v16261_v0  ;;  %v2051_v23 = vpop.f32.mrb[134].mxu1  ;;  %v11784_v12 = vpop.f32.mrb[135].mxu0  ;;  %12196 = vmatmul.mubr.msk.f32.gmra.mrb[240].mxu0 %vm716_vm3, %v16287_v43  ;;  %v16507_v0 = vsel %vm2718_vm6, %v2768_v56, %v2770_v62  ;;  %v2774_v56 = vrot.slane %v15980_v15, 4 }
 0x22a   : > { %v16498_v44 = vadd.f32 %v2051_v23, %v15948_v49  ;;  %12110 = vmatmul.mubr.msk.f32.gmra.mrb[240].mxu1 %vm716_vm3, %v16489_v34  ;;  %v11825_v46 = vpop.f32.mrb[135].mxu1  ;;  %12198 = vmatprep.mubr.msk.f32.mxu0 %vm14347_vm0, %v20660_v26 }
 0x22b   : > { %12112 = vmatprep.mubr.msk.f32.mxu1 %vm14347_vm0, %v20660_v26  ;;  %v16543_v15 = vsel %vm2718_vm6, %v2772_v30, %v2774_v56 }
 0x22c   : > { %v2471_v9 = vpop.f32.mrb[136].mxu0 }
 0x22d   : > { %v2056_v43 = vpop.f32.mrb[136].mxu1  ;;  %v16511_v49 = vadd.f32 %v2471_v9, %v16278_v52  ;;  %v11914_v11 = vpop.f32.mrb[137].mxu0  ;;  %12199 = vmatmul.mubr.msk.f32.gmra.mrb[242].mxu0 %vm716_vm3, %v16308_v28  ;;  %v16525_v52 = vsel %vm2718_vm6, %v2770_v62, %v2772_v30  ;;  %v20695_v30 = vld [vmem:[#allocation39_spill] sm:$0xff] }
 0x22e   : > { %v16516_v47 = vadd.f32 %v2056_v43, %v15969_v63  ;;  %12113 = vmatmul.mubr.msk.f32.gmra.mrb[242].mxu1 %vm716_vm3, %v16507_v0  ;;  %v11828_v41 = vpop.f32.mrb[137].mxu1  ;;  %12201 = vmatprep.mubr.msk.f32.mxu0 %vm14347_vm0, %v20660_v26  ;;  %v20696_v11 = vld [vmem:[#allocation40_spill] sm:$0xff] }
 0x22f   : > { %12115 = vmatprep.mubr.msk.f32.mxu1 %vm14347_vm0, %v20660_v26  ;;  %v2780_v41 = vrot.slane %v20696_v11, 4 }
 0x230   : > { %v2476_v37 = vpop.f32.mrb[138].mxu0 }
 0x231   : > { %v2061_v28 = vpop.f32.mrb[138].mxu1  ;;  %v16529_v63 = vadd.f32 %v2476_v37, %v16299_v2  ;;  %v11917_v39 = vpop.f32.mrb[139].mxu0  ;;  %12202 = vmatmul.mubr.msk.f32.gmra.mrb[244].mxu0 %vm716_vm3, %v16327_v57  ;;  %v2776_v2 = vrot.slane %v15998_v4, 4 }
 0x232   : > { %v16534_v1 = vadd.f32 %v2061_v28, %v15987_v17  ;;  %12116 = vmatmul.mubr.msk.f32.gmra.mrb[244].mxu1 %vm716_vm3, %v16525_v52  ;;  %v11831_v53 = vpop.f32.mrb[139].mxu1  ;;  %12204 = vmatprep.mubr.msk.f32.mxu0 %vm14347_vm0, %v20660_v26  ;;  %v20697_v39 = vld [vmem:[#allocation41_spill] sm:$0xff] }
 0x233   : > { %12118 = vmatprep.mubr.msk.f32.mxu1 %vm14347_vm0, %v20660_v26  ;;  %v16561_v4 = vsel %vm2718_vm6, %v2774_v56, %v2776_v2 }
 0x234   : > { %v2481_v14 = vpop.f32.mrb[140].mxu0 }
 0x235   : > { %v2066_v57 = vpop.f32.mrb[140].mxu1  ;;  %v16547_v17 = vadd.f32 %v2481_v14, %v16318_v5  ;;  %v11920_v62 = vpop.f32.mrb[141].mxu0  ;;  %12205 = vmatmul.mubr.msk.f32.gmra.mrb[246].mxu0 %vm716_vm3, %v16345_v48  ;;  %v20694_v5 = vld [vmem:[#allocation38_spill] sm:$0xff] }
 0x236   : > { %v16552_v61 = vadd.f32 %v2066_v57, %v16006_v51  ;;  %12119 = vmatmul.mubr.msk.f32.gmra.mrb[246].mxu1 %vm716_vm3, %v16543_v15  ;;  %v11834_v23 = vpop.f32.mrb[141].mxu1  ;;  %12207 = vmatprep.mubr.msk.f32.mxu0 %vm14347_vm0, %v20660_v26  ;;  %v2778_v12 = vrot.slane %v20694_v5, 4 }
 0x237   : > { %12121 = vmatprep.mubr.msk.f32.mxu1 %vm14347_vm0, %v20660_v26 }
 0x238   : > { %v2486_v46 = vpop.f32.mrb[142].mxu0 }
 0x239   : > { %v2071_v48 = vpop.f32.mrb[142].mxu1  ;;  %v16565_v51 = vadd.f32 %v2486_v46, %v16336_v27  ;;  %v11923_v24 = vpop.f32.mrb[143].mxu0  ;;  %12208 = vmatmul.mubr.msk.f32.gmra.mrb[248].mxu0 %vm716_vm3, %v16363_v59  ;;  %v16579_v27 = vsel %vm2718_vm6, %v2776_v2, %v2778_v12  ;;  %v20698_v2 = vld [vmem:[#allocation42_spill] sm:$0xff]  ;;  %v20699_v46 = vld [vmem:[#allocation43_spill] sm:$0xff] }
 0x23a   : > { %v16570_v9 = vadd.f32 %v2071_v48, %v20695_v30  ;;  %12122 = vmatmul.mubr.msk.f32.gmra.mrb[248].mxu1 %vm716_vm3, %v16561_v4  ;;  %v11837_v43 = vpop.f32.mrb[143].mxu1  ;;  %12210 = vmatprep.mubr.msk.f32.mxu0 %vm14347_vm0, %v20660_v26  ;;  %v2782_v57 = vrot.slane %v20698_v2, 4 }
 0x23b   : > { %12124 = vmatprep.mubr.msk.f32.mxu1 %vm14347_vm0, %v20660_v26 }
 0x23c   : > { %v2491_v56 = vpop.f32.mrb[144].mxu0 }
 0x23d   : > { %v2076_v59 = vpop.f32.mrb[144].mxu1  ;;  %v16583_v37 = vadd.f32 %v2491_v56, %v16354_v45  ;;  %v11926_v28 = vpop.f32.mrb[145].mxu0  ;;  %12211 = vmatmul.mubr.msk.f32.gmra.mrb[250].mxu0 %vm716_vm3, %v16381_v21  ;;  %v16597_v45 = vsel %vm2718_vm6, %v2778_v12, %v2780_v41  ;;  %v20700_v12 = vld [vmem:[#allocation44_spill] sm:$0xff] }
 0x23e   : > { %v16588_v53 = vadd.f32 %v2076_v59, %v20697_v39  ;;  %12125 = vmatmul.mubr.msk.f32.gmra.mrb[250].mxu1 %vm716_vm3, %v16579_v27  ;;  %v11840_v14 = vpop.f32.mrb[145].mxu1  ;;  %12213 = vmatprep.mubr.msk.f32.mxu0 %vm14347_vm0, %v20660_v26  ;;  %v2784_v30 = vrot.slane %v20700_v12, 4  ;;  %v20701_v59 = vld [vmem:[#allocation45_spill] sm:$0xff] }
 0x23f   : > { %12127 = vmatprep.mubr.msk.f32.mxu1 %vm14347_vm0, %v20660_v26 }
 0x240   : > { %v2496_v62 = vpop.f32.mrb[146].mxu0 }
 0x241   : > { %v2081_v21 = vpop.f32.mrb[146].mxu1  ;;  %v16601_v23 = vadd.f32 %v2496_v62, %v16372_v10  ;;  %v11929_v5 = vpop.f32.mrb[147].mxu0  ;;  %12214 = vmatmul.mubr.msk.f32.gmra.mrb[252].mxu0 %vm716_vm3, %v16399_v31  ;;  %v16615_v10 = vsel %vm2718_vm6, %v2780_v41, %v2782_v57  ;;  %v20702_v41 = vld [vmem:[#allocation16_spill] sm:$0xff] }
 0x242   : > { %v16606_v48 = vadd.f32 %v2081_v21, %v20699_v46  ;;  %12128 = vmatmul.mubr.msk.f32.gmra.mrb[252].mxu1 %vm716_vm3, %v16597_v45  ;;  %v11843_v24 = vpop.f32.mrb[147].mxu1  ;;  %12216 = vmatprep.mubr.msk.f32.mxu0 %vm14347_vm0, %v20660_v26  ;;  %v2786_v14 = vrot.slane %v20702_v41, 4  ;;  %v20703_v5 = vld [vmem:[#allocation25_spill] sm:$0xff] }
 0x243   : > { %12130 = vmatprep.mubr.msk.f32.mxu1 %vm14347_vm0, %v20660_v26 }
 0x244   : > { %v2501_v43 = vpop.f32.mrb[148].mxu0 }
 0x245   : > { %v2086_v31 = vpop.f32.mrb[148].mxu1  ;;  %v16619_v11 = vadd.f32 %v2501_v43, %v16390_v40  ;;  %v11932_v56 = vpop.f32.mrb[149].mxu0  ;;  %12217 = vmatmul.mubr.msk.f32.gmra.mrb[254].mxu0 %vm716_vm3, %v16417_v6  ;;  %v16633_v40 = vsel %vm2718_vm6, %v2782_v57, %v2784_v30  ;;  %v20704_v57 = vld [vmem:[#allocation17_spill] sm:$0xff] }
 0x246   : > { %v16624_v28 = vadd.f32 %v2086_v31, %v20701_v59  ;;  %12131 = vmatmul.mubr.msk.f32.gmra.mrb[254].mxu1 %vm716_vm3, %v16615_v10  ;;  %v11846_v39 = vpop.f32.mrb[149].mxu1  ;;  %12219 = vmatprep.mubr.msk.f32.mxu0 %vm14347_vm0, %v20660_v26  ;;  %v2788_v12 = vrot.slane %v20704_v57, 4  ;;  %v20705_v59 = vld [vmem:[#allocation26_spill] sm:$0xff] }
 0x247   : > { %12133 = vmatprep.mubr.msk.f32.mxu1 %vm14347_vm0, %v20660_v26 }
 0x248   : > { %v2506_v2 = vpop.f32.mrb[150].mxu0 }
 0x249   : > { %v2091_v6 = vpop.f32.mrb[150].mxu1  ;;  %v16637_v62 = vadd.f32 %v2506_v2, %v16408_v19  ;;  %v11935_v21 = vpop.f32.mrb[151].mxu0  ;;  %12220 = vmatmul.mubr.msk.f32.gmra.mrb[0].mxu0 %vm716_vm3, %v16435_v50  ;;  %v16651_v19 = vsel %vm2718_vm6, %v2784_v30, %v2786_v14  ;;  %v20706_v30 = vld [vmem:[#allocation18_spill] sm:$0xff] }
 0x24a   : > { %v16642_v46 = vadd.f32 %v2091_v6, %v20703_v5  ;;  %12134 = vmatmul.mubr.msk.f32.gmra.mrb[0].mxu1 %vm716_vm3, %v16633_v40  ;;  %v11849_v24 = vpop.f32.mrb[151].mxu1  ;;  %12222 = vmatprep.mubr.msk.f32.mxu0 %vm14347_vm0, %v20660_v26  ;;  %v2790_v2 = vrot.slane %v20706_v30, 4  ;;  %v20709_v30 = vld [vmem:[#allocation28_spill] sm:$0xff] }
 0x24b   : > { %12136 = vmatprep.mubr.msk.f32.mxu1 %vm14347_vm0, %v20660_v26  ;;  %v20707_v24 = vld [vmem:[#allocation27_spill] sm:$0xff] }
 0x24c   : > { %v2511_v43 = vpop.f32.mrb[152].mxu0 }
 0x24d   : > { %v2096_v50 = vpop.f32.mrb[152].mxu1  ;;  %v16655_v31 = vadd.f32 %v2511_v43, %v16426_v54  ;;  %v11938_v56 = vpop.f32.mrb[153].mxu0  ;;  %12223 = vmatmul.mubr.msk.f32.gmra.mrb[2].mxu0 %vm716_vm3, %v16453_v55  ;;  %v16669_v54 = vsel %vm2718_vm6, %v2786_v14, %v2788_v12  ;;  %v20708_v14 = vld [vmem:[#allocation19_spill] sm:$0xff] }
 0x24e   : > { %v16660_v39 = vadd.f32 %v2096_v50, %v20705_v59  ;;  %12137 = vmatmul.mubr.msk.f32.gmra.mrb[2].mxu1 %vm716_vm3, %v16651_v19  ;;  %v11852_v41 = vpop.f32.mrb[153].mxu1  ;;  %12225 = vmatprep.mubr.msk.f32.mxu0 %vm14347_vm0, %v20660_v26  ;;  %v2792_v50 = vrot.slane %v20708_v14, 4 }
 0x24f   : > { %12139 = vmatprep.mubr.msk.f32.mxu1 %vm14347_vm0, %v20660_v26 }
 0x250   : > { %v2516_v6 = vpop.f32.mrb[154].mxu0 }
 0x251   : > { %v2101_v55 = vpop.f32.mrb[154].mxu1  ;;  %v16673_v21 = vadd.f32 %v2516_v6, %v16444_v13  ;;  %v11941_v5 = vpop.f32.mrb[155].mxu0  ;;  %12226 = vmatmul.mubr.msk.f32.gmra.mrb[4].mxu0 %vm716_vm3, %v16471_v60  ;;  %v16687_v13 = vsel %vm2718_vm6, %v2788_v12, %v2790_v2  ;;  %v20710_v12 = vld [vmem:[#allocation20_spill] sm:$0xff] }
 0x252   : > { %v16678_v57 = vadd.f32 %v2101_v55, %v20707_v24  ;;  %12140 = vmatmul.mubr.msk.f32.gmra.mrb[4].mxu1 %vm716_vm3, %v16669_v54  ;;  %v11855_v43 = vpop.f32.mrb[155].mxu1  ;;  %12228 = vmatprep.mubr.msk.f32.mxu0 %vm14347_vm0, %v20660_v26  ;;  %v2794_v5 = vrot.slane %v20710_v12, 4 }
 0x253   : > { %12142 = vmatprep.mubr.msk.f32.mxu1 %vm14347_vm0, %v20660_v26 }
 0x254   : > { %v2521_v56 = vpop.f32.mrb[156].mxu0 }
 0x255   : > { %v2106_v60 = vpop.f32.mrb[156].mxu1  ;;  %v16691_v59 = vadd.f32 %v2521_v56, %v16462_v20  ;;  %v11944_v41 = vpop.f32.mrb[157].mxu0  ;;  %12229 = vmatmul.mubr.msk.f32.gmra.mrb[6].mxu0 %vm716_vm3, %v16489_v34  ;;  %v16705_v20 = vsel %vm2718_vm6, %v2790_v2, %v2792_v50  ;;  %v20711_v56 = vld [vmem:[#allocation29_spill] sm:$0xff] }
 0x256   : > { %v16696_v6 = vadd.f32 %v2106_v60, %v20709_v30  ;;  %12143 = vmatmul.mubr.msk.f32.gmra.mrb[6].mxu1 %vm716_vm3, %v16687_v13  ;;  %v11858_v55 = vpop.f32.mrb[157].mxu1  ;;  %12231 = vmatprep.mubr.msk.f32.mxu0 %vm14347_vm0, %v20660_v26  ;;  %v14171_v2 = vld [vmem:[%s14531_s26 + $0x148] sm:$0xff] }
 0x257   : > { %12145 = vmatprep.mubr.msk.f32.mxu1 %vm14347_vm0, %v20660_v26  ;;  %v2796_v30 = vrot.slane %v14171_v2, 4 }
 0x258   : > { %v2526_v34 = vpop.f32.mrb[158].mxu0 }
 0x259   : > { %v2111_v24 = vpop.f32.mrb[158].mxu1  ;;  %v16709_v43 = vadd.f32 %v2526_v34, %v16480_v16  ;;  %v11947_v14 = vpop.f32.mrb[159].mxu0  ;;  %12232 = vmatmul.mubr.msk.f32.gmra.mrb[8].mxu0 %vm716_vm3, %v16507_v0  ;;  %v16723_v16 = vsel %vm2718_vm6, %v2792_v50, %v2794_v5  ;;  %v14172_v50 = vld [vmem:[%s14531_s26 + $0x150] sm:$0xff] }
 0x25a   : > { %v16714_v60 = vadd.f32 %v2111_v24, %v20711_v56  ;;  %12146 = vmatmul.mubr.msk.f32.gmra.mrb[8].mxu1 %vm716_vm3, %v16705_v20  ;;  %v11861_v41 = vpop.f32.mrb[159].mxu1  ;;  %12234 = vmatprep.mubr.msk.f32.mxu0 %vm14347_vm0, %v20660_v26  ;;  %v20712_v24 = vld [vmem:[#allocation21_spill] sm:$0xff] }
 0x25b   : > { %12148 = vmatprep.mubr.msk.f32.mxu1 %vm14347_vm0, %v20660_v26  ;;  %v16744_v41 = vrot.slane %v14172_v50, 4 }
 0x25c   : > { %v2531_v0 = vpop.f32.mrb[160].mxu0 }
 0x25d   : > { %v2116_v55 = vpop.f32.mrb[160].mxu1  ;;  %v16727_v12 = vadd.f32 %v2531_v0, %v16498_v44  ;;  %v11950_v34 = vpop.f32.mrb[161].mxu0  ;;  %12235 = vmatmul.mubr.msk.f32.gmra.mrb[10].mxu0 %vm716_vm3, %v16525_v52  ;;  %v16741_v44 = vsel %vm2718_vm6, %v2794_v5, %v2796_v30 }
 0x25e   : > { %v16732_v14 = vadd.f32 %v2116_v55, %v20712_v24  ;;  %12149 = vmatmul.mubr.msk.f32.gmra.mrb[10].mxu1 %vm716_vm3, %v16723_v16  ;;  %v11864_v56 = vpop.f32.mrb[161].mxu1  ;;  %12237 = vmatprep.mubr.msk.f32.mxu0 %vm14347_vm0, %v20660_v26  ;;  %v20713_v34 = vld [vmem:[#allocation30_spill] sm:$0xff] }
 0x25f   : > { %12151 = vmatprep.mubr.msk.f32.mxu1 %vm14347_vm0, %v20660_v26 }
 0x260   : > { %v2536_v52 = vpop.f32.mrb[162].mxu0 }
 0x261   : > { %v2121_v2 = vpop.f32.mrb[162].mxu1  ;;  %v16747_v0 = vadd.f32 %v2536_v52, %v16516_v47  ;;  %v11953_v55 = vpop.f32.mrb[163].mxu0  ;;  %12238 = vmatmul.mubr.msk.f32.gmra.mrb[12].mxu0 %vm716_vm3, %v16543_v15  ;;  %v16762_v47 = vsel %vm2718_vm6, %v2796_v30, %v16744_v41 }
 0x262   : > { %v16752_v24 = vadd.f32 %v2121_v2, %v20713_v34  ;;  %12152 = vmatmul.mubr.msk.f32.gmra.mrb[12].mxu1 %vm716_vm3, %v16741_v44  ;;  %v11867_v5 = vpop.f32.mrb[163].mxu1  ;;  %12240 = vmatprep.mubr.msk.f32.mxu0 %vm14347_vm0, %v20660_v26  ;;  %v16783_v34 = vld [vmem:[%s14531_s26 + $0x28] sm:$0xff] }
 0x263   : > { %12154 = vmatprep.mubr.msk.f32.mxu1 %vm14347_vm0, %v20660_v26 }
 0x264   : > { %v2541_v15 = vpop.f32.mrb[164].mxu0 }
 0x265   : > { %v2126_v56 = vpop.f32.mrb[164].mxu1  ;;  %v16765_v50 = vadd.f32 %v2541_v15, %v16534_v1  ;;  %v11956_v52 = vpop.f32.mrb[165].mxu0  ;;  %12241 = vmatmul.mubr.msk.f32.gmra.mrb[14].mxu0 %vm716_vm3, %v16561_v4  ;;  %v16779_v1 = vld [vmem:[%s14531_s26 + $0x20] sm:$0xff] }
 0x266   : > { %v16770_v2 = vadd.f32 %v2126_v56, %v16257_v7  ;;  %12155 = vmatmul.mubr.msk.f32.gmra.mrb[14].mxu1 %vm716_vm3, %v16762_v47  ;;  %v11870_v55 = vpop.f32.mrb[165].mxu1  ;;  %12243 = vmatprep.mubr.msk.f32.mxu0 %vm14347_vm0, %v20660_v26  ;;  %v3527_v30 = vrot.slane %v16779_v1, 5  ;;  %v3528_v7 = vrot.slane %v16783_v34, 5 }
 0x267   : > { %20714 = vst [vmem:[#allocation22_spill] sm:$0xff] %v16765_v50  ;;  %12157 = vmatprep.mubr.msk.f32.mxu1 %vm14347_vm0, %v20660_v26 }
 0x268   : > { %v2546_v4 = vpop.f32.mrb[166].mxu0 }
 0x269   : > { %v2131_v5 = vpop.f32.mrb[166].mxu1  ;;  %v16787_v15 = vadd.f32 %v2546_v4, %v16552_v61  ;;  %v11959_v56 = vpop.f32.mrb[167].mxu0  ;;  %12244 = vmatmul.mubr.msk.f32.gmra.mrb[16].mxu0 %vm716_vm3, %v16579_v27  ;;  %v3529_v61 = vsel %vm799_vm1, %v3527_v30, %v3528_v7  ;;  %v16802_v4 = vld [vmem:[%s14531_s26 + $0x30] sm:$0xff]  ;;  %v16820_v30 = vld [vmem:[%s14531_s26 + $0x38] sm:$0xff] }
 0x26a   : > { %v16792_v52 = vadd.f32 %v2131_v5, %v16274_v35  ;;  %12158 = vmatmul.mubr.msk.f32.gmra.mrb[16].mxu1 %vm716_vm3, %v16744_v41  ;;  %v11873_v55 = vpop.f32.mrb[167].mxu1  ;;  %12246 = vmatprep.mubr.msk.f32.mxu0 %vm14347_vm0, %v20660_v26  ;;  %v3530_v27 = vrot.slane %v16802_v4, 5 }
 0x26b   : > { %20715 = vst [vmem:[#allocation31_spill] sm:$0xff] %v16787_v15  ;;  %12287 = vmatprep.mubr.msk.f32.mxu1 %vm14347_vm0, %v20660_v26 }
 0x26c   : > { %v2551_v56 = vpop.f32.mrb[168].mxu0 }
 0x26d   : > { %v2136_v35 = vpop.f32.mrb[168].mxu1  ;;  %v16806_v5 = vadd.f32 %v2551_v56, %v16570_v9  ;;  %v11962_v15 = vpop.f32.mrb[169].mxu0  ;;  %12247 = vmatmul.mubr.msk.f32.gmra.mrb[18].mxu0 %vm716_vm3, %v16597_v45  ;;  %v3531_v9 = vsel %vm799_vm1, %v3528_v7, %v3530_v27  ;;  %v16838_v7 = vld [vmem:[%s14531_s26 + $0x40] sm:$0xff] }
 0x26e   : > { %v16811_v55 = vadd.f32 %v2136_v35, %v16294_v36  ;;  %12288 = vmatmul.mubr.msk.f32.vlgmr.msra.gmra.mrb[18].mxu1 %vm716_vm3, %v3529_v61  ;;  %v11876_v50 = vpop.f32.mrb[169].mxu1  ;;  %12249 = vmatprep.mubr.msk.f32.mxu0 %vm14347_vm0, %v20660_v26  ;;  %v3532_v15 = vrot.slane %v16820_v30, 5 }
 0x26f   : > { %12290 = vmatprep.mubr.msk.f32.mxu1 %vm14347_vm0, %v20660_v26 }
 0x270   : > { %v2556_v45 = vpop.f32.mrb[170].mxu0 }
 0x271   : > { %v2141_v56 = vpop.f32.mrb[170].mxu1  ;;  %v16824_v36 = vadd.f32 %v2556_v45, %v16588_v53  ;;  %v11965_v61 = vpop.f32.mrb[171].mxu0  ;;  %12250 = vmatmul.mubr.msk.f32.gmra.mrb[20].mxu0 %vm716_vm3, %v16615_v10  ;;  %v3533_v53 = vsel %vm799_vm1, %v3530_v27, %v3532_v15  ;;  %v3534_v45 = vrot.slane %v16838_v7, 5  ;;  %v16856_v27 = vld [vmem:[%s14531_s26 + $0x48] sm:$0xff] }
 0x272   : > { %v16829_v50 = vadd.f32 %v2141_v56, %v16313_v3  ;;  %12291 = vmatmul.mubr.msk.f32.gmra.mrb[20].mxu1 %vm716_vm3, %v3531_v9  ;;  %v11879_v35 = vpop.f32.mrb[171].mxu1  ;;  %12252 = vmatprep.mubr.msk.f32.mxu0 %vm14347_vm0, %v20660_v26 }
 0x273   : > { %12293 = vmatprep.mubr.msk.f32.mxu1 %vm14347_vm0, %v20660_v26 }
 0x274   : > { %v2561_v10 = vpop.f32.mrb[172].mxu0 }
 0x275   : > { %v2146_v61 = vpop.f32.mrb[172].mxu1  ;;  %v16842_v3 = vadd.f32 %v2561_v10, %v16606_v48  ;;  %v11968_v9 = vpop.f32.mrb[173].mxu0  ;;  %12253 = vmatmul.mubr.msk.f32.gmra.mrb[22].mxu0 %vm716_vm3, %v16633_v40  ;;  %v3535_v48 = vsel %vm799_vm1, %v3532_v15, %v3534_v45  ;;  %v3536_v10 = vrot.slane %v16856_v27, 5  ;;  %v16874_v15 = vld [vmem:[%s14531_s26 + $0x50] sm:$0xff] }
 0x276   : > { %v16847_v56 = vadd.f32 %v2146_v61, %v16331_v8  ;;  %12294 = vmatmul.mubr.msk.f32.gmra.mrb[22].mxu1 %vm716_vm3, %v3533_v53  ;;  %v11882_v35 = vpop.f32.mrb[173].mxu1  ;;  %12255 = vmatprep.mubr.msk.f32.mxu0 %vm14347_vm0, %v20660_v26 }
 0x277   : > { %12296 = vmatprep.mubr.msk.f32.mxu1 %vm14347_vm0, %v20660_v26 }
 0x278   : > { %v2566_v40 = vpop.f32.mrb[174].mxu0 }
 0x279   : > { %v2151_v9 = vpop.f32.mrb[174].mxu1  ;;  %v16860_v8 = vadd.f32 %v2566_v40, %v16624_v28  ;;  %v11971_v53 = vpop.f32.mrb[175].mxu0  ;;  %12256 = vmatmul.mubr.msk.f32.gmra.mrb[24].mxu0 %vm716_vm3, %v16651_v19  ;;  %v3537_v28 = vsel %vm799_vm1, %v3534_v45, %v3536_v10  ;;  %v3538_v40 = vrot.slane %v16874_v15, 5  ;;  %v16892_v45 = vld [vmem:[%s14531_s26 + $0x58] sm:$0xff] }
 0x27a   : > { %v16865_v61 = vadd.f32 %v2151_v9, %v16349_v42  ;;  %12297 = vmatmul.mubr.msk.f32.gmra.mrb[24].mxu1 %vm716_vm3, %v3535_v48  ;;  %v11885_v35 = vpop.f32.mrb[175].mxu1  ;;  %12258 = vmatprep.mubr.msk.f32.mxu0 %vm14347_vm0, %v20660_v26 }
 0x27b   : > { %12299 = vmatprep.mubr.msk.f32.mxu1 %vm14347_vm0, %v20660_v26 }
 0x27c   : > { %v2571_v19 = vpop.f32.mrb[176].mxu0 }
 0x27d   : > { %v2156_v53 = vpop.f32.mrb[176].mxu1  ;;  %v16878_v42 = vadd.f32 %v2571_v19, %v16642_v46  ;;  %v11974_v48 = vpop.f32.mrb[177].mxu0  ;;  %12259 = vmatmul.mubr.msk.f32.gmra.mrb[26].mxu0 %vm716_vm3, %v16669_v54  ;;  %v3539_v46 = vsel %vm799_vm1, %v3536_v10, %v3538_v40  ;;  %v3540_v19 = vrot.slane %v16892_v45, 5  ;;  %v16910_v10 = vld [vmem:[%s14531_s26 + $0x60] sm:$0xff] }
 0x27e   : > { %v16883_v9 = vadd.f32 %v2156_v53, %v16367_v58  ;;  %12300 = vmatmul.mubr.msk.f32.gmra.mrb[26].mxu1 %vm716_vm3, %v3537_v28  ;;  %v11888_v35 = vpop.f32.mrb[177].mxu1  ;;  %12261 = vmatprep.mubr.msk.f32.mxu0 %vm14347_vm0, %v20660_v26 }
 0x27f   : > { %12302 = vmatprep.mubr.msk.f32.mxu1 %vm14347_vm0, %v20660_v26 }
 0x280   : > { %v2576_v54 = vpop.f32.mrb[178].mxu0 }
 0x281   : > { %v2161_v48 = vpop.f32.mrb[178].mxu1  ;;  %v16896_v58 = vadd.f32 %v2576_v54, %v16660_v39  ;;  %v11977_v28 = vpop.f32.mrb[179].mxu0  ;;  %12262 = vmatmul.mubr.msk.f32.gmra.mrb[28].mxu0 %vm716_vm3, %v16687_v13  ;;  %v3541_v39 = vsel %vm799_vm1, %v3538_v40, %v3540_v19  ;;  %v3542_v54 = vrot.slane %v16910_v10, 5  ;;  %v16928_v40 = vld [vmem:[%s14531_s26 + $0x68] sm:$0xff] }
 0x282   : > { %v16901_v53 = vadd.f32 %v2161_v48, %v16385_v32  ;;  %12303 = vmatmul.mubr.msk.f32.gmra.mrb[28].mxu1 %vm716_vm3, %v3539_v46  ;;  %v11891_v35 = vpop.f32.mrb[179].mxu1  ;;  %12264 = vmatprep.mubr.msk.f32.mxu0 %vm14347_vm0, %v20660_v26 }
 0x283   : > { %12305 = vmatprep.mubr.msk.f32.mxu1 %vm14347_vm0, %v20660_v26 }
 0x284   : > { %v2581_v13 = vpop.f32.mrb[180].mxu0 }
 0x285   : > { %v2166_v28 = vpop.f32.mrb[180].mxu1  ;;  %v16914_v32 = vadd.f32 %v2581_v13, %v16678_v57  ;;  %v11980_v46 = vpop.f32.mrb[181].mxu0  ;;  %12265 = vmatmul.mubr.msk.f32.gmra.mrb[30].mxu0 %vm716_vm3, %v16705_v20  ;;  %v3543_v57 = vsel %vm799_vm1, %v3540_v19, %v3542_v54  ;;  %v3544_v20 = vrot.slane %v16928_v40, 5 }
 0x286   : > { %v16919_v48 = vadd.f32 %v2166_v28, %v16403_v33  ;;  %12306 = vmatmul.mubr.msk.f32.gmra.mrb[30].mxu1 %vm716_vm3, %v3541_v39  ;;  %v11894_v35 = vpop.f32.mrb[181].mxu1  ;;  %12267 = vmatprep.mubr.msk.f32.mxu0 %vm14347_vm0, %v20660_v26 }
 0x287   : > { %20716 = vst [vmem:[#allocation23_spill] sm:$0xff] %v16914_v32  ;;  %12308 = vmatprep.mubr.msk.f32.mxu1 %vm14347_vm0, %v20660_v26  ;;  %v3545_v35 = vsel %vm799_vm1, %v3542_v54, %v3544_v20 }
 0x288   : > { %v2586_v13 = vpop.f32.mrb[182].mxu0 }
 0x289   : > { %v2171_v33 = vpop.f32.mrb[182].mxu1  ;;  %v16932_v28 = vadd.f32 %v2586_v13, %v16696_v6  ;;  %v11983_v39 = vpop.f32.mrb[183].mxu0  ;;  %12268 = vmatmul.mubr.msk.f32.gmra.mrb[32].mxu0 %vm716_vm3, %v16723_v16  ;;  %v16946_v6 = vld [vmem:[%s14531_s26 + $0x70] sm:$0xff]  ;;  %v16950_v16 = vld [vmem:[%s14531_s26 + $0x158] sm:$0xff] }
 0x28a   : > { %v16937_v46 = vadd.f32 %v2171_v33, %v16421_v38  ;;  %12309 = vmatmul.mubr.msk.f32.gmra.mrb[32].mxu1 %vm716_vm3, %v3543_v57  ;;  %v11897_v19 = vpop.f32.mrb[183].mxu1  ;;  %12270 = vmatprep.mubr.msk.f32.mxu0 %vm14347_vm0, %v20660_v26  ;;  %v3546_v13 = vrot.slane %v16946_v6, 5  ;;  %20718 = vst [vmem:[#allocation24_spill] sm:$0xff] %v16950_v16 }
 0x28b   : > { %20717 = vst [vmem:[#allocation32_spill] sm:$0xff] %v16932_v28  ;;  %12311 = vmatprep.mubr.msk.f32.mxu1 %vm14347_vm0, %v20660_v26  ;;  %v3200_v28 = vrot.slane %v16950_v16, 4 }
 0x28c   : > { %v2591_v38 = vpop.f32.mrb[184].mxu0 }
 0x28d   : > { %v2176_v33 = vpop.f32.mrb[184].mxu1  ;;  %v16953_v57 = vadd.f32 %v2591_v38, %v16714_v60  ;;  %v11986_v39 = vpop.f32.mrb[185].mxu0  ;;  %12271 = vmatmul.mubr.msk.f32.gmra.mrb[34].mxu0 %vm716_vm3, %v16741_v44  ;;  %v3547_v60 = vsel %vm799_vm1, %v3544_v20, %v3546_v13  ;;  %v16968_v38 = vld [vmem:[%s14531_s26 + $0x78] sm:$0xff] }
 0x28e   : > { %v16958_v19 = vadd.f32 %v2176_v33, %v16439_v18  ;;  %12312 = vmatmul.mubr.msk.f32.gmra.mrb[34].mxu1 %vm716_vm3, %v3545_v35  ;;  %v11900_v54 = vpop.f32.mrb[185].mxu1  ;;  %12273 = vmatprep.mubr.msk.f32.mxu0 %vm14347_vm0, %v20660_v26  ;;  %v3548_v44 = vrot.slane %v16968_v38, 5  ;;  %v16972_v18 = vld [vmem:[%s14531_s26 + $0x160] sm:$0xff] }
 0x28f   : > { %20719 = vst [vmem:[#allocation33_spill] sm:$0xff] %v16953_v57  ;;  %12314 = vmatprep.mubr.msk.f32.mxu1 %vm14347_vm0, %v20660_v26  ;;  %v3201_v57 = vsel %vm2718_vm6, %v16744_v41, %v3200_v28  ;;  %v3202_v32 = vrot.slane %v16972_v18, 4 }
 0x290   : > { %v2596_v33 = vpop.f32.mrb[186].mxu0 }
 0x291   : > { %v2181_v35 = vpop.f32.mrb[186].mxu1  ;;  %v16975_v39 = vadd.f32 %v2596_v33, %v16732_v14  ;;  %v11989_v54 = vpop.f32.mrb[187].mxu0  ;;  %12274 = vmatmul.mubr.msk.f32.gmra.mrb[36].mxu0 %vm716_vm3, %v16762_v47  ;;  %v3549_v14 = vsel %vm799_vm1, %v3546_v13, %v3548_v44  ;;  %v16992_v47 = vld [vmem:[%s14531_s26 + $0x80] sm:$0xff]  ;;  %v3203_v13 = vsel %vm2718_vm6, %v3200_v28, %v3202_v32 }
 0x292   : > { %v16980_v16 = vadd.f32 %v2181_v35, %v16457_v25  ;;  %12315 = vmatmul.mubr.msk.f32.gmra.mrb[36].mxu1 %vm716_vm3, %v3547_v60  ;;  %v11903_v20 = vpop.f32.mrb[187].mxu1  ;;  %12276 = vmatprep.mubr.msk.f32.mxu0 %vm14347_vm0, %v20660_v26  ;;  %v3550_v25 = vrot.slane %v16992_v47, 5 }
 0x293   : > { %12317 = vmatprep.mubr.msk.f32.mxu1 %vm14347_vm0, %v20660_v26 }
 0x294   : > { %v2601_v60 = vpop.f32.mrb[188].mxu0 }
 0x295   : > { %v2186_v33 = vpop.f32.mrb[188].mxu1  ;;  %v16996_v35 = vadd.f32 %v2601_v60, %v16752_v24  ;;  %v11992_v54 = vpop.f32.mrb[189].mxu0  ;;  %12277 = vmatmul.mubr.msk.f32.gmra.mrb[38].mxu0 %vm716_vm3, %v3201_v57  ;;  %v3551_v24 = vsel %vm799_vm1, %v3548_v44, %v3550_v25  ;;  %v17010_v60 = vld [vmem:[%s14531_s26 + $0x88] sm:$0xff]  ;;  %v4009_v44 = vrot.slane %v16779_v1, 6 }
 0x296   : > { %v17000_v41 = vadd.f32 %v2186_v33, %v16475_v29  ;;  %12318 = vmatmul.mubr.msk.f32.gmra.mrb[38].mxu1 %vm716_vm3, %v3549_v14  ;;  %v11906_v20 = vpop.f32.mrb[189].mxu1  ;;  %12279 = vmatprep.mubr.msk.f32.mxu0 %vm14347_vm0, %v20660_v26  ;;  %v3552_v57 = vrot.slane %v17010_v60, 5 }
 0x297   : > { %20720 = vst [vmem:[#allocation34_spill] sm:$0xff] %v16996_v35  ;;  %12320 = vmatprep.mubr.msk.f32.mxu1 %vm14347_vm0, %v20660_v26  ;;  %v4010_v35 = vrot.slane %v16783_v34, 6 }
 0x298   : > { %v2606_v29 = vpop.f32.mrb[190].mxu0 }
 0x299   : > { %v2191_v33 = vpop.f32.mrb[190].mxu1  ;;  %v17014_v14 = vadd.f32 %v2606_v29, %v16770_v2  ;;  %v11995_v54 = vpop.f32.mrb[191].mxu0  ;;  %12280 = vmatmul.mubr.msk.f32.gmra.mrb[40].mxu0 %vm716_vm3, %v3203_v13  ;;  %v3553_v2 = vsel %vm799_vm1, %v3550_v25, %v3552_v57  ;;  %v17029_v29 = vld [vmem:[%s14531_s26 + $0x90] sm:$0xff]  ;;  %v4011_v25 = vsel %vm4008_vm7, %v4009_v44, %v4010_v35 }
 0x29a   : > { %v17018_v28 = vadd.f32 %v2191_v33, %v16493_v22  ;;  %12321 = vmatmul.mubr.msk.f32.gmra.mrb[40].mxu1 %vm716_vm3, %v3551_v24  ;;  %v11909_v20 = vpop.f32.mrb[191].mxu1  ;;  %12282 = vmatprep.mubr.msk.f32.mxu0 %vm14347_vm0, %v20660_v26  ;;  %v3554_v22 = vrot.slane %v17029_v29, 5 }
 0x29b   : > { %12323 = vmatprep.mubr.msk.f32.mxu1 %vm14347_vm0, %v20660_v26  ;;  %v4012_v20 = vrot.slane %v16802_v4, 6 }
 0x29c   : > { %v2611_v13 = vpop.f32.mrb[192].mxu0 }
 0x29d   : > { %v17033_v24 = vadd.f32 %v2611_v13, %v16792_v52  ;;  %v2951_v33 = vpop.f32.mrb[192].mxu1  ;;  %v11998_v54 = vpop.f32.mrb[193].mxu0  ;;  %12283 = vmatmul.mubr.msk.f32.gmra.mrb[42].mxu0 %vm716_vm3, %v3202_v32  ;;  %v3555_v52 = vsel %vm799_vm1, %v3552_v57, %v3554_v22  ;;  %v17048_v32 = vld [vmem:[%s14531_s26 + $0x98] sm:$0xff]  ;;  %v4013_v57 = vsel %vm4008_vm7, %v4010_v35, %v4012_v20 }
 0x29e   : > { %v17037_v1 = vadd.f32 %v2951_v33, %v16511_v49  ;;  %12324 = vmatmul.mubr.msk.f32.gmra.mrb[42].mxu1 %vm716_vm3, %v3553_v2  ;;  %v12039_v34 = vpop.f32.mrb[193].mxu1  ;;  %12412 = vmatprep.mubr.msk.f32.mxu0 %vm14347_vm0, %v20660_v26  ;;  %v3556_v49 = vrot.slane %v17048_v32, 5 }
 0x29f   : > { %12326 = vmatprep.mubr.msk.f32.mxu1 %vm14347_vm0, %v20660_v26  ;;  %v4014_v34 = vrot.slane %v16820_v30, 6 }
 0x2a0   : > { %v2616_v13 = vpop.f32.mrb[194].mxu0 }
 0x2a1   : > { %v17052_v2 = vadd.f32 %v2616_v13, %v16811_v55  ;;  %v2956_v33 = vpop.f32.mrb[194].mxu1  ;;  %v12001_v54 = vpop.f32.mrb[195].mxu0  ;;  %12413 = vmatmul.mubr.msk.f32.vlgmr.msra.gmra.mrb[44].mxu0 %vm716_vm3, %v4011_v25  ;;  %v3557_v55 = vsel %vm799_vm1, %v3554_v22, %v3556_v49  ;;  %v17067_v25 = vld [vmem:[%s14531_s26 + $0xa0] sm:$0xff]  ;;  %v4015_v22 = vsel %vm4008_vm7, %v4012_v20, %v4014_v34 }
 0x2a2   : > { %v17056_v4 = vadd.f32 %v2956_v33, %v16529_v63  ;;  %12327 = vmatmul.mubr.msk.f32.gmra.mrb[44].mxu1 %vm716_vm3, %v3555_v52  ;;  %v12042_v44 = vpop.f32.mrb[195].mxu1  ;;  %12415 = vmatprep.mubr.msk.f32.mxu0 %vm14347_vm0, %v20660_v26  ;;  %v3558_v63 = vrot.slane %v17067_v25, 5 }
 0x2a3   : > { %12329 = vmatprep.mubr.msk.f32.mxu1 %vm14347_vm0, %v20660_v26  ;;  %v4016_v44 = vrot.slane %v16838_v7, 6 }
 0x2a4   : > { %v2621_v13 = vpop.f32.mrb[196].mxu0 }
 0x2a5   : > { %v17071_v52 = vadd.f32 %v2621_v13, %v16829_v50  ;;  %v2961_v33 = vpop.f32.mrb[196].mxu1  ;;  %v12004_v54 = vpop.f32.mrb[197].mxu0  ;;  %12416 = vmatmul.mubr.msk.f32.gmra.mrb[46].mxu0 %vm716_vm3, %v4013_v57  ;;  %v3559_v50 = vsel %vm799_vm1, %v3556_v49, %v3558_v63  ;;  %v17086_v57 = vld [vmem:[%s14531_s26 + $0xa8] sm:$0xff]  ;;  %v4017_v49 = vsel %vm4008_vm7, %v4014_v34, %v4016_v44 }
 0x2a6   : > { %v17075_v30 = vadd.f32 %v2961_v33, %v16547_v17  ;;  %12330 = vmatmul.mubr.msk.f32.gmra.mrb[46].mxu1 %vm716_vm3, %v3557_v55  ;;  %v12045_v35 = vpop.f32.mrb[197].mxu1  ;;  %12418 = vmatprep.mubr.msk.f32.mxu0 %vm14347_vm0, %v20660_v26  ;;  %v3560_v17 = vrot.slane %v17086_v57, 5 }
 0x2a7   : > { %12332 = vmatprep.mubr.msk.f32.mxu1 %vm14347_vm0, %v20660_v26  ;;  %v4018_v35 = vrot.slane %v16856_v27, 6 }
 0x2a8   : > { %v2626_v13 = vpop.f32.mrb[198].mxu0 }
 0x2a9   : > { %v17090_v55 = vadd.f32 %v2626_v13, %v16847_v56  ;;  %v2966_v33 = vpop.f32.mrb[198].mxu1  ;;  %v12007_v54 = vpop.f32.mrb[199].mxu0  ;;  %12419 = vmatmul.mubr.msk.f32.gmra.mrb[48].mxu0 %vm716_vm3, %v4015_v22  ;;  %v3561_v56 = vsel %vm799_vm1, %v3558_v63, %v3560_v17  ;;  %v17105_v22 = vld [vmem:[%s14531_s26 + $0xb0] sm:$0xff]  ;;  %v4019_v63 = vsel %vm4008_vm7, %v4016_v44, %v4018_v35 }
 0x2aa   : > { %v17094_v7 = vadd.f32 %v2966_v33, %v16565_v51  ;;  %12333 = vmatmul.mubr.msk.f32.gmra.mrb[48].mxu1 %vm716_vm3, %v3559_v50  ;;  %v12048_v20 = vpop.f32.mrb[199].mxu1  ;;  %12421 = vmatprep.mubr.msk.f32.mxu0 %vm14347_vm0, %v20660_v26  ;;  %v3562_v51 = vrot.slane %v17105_v22, 5 }
 0x2ab   : > { %12335 = vmatprep.mubr.msk.f32.mxu1 %vm14347_vm0, %v20660_v26  ;;  %v4020_v20 = vrot.slane %v16874_v15, 6 }
 0x2ac   : > { %v2631_v13 = vpop.f32.mrb[200].mxu0 }
 0x2ad   : > { %v17109_v50 = vadd.f32 %v2631_v13, %v16865_v61  ;;  %v2971_v33 = vpop.f32.mrb[200].mxu1  ;;  %v12010_v54 = vpop.f32.mrb[201].mxu0  ;;  %12422 = vmatmul.mubr.msk.f32.gmra.mrb[50].mxu0 %vm716_vm3, %v4017_v49  ;;  %v3563_v61 = vsel %vm799_vm1, %v3560_v17, %v3562_v51  ;;  %v17124_v49 = vld [vmem:[%s14531_s26 + $0xb8] sm:$0xff]  ;;  %v4021_v17 = vsel %vm4008_vm7, %v4018_v35, %v4020_v20 }
 0x2ae   : > { %v17113_v27 = vadd.f32 %v2971_v33, %v16583_v37  ;;  %12336 = vmatmul.mubr.msk.f32.gmra.mrb[50].mxu1 %vm716_vm3, %v3561_v56  ;;  %v12051_v34 = vpop.f32.mrb[201].mxu1  ;;  %12424 = vmatprep.mubr.msk.f32.mxu0 %vm14347_vm0, %v20660_v26  ;;  %v3564_v37 = vrot.slane %v17124_v49, 5 }
 0x2af   : > { %12338 = vmatprep.mubr.msk.f32.mxu1 %vm14347_vm0, %v20660_v26  ;;  %v4022_v34 = vrot.slane %v16892_v45, 6 }
 0x2b0   : > { %v2636_v13 = vpop.f32.mrb[202].mxu0 }
 0x2b1   : > { %v17128_v56 = vadd.f32 %v2636_v13, %v16883_v9  ;;  %v2976_v33 = vpop.f32.mrb[202].mxu1  ;;  %v12013_v54 = vpop.f32.mrb[203].mxu0  ;;  %12425 = vmatmul.mubr.msk.f32.gmra.mrb[52].mxu0 %vm716_vm3, %v4019_v63  ;;  %v3565_v9 = vsel %vm799_vm1, %v3562_v51, %v3564_v37  ;;  %v17143_v63 = vld [vmem:[%s14531_s26 + $0xc0] sm:$0xff]  ;;  %v4023_v51 = vsel %vm4008_vm7, %v4020_v20, %v4022_v34 }
 0x2b2   : > { %v17132_v15 = vadd.f32 %v2976_v33, %v16601_v23  ;;  %12339 = vmatmul.mubr.msk.f32.gmra.mrb[52].mxu1 %vm716_vm3, %v3563_v61  ;;  %v12054_v44 = vpop.f32.mrb[203].mxu1  ;;  %12427 = vmatprep.mubr.msk.f32.mxu0 %vm14347_vm0, %v20660_v26  ;;  %v3566_v23 = vrot.slane %v17143_v63, 5 }
 0x2b3   : > { %12341 = vmatprep.mubr.msk.f32.mxu1 %vm14347_vm0, %v20660_v26  ;;  %v4024_v44 = vrot.slane %v16910_v10, 6 }
 0x2b4   : > { %v2641_v13 = vpop.f32.mrb[204].mxu0 }
 0x2b5   : > { %v17147_v61 = vadd.f32 %v2641_v13, %v16901_v53  ;;  %v2981_v33 = vpop.f32.mrb[204].mxu1  ;;  %v12016_v54 = vpop.f32.mrb[205].mxu0  ;;  %12428 = vmatmul.mubr.msk.f32.gmra.mrb[54].mxu0 %vm716_vm3, %v4021_v17  ;;  %v3567_v53 = vsel %vm799_vm1, %v3564_v37, %v3566_v23  ;;  %v17162_v17 = vld [vmem:[%s14531_s26 + $0xc8] sm:$0xff]  ;;  %v4025_v37 = vsel %vm4008_vm7, %v4022_v34, %v4024_v44 }
 0x2b6   : > { %v17151_v45 = vadd.f32 %v2981_v33, %v16619_v11  ;;  %12342 = vmatmul.mubr.msk.f32.gmra.mrb[54].mxu1 %vm716_vm3, %v3565_v9  ;;  %v12057_v35 = vpop.f32.mrb[205].mxu1  ;;  %12430 = vmatprep.mubr.msk.f32.mxu0 %vm14347_vm0, %v20660_v26  ;;  %v3568_v11 = vrot.slane %v17162_v17, 5 }
 0x2b7   : > { %12344 = vmatprep.mubr.msk.f32.mxu1 %vm14347_vm0, %v20660_v26  ;;  %v4026_v35 = vrot.slane %v16928_v40, 6 }
 0x2b8   : > { %v2646_v13 = vpop.f32.mrb[206].mxu0 }
 0x2b9   : > { %v17166_v9 = vadd.f32 %v2646_v13, %v16919_v48  ;;  %v2986_v33 = vpop.f32.mrb[206].mxu1  ;;  %v12019_v54 = vpop.f32.mrb[207].mxu0  ;;  %12431 = vmatmul.mubr.msk.f32.gmra.mrb[56].mxu0 %vm716_vm3, %v4023_v51  ;;  %v3569_v48 = vsel %vm799_vm1, %v3566_v23, %v3568_v11  ;;  %v17181_v51 = vld [vmem:[%s14531_s26 + $0xd0] sm:$0xff]  ;;  %v4027_v23 = vsel %vm4008_vm7, %v4024_v44, %v4026_v35 }
 0x2ba   : > { %v17170_v10 = vadd.f32 %v2986_v33, %v16637_v62  ;;  %12345 = vmatmul.mubr.msk.f32.gmra.mrb[56].mxu1 %vm716_vm3, %v3567_v53  ;;  %v12060_v20 = vpop.f32.mrb[207].mxu1  ;;  %12433 = vmatprep.mubr.msk.f32.mxu0 %vm14347_vm0, %v20660_v26  ;;  %v3570_v62 = vrot.slane %v17181_v51, 5 }
 0x2bb   : > { %12347 = vmatprep.mubr.msk.f32.mxu1 %vm14347_vm0, %v20660_v26  ;;  %v4028_v20 = vrot.slane %v16946_v6, 6 }
 0x2bc   : > { %v2651_v13 = vpop.f32.mrb[208].mxu0 }
 0x2bd   : > { %v17185_v53 = vadd.f32 %v2651_v13, %v16937_v46  ;;  %v2991_v33 = vpop.f32.mrb[208].mxu1  ;;  %v12022_v54 = vpop.f32.mrb[209].mxu0  ;;  %12434 = vmatmul.mubr.msk.f32.gmra.mrb[58].mxu0 %vm716_vm3, %v4025_v37  ;;  %v3571_v46 = vsel %vm799_vm1, %v3568_v11, %v3570_v62  ;;  %v17200_v37 = vld [vmem:[%s14531_s26 + $0xd8] sm:$0xff]  ;;  %v4029_v11 = vsel %vm4008_vm7, %v4026_v35, %v4028_v20 }
 0x2be   : > { %v17189_v40 = vadd.f32 %v2991_v33, %v16655_v31  ;;  %12348 = vmatmul.mubr.msk.f32.gmra.mrb[58].mxu1 %vm716_vm3, %v3569_v48  ;;  %v12063_v34 = vpop.f32.mrb[209].mxu1  ;;  %12436 = vmatprep.mubr.msk.f32.mxu0 %vm14347_vm0, %v20660_v26  ;;  %v3572_v31 = vrot.slane %v17200_v37, 5 }
 0x2bf   : > { %12350 = vmatprep.mubr.msk.f32.mxu1 %vm14347_vm0, %v20660_v26  ;;  %v4030_v34 = vrot.slane %v16968_v38, 6 }
 0x2c0   : > { %v2656_v13 = vpop.f32.mrb[210].mxu0 }
 0x2c1   : > { %v17204_v48 = vadd.f32 %v2656_v13, %v16958_v19  ;;  %v2996_v33 = vpop.f32.mrb[210].mxu1  ;;  %v12025_v54 = vpop.f32.mrb[211].mxu0  ;;  %12437 = vmatmul.mubr.msk.f32.gmra.mrb[60].mxu0 %vm716_vm3, %v4027_v23  ;;  %v3573_v19 = vsel %vm799_vm1, %v3570_v62, %v3572_v31  ;;  %v17219_v23 = vld [vmem:[%s14531_s26 + $0xe0] sm:$0xff]  ;;  %v4031_v62 = vsel %vm4008_vm7, %v4028_v20, %v4030_v34 }
 0x2c2   : > { %v17208_v6 = vadd.f32 %v2996_v33, %v16673_v21  ;;  %12351 = vmatmul.mubr.msk.f32.gmra.mrb[60].mxu1 %vm716_vm3, %v3571_v46  ;;  %v12066_v44 = vpop.f32.mrb[211].mxu1  ;;  %12439 = vmatprep.mubr.msk.f32.mxu0 %vm14347_vm0, %v20660_v26  ;;  %v3574_v21 = vrot.slane %v17219_v23, 5 }
 0x2c3   : > { %12353 = vmatprep.mubr.msk.f32.mxu1 %vm14347_vm0, %v20660_v26  ;;  %v4032_v44 = vrot.slane %v16992_v47, 6 }
 0x2c4   : > { %v2661_v13 = vpop.f32.mrb[212].mxu0 }
 0x2c5   : > { %v17223_v46 = vadd.f32 %v2661_v13, %v16980_v16  ;;  %v3001_v33 = vpop.f32.mrb[212].mxu1  ;;  %v12028_v54 = vpop.f32.mrb[213].mxu0  ;;  %12440 = vmatmul.mubr.msk.f32.gmra.mrb[62].mxu0 %vm716_vm3, %v4029_v11  ;;  %v3575_v16 = vsel %vm799_vm1, %v3572_v31, %v3574_v21  ;;  %v17238_v11 = vld [vmem:[%s14531_s26 + $0xe8] sm:$0xff]  ;;  %v4033_v31 = vsel %vm4008_vm7, %v4030_v34, %v4032_v44 }
 0x2c6   : > { %v17227_v38 = vadd.f32 %v3001_v33, %v16691_v59  ;;  %12354 = vmatmul.mubr.msk.f32.gmra.mrb[62].mxu1 %vm716_vm3, %v3573_v19  ;;  %v12069_v35 = vpop.f32.mrb[213].mxu1  ;;  %12442 = vmatprep.mubr.msk.f32.mxu0 %vm14347_vm0, %v20660_v26  ;;  %v3576_v59 = vrot.slane %v17238_v11, 5 }
 0x2c7   : > { %12356 = vmatprep.mubr.msk.f32.mxu1 %vm14347_vm0, %v20660_v26  ;;  %v4034_v35 = vrot.slane %v17010_v60, 6 }
 0x2c8   : > { %v2666_v13 = vpop.f32.mrb[214].mxu0 }
 0x2c9   : > { %v17242_v19 = vadd.f32 %v2666_v13, %v17000_v41  ;;  %v3006_v33 = vpop.f32.mrb[214].mxu1  ;;  %v12031_v54 = vpop.f32.mrb[215].mxu0  ;;  %12443 = vmatmul.mubr.msk.f32.gmra.mrb[64].mxu0 %vm716_vm3, %v4031_v62  ;;  %v3577_v41 = vsel %vm799_vm1, %v3574_v21, %v3576_v59  ;;  %v17257_v62 = vld [vmem:[%s14531_s26 + $0xf0] sm:$0xff]  ;;  %v4035_v21 = vsel %vm4008_vm7, %v4032_v44, %v4034_v35 }
 0x2ca   : > { %v17246_v47 = vadd.f32 %v3006_v33, %v16709_v43  ;;  %12357 = vmatmul.mubr.msk.f32.gmra.mrb[64].mxu1 %vm716_vm3, %v3575_v16  ;;  %v12072_v20 = vpop.f32.mrb[215].mxu1  ;;  %12445 = vmatprep.mubr.msk.f32.mxu0 %vm14347_vm0, %v20660_v26  ;;  %v3578_v43 = vrot.slane %v17257_v62, 5 }
 0x2cb   : > { %12359 = vmatprep.mubr.msk.f32.mxu1 %vm14347_vm0, %v20660_v26  ;;  %v4036_v20 = vrot.slane %v17029_v29, 6 }
 0x2cc   : > { %v2671_v13 = vpop.f32.mrb[216].mxu0 }
 0x2cd   : > { %v17261_v16 = vadd.f32 %v2671_v13, %v17018_v28  ;;  %v3011_v33 = vpop.f32.mrb[216].mxu1  ;;  %v12034_v54 = vpop.f32.mrb[217].mxu0  ;;  %12446 = vmatmul.mubr.msk.f32.gmra.mrb[66].mxu0 %vm716_vm3, %v4033_v31  ;;  %v3579_v28 = vsel %vm799_vm1, %v3576_v59, %v3578_v43  ;;  %v17276_v31 = vld [vmem:[%s14531_s26 + $0xf8] sm:$0xff]  ;;  %v4037_v59 = vsel %vm4008_vm7, %v4034_v35, %v4036_v20 }
 0x2ce   : > { %v17265_v60 = vadd.f32 %v3011_v33, %v16727_v12  ;;  %12360 = vmatmul.mubr.msk.f32.gmra.mrb[66].mxu1 %vm716_vm3, %v3577_v41  ;;  %v12075_v34 = vpop.f32.mrb[217].mxu1  ;;  %12448 = vmatprep.mubr.msk.f32.mxu0 %vm14347_vm0, %v20660_v26  ;;  %v3580_v12 = vrot.slane %v17276_v31, 5  ;;  %v20723_v35 = vld [vmem:[#allocation22_spill] sm:$0xff] }
 0x2cf   : > { %12362 = vmatprep.mubr.msk.f32.mxu1 %vm14347_vm0, %v20660_v26  ;;  %v4038_v34 = vrot.slane %v17048_v32, 6 }
 0x2d0   : > { %v3279_v13 = vpop.f32.mrb[218].mxu0 }
 0x2d1   : > { %v3016_v41 = vpop.f32.mrb[218].mxu1  ;;  %v17280_v33 = vadd.f32 %v3279_v13, %v17037_v1  ;;  %v12164_v54 = vpop.f32.mrb[219].mxu0  ;;  %12449 = vmatmul.mubr.msk.f32.gmra.mrb[68].mxu0 %vm716_vm3, %v4035_v21  ;;  %v3581_v1 = vsel %vm799_vm1, %v3578_v43, %v3580_v12  ;;  %v17295_v21 = vld [vmem:[%s14531_s26 + $0x100] sm:$0xff]  ;;  %v4039_v43 = vsel %vm4008_vm7, %v4036_v20, %v4038_v34 }
 0x2d2   : > { %v17284_v29 = vadd.f32 %v3016_v41, %v16747_v0  ;;  %12363 = vmatmul.mubr.msk.f32.gmra.mrb[68].mxu1 %vm716_vm3, %v3579_v28  ;;  %v12078_v44 = vpop.f32.mrb[219].mxu1  ;;  %12451 = vmatprep.mubr.msk.f32.mxu0 %vm14347_vm0, %v20660_v26  ;;  %v3582_v0 = vrot.slane %v17295_v21, 5  ;;  %v20724_v20 = vld [vmem:[#allocation31_spill] sm:$0xff] }
 0x2d3   : > { %20721 = vst [vmem:[#allocation35_spill] sm:$0xff] %v17280_v33  ;;  %12365 = vmatprep.mubr.msk.f32.mxu1 %vm14347_vm0, %v20660_v26  ;;  %v4040_v33 = vrot.slane %v17067_v25, 6 }
 0x2d4   : > { %v3284_v13 = vpop.f32.mrb[220].mxu0 }
 0x2d5   : > { %v3021_v28 = vpop.f32.mrb[220].mxu1  ;;  %v17299_v41 = vadd.f32 %v3284_v13, %v17056_v4  ;;  %v12167_v54 = vpop.f32.mrb[221].mxu0  ;;  %12452 = vmatmul.mubr.msk.f32.gmra.mrb[70].mxu0 %vm716_vm3, %v4037_v59  ;;  %v3583_v4 = vsel %vm799_vm1, %v3580_v12, %v3582_v0  ;;  %v17314_v59 = vld [vmem:[%s14531_s26 + $0x108] sm:$0xff]  ;;  %v4041_v12 = vsel %vm4008_vm7, %v4038_v34, %v4040_v33 }
 0x2d6   : > { %v17303_v32 = vadd.f32 %v3021_v28, %v20723_v35  ;;  %12366 = vmatmul.mubr.msk.f32.gmra.mrb[70].mxu1 %vm716_vm3, %v3581_v1  ;;  %v12081_v44 = vpop.f32.mrb[221].mxu1  ;;  %12454 = vmatprep.mubr.msk.f32.mxu0 %vm14347_vm0, %v20660_v26  ;;  %v3584_v13 = vrot.slane %v17314_v59, 5 }
 0x2d7   : > { %20722 = vst [vmem:[#allocation36_spill] sm:$0xff] %v17299_v41  ;;  %12368 = vmatprep.mubr.msk.f32.mxu1 %vm14347_vm0, %v20660_v26  ;;  %v4042_v41 = vrot.slane %v17086_v57, 6 }
 0x2d8   : > { %v3289_v28 = vpop.f32.mrb[222].mxu0 }
 0x2d9   : > { %v3026_v1 = vpop.f32.mrb[222].mxu1  ;;  %v17318_v54 = vadd.f32 %v3289_v28, %v17075_v30  ;;  %v12170_v35 = vpop.f32.mrb[223].mxu0  ;;  %12455 = vmatmul.mubr.msk.f32.gmra.mrb[72].mxu0 %vm716_vm3, %v4039_v43  ;;  %v3585_v30 = vsel %vm799_vm1, %v3582_v0, %v3584_v13  ;;  %v17333_v43 = vld [vmem:[%s14531_s26 + $0x110] sm:$0xff]  ;;  %v4043_v0 = vsel %vm4008_vm7, %v4040_v33, %v4042_v41 }
 0x2da   : > { %v17322_v25 = vadd.f32 %v3026_v1, %v20724_v20  ;;  %12369 = vmatmul.mubr.msk.f32.gmra.mrb[72].mxu1 %vm716_vm3, %v3583_v4  ;;  %v12084_v44 = vpop.f32.mrb[223].mxu1  ;;  %12457 = vmatprep.mubr.msk.f32.mxu0 %vm14347_vm0, %v20660_v26  ;;  %v3586_v28 = vrot.slane %v17333_v43, 5 }
 0x2db   : > { %12371 = vmatprep.mubr.msk.f32.mxu1 %vm14347_vm0, %v20660_v26  ;;  %v4044_v44 = vrot.slane %v17105_v22, 6 }
 0x2dc   : > { %v3294_v1 = vpop.f32.mrb[224].mxu0 }
 0x2dd   : > { %v3031_v4 = vpop.f32.mrb[224].mxu1  ;;  %v17337_v35 = vadd.f32 %v3294_v1, %v17094_v7  ;;  %v12173_v20 = vpop.f32.mrb[225].mxu0  ;;  %12458 = vmatmul.mubr.msk.f32.gmra.mrb[74].mxu0 %vm716_vm3, %v4041_v12  ;;  %v3587_v7 = vsel %vm799_vm1, %v3584_v13, %v3586_v28  ;;  %v17352_v12 = vld [vmem:[%s14531_s26 + $0x118] sm:$0xff]  ;;  %v4045_v13 = vsel %vm4008_vm7, %v4042_v41, %v4044_v44 }
 0x2de   : > { %v17341_v57 = vadd.f32 %v3031_v4, %v16806_v5  ;;  %12372 = vmatmul.mubr.msk.f32.gmra.mrb[74].mxu1 %vm716_vm3, %v3585_v30  ;;  %v12087_v34 = vpop.f32.mrb[225].mxu1  ;;  %12460 = vmatprep.mubr.msk.f32.mxu0 %vm14347_vm0, %v20660_v26  ;;  %v3588_v5 = vrot.slane %v17352_v12, 5 }
 0x2df   : > { %12374 = vmatprep.mubr.msk.f32.mxu1 %vm14347_vm0, %v20660_v26  ;;  %v4046_v34 = vrot.slane %v17124_v49, 6 }
 0x2e0   : > { %v3299_v1 = vpop.f32.mrb[226].mxu0 }
 0x2e1   : > { %v3036_v30 = vpop.f32.mrb[226].mxu1  ;;  %v17356_v4 = vadd.f32 %v3299_v1, %v17113_v27  ;;  %v12176_v20 = vpop.f32.mrb[227].mxu0  ;;  %12461 = vmatmul.mubr.msk.f32.gmra.mrb[76].mxu0 %vm716_vm3, %v4043_v0  ;;  %v3589_v27 = vsel %vm799_vm1, %v3586_v28, %v3588_v5  ;;  %v17371_v0 = vld [vmem:[%s14531_s26 + $0x120] sm:$0xff]  ;;  %v4047_v28 = vsel %vm4008_vm7, %v4044_v44, %v4046_v34 }
 0x2e2   : > { %v17360_v22 = vadd.f32 %v3036_v30, %v16824_v36  ;;  %12375 = vmatmul.mubr.msk.f32.gmra.mrb[76].mxu1 %vm716_vm3, %v3587_v7  ;;  %v12090_v33 = vpop.f32.mrb[227].mxu1  ;;  %12463 = vmatprep.mubr.msk.f32.mxu0 %vm14347_vm0, %v20660_v26  ;;  %v3590_v36 = vrot.slane %v17371_v0, 5 }
 0x2e3   : > { %12377 = vmatprep.mubr.msk.f32.mxu1 %vm14347_vm0, %v20660_v26  ;;  %v4048_v33 = vrot.slane %v17143_v63, 6 }
 0x2e4   : > { %v3304_v1 = vpop.f32.mrb[228].mxu0 }
 0x2e5   : > { %v3041_v7 = vpop.f32.mrb[228].mxu1  ;;  %v17375_v30 = vadd.f32 %v3304_v1, %v17132_v15  ;;  %v12179_v20 = vpop.f32.mrb[229].mxu0  ;;  %12464 = vmatmul.mubr.msk.f32.gmra.mrb[78].mxu0 %vm716_vm3, %v4045_v13  ;;  %v3591_v15 = vsel %vm799_vm1, %v3588_v5, %v3590_v36  ;;  %v17390_v13 = vld [vmem:[%s14531_s26 + $0x128] sm:$0xff]  ;;  %v4049_v5 = vsel %vm4008_vm7, %v4046_v34, %v4048_v33 }
 0x2e6   : > { %v17379_v49 = vadd.f32 %v3041_v7, %v16842_v3  ;;  %12378 = vmatmul.mubr.msk.f32.gmra.mrb[78].mxu1 %vm716_vm3, %v3589_v27  ;;  %v12093_v41 = vpop.f32.mrb[229].mxu1  ;;  %12466 = vmatprep.mubr.msk.f32.mxu0 %vm14347_vm0, %v20660_v26  ;;  %v3592_v3 = vrot.slane %v17390_v13, 5 }
 0x2e7   : > { %12380 = vmatprep.mubr.msk.f32.mxu1 %vm14347_vm0, %v20660_v26  ;;  %v4050_v41 = vrot.slane %v17162_v17, 6 }
 0x2e8   : > { %v3309_v1 = vpop.f32.mrb[230].mxu0 }
 0x2e9   : > { %v3046_v27 = vpop.f32.mrb[230].mxu1  ;;  %v17394_v7 = vadd.f32 %v3309_v1, %v17151_v45  ;;  %v12182_v20 = vpop.f32.mrb[231].mxu0  ;;  %12467 = vmatmul.mubr.msk.f32.gmra.mrb[80].mxu0 %vm716_vm3, %v4047_v28  ;;  %v3593_v45 = vsel %vm799_vm1, %v3590_v36, %v3592_v3  ;;  %v17409_v28 = vld [vmem:[%s14531_s26 + $0x130] sm:$0xff]  ;;  %v4051_v36 = vsel %vm4008_vm7, %v4048_v33, %v4050_v41 }
 0x2ea   : > { %v17398_v63 = vadd.f32 %v3046_v27, %v16860_v8  ;;  %12381 = vmatmul.mubr.msk.f32.gmra.mrb[80].mxu1 %vm716_vm3, %v3591_v15  ;;  %v12096_v44 = vpop.f32.mrb[231].mxu1  ;;  %12469 = vmatprep.mubr.msk.f32.mxu0 %vm14347_vm0, %v20660_v26  ;;  %v3594_v8 = vrot.slane %v17409_v28, 5 }
 0x2eb   : > { %12383 = vmatprep.mubr.msk.f32.mxu1 %vm14347_vm0, %v20660_v26  ;;  %v4052_v44 = vrot.slane %v17181_v51, 6 }
 0x2ec   : > { %v3314_v1 = vpop.f32.mrb[232].mxu0 }
 0x2ed   : > { %v3051_v15 = vpop.f32.mrb[232].mxu1  ;;  %v17413_v27 = vadd.f32 %v3314_v1, %v17170_v10  ;;  %v12185_v20 = vpop.f32.mrb[233].mxu0  ;;  %12470 = vmatmul.mubr.msk.f32.gmra.mrb[82].mxu0 %vm716_vm3, %v4049_v5  ;;  %v3595_v10 = vsel %vm799_vm1, %v3592_v3, %v3594_v8  ;;  %v17428_v5 = vld [vmem:[%s14531_s26 + $0x138] sm:$0xff]  ;;  %v4053_v3 = vsel %vm4008_vm7, %v4050_v41, %v4052_v44 }
 0x2ee   : > { %v17417_v17 = vadd.f32 %v3051_v15, %v16878_v42  ;;  %12384 = vmatmul.mubr.msk.f32.gmra.mrb[82].mxu1 %vm716_vm3, %v3593_v45  ;;  %v12099_v34 = vpop.f32.mrb[233].mxu1  ;;  %12472 = vmatprep.mubr.msk.f32.mxu0 %vm14347_vm0, %v20660_v26  ;;  %v3596_v42 = vrot.slane %v17428_v5, 5  ;;  %v20727_v41 = vld [vmem:[#allocation23_spill] sm:$0xff] }
 0x2ef   : > { %12386 = vmatprep.mubr.msk.f32.mxu1 %vm14347_vm0, %v20660_v26  ;;  %v4054_v34 = vrot.slane %v17200_v37, 6 }
 0x2f0   : > { %v3319_v1 = vpop.f32.mrb[234].mxu0 }
 0x2f1   : > { %v3056_v45 = vpop.f32.mrb[234].mxu1  ;;  %v17432_v15 = vadd.f32 %v3319_v1, %v17189_v40  ;;  %v12188_v20 = vpop.f32.mrb[235].mxu0  ;;  %12473 = vmatmul.mubr.msk.f32.gmra.mrb[84].mxu0 %vm716_vm3, %v4051_v36  ;;  %v3597_v40 = vsel %vm799_vm1, %v3594_v8, %v3596_v42  ;;  %v17447_v36 = vld [vmem:[%s14531_s26 + $0x140] sm:$0xff]  ;;  %v4055_v8 = vsel %vm4008_vm7, %v4052_v44, %v4054_v34 }
 0x2f2   : > { %v17436_v51 = vadd.f32 %v3056_v45, %v16896_v58  ;;  %12387 = vmatmul.mubr.msk.f32.gmra.mrb[84].mxu1 %vm716_vm3, %v3595_v10  ;;  %v12102_v33 = vpop.f32.mrb[235].mxu1  ;;  %12475 = vmatprep.mubr.msk.f32.mxu0 %vm14347_vm0, %v20660_v26  ;;  %v3598_v58 = vrot.slane %v17447_v36, 5  ;;  %v20729_v44 = vld [vmem:[#allocation32_spill] sm:$0xff] }
 0x2f3   : > { %20725 = vst [vmem:[#allocation37_spill] sm:$0xff] %v17432_v15  ;;  %12389 = vmatprep.mubr.msk.f32.mxu1 %vm14347_vm0, %v20660_v26  ;;  %v4056_v15 = vrot.slane %v17219_v23, 6 }
 0x2f4   : > { %v3324_v1 = vpop.f32.mrb[236].mxu0 }
 0x2f5   : > { %v3061_v10 = vpop.f32.mrb[236].mxu1  ;;  %v17451_v45 = vadd.f32 %v3324_v1, %v17208_v6  ;;  %v12191_v20 = vpop.f32.mrb[237].mxu0  ;;  %12476 = vmatmul.mubr.msk.f32.gmra.mrb[86].mxu0 %vm716_vm3, %v4053_v3  ;;  %v3599_v6 = vsel %vm799_vm1, %v3596_v42, %v3598_v58  ;;  %v17466_v3 = vld [vmem:[%s14531_s26 + $0x148] sm:$0xff]  ;;  %v4057_v42 = vsel %vm4008_vm7, %v4054_v34, %v4056_v15 }
 0x2f6   : > { %v17455_v37 = vadd.f32 %v3061_v10, %v20727_v41  ;;  %12390 = vmatmul.mubr.msk.f32.gmra.mrb[86].mxu1 %vm716_vm3, %v3597_v40  ;;  %v12105_v33 = vpop.f32.mrb[237].mxu1  ;;  %12478 = vmatprep.mubr.msk.f32.mxu0 %vm14347_vm0, %v20660_v26  ;;  %v3600_v1 = vrot.slane %v17466_v3, 5  ;;  %v20730_v34 = vld [vmem:[#allocation33_spill] sm:$0xff] }
 0x2f7   : > { %20726 = vst [vmem:[#allocation38_spill] sm:$0xff] %v17451_v45  ;;  %12392 = vmatprep.mubr.msk.f32.mxu1 %vm14347_vm0, %v20660_v26  ;;  %v4058_v45 = vrot.slane %v17238_v11, 6 }
 0x2f8   : > { %v3329_v10 = vpop.f32.mrb[238].mxu0 }
 0x2f9   : > { %v3066_v40 = vpop.f32.mrb[238].mxu1  ;;  %v17470_v20 = vadd.f32 %v3329_v10, %v17227_v38  ;;  %v12194_v41 = vpop.f32.mrb[239].mxu0  ;;  %12479 = vmatmul.mubr.msk.f32.gmra.mrb[88].mxu0 %vm716_vm3, %v4055_v8  ;;  %v3601_v38 = vsel %vm799_vm1, %v3598_v58, %v3600_v1  ;;  %v17485_v10 = vld [vmem:[%s14531_s26 + $0x150] sm:$0xff]  ;;  %v4059_v58 = vsel %vm4008_vm7, %v4056_v15, %v4058_v45 }
 0x2fa   : > { %v17474_v23 = vadd.f32 %v3066_v40, %v20729_v44  ;;  %12393 = vmatmul.mubr.msk.f32.gmra.mrb[88].mxu1 %vm716_vm3, %v3599_v6  ;;  %v12108_v33 = vpop.f32.mrb[239].mxu1  ;;  %12481 = vmatprep.mubr.msk.f32.mxu0 %vm14347_vm0, %v20660_v26  ;;  %v3602_v8 = vrot.slane %v17485_v10, 5 }
 0x2fb   : > { %20728 = vst [vmem:[#allocation39_spill] sm:$0xff] %v17470_v20  ;;  %12395 = vmatprep.mubr.msk.f32.mxu1 %vm14347_vm0, %v20660_v26  ;;  %v4060_v20 = vrot.slane %v17257_v62, 6 }
 0x2fc   : > { %v3334_v40 = vpop.f32.mrb[240].mxu0 }
 0x2fd   : > { %v3071_v41 = vpop.f32.mrb[240].mxu1  ;;  %v17489_v6 = vadd.f32 %v3334_v40, %v17246_v47  ;;  %v12197_v44 = vpop.f32.mrb[241].mxu0  ;;  %12482 = vmatmul.mubr.msk.f32.gmra.mrb[90].mxu0 %vm716_vm3, %v4057_v42  ;;  %v3603_v47 = vsel %vm799_vm1, %v3600_v1, %v3602_v8  ;;  %v20731_v40 = vld [vmem:[#allocation24_spill] sm:$0xff]  ;;  %v4061_v1 = vsel %vm4008_vm7, %v4058_v45, %v4060_v20  ;;  %v20732_v45 = vld [vmem:[#allocation34_spill] sm:$0xff] }
 0x2fe   : > { %v17493_v33 = vadd.f32 %v3071_v41, %v20730_v34  ;;  %12396 = vmatmul.mubr.msk.f32.gmra.mrb[90].mxu1 %vm716_vm3, %v3601_v38  ;;  %v12111_v11 = vpop.f32.mrb[241].mxu1  ;;  %12484 = vmatprep.mubr.msk.f32.mxu0 %vm14347_vm0, %v20660_v26  ;;  %v3604_v42 = vrot.slane %v20731_v40, 5 }
 0x2ff   : > { %12398 = vmatprep.mubr.msk.f32.mxu1 %vm14347_vm0, %v20660_v26  ;;  %v4062_v11 = vrot.slane %v17276_v31, 6 }
 0x300   : > { %v3339_v41 = vpop.f32.mrb[242].mxu0 }
 0x301   : > { %v3076_v44 = vpop.f32.mrb[242].mxu1  ;;  %v17505_v38 = vadd.f32 %v3339_v41, %v17265_v60  ;;  %v12200_v34 = vpop.f32.mrb[243].mxu0  ;;  %12485 = vmatmul.mubr.msk.f32.gmra.mrb[92].mxu0 %vm716_vm3, %v4059_v58  ;;  %v3605_v60 = vsel %vm799_vm1, %v3602_v8, %v3604_v42  ;;  %v3606_v58 = vrot.slane %v16972_v18, 5  ;;  %v4063_v18 = vsel %vm4008_vm7, %v4060_v20, %v4062_v11 }
 0x302   : > { %v17509_v15 = vadd.f32 %v3076_v44, %v16975_v39  ;;  %12399 = vmatmul.mubr.msk.f32.gmra.mrb[92].mxu1 %vm716_vm3, %v3603_v47  ;;  %v12114_v62 = vpop.f32.mrb[243].mxu1  ;;  %12487 = vmatprep.mubr.msk.f32.mxu0 %vm14347_vm0, %v20660_v26  ;;  %v17521_v39 = vld [vmem:[%s14531_s26 + $0x168] sm:$0x3]  ;;  %v4064_v8 = vrot.slane %v17295_v21, 6 }
 0x303   : > { %12401 = vmatprep.mubr.msk.f32.mxu1 %vm14347_vm0, %v20660_v26  ;;  %v3608_v62 = vrot.slane %v17521_v39, 5 }
 0x304   : > { %v3344_v40 = vpop.f32.mrb[244].mxu0  ;;  %v4065_v20 = vsel %vm4008_vm7, %v4062_v11, %v4064_v8 }
 0x305   : > { %v3081_v41 = vpop.f32.mrb[244].mxu1  ;;  %v17524_v47 = vadd.f32 %v3344_v40, %v17284_v29  ;;  %v12203_v44 = vpop.f32.mrb[245].mxu0  ;;  %12488 = vmatmul.mubr.msk.f32.gmra.mrb[94].mxu0 %vm716_vm3, %v4061_v1  ;;  %v3607_v29 = vsel %vm799_vm1, %v3604_v42, %v3606_v58  ;;  %v4066_v42 = vrot.slane %v17314_v59, 6 }
 0x306   : > { %v17528_v34 = vadd.f32 %v3081_v41, %v20732_v45  ;;  %12402 = vmatmul.mubr.msk.f32.gmra.mrb[94].mxu1 %vm716_vm3, %v3605_v60  ;;  %v12117_v31 = vpop.f32.mrb[245].mxu1  ;;  %12490 = vmatprep.mubr.msk.f32.mxu0 %vm14347_vm0, %v20660_v26 }
 0x307   : > { %12404 = vmatprep.mubr.msk.f32.mxu1 %vm14347_vm0, %v20660_v26  ;;  %v4067_v59 = vsel %vm4008_vm7, %v4064_v8, %v4066_v42  ;;  %v4070_v8 = vrot.slane %v17352_v12, 6 }
 0x308   : > { %v3349_v1 = vpop.f32.mrb[246].mxu0 }
 0x309   : > { %v3086_v40 = vpop.f32.mrb[246].mxu1  ;;  %v17540_v41 = vadd.f32 %v3349_v1, %v17303_v32  ;;  %v12206_v60 = vpop.f32.mrb[247].mxu0  ;;  %12491 = vmatmul.mubr.msk.f32.gmra.mrb[96].mxu0 %vm716_vm3, %v4063_v18  ;;  %v3609_v32 = vsel %vm799_vm1, %v3606_v58, %v3608_v62  ;;  %v4068_v58 = vrot.slane %v17333_v43, 6 }
 0x30a   : > { %v17544_v44 = vadd.f32 %v3086_v40, %v17014_v14  ;;  %12405 = vmatmul.mubr.msk.f32.gmra.mrb[96].mxu1 %vm716_vm3, %v3607_v29  ;;  %v12120_v21 = vpop.f32.mrb[247].mxu1  ;;  %12493 = vmatprep.mubr.msk.f32.mxu0 %vm14347_vm0, %v20660_v26 }
 0x30b   : > { %12407 = vmatprep.mubr.msk.f32.mxu1 %vm14347_vm0, %v20660_v26  ;;  %v4069_v21 = vsel %vm4008_vm7, %v4066_v42, %v4068_v58  ;;  %v4072_v42 = vrot.slane %v17371_v0, 6 }
 0x30c   : > { %v3354_v45 = vpop.f32.mrb[248].mxu0 }
 0x30d   : > { %v3091_v31 = vpop.f32.mrb[248].mxu1  ;;  %v17555_v14 = vadd.f32 %v3354_v45, %v17322_v25  ;;  %v12209_v18 = vpop.f32.mrb[249].mxu0  ;;  %12494 = vmatmul.mubr.msk.f32.gmra.mrb[98].mxu0 %vm716_vm3, %v4065_v20 }
 0x30e   : > { %v17559_v29 = vadd.f32 %v3091_v31, %v17033_v24  ;;  %12408 = vmatmul.mubr.msk.f32.gmra.mrb[98].mxu1 %vm716_vm3, %v3609_v32  ;;  %v12123_v11 = vpop.f32.mrb[249].mxu1  ;;  %12496 = vmatprep.mubr.msk.f32.mxu0 %vm14347_vm0, %v20660_v26  ;;  %v4071_v31 = vsel %vm4008_vm7, %v4068_v58, %v4070_v8  ;;  %v4074_v58 = vrot.slane %v17390_v13, 6 }
 0x310   : > { %v3359_v62 = vpop.f32.mrb[250].mxu0 }
 0x311   : > { %v3096_v1 = vpop.f32.mrb[250].mxu1  ;;  %v17567_v25 = vadd.f32 %v3359_v62, %v17341_v57  ;;  %v12212_v40 = vpop.f32.mrb[251].mxu0  ;;  %12497 = vmatmul.mubr.msk.f32.gmra.mrb[100].mxu0 %vm716_vm3, %v4067_v59  ;;  %v4073_v62 = vsel %vm4008_vm7, %v4070_v8, %v4072_v42 }
 0x312   : > { %v17571_v24 = vadd.f32 %v3096_v1, %v17052_v2  ;;  %v12126_v60 = vpop.f32.mrb[251].mxu1  ;;  %12499 = vmatprep.mubr.msk.f32.mxu0 %vm14347_vm0, %v20660_v26 }
 0x314   : > { %v3364_v43 = vpop.f32.mrb[252].mxu0 }
 0x315   : > { %v3101_v20 = vpop.f32.mrb[252].mxu1  ;;  %v17578_v32 = vadd.f32 %v3364_v43, %v17360_v22  ;;  %v12215_v57 = vpop.f32.mrb[253].mxu0  ;;  %12500 = vmatmul.mubr.msk.f32.gmra.mrb[102].mxu0 %vm716_vm3, %v4069_v21  ;;  %v4076_v21 = vrot.slane %v17409_v28, 6 }
 0x316   : > { %v17582_v45 = vadd.f32 %v3101_v20, %v17071_v52  ;;  %v12129_v2 = vpop.f32.mrb[253].mxu1  ;;  %12502 = vmatprep.mubr.msk.f32.mxu0 %vm14347_vm0, %v20660_v26 }
 0x317   : > { %v4077_v2 = vsel %vm4008_vm7, %v4074_v58, %v4076_v21 }
 0x318   : > { %v3369_v12 = vpop.f32.mrb[254].mxu0 }
 0x319   : > { %v3106_v18 = vpop.f32.mrb[254].mxu1  ;;  %v17589_v11 = vadd.f32 %v3369_v12, %v17379_v49  ;;  %v12218_v22 = vpop.f32.mrb[255].mxu0  ;;  %12503 = vmatmul.mubr.msk.f32.gmra.mrb[104].mxu0 %vm716_vm3, %v4071_v31  ;;  %v4078_v31 = vrot.slane %v17428_v5, 6 }
 0x31a   : > { %v17593_v59 = vadd.f32 %v3106_v18, %v17090_v55  ;;  %v12132_v52 = vpop.f32.mrb[255].mxu1  ;;  %12505 = vmatprep.mubr.msk.f32.mxu0 %vm14347_vm0, %v20660_v26  ;;  %v4075_v55 = vsel %vm4008_vm7, %v4072_v42, %v4074_v58 }
 0x31b   : > { %v4079_v22 = vsel %vm4008_vm7, %v4076_v21, %v4078_v31  ;;  %v4080_v52 = vrot.slane %v17447_v36, 6 }
 0x31c   : > { %v3374_v0 = vpop.f32.mrb[0].mxu0 }
 0x31d   : > { %v3111_v1 = vpop.f32.mrb[0].mxu1  ;;  %v17600_v40 = vadd.f32 %v3374_v0, %v17398_v63  ;;  %v12221_v49 = vpop.f32.mrb[1].mxu0  ;;  %12506 = vmatmul.mubr.msk.f32.gmra.mrb[106].mxu0 %vm716_vm3, %v4073_v62 }
 0x31e   : > { %v12135_v60 = vpop.f32.mrb[1].mxu1  ;;  %12508 = vmatprep.mubr.msk.f32.mxu0 %vm14347_vm0, %v20660_v26  ;;  %v17608_v8 = vadd.f32 %v3111_v1, %v17109_v50  ;;  %v4081_v1 = vsel %vm4008_vm7, %v4078_v31, %v4080_v52  ;;  %v4082_v49 = vrot.slane %v17466_v3, 6  ;;  %v4084_v3 = vrot.slane %v17485_v10, 6 }
 0x320   : > { %v3379_v13 = vpop.f32.mrb[2].mxu0  ;;  %v4085_v31 = vsel %vm4008_vm7, %v4082_v49, %v4084_v3 }
 0x321   : > { %v3116_v43 = vpop.f32.mrb[2].mxu1  ;;  %v17611_v20 = vadd.f32 %v3379_v13, %v17417_v17  ;;  %v12224_v63 = vpop.f32.mrb[3].mxu0  ;;  %12509 = vmatmul.mubr.msk.f32.gmra.mrb[108].mxu0 %vm716_vm3, %v4075_v55  ;;  %v4083_v13 = vsel %vm4008_vm7, %v4080_v52, %v4082_v49 }
 0x322   : > { %v12138_v57 = vpop.f32.mrb[3].mxu1  ;;  %12511 = vmatprep.mubr.msk.f32.mxu0 %vm14347_vm0, %v20660_v26  ;;  %v17619_v28 = vadd.f32 %v3116_v43, %v17128_v56 }
 0x324   : > { %v3384_v50 = vpop.f32.mrb[4].mxu0 }
 0x325   : > { %v3121_v42 = vpop.f32.mrb[4].mxu1  ;;  %v17622_v12 = vadd.f32 %v3384_v50, %v17436_v51  ;;  %v12227_v17 = vpop.f32.mrb[5].mxu0  ;;  %12512 = vmatmul.mubr.msk.f32.gmra.mrb[110].mxu0 %vm716_vm3, %v4077_v2  ;;  %v14212_v50 = vld [vmem:[%s14531_s26 + $0x158] sm:$0xff] }
 0x326   : > { %v12141_v18 = vpop.f32.mrb[5].mxu1  ;;  %12514 = vmatprep.mubr.msk.f32.mxu0 %vm14347_vm0, %v20660_v26  ;;  %v17630_v5 = vadd.f32 %v3121_v42, %v17147_v61  ;;  %v4086_v10 = vrot.slane %v14212_v50, 6 }
 0x328   : > { %v3389_v56 = vpop.f32.mrb[6].mxu0  ;;  %v4087_v52 = vsel %vm4008_vm7, %v4084_v3, %v4086_v10 }
 0x329   : > { %v3126_v62 = vpop.f32.mrb[6].mxu1  ;;  %v17633_v58 = vadd.f32 %v3389_v56, %v17455_v37  ;;  %v12230_v51 = vpop.f32.mrb[7].mxu0  ;;  %12515 = vmatmul.mubr.msk.f32.gmra.mrb[112].mxu0 %vm716_vm3, %v4079_v22  ;;  %v14213_v56 = vld [vmem:[%s14531_s26 + $0x160] sm:$0xff]  ;;  %s9644_s26 = sshll.u32 %s532_s28, 4  ;;  %s9645_s26 = int_to_ptr.vmem [resolvable:$true] %s9644_s26 }
 0x32a   : > { %v12144_v0 = vpop.f32.mrb[7].mxu1  ;;  %12517 = vmatprep.mubr.msk.f32.mxu0 %vm14347_vm0, %v20660_v26  ;;  %v17641_v36 = vadd.f32 %v3126_v62, %v17166_v9  ;;  %v4088_v62 = vrot.slane %v14213_v56, 6  ;;  %s14243_s20 = scalar_lea.vmem %s9645_s26, 16  ;;  %p14250_p2 = scmp.lt.s32.totalorder %s9645_s26, %s14248_s23 }
 0x32b   : > { %p14244_p6 = scmp.ne.s32.totalorder %s9645_s26, %s14243_s20  ;;  %p14251_p3 = scmp.lt.s32.totalorder %s14249_s1, %s14243_s20 }
 0x32c   : > { %v3394_v61 = vpop.f32.mrb[8].mxu0 }
 0x32d   : > { %v3131_v60 = vpop.f32.mrb[8].mxu1  ;;  %v17644_v55 = vadd.f32 %v3394_v61, %v17474_v23  ;;  %v12233_v37 = vpop.f32.mrb[9].mxu0  ;;  %12518 = vmatmul.mubr.msk.f32.gmra.mrb[114].mxu0 %vm716_vm3, %v4081_v1  ;;  %v4089_v61 = vsel %vm4008_vm7, %v4086_v10, %v4088_v62  ;;  %p14245_p10 = pnand %p14244_p6, %p20738_p9  ;;  %p14252_p4 = por %p14251_p3, %p14250_p2 }
 0x32e   : > { %v12147_v21 = vpop.f32.mrb[9].mxu1  ;;  %12520 = vmatprep.mubr.msk.f32.mxu0 %vm14347_vm0, %v20660_v26  ;;  %v17652_v9 = vadd.f32 %v3131_v60, %v17185_v53  ;;  %v4090_v60 = vrot.slane %v17521_v39, 6 }
 0x32f   : > { %p14246_p12 = pneg %p14245_p10 }
 0x330   : > { %v3399_v43 = vpop.f32.mrb[10].mxu0 }
 0x331   : > { %v3136_v63 = vpop.f32.mrb[10].mxu1  ;;  %v17655_v23 = vadd.f32 %v3399_v43, %v17493_v33  ;;  %v12236_v57 = vpop.f32.mrb[11].mxu0  ;;  %12521 = vmatmul.mubr.msk.f32.gmra.mrb[116].mxu0 %vm716_vm3, %v4083_v13  ;;  %v4091_v43 = vsel %vm4008_vm7, %v4088_v62, %v4090_v60  ;;  %p14253_p7 = pnand %p14252_p4, %p14246_p12 }
 0x332   : > { %v12150_v2 = vpop.f32.mrb[11].mxu1  ;;  %12523 = vmatprep.mubr.msk.f32.mxu0 %vm14347_vm0, %v20660_v26  ;;  %v17663_v53 = vadd.f32 %v3136_v63, %v17204_v48 }
 0x334   : > { %v3404_v42 = vpop.f32.mrb[12].mxu0 }
 0x335   : > { %v3141_v17 = vpop.f32.mrb[12].mxu1  ;;  %v17666_v33 = vadd.f32 %v3404_v42, %v17509_v15  ;;  %v12239_v18 = vpop.f32.mrb[13].mxu0  ;;  %12524 = vmatmul.mubr.msk.f32.gmra.mrb[118].mxu0 %vm716_vm3, %v4085_v31  ;;  %v20733_v31 = vld [vmem:[#allocation35_spill] sm:$0xff] }
 0x336   : > { %v12153_v22 = vpop.f32.mrb[13].mxu1  ;;  %12526 = vmatprep.mubr.msk.f32.mxu0 %vm14347_vm0, %v20660_v26  ;;  %v17674_v51 = vadd.f32 %v3141_v17, %v17223_v46 }
 0x338   : > { %v3409_v48 = vpop.f32.mrb[14].mxu0 }
 0x339   : > { %v3146_v0 = vpop.f32.mrb[14].mxu1  ;;  %v17677_v1 = vadd.f32 %v3409_v48, %v17528_v34  ;;  %v12242_v15 = vpop.f32.mrb[15].mxu0  ;;  %12527 = vmatmul.mubr.msk.f32.gmra.mrb[120].mxu0 %vm716_vm3, %v4087_v52 }
 0x33a   : > { %v12156_v49 = vpop.f32.mrb[15].mxu1  ;;  %12529 = vmatprep.mubr.msk.f32.mxu0 %vm14347_vm0, %v20660_v26  ;;  %v17685_v37 = vadd.f32 %v3146_v0, %v17242_v19 }
 0x33c   : > { %v3414_v46 = vpop.f32.mrb[16].mxu0 }
 0x33d   : > { %v3151_v21 = vpop.f32.mrb[16].mxu1  ;;  %v17688_v13 = vadd.f32 %v3414_v46, %v17544_v44  ;;  %v12245_v34 = vpop.f32.mrb[17].mxu0  ;;  %12530 = vmatmul.mubr.msk.f32.gmra.mrb[122].mxu0 %vm716_vm3, %v4089_v61 }
 0x33e   : > { %v12159_v3 = vpop.f32.mrb[17].mxu1  ;;  %12532 = vmatprep.mubr.msk.f32.mxu0 %vm14347_vm0, %v20660_v26  ;;  %v17695_v63 = vadd.f32 %v3151_v21, %v17261_v16 }
 0x340   : > { %v3419_v39 = vpop.f32.mrb[18].mxu0 }
 0x341   : > { %v17698_v19 = vadd.f32 %v3419_v39, %v17559_v29  ;;  %v3761_v57 = vpop.f32.mrb[18].mxu1  ;;  %v12248_v2 = vpop.f32.mrb[19].mxu0  ;;  %12533 = vmatmul.mubr.msk.f32.gmra.mrb[124].mxu0 %vm716_vm3, %v4091_v43  ;;  %v20734_v29 = vld [vmem:[#allocation36_spill] sm:$0xff]  ;;  %vm14038_vm3 = vmpackc.low %vm799_vm1, %vm14349_vm11 }
 0x342   : > { %v12289_v44 = vpop.f32.mrb[19].mxu1  ;;  %v17702_v50 = vadd.f32 %v3761_v57, %v20733_v31  ;;  %12699 = vmatprep.mubr.msk.f32.mxu0 %vm14347_vm0, %v20660_v26 }
 0x344   : > { %v3424_v10 = vpop.f32.mrb[20].mxu0 }
 0x345   : > { %v17707_v42 = vadd.f32 %v3424_v10, %v17571_v24  ;;  %v3766_v16 = vpop.f32.mrb[20].mxu1  ;;  %v12251_v17 = vpop.f32.mrb[21].mxu0 }
 0x346   : > { %v12292_v18 = vpop.f32.mrb[21].mxu1  ;;  %v17710_v22 = vadd.f32 %v3766_v16, %v20734_v29 }
 0x348   : > { %v3429_v52 = vpop.f32.mrb[22].mxu0 }
 0x349   : > { %v17713_v56 = vadd.f32 %v3429_v52, %v17582_v45  ;;  %v3771_v62 = vpop.f32.mrb[22].mxu1  ;;  %v12254_v48 = vpop.f32.mrb[23].mxu0 }
 0x34a   : > { %v12295_v0 = vpop.f32.mrb[23].mxu1  ;;  %v17716_v15 = vadd.f32 %v3771_v62, %v17318_v54 }
 0x34c   : > { %v3434_v49 = vpop.f32.mrb[24].mxu0 }
 0x34d   : > { %v3776_v61 = vpop.f32.mrb[24].mxu1  ;;  %v12257_v24 = vpop.f32.mrb[25].mxu0  ;;  %v17719_v60 = vadd.f32 %v3434_v49, %v17593_v59 }
 0x34e   : > { %v12298_v46 = vpop.f32.mrb[25].mxu1  ;;  %v17722_v21 = vadd.f32 %v3776_v61, %v17337_v35 }
 0x34f   : > { %v20735_v46 = vld [vmem:[#allocation37_spill] sm:$0xff] }
 0x350   : > { %v3439_v34 = vpop.f32.mrb[26].mxu0 }
 0x351   : > { %v17725_v45 = vadd.f32 %v3439_v34, %v17608_v8  ;;  %v3781_v3 = vpop.f32.mrb[26].mxu1  ;;  %v12260_v43 = vpop.f32.mrb[27].mxu0 }
 0x352   : > { %v12301_v39 = vpop.f32.mrb[27].mxu1  ;;  %v17728_v54 = vadd.f32 %v3781_v3, %v17356_v4 }
 0x354   : > { %v3444_v57 = vpop.f32.mrb[28].mxu0 }
 0x355   : > { %v17731_v2 = vadd.f32 %v3444_v57, %v17619_v28  ;;  %v3786_v59 = vpop.f32.mrb[28].mxu1  ;;  %v12263_v44 = vpop.f32.mrb[29].mxu0  ;;  %v20736_v57 = vld [vmem:[#allocation38_spill] sm:$0xff] }
 0x356   : > { %v12304_v31 = vpop.f32.mrb[29].mxu1  ;;  %v17734_v35 = vadd.f32 %v3786_v59, %v17375_v30 }
 0x358   : > { %v3449_v10 = vpop.f32.mrb[30].mxu0 }
 0x359   : > { %v17737_v8 = vadd.f32 %v3449_v10, %v17630_v5  ;;  %v3791_v16 = vpop.f32.mrb[30].mxu1  ;;  %v12266_v17 = vpop.f32.mrb[31].mxu0 }
 0x35a   : > { %v12307_v18 = vpop.f32.mrb[31].mxu1  ;;  %v17740_v4 = vadd.f32 %v3791_v16, %v17394_v7  ;;  %v20737_v16 = vld [vmem:[#allocation39_spill] sm:$0xff] }
 0x35c   : > { %v3454_v29 = vpop.f32.mrb[32].mxu0 }
 0x35d   : > { %v17743_v28 = vadd.f32 %v3454_v29, %v17641_v36  ;;  %v3796_v52 = vpop.f32.mrb[32].mxu1  ;;  %v12269_v62 = vpop.f32.mrb[33].mxu0 }
 0x35e   : > { %v12310_v48 = vpop.f32.mrb[33].mxu1  ;;  %v17746_v30 = vadd.f32 %v3796_v52, %v17413_v27 }
 0x360   : > { %v3459_v0 = vpop.f32.mrb[34].mxu0 }
 0x361   : > { %v17749_v5 = vadd.f32 %v3459_v0, %v17652_v9  ;;  %v3801_v49 = vpop.f32.mrb[34].mxu1  ;;  %v12272_v61 = vpop.f32.mrb[35].mxu0 }
 0x362   : > { %v12313_v24 = vpop.f32.mrb[35].mxu1  ;;  %v17752_v7 = vadd.f32 %v3801_v49, %v20735_v46 }
 0x364   : > { %v3464_v34 = vpop.f32.mrb[36].mxu0 }
 0x365   : > { %v17755_v36 = vadd.f32 %v3464_v34, %v17663_v53  ;;  %v3806_v3 = vpop.f32.mrb[36].mxu1  ;;  %v12275_v43 = vpop.f32.mrb[37].mxu0 }
 0x366   : > { %v12316_v39 = vpop.f32.mrb[37].mxu1  ;;  %v17758_v27 = vadd.f32 %v3806_v3, %v20736_v57 }
 0x368   : > { %v3469_v59 = vpop.f32.mrb[38].mxu0 }
 0x369   : > { %v17761_v9 = vadd.f32 %v3469_v59, %v17674_v51  ;;  %v3811_v44 = vpop.f32.mrb[38].mxu1  ;;  %v12278_v31 = vpop.f32.mrb[39].mxu0 }
 0x36a   : > { %v12319_v10 = vpop.f32.mrb[39].mxu1  ;;  %v17764_v17 = vadd.f32 %v3811_v44, %v20737_v16 }
 0x36c   : > { %v3474_v18 = vpop.f32.mrb[40].mxu0 }
 0x36d   : > { %v17767_v53 = vadd.f32 %v3474_v18, %v17685_v37  ;;  %v3816_v29 = vpop.f32.mrb[40].mxu1  ;;  %v12281_v52 = vpop.f32.mrb[41].mxu0  ;;  %v17781_v37 = vld [vmem:[%s20565_s2] ss:$0 sm:$0xff] }
 0x36e   : > { %v12322_v62 = vpop.f32.mrb[41].mxu1  ;;  %v17770_v48 = vadd.f32 %v3816_v29, %v17489_v6 }
 0x370   : > { %v3479_v0 = vpop.f32.mrb[42].mxu0 }
 0x371   : > { %v17773_v51 = vadd.f32 %v3479_v0, %v17695_v63  ;;  %v3821_v49 = vpop.f32.mrb[42].mxu1  ;;  %v12284_v61 = vpop.f32.mrb[43].mxu0 }
 0x372   : > { %v12325_v24 = vpop.f32.mrb[43].mxu1  ;;  %v17776_v46 = vadd.f32 %v3821_v49, %v17505_v38 }
 0x374   : > { %v4243_v34 = vpop.f32.mrb[44].mxu0 }
 0x375   : > { %v3826_v3 = vpop.f32.mrb[44].mxu1  ;;  %v4447_v6 = vadd.f32 %v4243_v34, %v17702_v50  ;;  %v12414_v43 = vpop.f32.mrb[45].mxu0 }
 0x376   : > { %v12328_v39 = vpop.f32.mrb[45].mxu1  ;;  %v17785_v63 = vadd.f32 %v3826_v3, %v17524_v47 }
 0x377   : > { %v4495_v57 = vadd.f32 %v17781_v37, %v4447_v6 }
 0x378   : > { %v4248_v59 = vpop.f32.mrb[46].mxu0 }
 0x379   : > { %v3831_v44 = vpop.f32.mrb[46].mxu1  ;;  %v4448_v38 = vadd.f32 %v4248_v59, %v17710_v22  ;;  %v12417_v31 = vpop.f32.mrb[47].mxu0  ;;  %v4536_v18 = vmax.f32 %v4495_v57, 0.0 }
 0x37a   : > { %v12331_v10 = vpop.f32.mrb[47].mxu1  ;;  %v17790_v16 = vadd.f32 %v3831_v44, %v17540_v41 }
 0x37b   : > { %v4496_v29 = vadd.f32 %v17781_v37, %v4448_v38  ;;  %v4616_v24 = vrot.slane %v4536_v18, 1 }
 0x37c   : > { %v4253_v50 = vpop.f32.mrb[48].mxu0 }
 0x37d   : > { %v4537_v52 = vmax.f32 %v4496_v29, 0.0  ;;  %v3836_v62 = vpop.f32.mrb[48].mxu1  ;;  %v4449_v47 = vadd.f32 %v4253_v50, %v17716_v15  ;;  %v12420_v0 = vpop.f32.mrb[49].mxu0 }
 0x37e   : > { %v12334_v49 = vpop.f32.mrb[49].mxu1  ;;  %v17795_v61 = vadd.f32 %v3836_v62, %v17555_v14 }
 0x37f   : > { %v4617_v22 = vrot.slane %v4537_v52, 1  ;;  %v4497_v34 = vadd.f32 %v17781_v37, %v4449_v47 }
 0x380   : > { %v4258_v3 = vpop.f32.mrb[50].mxu0 }
 0x381   : > { %v4618_v41 = vsel %vm634_vm2, %v4616_v24, %v4617_v22  ;;  %v4538_v6 = vmax.f32 %v4497_v34, 0.0  ;;  %v3841_v43 = vpop.f32.mrb[50].mxu1  ;;  %v4450_v39 = vadd.f32 %v4258_v3, %v17722_v21  ;;  %v12423_v57 = vpop.f32.mrb[51].mxu0 }
 0x382   : > { %v17800_v59 = vmax.f32 %v4536_v18, %v4618_v41  ;;  %v12337_v15 = vpop.f32.mrb[51].mxu1  ;;  %v17803_v44 = vadd.f32 %v3841_v43, %v17567_v25 }
 0x383   : > { %v4619_v14 = vrot.slane %v4538_v6, 1  ;;  %v4498_v38 = vadd.f32 %v17781_v37, %v4450_v39 }
 0x384   : > { %v4263_v31 = vpop.f32.mrb[52].mxu0 }
 0x385   : > { %v4620_v10 = vsel %vm634_vm2, %v4617_v22, %v4619_v14  ;;  %v4539_v29 = vmax.f32 %v4498_v38, 0.0  ;;  %v3846_v50 = vpop.f32.mrb[52].mxu1  ;;  %v4451_v62 = vadd.f32 %v4263_v31, %v17728_v54  ;;  %v12426_v47 = vpop.f32.mrb[53].mxu0 }
 0x386   : > { %v17808_v0 = vmax.f32 %v4537_v52, %v4620_v10  ;;  %v12340_v21 = vpop.f32.mrb[53].mxu1  ;;  %v17811_v18 = vadd.f32 %v3846_v50, %v17578_v32 }
 0x387   : > { %v4621_v49 = vrot.slane %v4539_v29, 1  ;;  %v4499_v25 = vadd.f32 %v17781_v37, %v4451_v62 }
 0x388   : > { %v4268_v24 = vpop.f32.mrb[54].mxu0 }
 0x389   : > { %v4622_v34 = vsel %vm634_vm2, %v4619_v14, %v4621_v49  ;;  %v4540_v3 = vmax.f32 %v4499_v25, 0.0  ;;  %v3851_v41 = vpop.f32.mrb[54].mxu1  ;;  %v4452_v22 = vadd.f32 %v4268_v24, %v17734_v35  ;;  %v12429_v43 = vpop.f32.mrb[55].mxu0 }
 0x38a   : > { %v17816_v39 = vmax.f32 %v4538_v6, %v4622_v34  ;;  %v12343_v54 = vpop.f32.mrb[55].mxu1  ;;  %v17819_v52 = vadd.f32 %v3851_v41, %v17589_v11 }
 0x38b   : > { %v4623_v57 = vrot.slane %v4540_v3, 1  ;;  %v4500_v32 = vadd.f32 %v17781_v37, %v4452_v22 }
 0x38c   : > { %v4273_v15 = vpop.f32.mrb[56].mxu0  ;;  %v4822_v21 = vrot.slane %v17816_v39, 2 }
 0x38d   : > { %v4624_v38 = vsel %vm634_vm2, %v4621_v49, %v4623_v57  ;;  %v4541_v31 = vmax.f32 %v4500_v32, 0.0  ;;  %v3856_v10 = vpop.f32.mrb[56].mxu1  ;;  %v4453_v14 = vadd.f32 %v4273_v15, %v17740_v4  ;;  %v12432_v50 = vpop.f32.mrb[57].mxu0 }
 0x38e   : > { %v17824_v62 = vmax.f32 %v4539_v29, %v4624_v38  ;;  %v12346_v35 = vpop.f32.mrb[57].mxu1  ;;  %v17827_v6 = vadd.f32 %v3856_v10, %v17600_v40 }
 0x38f   : > { %v4625_v47 = vrot.slane %v4541_v31, 1  ;;  %v4501_v11 = vadd.f32 %v17781_v37, %v4453_v14 }
 0x390   : > { %v4823_v25 = vrot.slane %v17824_v62, 2  ;;  %v4278_v24 = vpop.f32.mrb[58].mxu0 }
 0x391   : > { %v4626_v49 = vsel %vm634_vm2, %v4623_v57, %v4625_v47  ;;  %v4542_v34 = vmax.f32 %v4501_v11, 0.0  ;;  %v3861_v41 = vpop.f32.mrb[58].mxu1  ;;  %v4454_v4 = vadd.f32 %v4278_v24, %v17746_v30  ;;  %v12435_v29 = vpop.f32.mrb[59].mxu0 }
 0x392   : > { %v17834_v22 = vmax.f32 %v4540_v3, %v4626_v49  ;;  %v12349_v43 = vpop.f32.mrb[59].mxu1  ;;  %v17837_v40 = vadd.f32 %v3861_v41, %v17611_v20  ;;  %v4824_v54 = vsel %vm1430_vm4, %v4822_v21, %v4823_v25 }
 0x393   : > { %v4627_v32 = vrot.slane %v4542_v34, 1  ;;  %v4502_v15 = vadd.f32 %v17781_v37, %v4454_v4  ;;  %v4938_v38 = vmax.f32 %v17800_v59, %v4824_v54  ;;  %v4978_v59 = vld [vmem:[%s20566_s3 + $0x8] sm:$0xff] }
 0x394   : > { %v4825_v57 = vrot.slane %v17834_v22, 2  ;;  %v4283_v10 = vpop.f32.mrb[60].mxu0  ;;  %5142 = vmatprep.mubr.f32.mxu1 %v4978_v59 }
 0x395   : > { %v4628_v14 = vsel %vm634_vm2, %v4625_v47, %v4627_v32  ;;  %v4543_v30 = vmax.f32 %v4502_v15, 0.0  ;;  %v3866_v50 = vpop.f32.mrb[60].mxu1  ;;  %v4455_v3 = vadd.f32 %v4283_v10, %v17752_v7  ;;  %v12438_v35 = vpop.f32.mrb[61].mxu0 }
 0x396   : > { %v17845_v11 = vmax.f32 %v4541_v31, %v4628_v14  ;;  %v12352_v20 = vpop.f32.mrb[61].mxu1  ;;  %v17848_v21 = vadd.f32 %v3866_v50, %v17622_v12  ;;  %v4826_v24 = vsel %vm1430_vm4, %v4823_v25, %v4825_v57 }
 0x397   : > { %v4629_v49 = vrot.slane %v4543_v30, 1  ;;  %v4503_v47 = vadd.f32 %v17781_v37, %v4455_v3  ;;  %v4939_v41 = vmax.f32 %v17808_v0, %v4826_v24 }
 0x398   : > { %v4827_v7 = vrot.slane %v17845_v11, 2  ;;  %v4288_v31 = vpop.f32.mrb[62].mxu0 }
 0x399   : > { %v4630_v4 = vsel %vm634_vm2, %v4627_v32, %v4629_v49  ;;  %v4544_v29 = vmax.f32 %v4503_v47, 0.0  ;;  %v3871_v12 = vpop.f32.mrb[62].mxu1  ;;  %v4456_v43 = vadd.f32 %v4288_v31, %v17758_v27  ;;  %v12441_v25 = vpop.f32.mrb[63].mxu0  ;;  %v17859_v54 = vpack.c.bf16 %v4939_v41, %v4938_v38 }
 0x39a   : > { %v17861_v15 = vmax.f32 %v4542_v34, %v4630_v4  ;;  %v12355_v10 = vpop.f32.mrb[63].mxu1  ;;  %v17864_v14 = vadd.f32 %v3871_v12, %v17633_v58  ;;  %v4828_v0 = vsel %vm1430_vm4, %v4825_v57, %v4827_v7 }
 0x39b   : > { %v4631_v50 = vrot.slane %v4544_v29, 1  ;;  %v4504_v3 = vadd.f32 %v17781_v37, %v4456_v43  ;;  %v4940_v32 = vmax.f32 %v17816_v39, %v4828_v0 }
 0x39c   : > { %v4829_v35 = vrot.slane %v17861_v15, 2  ;;  %v4293_v20 = vpop.f32.mrb[64].mxu0 }
 0x39d   : > { %v4632_v27 = vsel %vm634_vm2, %v4629_v49, %v4631_v50  ;;  %v4545_v38 = vmax.f32 %v4504_v3, 0.0  ;;  %v3876_v24 = vpop.f32.mrb[64].mxu1  ;;  %v4457_v34 = vadd.f32 %v4293_v20, %v17764_v17  ;;  %v12444_v59 = vpop.f32.mrb[65].mxu0 }
 0x39e   : > { %v17872_v47 = vmax.f32 %v4543_v30, %v4632_v27  ;;  %v12358_v58 = vpop.f32.mrb[65].mxu1  ;;  %v17875_v57 = vadd.f32 %v3876_v24, %v17644_v55  ;;  %v4830_v41 = vsel %vm1430_vm4, %v4827_v7, %v4829_v35 }
 0x39f   : > { %v4633_v31 = vrot.slane %v4545_v38, 1  ;;  %v4505_v39 = vadd.f32 %v17781_v37, %v4457_v34  ;;  %v4941_v4 = vmax.f32 %v17824_v62, %v4830_v41 }
 0x3a0   : > { %v4831_v49 = vrot.slane %v17872_v47, 2  ;;  %v4298_v12 = vpop.f32.mrb[66].mxu0 }
 0x3a1   : > { %v4634_v43 = vsel %vm634_vm2, %v4631_v50, %v4633_v31  ;;  %v4546_v17 = vmax.f32 %v4505_v39, 0.0  ;;  %v3881_v25 = vpop.f32.mrb[66].mxu1  ;;  %v4458_v30 = vadd.f32 %v4298_v12, %v17770_v48  ;;  %v12447_v10 = vpop.f32.mrb[67].mxu0  ;;  %v17883_v0 = vpack.c.bf16 %v4941_v4, %v4940_v32 }
 0x3a2   : > { %v17885_v55 = vmax.f32 %v4544_v29, %v4634_v43  ;;  %v12361_v7 = vpop.f32.mrb[67].mxu1  ;;  %v17888_v3 = vadd.f32 %v3881_v25, %v17655_v23  ;;  %v4832_v62 = vsel %vm1430_vm4, %v4829_v35, %v4831_v49 }
 0x3a3   : > { %v4635_v20 = vrot.slane %v4546_v17, 1  ;;  %v4506_v27 = vadd.f32 %v17781_v37, %v4458_v30  ;;  %v4942_v50 = vmax.f32 %v17834_v22, %v4832_v62 }
 0x3a4   : > { %v4833_v24 = vrot.slane %v17885_v55, 2  ;;  %v4303_v34 = vpop.f32.mrb[68].mxu0 }
 0x3a5   : > { %v4636_v48 = vsel %vm634_vm2, %v4633_v31, %v4635_v20  ;;  %v4547_v32 = vmax.f32 %v4506_v27, 0.0  ;;  %v3886_v59 = vpop.f32.mrb[68].mxu1  ;;  %v4459_v29 = vadd.f32 %v4303_v34, %v17776_v46  ;;  %v12450_v58 = vpop.f32.mrb[69].mxu0 }
 0x3a6   : > { %v17896_v41 = vmax.f32 %v4545_v38, %v4636_v48  ;;  %v12364_v23 = vpop.f32.mrb[69].mxu1  ;;  %v17899_v35 = vadd.f32 %v3886_v59, %v17666_v33  ;;  %v4834_v39 = vsel %vm1430_vm4, %v4831_v49, %v4833_v24 }
 0x3a7   : > { %v4637_v4 = vrot.slane %v4547_v32, 1  ;;  %v4507_v22 = vadd.f32 %v17781_v37, %v4459_v29  ;;  %v4943_v12 = vmax.f32 %v17845_v11, %v4834_v39 }
 0x3a8   : > { %v4835_v31 = vrot.slane %v17896_v41, 2  ;;  %v4308_v43 = vpop.f32.mrb[70].mxu0 }
 0x3a9   : > { %v4638_v25 = vsel %vm634_vm2, %v4635_v20, %v4637_v4  ;;  %v4548_v46 = vmax.f32 %v4507_v22, 0.0  ;;  %v3891_v30 = vpop.f32.mrb[70].mxu1  ;;  %v4460_v38 = vadd.f32 %v4308_v43, %v17785_v63  ;;  %v12453_v10 = vpop.f32.mrb[71].mxu0  ;;  %v17907_v7 = vpack.c.bf16 %v4943_v12, %v4942_v50 }
 0x3aa   : > { %v17909_v33 = vmax.f32 %v4546_v17, %v4638_v25  ;;  %v12367_v49 = vpop.f32.mrb[71].mxu1  ;;  %v17912_v62 = vadd.f32 %v3891_v30, %v17677_v1  ;;  %v4836_v11 = vsel %vm1430_vm4, %v4833_v24, %v4835_v31 }
 0x3ab   : > { %v4639_v27 = vrot.slane %v4548_v46, 1  ;;  %v4508_v34 = vadd.f32 %v17781_v37, %v4460_v38  ;;  %v4944_v20 = vmax.f32 %v17861_v15, %v4836_v11 }
 0x3ac   : > { %v4837_v48 = vrot.slane %v17909_v33, 2  ;;  %v4313_v59 = vpop.f32.mrb[72].mxu0 }
 0x3ad   : > { %v4640_v63 = vsel %vm634_vm2, %v4637_v4, %v4639_v27  ;;  %v4549_v50 = vmax.f32 %v4508_v34, 0.0  ;;  %v3896_v29 = vpop.f32.mrb[72].mxu1  ;;  %v4461_v17 = vadd.f32 %v4313_v59, %v17790_v16  ;;  %v12456_v58 = vpop.f32.mrb[73].mxu0 }
 0x3ae   : > { %v17920_v23 = vmax.f32 %v4547_v32, %v4640_v63  ;;  %v12370_v1 = vpop.f32.mrb[73].mxu1  ;;  %v17923_v24 = vadd.f32 %v3896_v29, %v17688_v13  ;;  %v4838_v39 = vsel %vm1430_vm4, %v4835_v31, %v4837_v48 }
 0x3af   : > { %v4641_v22 = vrot.slane %v4549_v50, 1  ;;  %v4509_v15 = vadd.f32 %v17781_v37, %v4461_v17  ;;  %v4945_v12 = vmax.f32 %v17872_v47, %v4838_v39 }
 0x3b0   : > { %v4839_v4 = vrot.slane %v17920_v23, 2  ;;  %v4318_v43 = vpop.f32.mrb[74].mxu0 }
 0x3b1   : > { %v4642_v25 = vsel %vm634_vm2, %v4639_v27, %v4641_v22  ;;  %v4550_v16 = vmax.f32 %v4509_v15, 0.0  ;;  %v3901_v30 = vpop.f32.mrb[74].mxu1  ;;  %v4462_v32 = vadd.f32 %v4318_v43, %v17795_v61  ;;  %v12459_v38 = vpop.f32.mrb[75].mxu0  ;;  %v17931_v10 = vpack.c.bf16 %v4945_v12, %v4944_v20 }
 0x3b2   : > { %v17933_v13 = vmax.f32 %v4548_v46, %v4642_v25  ;;  %v12373_v31 = vpop.f32.mrb[75].mxu1  ;;  %v17936_v49 = vadd.f32 %v3901_v30, %v17698_v19  ;;  %v4840_v47 = vsel %vm1430_vm4, %v4837_v48, %v4839_v4 }
 0x3b3   : > { %v4643_v11 = vrot.slane %v4550_v16, 1  ;;  %v4510_v34 = vadd.f32 %v17781_v37, %v4462_v32  ;;  %v4946_v27 = vmax.f32 %v17885_v55, %v4840_v47 }
 0x3b4   : > { %v4841_v59 = vrot.slane %v17933_v13, 2  ;;  %v4323_v63 = vpop.f32.mrb[76].mxu0 }
 0x3b5   : > { %v4644_v61 = vsel %vm634_vm2, %v4641_v22, %v4643_v11  ;;  %v4551_v20 = vmax.f32 %v4510_v34, 0.0  ;;  %v3906_v29 = vpop.f32.mrb[76].mxu1  ;;  %v4463_v46 = vadd.f32 %v4323_v63, %v17803_v44  ;;  %v12462_v17 = vpop.f32.mrb[77].mxu0 }
 0x3b6   : > { %v17944_v58 = vmax.f32 %v4549_v50, %v4644_v61  ;;  %v12376_v19 = vpop.f32.mrb[77].mxu1  ;;  %v17947_v48 = vadd.f32 %v3906_v29, %v17707_v42  ;;  %v4842_v1 = vsel %vm1430_vm4, %v4839_v4, %v4841_v59 }
 0x3b7   : > { %v4645_v39 = vrot.slane %v4551_v20, 1  ;;  %v4511_v55 = vadd.f32 %v17781_v37, %v4463_v46  ;;  %v4947_v15 = vmax.f32 %v17896_v41, %v4842_v1 }
 0x3b8   : > { %v4843_v22 = vrot.slane %v17944_v58, 2  ;;  %v4328_v12 = vpop.f32.mrb[78].mxu0 }
 0x3b9   : > { %v4646_v43 = vsel %vm634_vm2, %v4643_v11, %v4645_v39  ;;  %v4552_v44 = vmax.f32 %v4511_v55, 0.0  ;;  %v3911_v25 = vpop.f32.mrb[78].mxu1  ;;  %v4464_v50 = vadd.f32 %v4328_v12, %v17811_v18  ;;  %v12465_v30 = vpop.f32.mrb[79].mxu0  ;;  %v17955_v32 = vpack.c.bf16 %v4947_v15, %v4946_v27 }
 0x3ba   : > { %v17957_v42 = vmax.f32 %v4550_v16, %v4646_v43  ;;  %v12379_v4 = vpop.f32.mrb[79].mxu1  ;;  %v17960_v38 = vadd.f32 %v3911_v25, %v17713_v56  ;;  %v4844_v41 = vsel %vm1430_vm4, %v4841_v59, %v4843_v22 }
 0x3bb   : > { %v4647_v31 = vrot.slane %v4552_v44, 1  ;;  %v4512_v47 = vadd.f32 %v17781_v37, %v4464_v50  ;;  %v4948_v11 = vmax.f32 %v17909_v33, %v4844_v41 }
 0x3bc   : > { %v4845_v34 = vrot.slane %v17957_v42, 2  ;;  %v4333_v63 = vpop.f32.mrb[80].mxu0 }
 0x3bd   : > { %v4648_v18 = vsel %vm634_vm2, %v4645_v39, %v4647_v31  ;;  %v4553_v27 = vmax.f32 %v4512_v47, 0.0  ;;  %v3916_v61 = vpop.f32.mrb[80].mxu1  ;;  %v4465_v16 = vadd.f32 %v4333_v63, %v17819_v52  ;;  %v12468_v29 = vpop.f32.mrb[81].mxu0 }
 0x3be   : > { %v17968_v46 = vmax.f32 %v4551_v20, %v4648_v18  ;;  %v12382_v56 = vpop.f32.mrb[81].mxu1  ;;  %v17971_v59 = vadd.f32 %v3916_v61, %v17719_v60  ;;  %v4846_v17 = vsel %vm1430_vm4, %v4843_v22, %v4845_v34 }
 0x3bf   : > { %v4649_v19 = vrot.slane %v4553_v27, 1  ;;  %v4513_v33 = vadd.f32 %v17781_v37, %v4465_v16  ;;  %v4949_v1 = vmax.f32 %v17920_v23, %v4846_v17 }
 0x3c0   : > { %v4847_v39 = vrot.slane %v17968_v46, 2  ;;  %v4338_v55 = vpop.f32.mrb[82].mxu0 }
 0x3c1   : > { %v4554_v15 = vmax.f32 %v4513_v33, 0.0  ;;  %v3921_v12 = vpop.f32.mrb[82].mxu1  ;;  %v4466_v52 = vadd.f32 %v4338_v55, %v17827_v6  ;;  %v12471_v20 = vpop.f32.mrb[83].mxu0  ;;  %v4650_v43 = vsel %vm634_vm2, %v4647_v31, %v4649_v19  ;;  %v17979_v25 = vpack.c.bf16 %v4949_v1, %v4948_v11 }
 0x3c2   : > { %v12385_v60 = vpop.f32.mrb[83].mxu1  ;;  %v17981_v50 = vmax.f32 %v4552_v44, %v4650_v43  ;;  %v17984_v22 = vadd.f32 %v3921_v12, %v17725_v45  ;;  %v4848_v23 = vsel %vm1430_vm4, %v4845_v34, %v4847_v39 }
 0x3c3   : > { %v4651_v30 = vrot.slane %v4554_v15, 1  ;;  %v4514_v4 = vadd.f32 %v17781_v37, %v4466_v52  ;;  %v4950_v41 = vmax.f32 %v17933_v13, %v4848_v23 }
 0x3c4   : > { %v4343_v47 = vpop.f32.mrb[84].mxu0  ;;  %v4849_v6 = vrot.slane %v17981_v50, 2 }
 0x3c5   : > { %v4555_v63 = vmax.f32 %v4514_v4, 0.0  ;;  %v3926_v31 = vpop.f32.mrb[84].mxu1  ;;  %v4467_v11 = vadd.f32 %v4343_v47, %v17837_v40  ;;  %v12474_v18 = vpop.f32.mrb[85].mxu0  ;;  %v4652_v44 = vsel %vm634_vm2, %v4649_v19, %v4651_v30 }
 0x3c6   : > { %v17993_v45 = vadd.f32 %v3926_v31, %v17731_v2  ;;  %v12388_v61 = vpop.f32.mrb[85].mxu1  ;;  %v17995_v34 = vmax.f32 %v4553_v27, %v4652_v44  ;;  %v4850_v16 = vsel %vm1430_vm4, %v4847_v39, %v4849_v6 }
 0x3c7   : > { %v4653_v29 = vrot.slane %v4555_v63, 1  ;;  %v4515_v13 = vadd.f32 %v17781_v37, %v4467_v11  ;;  %v4951_v56 = vmax.f32 %v17944_v58, %v4850_v16 }
 0x3c8   : > { %v4348_v17 = vpop.f32.mrb[86].mxu0  ;;  %v4851_v33 = vrot.slane %v17995_v34, 2 }
 0x3c9   : > { %v4654_v40 = vsel %vm634_vm2, %v4651_v30, %v4653_v29  ;;  %v4556_v1 = vmax.f32 %v4515_v13, 0.0  ;;  %v3931_v19 = vpop.f32.mrb[86].mxu1  ;;  %v4468_v2 = vadd.f32 %v4348_v17, %v17848_v21  ;;  %v12477_v55 = vpop.f32.mrb[87].mxu0  ;;  %v18003_v12 = vpack.c.bf16 %v4951_v56, %v4950_v41 }
 0x3ca   : > { %v18005_v27 = vmax.f32 %v4554_v15, %v4654_v40  ;;  %v18008_v39 = vadd.f32 %v3931_v19, %v17737_v8  ;;  %v12391_v52 = vpop.f32.mrb[87].mxu1  ;;  %v4852_v58 = vsel %vm1430_vm4, %v4849_v6, %v4851_v33 }
 0x3cb   : > { %v4655_v20 = vrot.slane %v4556_v1, 1  ;;  %v4516_v43 = vadd.f32 %v17781_v37, %v4468_v2  ;;  %v4952_v60 = vmax.f32 %v17957_v42, %v4852_v58 }
 0x3cc   : > { %v4353_v23 = vpop.f32.mrb[88].mxu0  ;;  %v4853_v30 = vrot.slane %v18005_v27, 2 }
 0x3cd   : > { %v4656_v21 = vsel %vm634_vm2, %v4653_v29, %v4655_v20  ;;  %v4557_v4 = vmax.f32 %v4516_v43, 0.0  ;;  %v3936_v41 = vpop.f32.mrb[88].mxu1  ;;  %v4469_v15 = vadd.f32 %v4353_v23, %v17864_v14  ;;  %v12480_v47 = vpop.f32.mrb[89].mxu0 }
 0x3ce   : > { %v18016_v8 = vmax.f32 %v4555_v63, %v4656_v21  ;;  %v18019_v31 = vadd.f32 %v3936_v41, %v17743_v28  ;;  %v12394_v6 = vpop.f32.mrb[89].mxu1  ;;  %v4854_v11 = vsel %vm1430_vm4, %v4851_v33, %v4853_v30 }
 0x3cf   : > { %v4657_v18 = vrot.slane %v4557_v4, 1  ;;  %v4517_v42 = vadd.f32 %v17781_v37, %v4469_v15  ;;  %v4953_v44 = vmax.f32 %v17968_v46, %v4854_v11 }
 0x3d0   : > { %v4358_v61 = vpop.f32.mrb[90].mxu0  ;;  %v4855_v16 = vrot.slane %v18016_v8, 2 }
 0x3d1   : > { %v4658_v29 = vsel %vm634_vm2, %v4655_v20, %v4657_v18  ;;  %v4558_v14 = vmax.f32 %v4517_v42, 0.0  ;;  %v3941_v13 = vpop.f32.mrb[90].mxu1  ;;  %v4470_v63 = vadd.f32 %v4358_v61, %v17875_v57  ;;  %v12483_v56 = vpop.f32.mrb[91].mxu0  ;;  %v18027_v28 = vpack.c.bf16 %v4953_v44, %v4952_v60 }
 0x3d2   : > { %v18029_v17 = vmax.f32 %v4556_v1, %v4658_v29  ;;  %v18032_v33 = vadd.f32 %v3941_v13, %v17749_v5  ;;  %v12397_v40 = vpop.f32.mrb[91].mxu1  ;;  %v4856_v46 = vsel %vm1430_vm4, %v4853_v30, %v4855_v16 }
 0x3d3   : > { %v4659_v19 = vrot.slane %v4558_v14, 1  ;;  %v4518_v2 = vadd.f32 %v17781_v37, %v4470_v63  ;;  %v4954_v55 = vmax.f32 %v17981_v50, %v4856_v46 }
 0x3d4   : > { %v4363_v52 = vpop.f32.mrb[92].mxu0  ;;  %v4857_v58 = vrot.slane %v18029_v17, 2 }
 0x3d5   : > { %v4660_v57 = vsel %vm634_vm2, %v4657_v18, %v4659_v19  ;;  %v4559_v20 = vmax.f32 %v4518_v2, 0.0  ;;  %v3946_v43 = vpop.f32.mrb[92].mxu1  ;;  %v4471_v1 = vadd.f32 %v4363_v52, %v17888_v3  ;;  %v12486_v60 = vpop.f32.mrb[93].mxu0 }
 0x3d6   : > { %v18040_v5 = vmax.f32 %v4557_v4, %v4660_v57  ;;  %v18043_v23 = vadd.f32 %v3946_v43, %v17755_v36  ;;  %v12400_v30 = vpop.f32.mrb[93].mxu1  ;;  %v4858_v21 = vsel %vm1430_vm4, %v4855_v16, %v4857_v58 }
 0x3d7   : > { %v4661_v41 = vrot.slane %v4559_v20, 1  ;;  %v4519_v50 = vadd.f32 %v17781_v37, %v4471_v1  ;;  %v4955_v15 = vmax.f32 %v17995_v34, %v4858_v21 }
 0x3d8   : > { %v4368_v47 = vpop.f32.mrb[94].mxu0  ;;  %v4859_v6 = vrot.slane %v18040_v5, 2 }
 0x3d9   : > { %v4662_v11 = vsel %vm634_vm2, %v4659_v19, %v4661_v41  ;;  %v4560_v3 = vmax.f32 %v4519_v50, 0.0  ;;  %v3951_v18 = vpop.f32.mrb[94].mxu1  ;;  %v4472_v4 = vadd.f32 %v4368_v47, %v17899_v35  ;;  %v12489_v42 = vpop.f32.mrb[95].mxu0  ;;  %v13603_v36 = vpack.c.bf16 %v4955_v15, %v4954_v55 }
 0x3da   : > { %v18051_v44 = vmax.f32 %v4558_v14, %v4662_v11  ;;  %v18054_v61 = vadd.f32 %v3951_v18, %v17761_v9  ;;  %v12403_v16 = vpop.f32.mrb[95].mxu1  ;;  %v4860_v29 = vsel %vm1430_vm4, %v4857_v58, %v4859_v6 }
 0x3db   : > { %v4663_v34 = vrot.slane %v4560_v3, 1  ;;  %v4520_v13 = vadd.f32 %v17781_v37, %v4472_v4  ;;  %13604 = vmatprep.subr.bf16.mxu1 %v13603_v36  ;;  %v4956_v63 = vmax.f32 %v18005_v27, %v4860_v29 }
 0x3dc   : > { %v4373_v56 = vpop.f32.mrb[96].mxu0  ;;  %13606 = vmatpush3.bf16.msra.mxu1 %v17859_v54  ;;  %v4861_v35 = vrot.slane %v18051_v44, 2 }
 0x3dd   : > { %v4664_v14 = vsel %vm634_vm2, %v4661_v41, %v4663_v34  ;;  %v4561_v40 = vmax.f32 %v4520_v13, 0.0  ;;  %v3956_v46 = vpop.f32.mrb[96].mxu1  ;;  %v4473_v9 = vadd.f32 %v4373_v56, %v17912_v62  ;;  %v12492_v19 = vpop.f32.mrb[97].mxu0 }
 0x3de   : > { %v18063_v2 = vmax.f32 %v4559_v20, %v4664_v14  ;;  %v18066_v55 = vadd.f32 %v3956_v46, %v17767_v53  ;;  %v12406_v52 = vpop.f32.mrb[97].mxu1  ;;  %v4862_v27 = vsel %vm1430_vm4, %v4859_v6, %v4861_v35 }
 0x3df   : > { %v4665_v58 = vrot.slane %v4561_v40, 1  ;;  %v4521_v54 = vadd.f32 %v17781_v37, %v4473_v9  ;;  %v4957_v57 = vmax.f32 %v18016_v8, %v4862_v27 }
 0x3e0   : > { %v4378_v43 = vpop.f32.mrb[98].mxu0  ;;  %v4863_v1 = vrot.slane %v18063_v2, 2 }
 0x3e1   : > { %v4666_v60 = vsel %vm634_vm2, %v4663_v34, %v4665_v58  ;;  %v4562_v62 = vmax.f32 %v4521_v54, 0.0  ;;  %v3961_v30 = vpop.f32.mrb[98].mxu1  ;;  %v4474_v20 = vadd.f32 %v4378_v43, %v17923_v24  ;;  %v12495_v21 = vpop.f32.mrb[99].mxu0  ;;  %v13607_v53 = vpack.c.bf16 %v4957_v57, %v4956_v63 }
 0x3e2   : > { %v18074_v41 = vmax.f32 %v4560_v3, %v4666_v60  ;;  %v18077_v50 = vadd.f32 %v3961_v30, %v17773_v51  ;;  %v4864_v15 = vsel %vm1430_vm4, %v4861_v35, %v4863_v1  ;;  %v12409_v47 = vpop.f32.mrb[99].mxu1 }
 0x3e3   : > { %v4667_v8 = vrot.slane %v4562_v62, 1  ;;  %v4522_v6 = vadd.f32 %v17781_v37, %v4474_v20  ;;  %13608 = vmatprep.subr.bf16.mxu1 %v13607_v53  ;;  %v4958_v11 = vmax.f32 %v18029_v17, %v4864_v15 }
 0x3e4   : > { %v4383_v18 = vpop.f32.mrb[100].mxu0  ;;  %13610 = vmatpush3.bf16.msra.mxu1 %v17883_v0  ;;  %v4865_v24 = vrot.slane %v18074_v41, 2 }
 0x3e5   : > { %v4668_v3 = vsel %vm634_vm2, %v4665_v58, %v4667_v8  ;;  %v4563_v4 = vmax.f32 %v4522_v6, 0.0  ;;  %v4475_v51 = vadd.f32 %v4383_v18, %v17936_v49  ;;  %v12498_v42 = vpop.f32.mrb[101].mxu0 }
 0x3e6   : > { %v4757_v36 = vmax.f32 %v4561_v40, %v4668_v3  ;;  %v4866_v16 = vsel %vm1430_vm4, %v4863_v1, %v4865_v24 }
 0x3e7   : > { %v4669_v29 = vrot.slane %v4563_v4, 1  ;;  %v4523_v34 = vadd.f32 %v17781_v37, %v4475_v51  ;;  %v4959_v13 = vmax.f32 %v18040_v5, %v4866_v16 }
 0x3e8   : > { %v4388_v17 = vpop.f32.mrb[102].mxu0  ;;  %v4867_v63 = vrot.slane %v4757_v36, 2 }
 0x3e9   : > { %v4670_v0 = vsel %vm634_vm2, %v4667_v8, %v4669_v29  ;;  %v4564_v56 = vmax.f32 %v4523_v34, 0.0  ;;  %v4476_v35 = vadd.f32 %v4388_v17, %v17947_v48  ;;  %v12501_v14 = vpop.f32.mrb[103].mxu0  ;;  %v13611_v46 = vpack.c.bf16 %v4959_v13, %v4958_v11 }
 0x3ea   : > { %v18091_v9 = vmax.f32 %v4562_v62, %v4670_v0  ;;  %v4868_v49 = vsel %vm1430_vm4, %v4865_v24, %v4867_v63 }
 0x3eb   : > { %v4671_v40 = vrot.slane %v4564_v56, 1  ;;  %v4524_v19 = vadd.f32 %v17781_v37, %v4476_v35  ;;  %13612 = vmatprep.subr.bf16.mxu1 %v13611_v46  ;;  %v4960_v52 = vmax.f32 %v18051_v44, %v4868_v49 }
 0x3ec   : > { %v4393_v5 = vpop.f32.mrb[104].mxu0  ;;  %13614 = vmatpush3.bf16.msra.mxu1 %v17907_v7  ;;  %v4869_v27 = vrot.slane %v18091_v9, 2 }
 0x3ed   : > { %v4672_v58 = vsel %vm634_vm2, %v4669_v29, %v4671_v40  ;;  %v4565_v48 = vmax.f32 %v4524_v19, 0.0  ;;  %v4477_v54 = vadd.f32 %v4393_v5, %v17960_v38  ;;  %v12504_v57 = vpop.f32.mrb[105].mxu0 }
 0x3ee   : > { %v4759_v43 = vmax.f32 %v4563_v4, %v4672_v58  ;;  %v4870_v1 = vsel %vm1430_vm4, %v4867_v63, %v4869_v27 }
 0x3ef   : > { %v4673_v60 = vrot.slane %v4565_v48, 1  ;;  %v4525_v62 = vadd.f32 %v17781_v37, %v4477_v54  ;;  %v4961_v30 = vmax.f32 %v18063_v2, %v4870_v1 }
 0x3f0   : > { %v4398_v44 = vpop.f32.mrb[106].mxu0  ;;  %v4871_v20 = vrot.slane %v4759_v43, 2 }
 0x3f1   : > { %v4674_v7 = vsel %vm634_vm2, %v4671_v40, %v4673_v60  ;;  %v4566_v21 = vmax.f32 %v4525_v62, 0.0  ;;  %v4478_v53 = vadd.f32 %v4398_v44, %v17971_v59  ;;  %v12507_v15 = vpop.f32.mrb[107].mxu0  ;;  %v13615_v47 = vpack.c.bf16 %v4961_v30, %v4960_v52 }
 0x3f2   : > { %v18105_v8 = vmax.f32 %v4564_v56, %v4674_v7  ;;  %v4872_v38 = vsel %vm1430_vm4, %v4869_v27, %v4871_v20 }
 0x3f3   : > { %v4675_v6 = vrot.slane %v4566_v21, 1  ;;  %v4526_v11 = vadd.f32 %v17781_v37, %v4478_v53  ;;  %13616 = vmatprep.subr.bf16.mxu1 %v13615_v47  ;;  %v4962_v18 = vmax.f32 %v18074_v41, %v4872_v38 }
 0x3f4   : > { %v4403_v2 = vpop.f32.mrb[108].mxu0  ;;  %13618 = vmatpush3.bf16.msra.mxu1 %v17931_v10  ;;  %v4873_v24 = vrot.slane %v18105_v8, 2 }
 0x3f5   : > { %v4676_v3 = vsel %vm634_vm2, %v4673_v60, %v4675_v6  ;;  %v4567_v59 = vmax.f32 %v4526_v11, 0.0  ;;  %v4479_v4 = vadd.f32 %v4403_v2, %v17984_v22  ;;  %v12510_v51 = vpop.f32.mrb[109].mxu0 }
 0x3f6   : > { %v4761_v42 = vmax.f32 %v4565_v48, %v4676_v3  ;;  %v4874_v16 = vsel %vm1430_vm4, %v4871_v20, %v4873_v24 }
 0x3f7   : > { %v4677_v29 = vrot.slane %v4567_v59, 1  ;;  %v4527_v34 = vadd.f32 %v17781_v37, %v4479_v4  ;;  %v4963_v13 = vmax.f32 %v4757_v36, %v4874_v16 }
 0x3f8   : > { %v4408_v17 = vpop.f32.mrb[110].mxu0  ;;  %v4875_v41 = vrot.slane %v4761_v42, 2 }
 0x3f9   : > { %v4678_v63 = vsel %vm634_vm2, %v4675_v6, %v4677_v29  ;;  %v4568_v10 = vmax.f32 %v4527_v34, 0.0  ;;  %v4480_v0 = vadd.f32 %v4408_v17, %v17993_v45  ;;  %v12513_v56 = vpop.f32.mrb[111].mxu0  ;;  %v13619_v35 = vpack.c.bf16 %v4963_v13, %v4962_v18 }
 0x3fa   : > { %v18118_v14 = vmax.f32 %v4566_v21, %v4678_v63  ;;  %v4876_v22 = vsel %vm1430_vm4, %v4873_v24, %v4875_v41 }
 0x3fb   : > { %v4679_v46 = vrot.slane %v4568_v10, 1  ;;  %v4528_v49 = vadd.f32 %v17781_v37, %v4480_v0  ;;  %13620 = vmatprep.subr.bf16.mxu1 %v13619_v35  ;;  %v4964_v40 = vmax.f32 %v18091_v9, %v4876_v22 }
 0x3fc   : > { %v4413_v36 = vpop.f32.mrb[112].mxu0  ;;  %13622 = vmatpush3.bf16.msra.mxu1 %v17955_v32  ;;  %v4877_v19 = vrot.slane %v18118_v14, 2 }
 0x3fd   : > { %v4680_v52 = vsel %vm634_vm2, %v4677_v29, %v4679_v46  ;;  %v4569_v45 = vmax.f32 %v4528_v49, 0.0  ;;  %v4481_v5 = vadd.f32 %v4413_v36, %v18008_v39  ;;  %v12516_v27 = vpop.f32.mrb[113].mxu0 }
 0x3fe   : > { %v18127_v58 = vmax.f32 %v4567_v59, %v4680_v52  ;;  %v4878_v48 = vsel %vm1430_vm4, %v4875_v41, %v4877_v19 }
 0x3ff   : > { %v4681_v54 = vrot.slane %v4569_v45, 1  ;;  %v4529_v57 = vadd.f32 %v17781_v37, %v4481_v5  ;;  %v4965_v1 = vmax.f32 %v4759_v43, %v4878_v48 }
 0x400   : > { %v4418_v9 = vpop.f32.mrb[114].mxu0  ;;  %v4879_v60 = vrot.slane %v18127_v58, 2 }
 0x401   : > { %v4682_v32 = vsel %vm634_vm2, %v4679_v46, %v4681_v54  ;;  %v4570_v62 = vmax.f32 %v4529_v57, 0.0  ;;  %v4482_v30 = vadd.f32 %v4418_v9, %v18019_v31  ;;  %v12519_v44 = vpop.f32.mrb[115].mxu0  ;;  %v13623_v20 = vpack.c.bf16 %v4965_v1, %v4964_v40  ;;  %v4977_v9 = vld [vmem:[%s20566_s3] sm:$0xff] }
 0x402   : > { %v18134_v39 = vmax.f32 %v4568_v10, %v4682_v32  ;;  %v4880_v7 = vsel %vm1430_vm4, %v4877_v19, %v4879_v60 }
 0x403   : > { %v4683_v21 = vrot.slane %v4570_v62, 1  ;;  %v4530_v53 = vadd.f32 %v17781_v37, %v4482_v30  ;;  %13624 = vmatprep.subr.bf16.mxu1 %v13623_v20  ;;  %v4966_v43 = vmax.f32 %v18105_v8, %v4880_v7  ;;  %v4981_v30 = vld [vmem:[%s20566_s3 + $0x20] sm:$0xff] }
 0x404   : > { %v4423_v15 = vpop.f32.mrb[116].mxu0  ;;  %13626 = vmatpush3.bf16.msra.mxu1 %v17979_v25  ;;  %v4881_v47 = vrot.slane %v18134_v39, 2 }
 0x405   : > { %v4684_v38 = vsel %vm634_vm2, %v4681_v54, %v4683_v21  ;;  %v4571_v31 = vmax.f32 %v4530_v53, 0.0  ;;  %v4483_v6 = vadd.f32 %v4423_v15, %v18032_v33  ;;  %v12522_v11 = vpop.f32.mrb[117].mxu0  ;;  %v4980_v53 = vld [vmem:[%s20566_s3 + $0x18] sm:$0xff] }
 0x406   : > { %v18143_v18 = vmax.f32 %v4569_v45, %v4684_v38  ;;  %v4882_v2 = vsel %vm1430_vm4, %v4879_v60, %v4881_v47  ;;  %v4984_v38 = vld [vmem:[%s20566_s3 + $0x38] sm:$0xff] }
 0x407   : > { %v4685_v24 = vrot.slane %v4571_v31, 1  ;;  %v4531_v3 = vadd.f32 %v17781_v37, %v4483_v6  ;;  %v4967_v59 = vmax.f32 %v4761_v42, %v4882_v2 }
 0x408   : > { %v4428_v8 = vpop.f32.mrb[118].mxu0  ;;  %v4883_v4 = vrot.slane %v18143_v18, 2 }
 0x409   : > { %v4686_v25 = vsel %vm634_vm2, %v4683_v21, %v4685_v24  ;;  %v4572_v51 = vmax.f32 %v4531_v3, 0.0  ;;  %v4484_v16 = vadd.f32 %v4428_v8, %v18043_v23  ;;  %v12525_v29 = vpop.f32.mrb[119].mxu0  ;;  %v13627_v34 = vpack.c.bf16 %v4967_v59, %v4966_v43  ;;  %v4987_v8 = vld [vmem:[%s20566_s3 + $0x50] sm:$0xff] }
 0x40a   : > { %v18150_v33 = vmax.f32 %v4570_v62, %v4686_v25  ;;  %v4884_v13 = vsel %vm1430_vm4, %v4881_v47, %v4883_v4 }
 0x40b   : > { %v4687_v17 = vrot.slane %v4572_v51, 1  ;;  %v4532_v41 = vadd.f32 %v17781_v37, %v4484_v16  ;;  %13628 = vmatprep.subr.bf16.mxu1 %v13627_v34  ;;  %v4968_v42 = vmax.f32 %v18118_v14, %v4884_v13  ;;  %v14214_v37 = vld [vmem:[%s20565_s2] ss:$0 sm:$0xff] }
 0x40c   : > { %v4433_v63 = vpop.f32.mrb[120].mxu0  ;;  %13630 = vmatpush3.bf16.msra.mxu1 %v18003_v12  ;;  %v4885_v10 = vrot.slane %v18150_v33, 2 }
 0x40d   : > { %v4688_v0 = vsel %vm634_vm2, %v4685_v24, %v4687_v17  ;;  %v4573_v23 = vmax.f32 %v4532_v41, 0.0  ;;  %v4485_v56 = vadd.f32 %v4433_v63, %v18054_v61  ;;  %v12528_v35 = vpop.f32.mrb[121].mxu0  ;;  %v4983_v24 = vld [vmem:[%s20566_s3 + $0x30] sm:$0xff] }
 0x40e   : > { %v18159_v22 = vmax.f32 %v4571_v31, %v4688_v0  ;;  %v4886_v46 = vsel %vm1430_vm4, %v4883_v4, %v4885_v10  ;;  %v4993_v35 = vld [vmem:[%s20566_s3 + $0x80] sm:$0xff] }
 0x40f   : > { %v4689_v49 = vrot.slane %v4573_v23, 1  ;;  %v4533_v14 = vadd.f32 %v14214_v37, %v4485_v56  ;;  %v4969_v12 = vmax.f32 %v18127_v58, %v4886_v46  ;;  %v4996_v46 = vld [vmem:[%s20566_s3 + $0x98] sm:$0xff] }
 0x410   : > { %v4438_v40 = vpop.f32.mrb[122].mxu0  ;;  %v4887_v36 = vrot.slane %v18159_v22, 2 }
 0x411   : > { %v4690_v19 = vsel %vm634_vm2, %v4687_v17, %v4689_v49  ;;  %v4574_v52 = vmax.f32 %v4533_v14, 0.0  ;;  %v4486_v61 = vadd.f32 %v4438_v40, %v18066_v55  ;;  %v12531_v45 = vpop.f32.mrb[123].mxu0  ;;  %v13631_v5 = vpack.c.bf16 %v4969_v12, %v4968_v42  ;;  %v4990_v17 = vld [vmem:[%s20566_s3 + $0x68] sm:$0xff]  ;;  %v5001_v40 = vld [vmem:[%s20566_s3 + $0xc0] sm:$0xff] }
 0x412   : > { %v18169_v27 = vmax.f32 %v4572_v51, %v4690_v19  ;;  %v4888_v48 = vsel %vm1430_vm4, %v4885_v10, %v4887_v36  ;;  %v4998_v14 = vld [vmem:[%s20566_s3 + $0xa8] sm:$0xff]  ;;  %v5004_v19 = vld [vmem:[%s20566_s3 + $0xd8] sm:$0xff]  ;;  %v5011_v45 = vld [vmem:[%s20566_s3 + $0x110] sm:$0xff] }
 0x413   : > { %v4691_v54 = vrot.slane %v4574_v52, 1  ;;  %v4534_v57 = vadd.f32 %v14214_v37, %v4486_v61  ;;  %13632 = vmatprep.subr.bf16.mxu1 %v13631_v5  ;;  %v4970_v1 = vmax.f32 %v18134_v39, %v4888_v48  ;;  %v5002_v12 = vld [vmem:[%s20566_s3 + $0xc8] sm:$0xff]  ;;  %v5007_v61 = vld [vmem:[%s20566_s3 + $0xf0] sm:$0xff]  ;;  %v5013_v48 = vld [vmem:[%s20566_s3 + $0x120] sm:$0xff] }
 0x414   : > { %v4443_v58 = vpop.f32.mrb[124].mxu0  ;;  %13634 = vmatpush3.bf16.msra.mxu1 %v18027_v28  ;;  %v4889_v55 = vrot.slane %v18169_v27, 2  ;;  %v5010_v5 = vld [vmem:[%s20566_s3 + $0x108] sm:$0xff] }
 0x415   : > { %v4692_v60 = vsel %vm634_vm2, %v4689_v49, %v4691_v54  ;;  %v4575_v32 = vmax.f32 %v4534_v57, 0.0  ;;  %v4487_v62 = vadd.f32 %v4443_v58, %v18077_v50  ;;  %v12534_v44 = vpop.f32.mrb[125].mxu0  ;;  %v4770_v51 = vmax.f32 %v4574_v52, %v4691_v54  ;;  %v4995_v49 = vld [vmem:[%s20566_s3 + $0x90] sm:$0xff]  ;;  %v5016_v57 = vld [vmem:[%s20566_s3 + $0x138] sm:$0xff] }
 0x416   : > { %v4769_v20 = vmax.f32 %v4573_v23, %v4692_v60  ;;  %v4890_v39 = vsel %vm1430_vm4, %v4887_v36, %v4889_v55  ;;  %v4989_v23 = vld [vmem:[%s20566_s3 + $0x60] sm:$0xff]  ;;  %v5019_v58 = vld [vmem:[%s20566_s3 + $0x150] sm:$0xff] }
 0x417   : > { %v4773_v28 = vrot.slane %v4575_v32, 1  ;;  %v4535_v7 = vadd.f32 %v14214_v37, %v4487_v62  ;;  %5143 = vmatmul.mubr.f32.vlgmr.msra.gmra.mrb[100].mxu1 %v4977_v9  ;;  %v4971_v21 = vmax.f32 %v18143_v18, %v4890_v39  ;;  %v4999_v37 = vld [vmem:[%s20566_s3 + $0xb0] sm:$0xff]  ;;  %v5005_v36 = vld [vmem:[%s20566_s3 + $0xe0] sm:$0xff] }
 0x418   : > { %5147 = vmatprep.mubr.f32.mxu1 %v4981_v30  ;;  %v4891_v43 = vrot.slane %v4769_v20, 2  ;;  %v5023_v9 = vld [vmem:[%s20566_s3 + $0x170] sm:$0x3]  ;;  %v4985_v62 = vld [vmem:[%s20566_s3 + $0x40] sm:$0xff]  ;;  %v4988_v30 = vld [vmem:[%s20566_s3 + $0x58] sm:$0xff] }
 0x419   : > { %v4774_v50 = vsel %vm634_vm2, %v4691_v54, %v4773_v28  ;;  %v4576_v15 = vmax.f32 %v4535_v7, 0.0  ;;  %v13635_v47 = vpack.c.bf16 %v4971_v21, %v4970_v1  ;;  %v5017_v54 = vld [vmem:[%s20566_s3 + $0x140] sm:$0xff]  ;;  %v5020_v1 = vld [vmem:[%s20566_s3 + $0x158] sm:$0xff]  ;;  %v4979_v60 = vld [vmem:[%s20566_s3 + $0x10] sm:$0xff] }
 0x41a   : > { %v4780_v31 = vmax.f32 %v4574_v52, %v4774_v50  ;;  %v4892_v6 = vsel %vm1430_vm4, %v4889_v55, %v4891_v43  ;;  %v5008_v52 = vld [vmem:[%s20566_s3 + $0xf8] sm:$0xff]  ;;  %v5022_v55 = vld [vmem:[%s20566_s3 + $0x168] sm:$0x3]  ;;  %v4991_v44 = vld [vmem:[%s20566_s3 + $0x70] sm:$0xff] }
 0x41b   : > { %v4775_v11 = vrot.slane %v4576_v15, 1  ;;  %5148 = vmatmul.mubr.f32.gmra.mrb[102].mxu1 %v4980_v53  ;;  %13636 = vmatprep.subr.bf16.mxu1 %v13635_v47  ;;  %v4972_v18 = vmax.f32 %v18150_v33, %v4892_v6  ;;  %v4986_v33 = vld [vmem:[%s20566_s3 + $0x48] sm:$0xff]  ;;  %v4997_v39 = vld [vmem:[%s20566_s3 + $0xa0] sm:$0xff]  ;;  %v5003_v7 = vld [vmem:[%s20566_s3 + $0xd0] sm:$0xff] }
 0x41c   : > { %v4893_v2 = vrot.slane %v4780_v31, 2  ;;  %13638 = vmatpush3.bf16.msra.mxu1 %v13635_v47  ;;  %5152 = vmatprep.mubr.f32.mxu1 %v4984_v38  ;;  %v5006_v21 = vld [vmem:[%s20566_s3 + $0xe8] sm:$0xff]  ;;  %v5009_v53 = vld [vmem:[%s20566_s3 + $0x100] sm:$0xff]  ;;  %v5015_v50 = vld [vmem:[%s20566_s3 + $0x130] sm:$0xff]  ;;  %v14348_v31 = vmov 0.0|0.0  }
 0x41d   : > { %v4776_v3 = vsel %vm634_vm2, %v4773_v28, %v4775_v11  ;;  %v4782_v59 = vmax.f32 %v4576_v15, %v4775_v11  ;;  %v5000_v28 = vld [vmem:[%s20566_s3 + $0xb8] sm:$0xff]  ;;  %v5018_v15 = vld [vmem:[%s20566_s3 + $0x148] sm:$0xff]  ;;  %v5021_v47 = vld [vmem:[%s20566_s3 + $0x160] sm:$0xff]  ;;  %13671 = vmatprep.subr.bf16.mxu0 %v14348_v31 }
 0x41e   : > { %v4781_v4 = vmax.f32 %v4575_v32, %v4776_v3  ;;  %v4894_v25 = vsel %vm1430_vm4, %v4891_v43, %v4893_v2  ;;  %v4982_v32 = vld [vmem:[%s20566_s3 + $0x28] sm:$0xff]  ;;  %v5012_v43 = vld [vmem:[%s20566_s3 + $0x118] sm:$0xff]  ;;  %v10163_v6 = vld [vmem:[%s20567_s4 + $0x40] sm:$0xff] }
 0x41f   : > { %v4897_v16 = vrot.slane %v4782_v59, 2  ;;  %5153 = vmatmul.mubr.f32.gmra.mrb[104].mxu1 %v4983_v24  ;;  %v4973_v29 = vmax.f32 %v18159_v22, %v4894_v25  ;;  %v4992_v22 = vld [vmem:[%s20566_s3 + $0x78] sm:$0xff]  ;;  %v10164_v11 = vld [vmem:[%s20567_s4 + $0x48] sm:$0xff]  ;;  %v10165_v59 = vld [vmem:[%s20567_s4 + $0x50] sm:$0xff] }
 0x420   : > { %v4895_v34 = vrot.slane %v4781_v4, 2  ;;  %5157 = vmatprep.mubr.f32.mxu1 %v4987_v8  ;;  %v5024_v38 = vld [vmem:[%s20566_s3 + $0x178] sm:$0x3]  ;;  %v10198_v24 = vld [vmem:[%s20567_s4 + $0x88] sm:$0xff]  ;;  %v10199_v4 = vld [vmem:[%s20567_s4 + $0x90] sm:$0xff] }
 0x421   : > { %v13639_v13 = vpack.c.bf16 %v4973_v29, %v4972_v18  ;;  %v4976_v41 = vmax.f32 %v4770_v51, %v4897_v16  ;;  %v10197_v18 = vld [vmem:[%s20567_s4 + $0x80] sm:$0xff]  ;;  %v10166_v8 = vld [vmem:[%s20567_s4 + $0x58] sm:$0xff] }
 0x422   : > { %v4896_v42 = vsel %vm1430_vm4, %v4893_v2, %v4895_v34  ;;  %v4898_v63 = vsel %vm1430_vm4, %v4895_v34, %v4897_v16  ;;  %v13648_v2 = vpack.c.bf16 %v10164_v11, %v10163_v6  ;;  %v13672_v3 = vpack.c.bf16 %v10198_v24, %v10197_v18  ;;  %v10200_v51 = vld [vmem:[%s20567_s4 + $0x98] sm:$0xff]  ;;  %v10167_v29 = vld [vmem:[%s20567_s4 + $0x60] sm:$0xff]  ;;  %v10168_v34 = vld [vmem:[%s20567_s4 + $0x68] sm:$0xff] }
 0x423   : > { %5158 = vmatmul.mubr.f32.gmra.mrb[106].mxu1 %v4986_v33  ;;  %13640 = vmatprep.subr.bf16.mxu1 %v13639_v13  ;;  %v4974_v10 = vmax.f32 %v18169_v27, %v4896_v42  ;;  %v4975_v0 = vmax.f32 %v4769_v20, %v4898_v63  ;;  %v5014_v27 = vld [vmem:[%s20566_s3 + $0x128] sm:$0xff]  ;;  %v13651_v25 = vpack.c.bf16 %v10166_v8, %v10165_v59  ;;  %v10201_v33 = vld [vmem:[%s20567_s4 + $0xa0] sm:$0xff]  ;;  %v10169_v42 = vld [vmem:[%s20567_s4 + $0x70] sm:$0xff] }
 0x424   : > { %13642 = vmatpush3.bf16.msra.mxu1 %v13639_v13  ;;  %5162 = vmatprep.mubr.f32.mxu1 %v4990_v17  ;;  %v4994_v20 = vld [vmem:[%s20566_s3 + $0x88] sm:$0xff]  ;;  %v13675_v16 = vpack.c.bf16 %v10200_v51, %v10199_v4  ;;  %v13654_v13 = vpack.c.bf16 %v10168_v34, %v10167_v29  ;;  %v10170_v63 = vld [vmem:[%s20567_s4 + $0x78] sm:$0xff]  ;;  %v5368_v34 = vld [vmem:[%s20567_s4] sm:$0xff] }
 0x425   : > { %v13643_v56 = vpack.c.bf16 %v4975_v0, %v4974_v10  ;;  %13673 = vmatpush3.bf16.msra.mxu0 %v13672_v3  ;;  %v10202_v17 = vld [vmem:[%s20567_s4 + $0xa8] sm:$0xff]  ;;  %v10203_v10 = vld [vmem:[%s20567_s4 + $0xb0] sm:$0xff]  ;;  %v13657_v0 = vpack.c.bf16 %v10170_v63, %v10169_v42 }
 0x426   : > { %13674 = vmatprep.subr.bf16.mxu0 %v14348_v31 }
 0x427   : > { %5163 = vmatmul.mubr.f32.gmra.mrb[108].mxu1 %v4989_v23  ;;  %13644 = vmatprep.subr.bf16.mxu1 %v13643_v56  ;;  %v10204_v23 = vld [vmem:[%s20567_s4 + $0xb8] sm:$0xff] }
 0x428   : > { %13646 = vmatpush3.bf16.msra.mxu1 %v13643_v56  ;;  %5167 = vmatprep.mubr.f32.mxu1 %v4993_v35  ;;  %v13681_v56 = vpack.c.bf16 %v10204_v23, %v10203_v10  ;;  %v5370_v10 = vld [vmem:[%s20567_s4 + $0x10] sm:$0xff] }
 0x429   : > { %12547 = vmatprep.subr.msk.mxu1 %vm5074_vm8, %v4976_v41  ;;  %13676 = vmatpush3.bf16.msra.mxu0 %v13675_v16 }
 0x42a   : > { %13677 = vmatprep.subr.bf16.mxu0 %v14348_v31 }
 0x42b   : > { %5168 = vmatmul.mubr.f32.gmra.mrb[110].mxu1 %v4992_v22 }
 0x42c   : > { %12548 = vmatpush3.msk.msra.mxu1 %vm5074_vm8, %v4976_v41  ;;  %5172 = vmatprep.mubr.f32.mxu1 %v4996_v46  ;;  %v13678_v41 = vpack.c.bf16 %v10202_v17, %v10201_v33  ;;  %v10239_v17 = vld [vmem:[%s20567_s4 + $0x100] sm:$0xff] }
 0x42d   : > { %13647 = vmatprep.subr.bf16.mxu1 %v14348_v31 }
 0x42e   : > { %13679 = vmatpush3.bf16.msra.mxu0 %v13678_v41  ;;  %v10240_v41 = vld [vmem:[%s20567_s4 + $0x108] sm:$0xff] }
 0x42f   : > { %5173 = vmatmul.mubr.f32.gmra.mrb[112].mxu1 %v4995_v49  ;;  %13680 = vmatprep.subr.bf16.mxu0 %v14348_v31 }
 0x430   : > { %5177 = vmatprep.mubr.f32.mxu1 %v4999_v37 }
 0x432   : > { %13682 = vmatpush3.bf16.msra.mxu0 %v13681_v56 }
 0x433   : > { %5178 = vmatmul.mubr.f32.gmra.mrb[114].mxu1 %v4998_v14  ;;  %13695 = vmatprep.subr.bf16.mxu0 %v14348_v31 }
 0x434   : > { %5182 = vmatprep.mubr.f32.mxu1 %v5002_v12 }
 0x437   : > { %5183 = vmatmul.mubr.f32.gmra.mrb[116].mxu1 %v5001_v40 }
 0x438   : > { %5187 = vmatprep.mubr.f32.mxu1 %v5005_v36 }
 0x43b   : > { %5188 = vmatmul.mubr.f32.gmra.mrb[118].mxu1 %v5004_v19 }
 0x43c   : > { %5192 = vmatprep.mubr.f32.mxu1 %v5008_v52 }
 0x43f   : > { %5193 = vmatmul.mubr.f32.gmra.mrb[120].mxu1 %v5007_v61 }
 0x440   : > { %5197 = vmatprep.mubr.f32.mxu1 %v5011_v45 }
 0x443   : > { %5198 = vmatmul.mubr.f32.gmra.mrb[122].mxu1 %v5010_v5 }
 0x444   : > { %5202 = vmatprep.mubr.f32.mxu1 %v5014_v27 }
 0x447   : > { %5203 = vmatmul.mubr.f32.gmra.mrb[124].mxu1 %v5013_v48 }
 0x448   : > { %5207 = vmatprep.mubr.f32.mxu1 %v5017_v54 }
 0x44b   : > { %5208 = vmatmul.mubr.f32.gmra.mrb[126].mxu1 %v5016_v57 }
 0x44c   : > { %5212 = vmatprep.mubr.f32.mxu1 %v5020_v1 }
 0x44f   : > { %5213 = vmatmul.mubr.f32.gmra.mrb[128].mxu1 %v5019_v58 }
 0x450   : > { %5217 = vmatprep.mubr.f32.mxu1 %v5023_v9 }
 0x453   : > { %5218 = vmatmul.mubr.f32.gmra.mrb[130].mxu1 %v5022_v55 }
 0x454   : > { %12549 = vmatprep.mubr.msk.f32.mxu1 %vm5025_vm9, %v4979_v60 }
 0x457   : > { %12550 = vmatmul.mubr.msk.f32.vlgmr.msra.gmra.mrb[132].mxu1 %vm5025_vm9, %v4982_v32 }
 0x458   : > { %12552 = vmatprep.mubr.msk.f32.mxu1 %vm5025_vm9, %v4985_v62  ;;  %13649 = vmatpush3.bf16.msra.mxu1 %v13648_v2 }
 0x459   : > { %13650 = vmatprep.subr.bf16.mxu1 %v14348_v31 }
 0x45b   : > { %12553 = vmatmul.mubr.msk.f32.gmra.mrb[134].mxu1 %vm5025_vm9, %v4988_v30 }
 0x45c   : > { %12555 = vmatprep.mubr.msk.f32.mxu1 %vm5025_vm9, %v4991_v44  ;;  %13652 = vmatpush3.bf16.msra.mxu1 %v13651_v25 }
 0x45d   : > { %13653 = vmatprep.subr.bf16.mxu1 %v14348_v31 }
 0x45f   : > { %12556 = vmatmul.mubr.msk.f32.gmra.mrb[136].mxu1 %vm5025_vm9, %v4994_v20 }
 0x460   : > { %12558 = vmatprep.mubr.msk.f32.mxu1 %vm5025_vm9, %v4997_v39  ;;  %13655 = vmatpush3.bf16.msra.mxu1 %v13654_v13  ;;  %v5369_v13 = vld [vmem:[%s20567_s4 + $0x8] sm:$0xff] }
 0x461   : > { %13656 = vmatprep.subr.bf16.mxu1 %v14348_v31 }
 0x463   : > { %12559 = vmatmul.mubr.msk.f32.gmra.mrb[138].mxu1 %vm5025_vm9, %v5000_v28 }
 0x464   : > { %12561 = vmatprep.mubr.msk.f32.mxu1 %vm5025_vm9, %v5003_v7  ;;  %13658 = vmatpush3.bf16.msra.mxu1 %v13657_v0 }
 0x465   : > { %13659 = vmatprep.subr.bf16.mxu1 %v14348_v31 }
 0x467   : > { %12562 = vmatmul.mubr.msk.f32.gmra.mrb[140].mxu1 %vm5025_vm9, %v5006_v21 }
 0x468   : > { %12564 = vmatprep.mubr.msk.f32.mxu1 %vm5025_vm9, %v5009_v53 }
 0x46b   : > { %12565 = vmatmul.mubr.msk.f32.gmra.mrb[142].mxu1 %vm5025_vm9, %v5012_v43 }
 0x46c   : > { %12567 = vmatprep.mubr.msk.f32.mxu1 %vm5025_vm9, %v5015_v50 }
 0x46f   : > { %12568 = vmatmul.mubr.msk.f32.gmra.mrb[144].mxu1 %vm5025_vm9, %v5018_v15 }
 0x470   : > { %12570 = vmatprep.mubr.msk.f32.mxu1 %vm5025_vm9, %v5021_v47 }
 0x473   : > { %12571 = vmatmul.mubr.msk.f32.gmra.mrb[146].mxu1 %vm5025_vm9, %v5024_v38 }
 0x474   : > { %12589 = vmatprep.mubr.msk.f32.mxu1 %vm14347_vm0, %v20660_v26 }
 0x4ea   : > { %v10904_v35 = vpop.f32.mrb[100].mxu1 }
 0x4eb   : > { %v10905_v22 = vpop.f32.mrb[101].mxu1 }
 0x4ec   : > { %v10906_v46 = vadd.f32 %v10905_v22, %v10904_v35  ;;  %v5371_v35 = vld [vmem:[%s20567_s4 + $0x18] sm:$0xff]  ;;  %v10241_v22 = vld [vmem:[%s20567_s4 + $0x110] sm:$0xff] }
 0x4ee   : > { %v10907_v49 = vpop.f32.mrb[102].mxu1 }
 0x4ef   : > { %v10908_v37 = vpop.f32.mrb[103].mxu1 }
 0x4f0   : > { %v10909_v14 = vadd.f32 %v10908_v37, %v10907_v49 }
 0x4f2   : > { %v10910_v12 = vpop.f32.mrb[104].mxu1 }
 0x4f3   : > { %v10911_v40 = vpop.f32.mrb[105].mxu1 }
 0x4f4   : > { %v18407_v36 = vadd.f32 %v10911_v40, %v10910_v12  ;;  %v13696_v12 = vpack.c.bf16 %v10240_v41, %v10239_v17 }
 0x4f6   : > { %v10913_v19 = vpop.f32.mrb[106].mxu1 }
 0x4f7   : > { %v10914_v52 = vpop.f32.mrb[107].mxu1 }
 0x4f8   : > { %v10915_v61 = vadd.f32 %v10914_v52, %v10913_v19 }
 0x4fa   : > { %v10916_v45 = vpop.f32.mrb[108].mxu1 }
 0x4fb   : > { %v10917_v5 = vpop.f32.mrb[109].mxu1 }
 0x4fc   : > { %v18409_v27 = vadd.f32 %v10917_v5, %v10916_v45 }
 0x4fe   : > { %v10919_v48 = vpop.f32.mrb[110].mxu1 }
 0x4ff   : > { %v10920_v54 = vpop.f32.mrb[111].mxu1 }
 0x500   : > { %v18411_v57 = vadd.f32 %v10920_v54, %v10919_v48 }
 0x502   : > { %v10922_v1 = vpop.f32.mrb[112].mxu1 }
 0x503   : > { %v10923_v58 = vpop.f32.mrb[113].mxu1 }
 0x504   : > { %v18413_v9 = vadd.f32 %v10923_v58, %v10922_v1 }
 0x506   : > { %v10925_v55 = vpop.f32.mrb[114].mxu1 }
 0x507   : > { %v10926_v60 = vpop.f32.mrb[115].mxu1 }
 0x508   : > { %v18415_v32 = vadd.f32 %v10926_v60, %v10925_v55 }
 0x50a   : > { %v10928_v62 = vpop.f32.mrb[116].mxu1 }
 0x50b   : > { %v10929_v30 = vpop.f32.mrb[117].mxu1 }
 0x50c   : > { %v18417_v44 = vadd.f32 %v10929_v30, %v10928_v62 }
 0x50e   : > { %v10931_v20 = vpop.f32.mrb[118].mxu1 }
 0x50f   : > { %v10932_v39 = vpop.f32.mrb[119].mxu1 }
 0x510   : > { %v18419_v28 = vadd.f32 %v10932_v39, %v10931_v20 }
 0x512   : > { %v10934_v7 = vpop.f32.mrb[120].mxu1 }
 0x513   : > { %v10935_v21 = vpop.f32.mrb[121].mxu1 }
 0x514   : > { %v18421_v53 = vadd.f32 %v10935_v21, %v10934_v7 }
 0x516   : > { %v10937_v43 = vpop.f32.mrb[122].mxu1 }
 0x517   : > { %v10938_v50 = vpop.f32.mrb[123].mxu1 }
 0x518   : > { %v18423_v15 = vadd.f32 %v10938_v50, %v10937_v43 }
 0x51a   : > { %v10940_v47 = vpop.f32.mrb[124].mxu1 }
 0x51b   : > { %v10941_v38 = vpop.f32.mrb[125].mxu1 }
 0x51c   : > { %v18425_v6 = vadd.f32 %v10941_v38, %v10940_v47  ;;  %v5372_v47 = vld [vmem:[%s20567_s4 + $0x20] sm:$0xff] }
 0x51e   : > { %v10943_v11 = vpop.f32.mrb[126].mxu1 }
 0x51f   : > { %v10944_v18 = vpop.f32.mrb[127].mxu1 }
 0x520   : > { %v18427_v2 = vadd.f32 %v10944_v18, %v10943_v11 }
 0x522   : > { %v10946_v24 = vpop.f32.mrb[128].mxu1 }
 0x523   : > { %v10947_v3 = vpop.f32.mrb[129].mxu1 }
 0x524   : > { %v18429_v59 = vadd.f32 %v10947_v3, %v10946_v24 }
 0x526   : > { %v10949_v8 = vpop.f32.mrb[130].mxu1 }
 0x527   : > { %v10950_v4 = vpop.f32.mrb[131].mxu1 }
 0x528   : > { %v18431_v25 = vadd.f32 %v10950_v4, %v10949_v8 }
 0x52a   : > { %v12551_v51 = vpop.f32.mrb[132].mxu1 }
 0x52b   : > { %v18433_v16 = vadd.f32 %v12551_v51, %v10909_v14  ;;  %v5289_v29 = vpop.f32.mrb[133].mxu1  ;;  %v13660_v14 = vpack.c.bf16 %v5369_v13, %v5368_v34 }
 0x52c   : > { %v18438_v33 = vadd.f32 %v10906_v46, %v5289_v29  ;;  %v10242_v46 = vld [vmem:[%s20567_s4 + $0x118] sm:$0xff] }
 0x52d   : > { %v5399_v42 = vrot.slane %v18433_v16, 1  ;;  %v5746_v63 = vrot.slane %v18433_v16, 2  ;;  %v13699_v48 = vpack.c.bf16 %v10242_v46, %v10241_v22  ;;  %v6107_v60 = vrot.slane %v18433_v16, 3  ;;  %v5374_v22 = vld [vmem:[%s20567_s4 + $0x30] sm:$0xff]  ;;  %v5375_v46 = vld [vmem:[%s20567_s4 + $0x38] sm:$0xff] }
 0x52e   : > { %v5398_v0 = vrot.slane %v18438_v33, 1  ;;  %v5745_v23 = vrot.slane %v18438_v33, 2  ;;  %v12554_v56 = vpop.f32.mrb[134].mxu1 }
 0x52f   : > { %v18465_v49 = vadd.f32 %v12554_v56, %v10915_v61  ;;  %v5299_v37 = vpop.f32.mrb[135].mxu1  ;;  %v13663_v61 = vpack.c.bf16 %v5371_v35, %v5370_v10 }
 0x530   : > { %v5400_v40 = vsel %vm634_vm2, %v5398_v0, %v5399_v42  ;;  %v5747_v19 = vsel %vm1430_vm4, %v5745_v23, %v5746_v63  ;;  %v18470_v52 = vadd.f32 %v18407_v36, %v5299_v37 }
 0x531   : > { %12590 = vmatmul.mubr.msk.f32.vlgmr.msra.gmra.mrb[148].mxu1 %vm5423_vm10, %v5400_v40  ;;  %12700 = vmatmul.mubr.msk.f32.vlgmr.msra.gmra.mrb[126].mxu0 %vm5423_vm10, %v5747_v19  ;;  %v5403_v45 = vrot.slane %v18465_v49, 1  ;;  %v5750_v5 = vrot.slane %v18465_v49, 2  ;;  %v6110_v55 = vrot.slane %v18465_v49, 3  ;;  %v6313_v39 = vrot.slane %v18465_v49, 4  ;;  %v10246_v40 = vld [vmem:[%s20567_s4 + $0x138] sm:$0xff] }
 0x532   : > { %12592 = vmatprep.mubr.msk.f32.mxu1 %vm14347_vm0, %v20660_v26  ;;  %12702 = vmatprep.mubr.msk.f32.mxu0 %vm14347_vm0, %v20660_v26  ;;  %v5401_v54 = vrot.slane %v18470_v52, 1  ;;  %v5748_v36 = vrot.slane %v18470_v52, 2  ;;  %v12557_v1 = vpop.f32.mrb[136].mxu1  ;;  %v6108_v58 = vrot.slane %v18470_v52, 3  ;;  %v6311_v20 = vrot.slane %v18470_v52, 4 }
 0x533   : > { %v18486_v62 = vadd.f32 %v12557_v1, %v18411_v57  ;;  %v5309_v30 = vpop.f32.mrb[137].mxu1  ;;  %13661 = vmatpush3.bf16.msra.mxu1 %v13660_v14  ;;  %13697 = vmatpush3.bf16.msra.mxu0 %v13696_v12  ;;  %v10245_v12 = vld [vmem:[%s20567_s4 + $0x130] sm:$0xff]  ;;  %v13669_v19 = vpack.c.bf16 %v5375_v46, %v5374_v22 }
 0x534   : > { %v5402_v7 = vsel %vm634_vm2, %v5399_v42, %v5401_v54  ;;  %v18492_v21 = vsel %vm1430_vm4, %v5746_v63, %v5748_v36  ;;  %v18495_v43 = vadd.f32 %v18409_v27, %v5309_v30  ;;  %v5404_v50 = vsel %vm634_vm2, %v5401_v54, %v5403_v45  ;;  %13662 = vmatprep.subr.bf16.mxu1 %v14348_v31  ;;  %v5373_v27 = vld [vmem:[%s20567_s4 + $0x28] sm:$0xff]  ;;  %v10243_v42 = vld [vmem:[%s20567_s4 + $0x120] sm:$0xff] }
 0x535   : > { %12593 = vmatmul.mubr.msk.f32.gmra.mrb[150].mxu1 %vm5423_vm10, %v5402_v7  ;;  %12703 = vmatmul.mubr.msk.f32.gmra.mrb[128].mxu0 %vm5423_vm10, %v18492_v21  ;;  %v18503_v57 = vsel %vm1430_vm4, %v5748_v36, %v5750_v5  ;;  %v18512_v38 = vsel %vm2238_vm5, %v6107_v60, %v6108_v58  ;;  %v18521_v3 = vsel %vm2238_vm5, %v6108_v58, %v6110_v55  ;;  %v10244_v63 = vld [vmem:[%s20567_s4 + $0x128] sm:$0xff]  ;;  %v5407_v0 = vrot.slane %v18486_v62, 1 }
 0x536   : > { %12595 = vmatprep.mubr.msk.f32.mxu1 %vm14347_vm0, %v20660_v26  ;;  %12705 = vmatprep.mubr.msk.f32.mxu0 %vm14347_vm0, %v20660_v26  ;;  %v5405_v11 = vrot.slane %v18495_v43, 1  ;;  %v5752_v18 = vrot.slane %v18495_v43, 2  ;;  %v12560_v24 = vpop.f32.mrb[138].mxu1  ;;  %v6112_v8 = vrot.slane %v18495_v43, 3  ;;  %v18531_v29 = vsel %vm2718_vm6, %v6311_v20, %v6313_v39 }
 0x537   : > { %v18525_v4 = vadd.f32 %v12560_v24, %v18415_v32  ;;  %v5319_v51 = vpop.f32.mrb[139].mxu1  ;;  %13698 = vmatprep.subr.bf16.mxu0 %v14348_v31  ;;  %13664 = vmatpush3.bf16.msra.mxu1 %v13663_v61  ;;  %v6315_v34 = vrot.slane %v18495_v43, 4  ;;  %v13666_v32 = vpack.c.bf16 %v5373_v27, %v5372_v47  ;;  %v13702_v35 = vpack.c.bf16 %v10244_v63, %v10243_v42 }
 0x538   : > { %v5406_v13 = vsel %vm634_vm2, %v5403_v45, %v5405_v11  ;;  %v18536_v17 = vsel %vm1430_vm4, %v5750_v5, %v5752_v18  ;;  %v18539_v41 = vadd.f32 %v18413_v9, %v5319_v51  ;;  %13700 = vmatpush3.bf16.msra.mxu0 %v13699_v48  ;;  %v18553_v9 = vsel %vm2238_vm5, %v6110_v55, %v6112_v8 }
 0x539   : > { %12596 = vmatmul.mubr.msk.f32.gmra.mrb[152].mxu1 %vm5423_vm10, %v5404_v50  ;;  %12706 = vmatmul.mubr.msk.f32.gmra.mrb[130].mxu0 %vm5423_vm10, %v18503_v57  ;;  %v18574_v37 = vsel %vm2718_vm6, %v6313_v39, %v6315_v34  ;;  %v5408_v45 = vsel %vm634_vm2, %v5405_v11, %v5407_v0  ;;  %v13705_v48 = vpack.c.bf16 %v10246_v40, %v10245_v12  ;;  %v5411_v55 = vrot.slane %v18525_v4, 1 }
 0x53a   : > { %12598 = vmatprep.mubr.msk.f32.mxu1 %vm14347_vm0, %v20660_v26  ;;  %12708 = vmatprep.mubr.msk.f32.mxu0 %vm14347_vm0, %v20660_v26  ;;  %v12563_v10 = vpop.f32.mrb[140].mxu1  ;;  %v5409_v36 = vrot.slane %v18539_v41, 1  ;;  %v5756_v1 = vrot.slane %v18539_v41, 2  ;;  %v5758_v7 = vrot.slane %v18525_v4, 2  ;;  %v6878_v42 = vrot.slane %v18470_v52, 6 }
 0x53b   : > { %v18561_v23 = vadd.f32 %v12563_v10, %v18419_v28  ;;  %v5329_v56 = vpop.f32.mrb[141].mxu1  ;;  %13665 = vmatprep.subr.bf16.mxu1 %v14348_v31  ;;  %13701 = vmatprep.subr.bf16.mxu0 %v14348_v31  ;;  %v5754_v28 = vrot.slane %v18486_v62, 2  ;;  %v6881_v40 = vrot.slane %v18495_v43, 6 }
 0x53c   : > { %v18578_v14 = vadd.f32 %v18417_v44, %v5329_v56  ;;  %13667 = vmatpush3.bf16.msra.mxu1 %v13666_v32  ;;  %13703 = vmatpush3.bf16.msra.mxu0 %v13702_v35  ;;  %v5410_v30 = vsel %vm634_vm2, %v5407_v0, %v5409_v36  ;;  %v5412_v47 = vsel %vm634_vm2, %v5409_v36, %v5411_v55  ;;  %v6879_v56 = vrot.slane %v18465_v49, 6 }
 0x53d   : > { %12599 = vmatmul.mubr.msk.f32.gmra.mrb[154].mxu1 %vm5423_vm10, %v5406_v13  ;;  %12709 = vmatmul.mubr.msk.f32.gmra.mrb[132].mxu0 %vm5423_vm10, %v18536_v17  ;;  %v18599_v54 = vsel %vm1430_vm4, %v5752_v18, %v5754_v28  ;;  %v18620_v39 = vsel %vm1430_vm4, %v5754_v28, %v5756_v1  ;;  %v18640_v11 = vsel %vm1430_vm4, %v5756_v1, %v5758_v7  ;;  %v5762_v13 = vrot.slane %v18561_v23, 2 }
 0x53e   : > { %12601 = vmatprep.mubr.msk.f32.mxu1 %vm14347_vm0, %v20660_v26  ;;  %12711 = vmatprep.mubr.msk.f32.mxu0 %vm14347_vm0, %v20660_v26  ;;  %v12566_v44 = vpop.f32.mrb[142].mxu1  ;;  %v5413_v18 = vrot.slane %v18578_v14, 1  ;;  %v5760_v24 = vrot.slane %v18578_v14, 2  ;;  %v6310_v35 = vrot.slane %v18433_v16, 4  ;;  %v18705_v1 = vsel %vm4008_vm7, %v6878_v42, %v6879_v56 }
 0x53f   : > { %v18595_v5 = vadd.f32 %v12566_v44, %v18423_v15  ;;  %v5339_v61 = vpop.f32.mrb[143].mxu1  ;;  %13668 = vmatprep.subr.bf16.mxu1 %v14348_v31  ;;  %13704 = vmatprep.subr.bf16.mxu0 %v14348_v31 }
 0x540   : > { %v18604_v58 = vadd.f32 %v18421_v53, %v5339_v61  ;;  %13670 = vmatpush3.bf16.msra.mxu1 %v13669_v19  ;;  %13706 = vmatpush3.bf16.msra.mxu0 %v13705_v48  ;;  %v5414_v63 = vsel %vm634_vm2, %v5411_v55, %v5413_v18  ;;  %v18663_v10 = vsel %vm1430_vm4, %v5758_v7, %v5760_v24 }
 0x541   : > { %12602 = vmatmul.mubr.msk.f32.gmra.mrb[156].mxu1 %vm5423_vm10, %v5408_v45  ;;  %12712 = vmatmul.mubr.msk.f32.gmra.mrb[134].mxu0 %vm5423_vm10, %v18599_v54  ;;  %v18680_v28 = vsel %vm1430_vm4, %v5760_v24, %v5762_v13  ;;  %v18700_v61 = vsel %vm2718_vm6, %v6310_v35, %v6311_v20  ;;  %v5419_v20 = vrot.slane %v18595_v5, 1  ;;  %v5766_v55 = vrot.slane %v18595_v5, 2 }
 0x542   : > { %12604 = vmatprep.mubr.msk.f32.mxu1 %vm14347_vm0, %v20660_v26  ;;  %12714 = vmatprep.mubr.msk.f32.mxu0 %vm14347_vm0, %v20660_v26  ;;  %v12569_v15 = vpop.f32.mrb[144].mxu1  ;;  %v5417_v44 = vrot.slane %v18604_v58, 1  ;;  %v5764_v19 = vrot.slane %v18604_v58, 2  ;;  %v6674_v24 = vrot.slane %v18465_v49, 5 }
 0x543   : > { %v18616_v60 = vadd.f32 %v12569_v15, %v18427_v2  ;;  %v5349_v53 = vpop.f32.mrb[145].mxu1  ;;  %13683 = vmatprep.subr.bf16.mxu1 %v14348_v31  ;;  %13719 = vmatprep.subr.bf16.mxu0 %v14348_v31  ;;  %v18710_v15 = vsel %vm4008_vm7, %v6879_v56, %v6881_v40 }
 0x544   : > { %v18624_v50 = vadd.f32 %v18425_v6, %v5349_v53  ;;  %v6673_v53 = vrot.slane %v18470_v52, 5  ;;  %v18724_v7 = vsel %vm1430_vm4, %v5762_v13, %v5764_v19  ;;  %v18756_v56 = vsel %vm1430_vm4, %v5764_v19, %v5766_v55 }
 0x545   : > { %12605 = vmatmul.mubr.msk.f32.gmra.mrb[158].mxu1 %vm5423_vm10, %v5410_v30  ;;  %12715 = vmatmul.mubr.msk.f32.gmra.mrb[136].mxu0 %vm5423_vm10, %v18620_v39  ;;  %v18666_v0 = vrot.slane %v18616_v60, 4  ;;  %v5949_v22 = vrot.slane %v18616_v60, 2 }
 0x546   : > { %12607 = vmatprep.mubr.msk.f32.mxu1 %vm14347_vm0, %v20660_v26  ;;  %12717 = vmatprep.mubr.msk.f32.mxu0 %vm14347_vm0, %v20660_v26  ;;  %v12572_v2 = vpop.f32.mrb[146].mxu1  ;;  %v18747_v42 = vsel %vm799_vm1, %v6673_v53, %v6674_v24  ;;  %v5421_v35 = vrot.slane %v18624_v50, 1  ;;  %v10218_v53 = vld [vmem:[%s20567_s4 + $0xc0] sm:$0xff] }
 0x547   : > { %v18636_v27 = vadd.f32 %v12572_v2, %v18431_v25  ;;  %v5359_v6 = vpop.f32.mrb[147].mxu1  ;;  %v5415_v25 = vrot.slane %v18561_v23, 1  ;;  %v6899_v2 = vrot.slane %v18616_v60, 6 }
 0x548   : > { %v18645_v51 = vadd.f32 %v18429_v59, %v5359_v6  ;;  %v18658_v59 = vrot.slane %v18624_v50, 2  ;;  %v5422_v19 = vsel %vm634_vm2, %v5419_v20, %v5421_v35 }
 0x549   : > { %12608 = vmatmul.mubr.msk.f32.gmra.mrb[160].mxu1 %vm5423_vm10, %v5412_v47  ;;  %12718 = vmatmul.mubr.msk.f32.gmra.mrb[138].mxu0 %vm5423_vm10, %v18640_v11  ;;  %v5416_v46 = vsel %vm634_vm2, %v5413_v18, %v5415_v25  ;;  %v6903_v48 = vrot.slane %v18636_v27, 6  ;;  %v5418_v30 = vsel %vm634_vm2, %v5415_v25, %v5417_v44  ;;  %v6698_v6 = vrot.slane %v18636_v27, 5 }
 0x54a   : > { %12610 = vmatprep.mubr.msk.f32.mxu1 %vm14347_vm0, %v20660_v26  ;;  %12720 = vmatprep.mubr.msk.f32.mxu0 %vm14347_vm0, %v20660_v26  ;;  %v6514_v32 = vrot.slane %v18645_v51, 4  ;;  %v18695_v45 = vsel %vm1430_vm4, %v18658_v59, %v5949_v22  ;;  %v6901_v36 = vrot.slane %v18645_v51, 6  ;;  %v6696_v18 = vrot.slane %v18645_v51, 5 }
 0x54b   : > { %v6676_v25 = vrot.slane %v18495_v43, 5 }
 0x54c   : > { %v18686_v12 = vsel %vm2718_vm6, %v18666_v0, %v6514_v32  ;;  %v18728_v47 = vsel %vm4008_vm7, %v6901_v36, %v6903_v48  ;;  %v18744_v13 = vsel %vm4008_vm7, %v6899_v2, %v6901_v36  ;;  %v18764_v48 = vsel %vm799_vm1, %v6696_v18, %v6698_v6 }
 0x54d   : > { %12611 = vmatmul.mubr.msk.f32.gmra.mrb[162].mxu1 %vm5423_vm10, %v5414_v63  ;;  %12721 = vmatmul.mubr.msk.f32.gmra.mrb[140].mxu0 %vm5423_vm10, %v18663_v10  ;;  %v18752_v27 = vsel %vm799_vm1, %v6674_v24, %v6676_v25  ;;  %v5420_v63 = vsel %vm634_vm2, %v5417_v44, %v5419_v20  ;;  %v18778_v36 = vsel %vm1430_vm4, %v5766_v55, %v18658_v59  ;;  %v10219_v20 = vld [vmem:[%s20567_s4 + $0xc8] sm:$0xff]  ;;  %v10281_v55 = vld [vmem:[%s20567_s4 + $0x180] sm:$0xff]  ;;  %v10220_v24 = vld [vmem:[%s20567_s4 + $0xd0] sm:$0xff] }
 0x54e   : > { %12613 = vmatprep.mubr.msk.f32.mxu1 %vm14347_vm0, %v20660_v26  ;;  %12723 = vmatprep.mubr.msk.f32.mxu0 %vm14347_vm0, %v20660_v26  ;;  %v13684_v6 = vpack.c.bf16 %v10219_v20, %v10218_v53  ;;  %v10222_v20 = vld [vmem:[%s20567_s4 + $0xe0] sm:$0xff] }
 0x551   : > { %12614 = vmatmul.mubr.msk.f32.gmra.mrb[164].mxu1 %vm5423_vm10, %v5416_v46  ;;  %12724 = vmatmul.mubr.msk.f32.gmra.mrb[142].mxu0 %vm5423_vm10, %v18680_v28  ;;  %v6694_v46 = vrot.slane %v18616_v60, 5 }
 0x552   : > { %12616 = vmatprep.mubr.msk.f32.mxu1 %vm14347_vm0, %v20660_v26  ;;  %12726 = vmatprep.mubr.msk.f32.mxu0 %vm14347_vm0, %v20660_v26 }
 0x553   : > { %v18773_v44 = vsel %vm799_vm1, %v6694_v46, %v6696_v18 }
 0x555   : > { %12617 = vmatmul.mubr.msk.f32.gmra.mrb[166].mxu1 %vm5423_vm10, %v5418_v30  ;;  %12727 = vmatmul.mubr.msk.f32.gmra.mrb[144].mxu0 %vm5423_vm10, %v18724_v7  ;;  %v10282_v30 = vld [vmem:[%s20567_s4 + $0x188] sm:$0xff] }
 0x556   : > { %12619 = vmatprep.mubr.msk.f32.mxu1 %vm14347_vm0, %v20660_v26  ;;  %12729 = vmatprep.mubr.msk.f32.mxu0 %vm14347_vm0, %v20660_v26  ;;  %v13720_v18 = vpack.c.bf16 %v10282_v30, %v10281_v55  ;;  %v10286_v55 = vld [vmem:[%s20567_s4 + $0x1a8] sm:$0xff] }
 0x559   : > { %12620 = vmatmul.mubr.msk.f32.gmra.mrb[168].mxu1 %vm5423_vm10, %v5420_v63  ;;  %12730 = vmatmul.mubr.msk.f32.gmra.mrb[146].mxu0 %vm5423_vm10, %v18756_v56  ;;  %v10221_v63 = vld [vmem:[%s20567_s4 + $0xd8] sm:$0xff] }
 0x55a   : > { %12622 = vmatprep.mubr.msk.f32.mxu1 %vm14347_vm0, %v20660_v26  ;;  %12732 = vmatprep.mubr.msk.f32.mxu0 %vm14347_vm0, %v20660_v26 }
 0x55d   : > { %12623 = vmatmul.mubr.msk.f32.gmra.mrb[170].mxu1 %vm5423_vm10, %v5422_v19  ;;  %12733 = vmatmul.mubr.msk.f32.gmra.mrb[148].mxu0 %vm5423_vm10, %v18778_v36  ;;  %v13687_v19 = vpack.c.bf16 %v10221_v63, %v10220_v24  ;;  %v6114_v24 = vrot.slane %v18486_v62, 3  ;;  %v10288_v63 = vld [vmem:[%s20567_s4 + $0x1b8] sm:$0xff] }
 0x55e   : > { %12625 = vmatprep.mubr.msk.f32.mxu1 %vm14347_vm0, %v20660_v26  ;;  %12735 = vmatprep.mubr.msk.f32.mxu0 %vm14347_vm0, %v20660_v26 }
 0x561   : > { %12626 = vmatmul.mubr.msk.f32.gmra.mrb[172].mxu1 %vm5423_vm10, %v5421_v35  ;;  %12736 = vmatmul.mubr.msk.f32.gmra.mrb[150].mxu0 %vm5423_vm10, %v18658_v59  ;;  %v10283_v59 = vld [vmem:[%s20567_s4 + $0x190] sm:$0xff]  ;;  %v10284_v35 = vld [vmem:[%s20567_s4 + $0x198] sm:$0xff] }
 0x562   : > { %12644 = vmatprep.mubr.msk.f32.mxu1 %vm14347_vm0, %v20660_v26  ;;  %12809 = vmatprep.mubr.msk.f32.mxu0 %vm14347_vm0, %v20660_v26  ;;  %v13723_v53 = vpack.c.bf16 %v10284_v35, %v10283_v59 }
 0x565   : > { %12645 = vmatmul.mubr.msk.f32.vlgmr.msra.gmra.mrb[174].mxu1 %vm5423_vm10, %v18438_v33  ;;  %12810 = vmatmul.mubr.msk.f32.vlgmr.msra.gmra.mrb[152].mxu0 %vm5423_vm10, %v18512_v38  ;;  %v10223_v33 = vld [vmem:[%s20567_s4 + $0xe8] sm:$0xff]  ;;  %v10285_v38 = vld [vmem:[%s20567_s4 + $0x1a0] sm:$0xff] }
 0x566   : > { %12647 = vmatprep.mubr.msk.f32.mxu1 %vm14347_vm0, %v20660_v26  ;;  %12812 = vmatprep.mubr.msk.f32.mxu0 %vm14347_vm0, %v20660_v26  ;;  %v13690_v30 = vpack.c.bf16 %v10223_v33, %v10222_v20  ;;  %v6122_v33 = vrot.slane %v18561_v23, 3 }
 0x567   : > { %13685 = vmatpush3.bf16.msra.mxu1 %v13684_v6  ;;  %13721 = vmatpush3.bf16.msra.mxu0 %v13720_v18  ;;  %v13726_v6 = vpack.c.bf16 %v10286_v55, %v10285_v38  ;;  %v10224_v18 = vld [vmem:[%s20567_s4 + $0xf0] sm:$0xff]  ;;  %v6124_v55 = vrot.slane %v18604_v58, 3 }
 0x568   : > { %13686 = vmatprep.subr.bf16.mxu1 %v14348_v31  ;;  %13722 = vmatprep.subr.bf16.mxu0 %v14348_v31 }
 0x569   : > { %12648 = vmatmul.mubr.msk.f32.gmra.mrb[176].mxu1 %vm5423_vm10, %v18433_v16  ;;  %12813 = vmatmul.mubr.msk.f32.gmra.mrb[154].mxu0 %vm5423_vm10, %v18521_v3  ;;  %v10225_v16 = vld [vmem:[%s20567_s4 + $0xf8] sm:$0xff]  ;;  %v10287_v3 = vld [vmem:[%s20567_s4 + $0x1b0] sm:$0xff] }
 0x56a   : > { %12650 = vmatprep.mubr.msk.f32.mxu1 %vm14347_vm0, %v20660_v26  ;;  %12815 = vmatprep.mubr.msk.f32.mxu0 %vm14347_vm0, %v20660_v26  ;;  %v13693_v59 = vpack.c.bf16 %v10225_v16, %v10224_v18  ;;  %v13729_v35 = vpack.c.bf16 %v10288_v63, %v10287_v3  ;;  %v6130_v3 = vrot.slane %v18616_v60, 3 }
 0x56b   : > { %13688 = vmatpush3.bf16.msra.mxu1 %v13687_v19  ;;  %13724 = vmatpush3.bf16.msra.mxu0 %v13723_v53  ;;  %v6115_v19 = vsel %vm2238_vm5, %v6112_v8, %v6114_v24  ;;  %v6116_v53 = vrot.slane %v18539_v41, 3  ;;  %v6118_v8 = vrot.slane %v18525_v4, 3 }
 0x56c   : > { %13689 = vmatprep.subr.bf16.mxu1 %v14348_v31  ;;  %13725 = vmatprep.subr.bf16.mxu0 %v14348_v31 }
 0x56d   : > { %12651 = vmatmul.mubr.msk.f32.gmra.mrb[178].mxu1 %vm5423_vm10, %v18470_v52  ;;  %12816 = vmatmul.mubr.msk.f32.gmra.mrb[156].mxu0 %vm5423_vm10, %v18553_v9  ;;  %v6117_v52 = vsel %vm2238_vm5, %v6114_v24, %v6116_v53  ;;  %v6120_v9 = vrot.slane %v18578_v14, 3  ;;  %v6128_v24 = vrot.slane %v18624_v50, 3 }
 0x56e   : > { %12653 = vmatprep.mubr.msk.f32.mxu1 %vm14347_vm0, %v20660_v26  ;;  %12818 = vmatprep.mubr.msk.f32.mxu0 %vm14347_vm0, %v20660_v26 }
 0x56f   : > { %13691 = vmatpush3.bf16.msra.mxu1 %v13690_v30  ;;  %13727 = vmatpush3.bf16.msra.mxu0 %v13726_v6  ;;  %v6121_v20 = vsel %vm2238_vm5, %v6118_v8, %v6120_v9  ;;  %v6123_v38 = vsel %vm2238_vm5, %v6120_v9, %v6122_v33  ;;  %v6125_v30 = vsel %vm2238_vm5, %v6122_v33, %v6124_v55  ;;  %v6126_v6 = vrot.slane %v18595_v5, 3  ;;  %v10263_v9 = vld [vmem:[%s20567_s4 + $0x158] sm:$0xff] }
 0x570   : > { %13692 = vmatprep.subr.bf16.mxu1 %v14348_v31  ;;  %13728 = vmatprep.subr.bf16.mxu0 %v14348_v31  ;;  %v6131_v63 = vsel %vm2238_vm5, %v6128_v24, %v6130_v3  ;;  %v10326_v33 = vld [vmem:[%s20567_s4 + $0x218] sm:$0xff] }
 0x571   : > { %12654 = vmatmul.mubr.msk.f32.gmra.mrb[180].mxu1 %vm5423_vm10, %v18465_v49  ;;  %12819 = vmatmul.mubr.msk.f32.gmra.mrb[158].mxu0 %vm5423_vm10, %v6115_v19  ;;  %v6119_v49 = vsel %vm2238_vm5, %v6116_v53, %v6118_v8  ;;  %v6127_v18 = vsel %vm2238_vm5, %v6124_v55, %v6126_v6  ;;  %v6129_v16 = vsel %vm2238_vm5, %v6126_v6, %v6128_v24  ;;  %v10323_v19 = vld [vmem:[%s20567_s4 + $0x200] sm:$0xff]  ;;  %v10324_v53 = vld [vmem:[%s20567_s4 + $0x208] sm:$0xff]  ;;  %v6317_v6 = vrot.slane %v18486_v62, 4 }
 0x572   : > { %12656 = vmatprep.mubr.msk.f32.mxu1 %vm14347_vm0, %v20660_v26  ;;  %12821 = vmatprep.mubr.msk.f32.mxu0 %vm14347_vm0, %v20660_v26  ;;  %v13744_v8 = vpack.c.bf16 %v10324_v53, %v10323_v19  ;;  %v10328_v24 = vld [vmem:[%s20567_s4 + $0x228] sm:$0xff]  ;;  %v10329_v19 = vld [vmem:[%s20567_s4 + $0x230] sm:$0xff]  ;;  %v10330_v53 = vld [vmem:[%s20567_s4 + $0x238] sm:$0xff] }
 0x573   : > { %13694 = vmatpush3.bf16.msra.mxu1 %v13693_v59  ;;  %13730 = vmatpush3.bf16.msra.mxu0 %v13729_v35  ;;  %v10260_v59 = vld [vmem:[%s20567_s4 + $0x140] sm:$0xff]  ;;  %v10261_v35 = vld [vmem:[%s20567_s4 + $0x148] sm:$0xff] }
 0x574   : > { %13707 = vmatprep.subr.bf16.mxu1 %v14348_v31  ;;  %13743 = vmatprep.subr.bf16.mxu0 %v14348_v31 }
 0x575   : > { %12657 = vmatmul.mubr.msk.f32.gmra.mrb[182].mxu1 %vm5423_vm10, %v18495_v43  ;;  %12822 = vmatmul.mubr.msk.f32.gmra.mrb[160].mxu0 %vm5423_vm10, %v6117_v52  ;;  %v13708_v52 = vpack.c.bf16 %v10261_v35, %v10260_v59  ;;  %v6319_v59 = vrot.slane %v18539_v41, 4  ;;  %v10267_v35 = vld [vmem:[%s20567_s4 + $0x178] sm:$0xff] }
 0x576   : > { %12659 = vmatprep.mubr.msk.f32.mxu1 %vm14347_vm0, %v20660_v26  ;;  %12824 = vmatprep.mubr.msk.f32.mxu0 %vm14347_vm0, %v20660_v26 }
 0x579   : > { %12660 = vmatmul.mubr.msk.f32.gmra.mrb[184].mxu1 %vm5423_vm10, %v18486_v62  ;;  %12825 = vmatmul.mubr.msk.f32.gmra.mrb[162].mxu0 %vm5423_vm10, %v6119_v49  ;;  %v10262_v49 = vld [vmem:[%s20567_s4 + $0x150] sm:$0xff] }
 0x57a   : > { %12662 = vmatprep.mubr.msk.f32.mxu1 %vm14347_vm0, %v20660_v26  ;;  %12827 = vmatprep.mubr.msk.f32.mxu0 %vm14347_vm0, %v20660_v26 }
 0x57d   : > { %12663 = vmatmul.mubr.msk.f32.gmra.mrb[186].mxu1 %vm5423_vm10, %v18539_v41  ;;  %12828 = vmatmul.mubr.msk.f32.gmra.mrb[164].mxu0 %vm5423_vm10, %v6121_v20  ;;  %v10325_v20 = vld [vmem:[%s20567_s4 + $0x210] sm:$0xff] }
 0x57e   : > { %12665 = vmatprep.mubr.msk.f32.mxu1 %vm14347_vm0, %v20660_v26  ;;  %12830 = vmatprep.mubr.msk.f32.mxu0 %vm14347_vm0, %v20660_v26  ;;  %v13747_v55 = vpack.c.bf16 %v10326_v33, %v10325_v20  ;;  %v6325_v20 = vrot.slane %v18561_v23, 4  ;;  %v6327_v33 = vrot.slane %v18604_v58, 4 }
 0x581   : > { %12666 = vmatmul.mubr.msk.f32.gmra.mrb[188].mxu1 %vm5423_vm10, %v18525_v4  ;;  %12831 = vmatmul.mubr.msk.f32.gmra.mrb[166].mxu0 %vm5423_vm10, %v6123_v38  ;;  %v13711_v38 = vpack.c.bf16 %v10263_v9, %v10262_v49  ;;  %v6321_v49 = vrot.slane %v18525_v4, 4  ;;  %v6323_v9 = vrot.slane %v18578_v14, 4 }
 0x582   : > { %12668 = vmatprep.mubr.msk.f32.mxu1 %vm14347_vm0, %v20660_v26  ;;  %12833 = vmatprep.mubr.msk.f32.mxu0 %vm14347_vm0, %v20660_v26 }
 0x585   : > { %12669 = vmatmul.mubr.msk.f32.gmra.mrb[190].mxu1 %vm5423_vm10, %v18578_v14  ;;  %12834 = vmatmul.mubr.msk.f32.gmra.mrb[168].mxu0 %vm5423_vm10, %v6125_v30  ;;  %v10264_v30 = vld [vmem:[%s20567_s4 + $0x160] sm:$0xff] }
 0x586   : > { %12671 = vmatprep.mubr.msk.f32.mxu1 %vm14347_vm0, %v20660_v26  ;;  %12836 = vmatprep.mubr.msk.f32.mxu0 %vm14347_vm0, %v20660_v26 }
 0x589   : > { %12672 = vmatmul.mubr.msk.f32.gmra.mrb[192].mxu1 %vm5423_vm10, %v18561_v23  ;;  %12837 = vmatmul.mubr.msk.f32.gmra.mrb[170].mxu0 %vm5423_vm10, %v6127_v18  ;;  %v10327_v18 = vld [vmem:[%s20567_s4 + $0x220] sm:$0xff] }
 0x58a   : > { %12674 = vmatprep.mubr.msk.f32.mxu1 %vm14347_vm0, %v20660_v26  ;;  %12839 = vmatprep.mubr.msk.f32.mxu0 %vm14347_vm0, %v20660_v26 }
 0x58d   : > { %12675 = vmatmul.mubr.msk.f32.gmra.mrb[194].mxu1 %vm5423_vm10, %v18604_v58  ;;  %12840 = vmatmul.mubr.msk.f32.gmra.mrb[172].mxu0 %vm5423_vm10, %v6129_v16 }
 0x58e   : > { %12677 = vmatprep.mubr.msk.f32.mxu1 %vm14347_vm0, %v20660_v26  ;;  %12842 = vmatprep.mubr.msk.f32.mxu0 %vm14347_vm0, %v20660_v26 }
 0x591   : > { %12678 = vmatmul.mubr.msk.f32.gmra.mrb[196].mxu1 %vm5423_vm10, %v18595_v5  ;;  %12843 = vmatmul.mubr.msk.f32.gmra.mrb[174].mxu0 %vm5423_vm10, %v6131_v63  ;;  %v10266_v63 = vld [vmem:[%s20567_s4 + $0x170] sm:$0xff] }
 0x592   : > { %12680 = vmatprep.mubr.msk.f32.mxu1 %vm14347_vm0, %v20660_v26  ;;  %12845 = vmatprep.mubr.msk.f32.mxu0 %vm14347_vm0, %v20660_v26 }
 0x595   : > { %12681 = vmatmul.mubr.msk.f32.gmra.mrb[198].mxu1 %vm5423_vm10, %v18624_v50  ;;  %12846 = vmatmul.mubr.msk.f32.gmra.mrb[176].mxu0 %vm5423_vm10, %v6130_v3  ;;  %v13750_v3 = vpack.c.bf16 %v10328_v24, %v10327_v18  ;;  %v6887_v24 = vrot.slane %v18525_v4, 6 }
 0x596   : > { %12754 = vmatprep.mubr.msk.f32.mxu1 %vm14347_vm0, %v20660_v26  ;;  %12919 = vmatprep.mubr.msk.f32.mxu0 %vm14347_vm0, %v20660_v26 }
 0x599   : > { %12755 = vmatmul.mubr.msk.f32.vlgmr.msra.gmra.mrb[200].mxu1 %vm5423_vm10, %v18492_v21  ;;  %12920 = vmatmul.mubr.msk.f32.vlgmr.msra.gmra.mrb[178].mxu0 %vm5423_vm10, %v18531_v29  ;;  %v10265_v21 = vld [vmem:[%s20567_s4 + $0x168] sm:$0xff] }
 0x59a   : > { %12757 = vmatprep.mubr.msk.f32.mxu1 %vm14347_vm0, %v20660_v26  ;;  %12922 = vmatprep.mubr.msk.f32.mxu0 %vm14347_vm0, %v20660_v26  ;;  %v13714_v16 = vpack.c.bf16 %v10265_v21, %v10264_v30  ;;  %v10305_v30 = vld [vmem:[%s20567_s4 + $0x1d8] sm:$0xff]  ;;  %v6885_v21 = vrot.slane %v18539_v41, 6 }
 0x59b   : > { %13709 = vmatpush3.bf16.msra.mxu1 %v13708_v52  ;;  %13745 = vmatpush3.bf16.msra.mxu0 %v13744_v8  ;;  %v13753_v52 = vpack.c.bf16 %v10330_v53, %v10329_v19  ;;  %v19048_v8 = vsel %vm2718_vm6, %v6317_v6, %v6319_v59  ;;  %v6895_v19 = vrot.slane %v18595_v5, 6 }
 0x59c   : > { %13710 = vmatprep.subr.bf16.mxu1 %v14348_v31  ;;  %13746 = vmatprep.subr.bf16.mxu0 %v14348_v31 }
 0x59d   : > { %12758 = vmatmul.mubr.msk.f32.gmra.mrb[202].mxu1 %vm5423_vm10, %v18503_v57  ;;  %12923 = vmatmul.mubr.msk.f32.gmra.mrb[180].mxu0 %vm5423_vm10, %v18574_v37  ;;  %v19025_v57 = vsel %vm2718_vm6, %v6315_v34, %v6317_v6  ;;  %v13717_v34 = vpack.c.bf16 %v10267_v35, %v10266_v63  ;;  %v6891_v63 = vrot.slane %v18561_v23, 6 }
 0x59e   : > { %12760 = vmatprep.mubr.msk.f32.mxu1 %vm14347_vm0, %v20660_v26  ;;  %12925 = vmatprep.mubr.msk.f32.mxu0 %vm14347_vm0, %v20660_v26 }
 0x59f   : > { %13712 = vmatpush3.bf16.msra.mxu1 %v13711_v38  ;;  %13748 = vmatpush3.bf16.msra.mxu0 %v13747_v55  ;;  %v6329_v38 = vrot.slane %v18595_v5, 4  ;;  %v6331_v55 = vrot.slane %v18624_v50, 4 }
 0x5a0   : > { %13713 = vmatprep.subr.bf16.mxu1 %v14348_v31  ;;  %13749 = vmatprep.subr.bf16.mxu0 %v14348_v31 }
 0x5a1   : > { %12761 = vmatmul.mubr.msk.f32.gmra.mrb[204].mxu1 %vm5423_vm10, %v18536_v17  ;;  %12926 = vmatmul.mubr.msk.f32.gmra.mrb[182].mxu0 %vm5423_vm10, %v19025_v57  ;;  %v19062_v17 = vsel %vm2718_vm6, %v6319_v59, %v6321_v49  ;;  %v6893_v59 = vrot.slane %v18604_v58, 6 }
 0x5a2   : > { %12763 = vmatprep.mubr.msk.f32.mxu1 %vm14347_vm0, %v20660_v26  ;;  %12928 = vmatprep.mubr.msk.f32.mxu0 %vm14347_vm0, %v20660_v26 }
 0x5a3   : > { %13715 = vmatpush3.bf16.msra.mxu1 %v13714_v16  ;;  %13751 = vmatpush3.bf16.msra.mxu0 %v13750_v3  ;;  %v6889_v16 = vrot.slane %v18578_v14, 6  ;;  %v6894_v35 = vsel %vm4008_vm7, %v6891_v63, %v6893_v59  ;;  %v6896_v53 = vsel %vm4008_vm7, %v6893_v59, %v6895_v19 }
 0x5a4   : > { %13716 = vmatprep.subr.bf16.mxu1 %v14348_v31  ;;  %13752 = vmatprep.subr.bf16.mxu0 %v14348_v31 }
 0x5a5   : > { %12764 = vmatmul.mubr.msk.f32.gmra.mrb[206].mxu1 %vm5423_vm10, %v18599_v54  ;;  %12929 = vmatmul.mubr.msk.f32.gmra.mrb[184].mxu0 %vm5423_vm10, %v19048_v8  ;;  %v19076_v54 = vsel %vm2718_vm6, %v6321_v49, %v6323_v9  ;;  %v6890_v3 = vsel %vm4008_vm7, %v6887_v24, %v6889_v16 }
 0x5a6   : > { %12766 = vmatprep.mubr.msk.f32.mxu1 %vm14347_vm0, %v20660_v26  ;;  %12931 = vmatprep.mubr.msk.f32.mxu0 %vm14347_vm0, %v20660_v26 }
 0x5a7   : > { %13718 = vmatpush3.bf16.msra.mxu1 %v13717_v34  ;;  %13754 = vmatpush3.bf16.msra.mxu0 %v13753_v52  ;;  %v6897_v34 = vrot.slane %v18624_v50, 6 }
 0x5a8   : > { %13731 = vmatprep.subr.bf16.mxu1 %v14348_v31  ;;  %13774 = vmatprep.subr.bf16.mxu0 %v14348_v31 }
 0x5a9   : > { %12767 = vmatmul.mubr.msk.f32.gmra.mrb[208].mxu1 %vm5423_vm10, %v18620_v39  ;;  %12932 = vmatmul.mubr.msk.f32.gmra.mrb[186].mxu0 %vm5423_vm10, %v19062_v17  ;;  %v19088_v39 = vsel %vm2718_vm6, %v6323_v9, %v6325_v20  ;;  %v6898_v52 = vsel %vm4008_vm7, %v6895_v19, %v6897_v34 }
 0x5aa   : > { %12769 = vmatprep.mubr.msk.f32.mxu1 %vm14347_vm0, %v20660_v26  ;;  %12934 = vmatprep.mubr.msk.f32.mxu0 %vm14347_vm0, %v20660_v26 }
 0x5ad   : > { %12770 = vmatmul.mubr.msk.f32.gmra.mrb[210].mxu1 %vm5423_vm10, %v18640_v11  ;;  %12935 = vmatmul.mubr.msk.f32.gmra.mrb[188].mxu0 %vm5423_vm10, %v19076_v54  ;;  %v19100_v11 = vsel %vm2718_vm6, %v6325_v20, %v6327_v33 }
 0x5ae   : > { %12772 = vmatprep.mubr.msk.f32.mxu1 %vm14347_vm0, %v20660_v26  ;;  %12937 = vmatprep.mubr.msk.f32.mxu0 %vm14347_vm0, %v20660_v26 }
 0x5b1   : > { %12773 = vmatmul.mubr.msk.f32.gmra.mrb[212].mxu1 %vm5423_vm10, %v18663_v10  ;;  %12938 = vmatmul.mubr.msk.f32.gmra.mrb[190].mxu0 %vm5423_vm10, %v19088_v39  ;;  %v19112_v10 = vsel %vm2718_vm6, %v6327_v33, %v6329_v38 }
 0x5b2   : > { %12775 = vmatprep.mubr.msk.f32.mxu1 %vm14347_vm0, %v20660_v26  ;;  %12940 = vmatprep.mubr.msk.f32.mxu0 %vm14347_vm0, %v20660_v26 }
 0x5b5   : > { %12776 = vmatmul.mubr.msk.f32.gmra.mrb[214].mxu1 %vm5423_vm10, %v18680_v28  ;;  %12941 = vmatmul.mubr.msk.f32.gmra.mrb[192].mxu0 %vm5423_vm10, %v19100_v11  ;;  %v19124_v28 = vsel %vm2718_vm6, %v6329_v38, %v6331_v55  ;;  %v6684_v38 = vrot.slane %v18578_v14, 5 }
 0x5b6   : > { %12778 = vmatprep.mubr.msk.f32.mxu1 %vm14347_vm0, %v20660_v26  ;;  %12943 = vmatprep.mubr.msk.f32.mxu0 %vm14347_vm0, %v20660_v26 }
 0x5b9   : > { %12779 = vmatmul.mubr.msk.f32.gmra.mrb[216].mxu1 %vm5423_vm10, %v18724_v7  ;;  %12944 = vmatmul.mubr.msk.f32.gmra.mrb[194].mxu0 %vm5423_vm10, %v19112_v10  ;;  %v19136_v7 = vsel %vm2718_vm6, %v6331_v55, %v18666_v0 }
 0x5ba   : > { %12781 = vmatprep.mubr.msk.f32.mxu1 %vm14347_vm0, %v20660_v26  ;;  %12946 = vmatprep.mubr.msk.f32.mxu0 %vm14347_vm0, %v20660_v26 }
 0x5bd   : > { %12782 = vmatmul.mubr.msk.f32.gmra.mrb[218].mxu1 %vm5423_vm10, %v18756_v56  ;;  %12947 = vmatmul.mubr.msk.f32.gmra.mrb[196].mxu0 %vm5423_vm10, %v19124_v28  ;;  %v10302_v56 = vld [vmem:[%s20567_s4 + $0x1c0] sm:$0xff] }
 0x5be   : > { %12784 = vmatprep.mubr.msk.f32.mxu1 %vm14347_vm0, %v20660_v26  ;;  %12949 = vmatprep.mubr.msk.f32.mxu0 %vm14347_vm0, %v20660_v26 }
 0x5c1   : > { %12785 = vmatmul.mubr.msk.f32.gmra.mrb[220].mxu1 %vm5423_vm10, %v18778_v36  ;;  %12950 = vmatmul.mubr.msk.f32.gmra.mrb[198].mxu0 %vm5423_vm10, %v19136_v7  ;;  %v10303_v36 = vld [vmem:[%s20567_s4 + $0x1c8] sm:$0xff] }
 0x5c2   : > { %12787 = vmatprep.mubr.msk.f32.mxu1 %vm14347_vm0, %v20660_v26  ;;  %12952 = vmatprep.mubr.msk.f32.mxu0 %vm14347_vm0, %v20660_v26 }
 0x5c5   : > { %12788 = vmatmul.mubr.msk.f32.gmra.mrb[222].mxu1 %vm5423_vm10, %v18695_v45  ;;  %12953 = vmatmul.mubr.msk.f32.gmra.mrb[200].mxu0 %vm5423_vm10, %v18686_v12  ;;  %v13732_v12 = vpack.c.bf16 %v10303_v36, %v10302_v56  ;;  %v10304_v45 = vld [vmem:[%s20567_s4 + $0x1d0] sm:$0xff]  ;;  %v6686_v56 = vrot.slane %v18561_v23, 5 }
 0x5c6   : > { %12790 = vmatprep.mubr.msk.f32.mxu1 %vm14347_vm0, %v20660_v26  ;;  %12955 = vmatprep.mubr.msk.f32.mxu0 %vm14347_vm0, %v20660_v26  ;;  %v13735_v51 = vpack.c.bf16 %v10305_v30, %v10304_v45 }
 0x5c7   : > { %v6687_v30 = vsel %vm799_vm1, %v6684_v38, %v6686_v56 }
 0x5c9   : > { %12791 = vmatmul.mubr.msk.f32.gmra.mrb[224].mxu1 %vm5423_vm10, %v5949_v22  ;;  %12956 = vmatmul.mubr.msk.f32.gmra.mrb[202].mxu0 %vm5423_vm10, %v6514_v32  ;;  %v6883_v32 = vrot.slane %v18486_v62, 6  ;;  %v10306_v22 = vld [vmem:[%s20567_s4 + $0x1e0] sm:$0xff] }
 0x5ca   : > { %12864 = vmatprep.mubr.msk.f32.mxu1 %vm14347_vm0, %v20660_v26  ;;  %13029 = vmatprep.mubr.msk.f32.mxu0 %vm14347_vm0, %v20660_v26 }
 0x5cb   : > { %v6884_v6 = vsel %vm4008_vm7, %v6881_v40, %v6883_v32  ;;  %v6886_v18 = vsel %vm4008_vm7, %v6883_v32, %v6885_v21 }
 0x5cd   : > { %12865 = vmatmul.mubr.msk.f32.vlgmr.msra.gmra.mrb[226].mxu1 %vm5423_vm10, %v18700_v61  ;;  %13030 = vmatmul.mubr.msk.f32.vlgmr.msra.gmra.mrb[204].mxu0 %vm5423_vm10, %v18705_v1  ;;  %v10307_v61 = vld [vmem:[%s20567_s4 + $0x1e8] sm:$0xff] }
 0x5ce   : > { %12867 = vmatprep.mubr.msk.f32.mxu1 %vm14347_vm0, %v20660_v26  ;;  %13032 = vmatprep.mubr.msk.f32.mxu0 %vm14347_vm0, %v20660_v26  ;;  %v13738_v1 = vpack.c.bf16 %v10307_v61, %v10306_v22 }
 0x5cf   : > { %13733 = vmatpush3.bf16.msra.mxu1 %v13732_v12 }
 0x5d0   : > { %13734 = vmatprep.subr.bf16.mxu1 %v14348_v31 }
 0x5d1   : > { %12868 = vmatmul.mubr.msk.f32.gmra.mrb[228].mxu1 %vm5423_vm10, %v18531_v29  ;;  %13033 = vmatmul.mubr.msk.f32.gmra.mrb[206].mxu0 %vm5423_vm10, %v18710_v15  ;;  %v10308_v29 = vld [vmem:[%s20567_s4 + $0x1f0] sm:$0xff]  ;;  %v10309_v15 = vld [vmem:[%s20567_s4 + $0x1f8] sm:$0xff] }
 0x5d2   : > { %12870 = vmatprep.mubr.msk.f32.mxu1 %vm14347_vm0, %v20660_v26  ;;  %13035 = vmatprep.mubr.msk.f32.mxu0 %vm14347_vm0, %v20660_v26  ;;  %v13741_v40 = vpack.c.bf16 %v10309_v15, %v10308_v29 }
 0x5d3   : > { %13736 = vmatpush3.bf16.msra.mxu1 %v13735_v51  ;;  %v6688_v51 = vrot.slane %v18604_v58, 5 }
 0x5d4   : > { %13737 = vmatprep.subr.bf16.mxu1 %v14348_v31 }
 0x5d5   : > { %12871 = vmatmul.mubr.msk.f32.gmra.mrb[230].mxu1 %vm5423_vm10, %v18574_v37  ;;  %13036 = vmatmul.mubr.msk.f32.gmra.mrb[208].mxu0 %vm5423_vm10, %v6884_v6  ;;  %v6888_v37 = vsel %vm4008_vm7, %v6885_v21, %v6887_v24  ;;  %v6690_v6 = vrot.slane %v18595_v5, 5 }
 0x5d6   : > { %12873 = vmatprep.mubr.msk.f32.mxu1 %vm14347_vm0, %v20660_v26  ;;  %13038 = vmatprep.mubr.msk.f32.mxu0 %vm14347_vm0, %v20660_v26 }
 0x5d7   : > { %13739 = vmatpush3.bf16.msra.mxu1 %v13738_v1  ;;  %v6689_v1 = vsel %vm799_vm1, %v6686_v56, %v6688_v51 }
 0x5d8   : > { %13740 = vmatprep.subr.bf16.mxu1 %v14348_v31 }
 0x5d9   : > { %12874 = vmatmul.mubr.msk.f32.gmra.mrb[232].mxu1 %vm5423_vm10, %v19025_v57  ;;  %13039 = vmatmul.mubr.msk.f32.gmra.mrb[210].mxu0 %vm5423_vm10, %v6886_v18  ;;  %v6892_v57 = vsel %vm4008_vm7, %v6889_v16, %v6891_v63  ;;  %v6692_v18 = vrot.slane %v18624_v50, 5 }
 0x5da   : > { %12876 = vmatprep.mubr.msk.f32.mxu1 %vm14347_vm0, %v20660_v26  ;;  %13041 = vmatprep.mubr.msk.f32.mxu0 %vm14347_vm0, %v20660_v26 }
 0x5db   : > { %13742 = vmatpush3.bf16.msra.mxu1 %v13741_v40  ;;  %v6691_v40 = vsel %vm799_vm1, %v6688_v51, %v6690_v6 }
 0x5dc   : > { %13755 = vmatprep.subr.bf16.mxu1 %v14348_v31 }
 0x5dd   : > { %12877 = vmatmul.mubr.msk.f32.gmra.mrb[234].mxu1 %vm5423_vm10, %v19048_v8  ;;  %13042 = vmatmul.mubr.msk.f32.gmra.mrb[212].mxu0 %vm5423_vm10, %v6888_v37  ;;  %v6900_v8 = vsel %vm4008_vm7, %v6897_v34, %v6899_v2  ;;  %v6678_v2 = vrot.slane %v18486_v62, 5 }
 0x5de   : > { %12879 = vmatprep.mubr.msk.f32.mxu1 %vm14347_vm0, %v20660_v26  ;;  %13044 = vmatprep.mubr.msk.f32.mxu0 %vm14347_vm0, %v20660_v26 }
 0x5e1   : > { %12880 = vmatmul.mubr.msk.f32.gmra.mrb[236].mxu1 %vm5423_vm10, %v19062_v17  ;;  %13045 = vmatmul.mubr.msk.f32.gmra.mrb[214].mxu0 %vm5423_vm10, %v6890_v3  ;;  %v6680_v17 = vrot.slane %v18539_v41, 5  ;;  %v6693_v3 = vsel %vm799_vm1, %v6690_v6, %v6692_v18 }
 0x5e2   : > { %12882 = vmatprep.mubr.msk.f32.mxu1 %vm14347_vm0, %v20660_v26  ;;  %13047 = vmatprep.mubr.msk.f32.mxu0 %vm14347_vm0, %v20660_v26 }
 0x5e5   : > { %12883 = vmatmul.mubr.msk.f32.gmra.mrb[238].mxu1 %vm5423_vm10, %v19076_v54  ;;  %13048 = vmatmul.mubr.msk.f32.gmra.mrb[216].mxu0 %vm5423_vm10, %v6892_v57 }
 0x5e6   : > { %12885 = vmatprep.mubr.msk.f32.mxu1 %vm14347_vm0, %v20660_v26  ;;  %13050 = vmatprep.mubr.msk.f32.mxu0 %vm14347_vm0, %v20660_v26 }
 0x5e9   : > { %12886 = vmatmul.mubr.msk.f32.gmra.mrb[240].mxu1 %vm5423_vm10, %v19088_v39  ;;  %13051 = vmatmul.mubr.msk.f32.gmra.mrb[218].mxu0 %vm5423_vm10, %v6894_v35  ;;  %v6682_v39 = vrot.slane %v18525_v4, 5  ;;  %v6695_v35 = vsel %vm799_vm1, %v6692_v18, %v6694_v46 }
 0x5ea   : > { %12888 = vmatprep.mubr.msk.f32.mxu1 %vm14347_vm0, %v20660_v26  ;;  %13053 = vmatprep.mubr.msk.f32.mxu0 %vm14347_vm0, %v20660_v26 }
 0x5ed   : > { %12889 = vmatmul.mubr.msk.f32.gmra.mrb[242].mxu1 %vm5423_vm10, %v19100_v11  ;;  %13054 = vmatmul.mubr.msk.f32.gmra.mrb[220].mxu0 %vm5423_vm10, %v6896_v53  ;;  %v6683_v11 = vsel %vm799_vm1, %v6680_v17, %v6682_v39 }
 0x5ee   : > { %12891 = vmatprep.mubr.msk.f32.mxu1 %vm14347_vm0, %v20660_v26  ;;  %13056 = vmatprep.mubr.msk.f32.mxu0 %vm14347_vm0, %v20660_v26 }
 0x5f1   : > { %12892 = vmatmul.mubr.msk.f32.gmra.mrb[244].mxu1 %vm5423_vm10, %v19112_v10  ;;  %13057 = vmatmul.mubr.msk.f32.gmra.mrb[222].mxu0 %vm5423_vm10, %v6898_v52 }
 0x5f2   : > { %12894 = vmatprep.mubr.msk.f32.mxu1 %vm14347_vm0, %v20660_v26  ;;  %13059 = vmatprep.mubr.msk.f32.mxu0 %vm14347_vm0, %v20660_v26 }
 0x5f5   : > { %12895 = vmatmul.mubr.msk.f32.gmra.mrb[246].mxu1 %vm5423_vm10, %v19124_v28  ;;  %13060 = vmatmul.mubr.msk.f32.gmra.mrb[224].mxu0 %vm5423_vm10, %v6900_v8 }
 0x5f6   : > { %12897 = vmatprep.mubr.msk.f32.mxu1 %vm14347_vm0, %v20660_v26  ;;  %13062 = vmatprep.mubr.msk.f32.mxu0 %vm14347_vm0, %v20660_v26 }
 0x5f9   : > { %12898 = vmatmul.mubr.msk.f32.gmra.mrb[248].mxu1 %vm5423_vm10, %v19136_v7  ;;  %13063 = vmatmul.mubr.msk.f32.gmra.mrb[226].mxu0 %vm5423_vm10, %v18744_v13  ;;  %v6685_v7 = vsel %vm799_vm1, %v6682_v39, %v6684_v38 }
 0x5fa   : > { %12900 = vmatprep.mubr.msk.f32.mxu1 %vm14347_vm0, %v20660_v26  ;;  %13065 = vmatprep.mubr.msk.f32.mxu0 %vm14347_vm0, %v20660_v26 }
 0x5fd   : > { %12901 = vmatmul.mubr.msk.f32.gmra.mrb[250].mxu1 %vm5423_vm10, %v18666_v0  ;;  %13066 = vmatmul.mubr.msk.f32.gmra.mrb[228].mxu0 %vm5423_vm10, %v18728_v47 }
 0x5fe   : > { %12974 = vmatprep.mubr.msk.f32.mxu1 %vm14347_vm0, %v20660_v26  ;;  %13129 = vmatprep.mubr.msk.f32.mxu0 %vm14347_vm0, %v20660_v26 }
 0x601   : > { %12975 = vmatmul.mubr.msk.f32.vlgmr.msra.gmra.mrb[252].mxu1 %vm5423_vm10, %v18747_v42  ;;  %v6679_v42 = vsel %vm799_vm1, %v6676_v25, %v6678_v2 }
 0x602   : > { %12977 = vmatprep.mubr.msk.f32.mxu1 %vm14347_vm0, %v20660_v26 }
 0x604   : > { %v19313_v13 = vpop.f32.mrb[148].mxu1  ;;  %v19315_v0 = vpop.f32.mrb[126].mxu0 }
 0x605   : > { %12978 = vmatmul.mubr.msk.f32.gmra.mrb[254].mxu1 %vm5423_vm10, %v18752_v27  ;;  %v12591_v47 = vpop.f32.mrb[149].mxu1  ;;  %v12701_v49 = vpop.f32.mrb[127].mxu0  ;;  %v6681_v27 = vsel %vm799_vm1, %v6678_v2, %v6680_v17 }
 0x606   : > { %12980 = vmatprep.mubr.msk.f32.mxu1 %vm14347_vm0, %v20660_v26 }
 0x608   : > { %v19325_v9 = vpop.f32.mrb[150].mxu1  ;;  %v19327_v62 = vpop.f32.mrb[128].mxu0 }
 0x609   : > { %12981 = vmatmul.mubr.msk.f32.gmra.mrb[0].mxu1 %vm5423_vm10, %v6679_v42  ;;  %v12594_v54 = vpop.f32.mrb[151].mxu1  ;;  %v12704_v20 = vpop.f32.mrb[129].mxu0 }
 0x60a   : > { %12983 = vmatprep.mubr.msk.f32.mxu1 %vm14347_vm0, %v20660_v26 }
 0x60c   : > { %v19334_v43 = vpop.f32.mrb[152].mxu1  ;;  %v19336_v25 = vpop.f32.mrb[130].mxu0 }
 0x60d   : > { %12984 = vmatmul.mubr.msk.f32.gmra.mrb[2].mxu1 %vm5423_vm10, %v6681_v27  ;;  %v12597_v41 = vpop.f32.mrb[153].mxu1  ;;  %v12707_v33 = vpop.f32.mrb[131].mxu0 }
 0x60e   : > { %12986 = vmatprep.mubr.msk.f32.mxu1 %vm14347_vm0, %v20660_v26 }
 0x610   : > { %v19343_v10 = vpop.f32.mrb[154].mxu1  ;;  %v19345_v55 = vpop.f32.mrb[132].mxu0 }
 0x611   : > { %12987 = vmatmul.mubr.msk.f32.gmra.mrb[4].mxu1 %vm5423_vm10, %v6683_v11  ;;  %v12600_v4 = vpop.f32.mrb[155].mxu1  ;;  %v12710_v28 = vpop.f32.mrb[133].mxu0 }
 0x612   : > { %12989 = vmatprep.mubr.msk.f32.mxu1 %vm14347_vm0, %v20660_v26 }
 0x614   : > { %v19352_v36 = vpop.f32.mrb[156].mxu1  ;;  %v19354_v12 = vpop.f32.mrb[134].mxu0 }
 0x615   : > { %12990 = vmatmul.mubr.msk.f32.gmra.mrb[6].mxu1 %vm5423_vm10, %v6685_v7  ;;  %v12603_v14 = vpop.f32.mrb[157].mxu1  ;;  %v12713_v45 = vpop.f32.mrb[135].mxu0 }
 0x616   : > { %12992 = vmatprep.mubr.msk.f32.mxu1 %vm14347_vm0, %v20660_v26 }
 0x618   : > { %v19361_v32 = vpop.f32.mrb[158].mxu1  ;;  %v19363_v22 = vpop.f32.mrb[136].mxu0 }
 0x619   : > { %12993 = vmatmul.mubr.msk.f32.gmra.mrb[8].mxu1 %vm5423_vm10, %v6687_v30  ;;  %v12606_v23 = vpop.f32.mrb[159].mxu1  ;;  %v12716_v61 = vpop.f32.mrb[137].mxu0 }
 0x61a   : > { %12995 = vmatprep.mubr.msk.f32.mxu1 %vm14347_vm0, %v20660_v26 }
 0x61c   : > { %v19370_v21 = vpop.f32.mrb[160].mxu1  ;;  %v19372_v29 = vpop.f32.mrb[138].mxu0 }
 0x61d   : > { %12996 = vmatmul.mubr.msk.f32.gmra.mrb[10].mxu1 %vm5423_vm10, %v6689_v1  ;;  %v12609_v58 = vpop.f32.mrb[161].mxu1  ;;  %v12719_v15 = vpop.f32.mrb[139].mxu0 }
 0x61e   : > { %12998 = vmatprep.mubr.msk.f32.mxu1 %vm14347_vm0, %v20660_v26 }
 0x620   : > { %v19379_v24 = vpop.f32.mrb[162].mxu1  ;;  %v19381_v37 = vpop.f32.mrb[140].mxu0 }
 0x621   : > { %12999 = vmatmul.mubr.msk.f32.gmra.mrb[12].mxu1 %vm5423_vm10, %v6691_v40  ;;  %v12612_v5 = vpop.f32.mrb[163].mxu1  ;;  %v12722_v16 = vpop.f32.mrb[141].mxu0 }
 0x622   : > { %13001 = vmatprep.mubr.msk.f32.mxu1 %vm14347_vm0, %v20660_v26 }
 0x624   : > { %v19387_v63 = vpop.f32.mrb[164].mxu1  ;;  %v19389_v57 = vpop.f32.mrb[142].mxu0 }
 0x625   : > { %13002 = vmatmul.mubr.msk.f32.gmra.mrb[14].mxu1 %vm5423_vm10, %v6693_v3  ;;  %v12615_v50 = vpop.f32.mrb[165].mxu1  ;;  %v12725_v59 = vpop.f32.mrb[143].mxu0 }
 0x626   : > { %13004 = vmatprep.mubr.msk.f32.mxu1 %vm14347_vm0, %v20660_v26 }
 0x628   : > { %v19397_v19 = vpop.f32.mrb[166].mxu1  ;;  %v19399_v53 = vpop.f32.mrb[144].mxu0 }
 0x629   : > { %13005 = vmatmul.mubr.msk.f32.gmra.mrb[16].mxu1 %vm5423_vm10, %v6695_v35  ;;  %v12618_v34 = vpop.f32.mrb[167].mxu1  ;;  %v12728_v52 = vpop.f32.mrb[145].mxu0 }
 0x62a   : > { %13007 = vmatprep.mubr.msk.f32.mxu1 %vm14347_vm0, %v20660_v26 }
 0x62c   : > { %v19404_v8 = vpop.f32.mrb[168].mxu1  ;;  %v19406_v2 = vpop.f32.mrb[146].mxu0 }
 0x62d   : > { %13008 = vmatmul.mubr.msk.f32.gmra.mrb[18].mxu1 %vm5423_vm10, %v18773_v44  ;;  %v12621_v60 = vpop.f32.mrb[169].mxu1  ;;  %v12731_v46 = vpop.f32.mrb[147].mxu0 }
 0x62e   : > { %13010 = vmatprep.mubr.msk.f32.mxu1 %vm14347_vm0, %v20660_v26 }
 0x630   : > { %v19412_v47 = vpop.f32.mrb[170].mxu1  ;;  %v19414_v49 = vpop.f32.mrb[148].mxu0 }
 0x631   : > { %13011 = vmatmul.mubr.msk.f32.gmra.mrb[20].mxu1 %vm5423_vm10, %v18764_v48  ;;  %v12624_v42 = vpop.f32.mrb[171].mxu1  ;;  %v12734_v17 = vpop.f32.mrb[149].mxu0 }
 0x632   : > { %13092 = vmatprep.mubr.msk.f32.mxu1 %vm14347_vm0, %v20660_v26 }
 0x634   : > { %v19420_v54 = vpop.f32.mrb[172].mxu1  ;;  %v19422_v44 = vpop.f32.mrb[150].mxu0 }
 0x635   : > { %v12627_v20 = vpop.f32.mrb[173].mxu1  ;;  %v12737_v27 = vpop.f32.mrb[151].mxu0 }
 0x638   : > { %v5672_v39 = vpop.f32.mrb[174].mxu1  ;;  %v19424_v41 = vpop.f32.mrb[152].mxu0 }
 0x639   : > { %v5673_v33 = vadd.f32 %v5672_v39, %v19313_v13  ;;  %v12646_v11 = vpop.f32.mrb[175].mxu1  ;;  %v12811_v38 = vpop.f32.mrb[153].mxu0 }
 0x63b   : > { %v19428_v48 = vadd.f32 %v19315_v0, %v5673_v33 }
 0x63c   : > { %v5677_v4 = vpop.f32.mrb[176].mxu1  ;;  %v19430_v28 = vpop.f32.mrb[154].mxu0 }
 0x63d   : > { %v5678_v7 = vadd.f32 %v5677_v4, %v19325_v9  ;;  %v12649_v56 = vpop.f32.mrb[177].mxu1  ;;  %v12814_v14 = vpop.f32.mrb[155].mxu0 }
 0x63f   : > { %v19434_v45 = vadd.f32 %v19327_v62, %v5678_v7 }
 0x640   : > { %v5682_v30 = vpop.f32.mrb[178].mxu1  ;;  %v19436_v51 = vpop.f32.mrb[156].mxu0 }
 0x641   : > { %v5683_v13 = vadd.f32 %v5682_v30, %v19334_v43  ;;  %v12652_v23 = vpop.f32.mrb[179].mxu1  ;;  %v12817_v61 = vpop.f32.mrb[157].mxu0 }
 0x643   : > { %v19440_v0 = vadd.f32 %v19336_v25, %v5683_v13 }
 0x644   : > { %v5687_v1 = vpop.f32.mrb[180].mxu1  ;;  %v19442_v6 = vpop.f32.mrb[158].mxu0 }
 0x645   : > { %v5688_v9 = vadd.f32 %v5687_v1, %v19343_v10  ;;  %v12655_v58 = vpop.f32.mrb[181].mxu1  ;;  %v12820_v15 = vpop.f32.mrb[159].mxu0 }
 0x647   : > { %v19446_v62 = vadd.f32 %v19345_v55, %v5688_v9 }
 0x648   : > { %v5692_v40 = vpop.f32.mrb[182].mxu1  ;;  %v19448_v18 = vpop.f32.mrb[160].mxu0 }
 0x649   : > { %v5693_v43 = vadd.f32 %v5692_v40, %v19352_v36  ;;  %v12658_v5 = vpop.f32.mrb[183].mxu1  ;;  %v12823_v16 = vpop.f32.mrb[161].mxu0 }
 0x64b   : > { %v19452_v25 = vadd.f32 %v19354_v12, %v5693_v43 }
 0x64c   : > { %v5697_v3 = vpop.f32.mrb[184].mxu1  ;;  %v19454_v50 = vpop.f32.mrb[162].mxu0 }
 0x64d   : > { %v5698_v10 = vadd.f32 %v5697_v3, %v19361_v32  ;;  %v12661_v59 = vpop.f32.mrb[185].mxu1  ;;  %v12826_v35 = vpop.f32.mrb[163].mxu0 }
 0x64f   : > { %v19458_v55 = vadd.f32 %v19363_v22, %v5698_v10 }
 0x650   : > { %v5702_v34 = vpop.f32.mrb[186].mxu1  ;;  %v19460_v52 = vpop.f32.mrb[164].mxu0 }
 0x651   : > { %v5703_v36 = vadd.f32 %v5702_v34, %v19370_v21  ;;  %v12664_v60 = vpop.f32.mrb[187].mxu1  ;;  %v12829_v46 = vpop.f32.mrb[165].mxu0 }
 0x653   : > { %v19464_v12 = vadd.f32 %v19372_v29, %v5703_v36 }
 0x654   : > { %v5707_v42 = vpop.f32.mrb[188].mxu1  ;;  %v19466_v17 = vpop.f32.mrb[166].mxu0 }
 0x655   : > { %v5708_v32 = vadd.f32 %v5707_v42, %v19379_v24  ;;  %v12667_v20 = vpop.f32.mrb[189].mxu1  ;;  %v12832_v27 = vpop.f32.mrb[167].mxu0 }
 0x657   : > { %v19470_v22 = vadd.f32 %v19381_v37, %v5708_v32 }
 0x658   : > { %v5712_v39 = vpop.f32.mrb[190].mxu1  ;;  %v19472_v33 = vpop.f32.mrb[168].mxu0 }
 0x659   : > { %v5713_v21 = vadd.f32 %v5712_v39, %v19387_v63  ;;  %v12670_v11 = vpop.f32.mrb[191].mxu1  ;;  %v12835_v38 = vpop.f32.mrb[169].mxu0 }
 0x65b   : > { %v19476_v29 = vadd.f32 %v19389_v57, %v5713_v21 }
 0x65c   : > { %v5717_v4 = vpop.f32.mrb[192].mxu1  ;;  %v19478_v7 = vpop.f32.mrb[170].mxu0 }
 0x65d   : > { %v5718_v24 = vadd.f32 %v5717_v4, %v19397_v19  ;;  %v12673_v56 = vpop.f32.mrb[193].mxu1  ;;  %v12838_v14 = vpop.f32.mrb[171].mxu0 }
 0x65f   : > { %v19482_v37 = vadd.f32 %v19399_v53, %v5718_v24 }
 0x660   : > { %v5722_v30 = vpop.f32.mrb[194].mxu1  ;;  %v19484_v13 = vpop.f32.mrb[172].mxu0 }
 0x661   : > { %v5723_v63 = vadd.f32 %v5722_v30, %v19404_v8  ;;  %v12676_v23 = vpop.f32.mrb[195].mxu1  ;;  %v12841_v61 = vpop.f32.mrb[173].mxu0 }
 0x663   : > { %v19488_v57 = vadd.f32 %v19406_v2, %v5723_v63 }
 0x664   : > { %v5727_v1 = vpop.f32.mrb[196].mxu1  ;;  %v19490_v9 = vpop.f32.mrb[174].mxu0 }
 0x665   : > { %v5728_v19 = vadd.f32 %v5727_v1, %v19412_v47  ;;  %v12679_v58 = vpop.f32.mrb[197].mxu1  ;;  %v12844_v15 = vpop.f32.mrb[175].mxu0 }
 0x667   : > { %v19494_v53 = vadd.f32 %v19414_v49, %v5728_v19 }
 0x668   : > { %v5732_v40 = vpop.f32.mrb[198].mxu1  ;;  %v19496_v43 = vpop.f32.mrb[176].mxu0 }
 0x669   : > { %v5733_v8 = vadd.f32 %v5732_v40, %v19420_v54  ;;  %v12682_v5 = vpop.f32.mrb[199].mxu1  ;;  %v12847_v16 = vpop.f32.mrb[177].mxu0 }
 0x66b   : > { %v19500_v2 = vadd.f32 %v19422_v44, %v5733_v8 }
 0x66c   : > { %v6021_v3 = vpop.f32.mrb[200].mxu1  ;;  %v19502_v10 = vpop.f32.mrb[178].mxu0 }
 0x66d   : > { %v6085_v47 = vadd.f32 %v6021_v3, %v19428_v48  ;;  %v12756_v59 = vpop.f32.mrb[201].mxu1  ;;  %v12921_v35 = vpop.f32.mrb[179].mxu0 }
 0x66f   : > { %v19506_v49 = vadd.f32 %v19424_v41, %v6085_v47 }
 0x670   : > { %v6026_v34 = vpop.f32.mrb[202].mxu1  ;;  %v19508_v36 = vpop.f32.mrb[180].mxu0 }
 0x671   : > { %v6086_v54 = vadd.f32 %v6026_v34, %v19434_v45  ;;  %v12759_v60 = vpop.f32.mrb[203].mxu1  ;;  %v12924_v46 = vpop.f32.mrb[181].mxu0 }
 0x673   : > { %v19512_v44 = vadd.f32 %v19430_v28, %v6086_v54 }
 0x674   : > { %v6031_v42 = vpop.f32.mrb[204].mxu1  ;;  %v19514_v32 = vpop.f32.mrb[182].mxu0 }
 0x675   : > { %v6087_v48 = vadd.f32 %v6031_v42, %v19440_v0  ;;  %v12762_v20 = vpop.f32.mrb[205].mxu1  ;;  %v12927_v27 = vpop.f32.mrb[183].mxu0 }
 0x677   : > { %v19518_v41 = vadd.f32 %v19436_v51, %v6087_v48 }
 0x678   : > { %v6036_v39 = vpop.f32.mrb[206].mxu1  ;;  %v19520_v21 = vpop.f32.mrb[184].mxu0 }
 0x679   : > { %v6088_v45 = vadd.f32 %v6036_v39, %v19446_v62  ;;  %v12765_v11 = vpop.f32.mrb[207].mxu1  ;;  %v12930_v38 = vpop.f32.mrb[185].mxu0 }
 0x67b   : > { %v19524_v28 = vadd.f32 %v19442_v6, %v6088_v45 }
 0x67c   : > { %v6041_v4 = vpop.f32.mrb[208].mxu1  ;;  %v19526_v24 = vpop.f32.mrb[186].mxu0 }
 0x67d   : > { %v6089_v0 = vadd.f32 %v6041_v4, %v19452_v25  ;;  %v12768_v56 = vpop.f32.mrb[209].mxu1  ;;  %v12933_v14 = vpop.f32.mrb[187].mxu0 }
 0x67f   : > { %v19530_v51 = vadd.f32 %v19448_v18, %v6089_v0 }
 0x680   : > { %v6046_v30 = vpop.f32.mrb[210].mxu1  ;;  %v19532_v63 = vpop.f32.mrb[188].mxu0 }
 0x681   : > { %v6090_v62 = vadd.f32 %v6046_v30, %v19458_v55  ;;  %v12771_v23 = vpop.f32.mrb[211].mxu1  ;;  %v12936_v61 = vpop.f32.mrb[189].mxu0 }
 0x683   : > { %v19536_v6 = vadd.f32 %v19454_v50, %v6090_v62 }
 0x684   : > { %v6051_v1 = vpop.f32.mrb[212].mxu1  ;;  %v19538_v19 = vpop.f32.mrb[190].mxu0 }
 0x685   : > { %v6091_v25 = vadd.f32 %v6051_v1, %v19464_v12  ;;  %v12774_v58 = vpop.f32.mrb[213].mxu1  ;;  %v12939_v15 = vpop.f32.mrb[191].mxu0 }
 0x687   : > { %v19542_v18 = vadd.f32 %v19460_v52, %v6091_v25 }
 0x688   : > { %v6056_v40 = vpop.f32.mrb[214].mxu1  ;;  %v19544_v8 = vpop.f32.mrb[192].mxu0 }
 0x689   : > { %v6092_v55 = vadd.f32 %v6056_v40, %v19470_v22  ;;  %v12777_v5 = vpop.f32.mrb[215].mxu1  ;;  %v12942_v16 = vpop.f32.mrb[193].mxu0 }
 0x68b   : > { %v19548_v50 = vadd.f32 %v19466_v17, %v6092_v55 }
 0x68c   : > { %v6061_v3 = vpop.f32.mrb[216].mxu1  ;;  %v19550_v47 = vpop.f32.mrb[194].mxu0 }
 0x68d   : > { %v6093_v12 = vadd.f32 %v6061_v3, %v19476_v29  ;;  %v12780_v59 = vpop.f32.mrb[217].mxu1  ;;  %v12945_v35 = vpop.f32.mrb[195].mxu0 }
 0x68f   : > { %v19554_v52 = vadd.f32 %v19472_v33, %v6093_v12 }
 0x690   : > { %v6066_v34 = vpop.f32.mrb[218].mxu1  ;;  %v19556_v54 = vpop.f32.mrb[196].mxu0 }
 0x691   : > { %v6094_v22 = vadd.f32 %v6066_v34, %v19482_v37  ;;  %v12783_v60 = vpop.f32.mrb[219].mxu1  ;;  %v12948_v46 = vpop.f32.mrb[197].mxu0 }
 0x693   : > { %v19560_v17 = vadd.f32 %v19478_v7, %v6094_v22 }
 0x694   : > { %v6071_v42 = vpop.f32.mrb[220].mxu1  ;;  %v19562_v48 = vpop.f32.mrb[198].mxu0 }
 0x695   : > { %v6095_v29 = vadd.f32 %v6071_v42, %v19488_v57  ;;  %v12786_v20 = vpop.f32.mrb[221].mxu1  ;;  %v12951_v27 = vpop.f32.mrb[199].mxu0 }
 0x697   : > { %v19566_v33 = vadd.f32 %v19484_v13, %v6095_v29 }
 0x698   : > { %v6076_v39 = vpop.f32.mrb[222].mxu1  ;;  %v19568_v45 = vpop.f32.mrb[200].mxu0 }
 0x699   : > { %v6096_v37 = vadd.f32 %v6076_v39, %v19494_v53  ;;  %v12789_v11 = vpop.f32.mrb[223].mxu1  ;;  %v12954_v38 = vpop.f32.mrb[201].mxu0 }
 0x69b   : > { %v19572_v7 = vadd.f32 %v19490_v9, %v6096_v37 }
 0x69c   : > { %v6081_v4 = vpop.f32.mrb[224].mxu1  ;;  %v19574_v0 = vpop.f32.mrb[202].mxu0 }
 0x69d   : > { %v6097_v57 = vadd.f32 %v6081_v4, %v19500_v2  ;;  %v12792_v56 = vpop.f32.mrb[225].mxu1  ;;  %v12957_v14 = vpop.f32.mrb[203].mxu0 }
 0x69f   : > { %v19578_v13 = vadd.f32 %v19496_v43, %v6097_v57  ;;  %v10356_v57 = vld [vmem:[%s20570_s7 + $0x58] sm:$0xff] }
 0x6a0   : > { %v6427_v30 = vpop.f32.mrb[226].mxu1  ;;  %v19580_v62 = vpop.f32.mrb[204].mxu0 }
 0x6a1   : > { %v6491_v53 = vadd.f32 %v6427_v30, %v19506_v49  ;;  %v12866_v23 = vpop.f32.mrb[227].mxu1  ;;  %v13031_v61 = vpop.f32.mrb[205].mxu0 }
 0x6a2   : > { %v10358_v23 = vld [vmem:[%s20570_s7 + $0x68] sm:$0xff] }
 0x6a3   : > { %v19584_v9 = vadd.f32 %v19502_v10, %v6491_v53 }
 0x6a4   : > { %v6432_v1 = vpop.f32.mrb[228].mxu1  ;;  %v19586_v25 = vpop.f32.mrb[206].mxu0 }
 0x6a5   : > { %v6492_v2 = vadd.f32 %v6432_v1, %v19512_v44  ;;  %v12869_v58 = vpop.f32.mrb[229].mxu1  ;;  %v13034_v15 = vpop.f32.mrb[207].mxu0 }
 0x6a7   : > { %v19590_v43 = vadd.f32 %v19508_v36, %v6492_v2 }
 0x6a8   : > { %v6437_v40 = vpop.f32.mrb[230].mxu1  ;;  %v19592_v55 = vpop.f32.mrb[208].mxu0 }
 0x6a9   : > { %v6493_v49 = vadd.f32 %v6437_v40, %v19518_v41  ;;  %v12872_v5 = vpop.f32.mrb[231].mxu1  ;;  %v13037_v16 = vpop.f32.mrb[209].mxu0 }
 0x6ab   : > { %v19596_v10 = vadd.f32 %v19514_v32, %v6493_v49 }
 0x6ac   : > { %v6442_v3 = vpop.f32.mrb[232].mxu1  ;;  %v19598_v12 = vpop.f32.mrb[210].mxu0 }
 0x6ad   : > { %v6494_v44 = vadd.f32 %v6442_v3, %v19524_v28  ;;  %v12875_v59 = vpop.f32.mrb[233].mxu1  ;;  %v13040_v35 = vpop.f32.mrb[211].mxu0 }
 0x6af   : > { %v19602_v36 = vadd.f32 %v19520_v21, %v6494_v44 }
 0x6b0   : > { %v6447_v34 = vpop.f32.mrb[234].mxu1  ;;  %v19604_v22 = vpop.f32.mrb[212].mxu0 }
 0x6b1   : > { %v6495_v41 = vadd.f32 %v6447_v34, %v19530_v51  ;;  %v12878_v60 = vpop.f32.mrb[235].mxu1  ;;  %v13043_v46 = vpop.f32.mrb[213].mxu0  ;;  %v10353_v51 = vld [vmem:[%s20570_s7 + $0x40] sm:$0xff] }
 0x6b3   : > { %v19608_v32 = vadd.f32 %v19526_v24, %v6495_v41  ;;  %v10354_v24 = vld [vmem:[%s20570_s7 + $0x48] sm:$0xff] }
 0x6b4   : > { %v6452_v42 = vpop.f32.mrb[236].mxu1  ;;  %v19610_v29 = vpop.f32.mrb[214].mxu0  ;;  %v13775_v4 = vpack.c.bf16 %v10354_v24, %v10353_v51 }
 0x6b5   : > { %v6496_v28 = vadd.f32 %v6452_v42, %v19536_v6  ;;  %v12881_v20 = vpop.f32.mrb[237].mxu1  ;;  %v13046_v27 = vpop.f32.mrb[215].mxu0  ;;  %v10355_v6 = vld [vmem:[%s20570_s7 + $0x50] sm:$0xff] }
 0x6b6   : > { %13776 = vmatpush3.bf16.msra.mxu0 %v13775_v4  ;;  %v13778_v14 = vpack.c.bf16 %v10356_v57, %v10355_v6 }
 0x6b7   : > { %v19614_v21 = vadd.f32 %v19532_v63, %v6496_v28  ;;  %13777 = vmatprep.subr.bf16.mxu0 %v14348_v31 }
 0x6b8   : > { %v6457_v39 = vpop.f32.mrb[238].mxu1  ;;  %v19616_v37 = vpop.f32.mrb[216].mxu0 }
 0x6b9   : > { %v6497_v11 = vadd.f32 %v6457_v39, %v19542_v18  ;;  %v12884_v38 = vpop.f32.mrb[239].mxu1  ;;  %v13049_v63 = vpop.f32.mrb[217].mxu0  ;;  %v10357_v18 = vld [vmem:[%s20570_s7 + $0x60] sm:$0xff] }
 0x6ba   : > { %13779 = vmatpush3.bf16.msra.mxu0 %v13778_v14  ;;  %v13781_v58 = vpack.c.bf16 %v10358_v23, %v10357_v18 }
 0x6bb   : > { %v19632_v56 = vadd.f32 %v19538_v19, %v6497_v11  ;;  %13780 = vmatprep.subr.bf16.mxu0 %v14348_v31 }
 0x6bc   : > { %v6462_v30 = vpop.f32.mrb[240].mxu1  ;;  %v19634_v53 = vpop.f32.mrb[218].mxu0 }
 0x6bd   : > { %v6498_v61 = vadd.f32 %v6462_v30, %v19548_v50  ;;  %v12887_v1 = vpop.f32.mrb[241].mxu1  ;;  %v13052_v19 = vpop.f32.mrb[219].mxu0 }
 0x6be   : > { %13782 = vmatpush3.bf16.msra.mxu0 %v13781_v58 }
 0x6bf   : > { %v19645_v2 = vadd.f32 %v19544_v8, %v6498_v61  ;;  %13783 = vmatprep.subr.bf16.mxu0 %v14348_v31 }
 0x6c0   : > { %v6467_v15 = vpop.f32.mrb[242].mxu1  ;;  %v19647_v40 = vpop.f32.mrb[220].mxu0 }
 0x6c1   : > { %v6499_v49 = vadd.f32 %v6467_v15, %v19554_v52  ;;  %v12890_v5 = vpop.f32.mrb[243].mxu1  ;;  %v13055_v16 = vpop.f32.mrb[221].mxu0 }
 0x6c3   : > { %v19652_v3 = vadd.f32 %v19550_v47, %v6499_v49 }
 0x6c4   : > { %v6472_v50 = vpop.f32.mrb[244].mxu1  ;;  %v19654_v44 = vpop.f32.mrb[222].mxu0 }
 0x6c5   : > { %v6500_v8 = vadd.f32 %v6472_v50, %v19560_v17  ;;  %v12893_v59 = vpop.f32.mrb[245].mxu1  ;;  %v13058_v35 = vpop.f32.mrb[223].mxu0 }
 0x6c7   : > { %v19659_v34 = vadd.f32 %v19556_v54, %v6500_v8 }
 0x6c8   : > { %v6477_v41 = vpop.f32.mrb[246].mxu1  ;;  %v19661_v52 = vpop.f32.mrb[224].mxu0 }
 0x6c9   : > { %v6501_v60 = vadd.f32 %v6477_v41, %v19566_v33  ;;  %v12896_v47 = vpop.f32.mrb[247].mxu1  ;;  %v13061_v46 = vpop.f32.mrb[225].mxu0 }
 0x6cb   : > { %v19665_v42 = vadd.f32 %v19562_v48, %v6501_v60 }
 0x6cc   : > { %v6482_v28 = vpop.f32.mrb[248].mxu1  ;;  %v19667_v20 = vpop.f32.mrb[226].mxu0 }
 0x6cd   : > { %v6502_v17 = vadd.f32 %v6482_v28, %v19572_v7  ;;  %v12899_v27 = vpop.f32.mrb[249].mxu1  ;;  %v13064_v39 = vpop.f32.mrb[227].mxu0  ;;  %v19683_v7 = vld [vmem:[%s20568_s5] ss:$0 sm:$0xff] }
 0x6cf   : > { %v19671_v54 = vadd.f32 %v19568_v45, %v6502_v17 }
 0x6d0   : > { %v6487_v51 = vpop.f32.mrb[250].mxu1  ;;  %v19673_v24 = vpop.f32.mrb[228].mxu0 }
 0x6d1   : > { %v6503_v33 = vadd.f32 %v6487_v51, %v19578_v13  ;;  %v12902_v6 = vpop.f32.mrb[251].mxu1  ;;  %v13067_v11 = vpop.f32.mrb[229].mxu0 }
 0x6d3   : > { %v19677_v48 = vadd.f32 %v19574_v0, %v6503_v33 }
 0x6d4   : > { %v6792_v38 = vpop.f32.mrb[252].mxu1 }
 0x6d5   : > { %v6856_v63 = vadd.f32 %v6792_v38, %v19584_v9  ;;  %v12976_v4 = vpop.f32.mrb[253].mxu1 }
 0x6d7   : > { %v7061_v45 = vadd.f32 %v19580_v62, %v6856_v63 }
 0x6d8   : > { %v6797_v57 = vpop.f32.mrb[254].mxu1 }
 0x6d9   : > { %v7081_v14 = vadd.f32 %v19683_v7, %v7061_v45  ;;  %v6857_v13 = vadd.f32 %v6797_v57, %v19590_v43  ;;  %v12979_v30 = vpop.f32.mrb[255].mxu1 }
 0x6db   : > { %v7062_v0 = vadd.f32 %v19586_v25, %v6857_v13  ;;  %v7094_v23 = vmax.f32 %v7081_v14, 0.0 }
 0x6dc   : > { %v6802_v18 = vpop.f32.mrb[0].mxu1 }
 0x6dd   : > { %v7082_v9 = vadd.f32 %v19683_v7, %v7062_v0  ;;  %v6858_v61 = vadd.f32 %v6802_v18, %v19596_v10  ;;  %v12982_v1 = vpop.f32.mrb[1].mxu1  ;;  %v7119_v62 = vrot.slane %v7094_v23, 1 }
 0x6df   : > { %v7095_v19 = vmax.f32 %v7082_v9, 0.0  ;;  %v7063_v58 = vadd.f32 %v19592_v55, %v6858_v61 }
 0x6e0   : > { %v6807_v15 = vpop.f32.mrb[2].mxu1 }
 0x6e1   : > { %v7120_v49 = vrot.slane %v7095_v19, 1  ;;  %v7083_v5 = vadd.f32 %v19683_v7, %v7063_v58  ;;  %v6859_v43 = vadd.f32 %v6807_v15, %v19602_v36  ;;  %v12985_v16 = vpop.f32.mrb[3].mxu1 }
 0x6e3   : > { %v7121_v25 = vsel %vm634_vm2, %v7119_v62, %v7120_v49  ;;  %v7096_v50 = vmax.f32 %v7083_v5, 0.0  ;;  %v7064_v8 = vadd.f32 %v19598_v12, %v6859_v43 }
 0x6e4   : > { %v6812_v59 = vpop.f32.mrb[4].mxu1  ;;  %v7154_v35 = vmax.f32 %v7094_v23, %v7121_v25 }
 0x6e5   : > { %v7122_v10 = vrot.slane %v7096_v50, 1  ;;  %v7084_v41 = vadd.f32 %v19683_v7, %v7064_v8  ;;  %v6860_v55 = vadd.f32 %v6812_v59, %v19608_v32  ;;  %v12988_v60 = vpop.f32.mrb[5].mxu1 }
 0x6e7   : > { %v7123_v47 = vsel %vm634_vm2, %v7120_v49, %v7122_v10  ;;  %v7097_v46 = vmax.f32 %v7084_v41, 0.0  ;;  %v7065_v28 = vadd.f32 %v19604_v22, %v6860_v55 }
 0x6e8   : > { %v6817_v36 = vpop.f32.mrb[6].mxu1  ;;  %v7155_v17 = vmax.f32 %v7095_v19, %v7123_v47 }
 0x6e9   : > { %v7124_v27 = vrot.slane %v7097_v46, 1  ;;  %v7085_v39 = vadd.f32 %v19683_v7, %v7065_v28  ;;  %v6861_v12 = vadd.f32 %v6817_v36, %v19614_v21  ;;  %v12991_v51 = vpop.f32.mrb[7].mxu1 }
 0x6ea   : > { %v7185_v14 = vrot.slane %v7155_v17, 2 }
 0x6eb   : > { %v7125_v33 = vsel %vm634_vm2, %v7122_v10, %v7124_v27  ;;  %v7098_v6 = vmax.f32 %v7085_v39, 0.0  ;;  %v7066_v11 = vadd.f32 %v19610_v29, %v6861_v12 }
 0x6ec   : > { %v19704_v32 = vmax.f32 %v7096_v50, %v7125_v33  ;;  %v6822_v38 = vpop.f32.mrb[8].mxu1 }
 0x6ed   : > { %v7126_v63 = vrot.slane %v7098_v6, 1  ;;  %v7086_v4 = vadd.f32 %v19683_v7, %v7066_v11  ;;  %v6862_v22 = vadd.f32 %v6822_v38, %v19632_v56  ;;  %v12994_v45 = vpop.f32.mrb[9].mxu1 }
 0x6ee   : > { %v7186_v57 = vrot.slane %v19704_v32, 2 }
 0x6ef   : > { %v7127_v21 = vsel %vm634_vm2, %v7124_v27, %v7126_v63  ;;  %v7099_v13 = vmax.f32 %v7086_v4, 0.0  ;;  %v7067_v30 = vadd.f32 %v19616_v37, %v6862_v22 }
 0x6f0   : > { %v7157_v0 = vmax.f32 %v7097_v46, %v7127_v21  ;;  %v6827_v18 = vpop.f32.mrb[10].mxu1  ;;  %v7187_v29 = vsel %vm1430_vm4, %v7185_v14, %v7186_v57 }
 0x6f1   : > { %v7128_v23 = vrot.slane %v7099_v13, 1  ;;  %v7087_v9 = vadd.f32 %v19683_v7, %v7067_v30  ;;  %v6863_v61 = vadd.f32 %v6827_v18, %v19645_v2  ;;  %v12997_v1 = vpop.f32.mrb[11].mxu1  ;;  %v7220_v56 = vmax.f32 %v7154_v35, %v7187_v29 }
 0x6f2   : > { %v7188_v19 = vrot.slane %v7157_v0, 2 }
 0x6f3   : > { %v7129_v58 = vsel %vm634_vm2, %v7126_v63, %v7128_v23  ;;  %v7100_v15 = vmax.f32 %v7087_v9, 0.0  ;;  %v7068_v62 = vadd.f32 %v19634_v53, %v6863_v61 }
 0x6f4   : > { %v19716_v49 = vmax.f32 %v7098_v6, %v7129_v58  ;;  %v6832_v37 = vpop.f32.mrb[12].mxu1  ;;  %v7189_v5 = vsel %vm1430_vm4, %v7186_v57, %v7188_v19 }
 0x6f5   : > { %v7130_v43 = vrot.slane %v7100_v15, 1  ;;  %v7088_v16 = vadd.f32 %v19683_v7, %v7068_v62  ;;  %v6864_v25 = vadd.f32 %v6832_v37, %v19652_v3  ;;  %v13000_v50 = vpop.f32.mrb[13].mxu1  ;;  %v7221_v2 = vmax.f32 %v7155_v17, %v7189_v5 }
 0x6f6   : > { %v7190_v8 = vrot.slane %v19716_v49, 2 }
 0x6f7   : > { %v7131_v59 = vsel %vm634_vm2, %v7128_v23, %v7130_v43  ;;  %v7101_v35 = vmax.f32 %v7088_v16, 0.0  ;;  %v7069_v10 = vadd.f32 %v19647_v40, %v6864_v25  ;;  %v13756_v53 = vpack.c.bf16 %v7221_v2, %v7220_v56 }
 0x6f8   : > { %v7159_v41 = vmax.f32 %v7099_v13, %v7131_v59  ;;  %v6837_v55 = vpop.f32.mrb[14].mxu1  ;;  %v7191_v60 = vsel %vm1430_vm4, %v7188_v19, %v7190_v8 }
 0x6f9   : > { %v7132_v47 = vrot.slane %v7101_v35, 1  ;;  %v7089_v46 = vadd.f32 %v19683_v7, %v7069_v10  ;;  %v6865_v28 = vadd.f32 %v6837_v55, %v19659_v34  ;;  %v13003_v3 = vpop.f32.mrb[15].mxu1  ;;  %13757 = vmatpush3.bf16.msra.mxu1 %v13756_v53  ;;  %v7222_v36 = vmax.f32 %v19704_v32, %v7191_v60 }
 0x6fa   : > { %v7192_v17 = vrot.slane %v7159_v41, 2  ;;  %13758 = vmatprep.subr.bf16.mxu1 %v14348_v31 }
 0x6fb   : > { %v7133_v27 = vsel %vm634_vm2, %v7130_v43, %v7132_v47  ;;  %v7102_v40 = vmax.f32 %v7089_v46, 0.0  ;;  %v7070_v39 = vadd.f32 %v19654_v44, %v6865_v28 }
 0x6fc   : > { %v7160_v12 = vmax.f32 %v7100_v15, %v7133_v27  ;;  %v6842_v51 = vpop.f32.mrb[16].mxu1  ;;  %v7193_v33 = vsel %vm1430_vm4, %v7190_v8, %v7192_v17 }
 0x6fd   : > { %v7134_v6 = vrot.slane %v7102_v40, 1  ;;  %v7090_v11 = vadd.f32 %v19683_v7, %v7070_v39  ;;  %v6866_v34 = vadd.f32 %v6842_v51, %v19665_v42  ;;  %v13006_v38 = vpop.f32.mrb[17].mxu1  ;;  %v7223_v63 = vmax.f32 %v7157_v0, %v7193_v33 }
 0x6fe   : > { %v7194_v32 = vrot.slane %v7160_v12, 2  ;;  %v7233_v38 = vld [vmem:[%s20569_s6 + $0x8] sm:$0xff] }
 0x6ff   : > { %v7135_v4 = vsel %vm634_vm2, %v7132_v47, %v7134_v6  ;;  %v7103_v22 = vmax.f32 %v7090_v11, 0.0  ;;  %v7071_v45 = vadd.f32 %v19661_v52, %v6866_v34  ;;  %v13759_v57 = vpack.c.bf16 %v7223_v63, %v7222_v36  ;;  %v7232_v34 = vld [vmem:[%s20569_s6] sm:$0xff]  ;;  %v7234_v63 = vld [vmem:[%s20569_s6 + $0x10] sm:$0xff] }
 0x700   : > { %v7161_v14 = vmax.f32 %v7101_v35, %v7135_v4  ;;  %v6847_v44 = vpop.f32.mrb[18].mxu1  ;;  %v7195_v21 = vsel %vm1430_vm4, %v7192_v17, %v7194_v32  ;;  %v7236_v4 = vld [vmem:[%s20569_s6 + $0x20] sm:$0xff] }
 0x701   : > { %v7136_v13 = vrot.slane %v7103_v22, 1  ;;  %v7091_v30 = vadd.f32 %v19683_v7, %v7071_v45  ;;  %v6867_v18 = vadd.f32 %v6847_v44, %v19671_v54  ;;  %v13009_v29 = vpop.f32.mrb[19].mxu1  ;;  %13760 = vmatpush3.bf16.msra.mxu1 %v13759_v57  ;;  %v7224_v42 = vmax.f32 %v19716_v49, %v7195_v21  ;;  %v7238_v45 = vld [vmem:[%s20569_s6 + $0x30] sm:$0x3]  ;;  %v7364_v21 = vld [vmem:[%s20570_s7] sm:$0xff] }
 0x702   : > { %v7196_v0 = vrot.slane %v7161_v14, 2  ;;  %13761 = vmatprep.subr.bf16.mxu1 %v14348_v31  ;;  %v10359_v57 = vld [vmem:[%s20570_s7 + $0x70] sm:$0xff]  ;;  %v7367_v29 = vld [vmem:[%s20570_s7 + $0x18] sm:$0xff] }
 0x703   : > { %v7137_v23 = vsel %vm634_vm2, %v7134_v6, %v7136_v13  ;;  %v7104_v52 = vmax.f32 %v7091_v30, 0.0  ;;  %v7072_v9 = vadd.f32 %v19667_v20, %v6867_v18  ;;  %v7366_v18 = vld [vmem:[%s20570_s7 + $0x10] sm:$0xff] }
 0x704   : > { %v7162_v61 = vmax.f32 %v7102_v40, %v7137_v23  ;;  %v6852_v1 = vpop.f32.mrb[20].mxu1  ;;  %v7197_v56 = vsel %vm1430_vm4, %v7194_v32, %v7196_v0  ;;  %v7235_v32 = vld [vmem:[%s20569_s6 + $0x18] sm:$0xff]  ;;  %v7369_v23 = vld [vmem:[%s20570_s7 + $0x28] sm:$0xff] }
 0x705   : > { %v7138_v19 = vrot.slane %v7104_v52, 1  ;;  %v7092_v58 = vadd.f32 %v19683_v7, %v7072_v9  ;;  %v6868_v54 = vadd.f32 %v6852_v1, %v19677_v48  ;;  %v13012_v15 = vpop.f32.mrb[21].mxu1  ;;  %v7225_v62 = vmax.f32 %v7159_v41, %v7197_v56  ;;  %v7370_v9 = vld [vmem:[%s20570_s7 + $0x30] sm:$0xff]  ;;  %v10384_v56 = vld [vmem:[%s20570_s7 + $0xc0] sm:$0xff] }
 0x706   : > { %v7198_v49 = vrot.slane %v7162_v61, 2  ;;  %v10387_v15 = vld [vmem:[%s20570_s7 + $0xd8] sm:$0xff] }
 0x707   : > { %v7139_v37 = vsel %vm634_vm2, %v7136_v13, %v7138_v19  ;;  %v7105_v5 = vmax.f32 %v7092_v58, 0.0  ;;  %v7073_v43 = vadd.f32 %v19673_v24, %v6868_v54  ;;  %v13762_v16 = vpack.c.bf16 %v7225_v62, %v7224_v42  ;;  %v7365_v13 = vld [vmem:[%s20570_s7 + $0x8] sm:$0xff]  ;;  %v10386_v54 = vld [vmem:[%s20570_s7 + $0xd0] sm:$0xff] }
 0x708   : > { %v7163_v25 = vmax.f32 %v7103_v22, %v7139_v37  ;;  %v7199_v20 = vsel %vm1430_vm4, %v7196_v0, %v7198_v49  ;;  %v7237_v22 = vld [vmem:[%s20569_s6 + $0x28] sm:$0xff]  ;;  %v13787_v30 = vpack.c.bf16 %v7365_v13, %v7364_v21  ;;  %v13790_v42 = vpack.c.bf16 %v7367_v29, %v7366_v18  ;;  %v7368_v0 = vld [vmem:[%s20570_s7 + $0x20] sm:$0xff] }
 0x709   : > { %v7140_v50 = vrot.slane %v7105_v5, 1  ;;  %v7093_v2 = vadd.f32 %v19683_v7, %v7073_v43  ;;  %13763 = vmatpush3.bf16.msra.mxu1 %v13762_v16  ;;  %v7226_v8 = vmax.f32 %v7160_v12, %v7199_v20  ;;  %v10372_v37 = vld [vmem:[%s20570_s7 + $0x88] sm:$0xff]  ;;  %v13814_v43 = vpack.c.bf16 %v10387_v15, %v10386_v54  ;;  %v10374_v20 = vld [vmem:[%s20570_s7 + $0x98] sm:$0xff]  ;;  %v10410_v15 = vld [vmem:[%s20570_s7 + $0x140] sm:$0xff] }
 0x70a   : > { %v7200_v59 = vrot.slane %v7163_v25, 2  ;;  %13764 = vmatprep.subr.bf16.mxu1 %v14348_v31 }
 0x70b   : > { %v7141_v48 = vsel %vm634_vm2, %v7138_v19, %v7140_v50  ;;  %v7106_v35 = vmax.f32 %v7093_v2, 0.0  ;;  %v7165_v3 = vmax.f32 %v7105_v5, %v7140_v50  ;;  %v10385_v19 = vld [vmem:[%s20570_s7 + $0xc8] sm:$0xff] }
 0x70c   : > { %v7164_v10 = vmax.f32 %v7104_v52, %v7141_v48  ;;  %v7201_v53 = vsel %vm1430_vm4, %v7198_v49, %v7200_v59  ;;  %v13793_v52 = vpack.c.bf16 %v7369_v23, %v7368_v0  ;;  %v13811_v58 = vpack.c.bf16 %v10385_v19, %v10384_v56  ;;  %v10371_v49 = vld [vmem:[%s20570_s7 + $0x80] sm:$0xff]  ;;  %v10389_v2 = vld [vmem:[%s20570_s7 + $0xe8] sm:$0xff] }
 0x70d   : > { %v7167_v41 = vrot.slane %v7106_v35, 1  ;;  %v7227_v24 = vmax.f32 %v7161_v14, %v7201_v53  ;;  %v10360_v14 = vld [vmem:[%s20570_s7 + $0x78] sm:$0xff]  ;;  %v13799_v16 = vpack.c.bf16 %v10372_v37, %v10371_v49  ;;  %v19878_v53 = vld [vmem:[%s20570_s7 + $0xa0] sm:$0xff] }
 0x70e   : > { %v7202_v55 = vrot.slane %v7164_v10, 2  ;;  %v13784_v44 = vpack.c.bf16 %v10360_v14, %v10359_v57  ;;  %v10377_v14 = vld [vmem:[%s20570_s7 + $0xb0] sm:$0xff] }
 0x70f   : > { %v7168_v60 = vsel %vm634_vm2, %v7140_v50, %v7167_v41  ;;  %v7172_v47 = vmax.f32 %v7106_v35, %v7167_v41  ;;  %v13765_v46 = vpack.c.bf16 %v7227_v24, %v7226_v8  ;;  %v10388_v50 = vld [vmem:[%s20570_s7 + $0xe0] sm:$0xff] }
 0x710   : > { %v7171_v28 = vmax.f32 %v7105_v5, %v7168_v60  ;;  %v7203_v7 = vsel %vm1430_vm4, %v7200_v59, %v7202_v55  ;;  %13785 = vmatpush3.bf16.msra.mxu0 %v13784_v44  ;;  %v10378_v44 = vld [vmem:[%s20570_s7 + $0xb8] sm:$0xff] }
 0x711   : > { %v7206_v36 = vrot.slane %v7172_v47, 2  ;;  %13766 = vmatpush3.bf16.msra.mxu1 %v13765_v46  ;;  %v7228_v17 = vmax.f32 %v7162_v61, %v7203_v7  ;;  %13798 = vmatprep.subr.bf16.mxu0 %v14348_v31  ;;  %v7371_v61 = vld [vmem:[%s20570_s7 + $0x38] sm:$0xff]  ;;  %v19887_v46 = vld [vmem:[%s20570_s7 + $0xa8] sm:$0xff] }
 0x712   : > { %v7204_v27 = vrot.slane %v7171_v28, 2  ;;  %13767 = vmatprep.subr.bf16.mxu1 %v14348_v31  ;;  %v13796_v1 = vpack.c.bf16 %v7371_v61, %v7370_v9  ;;  %v13817_v28 = vpack.c.bf16 %v10389_v2, %v10388_v50 }
 0x713   : > { %v7231_v40 = vmax.f32 %v7165_v3, %v7206_v36 }
 0x714   : > { %v7207_v39 = vsel %vm1430_vm4, %v7204_v27, %v7206_v36  ;;  %v7205_v12 = vsel %vm1430_vm4, %v7202_v55, %v7204_v27  ;;  %v10390_v36 = vld [vmem:[%s20570_s7 + $0xf0] sm:$0xff] }
 0x715   : > { %v7230_v51 = vmax.f32 %v7164_v10, %v7207_v39  ;;  %v7229_v33 = vmax.f32 %v7163_v25, %v7205_v12  ;;  %v10373_v25 = vld [vmem:[%s20570_s7 + $0x90] sm:$0xff] }
 0x717   : > { %v13771_v6 = vpack.c.bf16 %v7231_v40, %v7230_v51  ;;  %v13768_v11 = vpack.c.bf16 %v7229_v33, %v7228_v17  ;;  %v10391_v17 = vld [vmem:[%s20570_s7 + $0xf8] sm:$0xff]  ;;  %v13802_v51 = vpack.c.bf16 %v10374_v20, %v10373_v25  ;;  %v13805_v33 = vpack.c.bf16 %v19887_v46, %v19878_v53 }
 0x719   : > { %13769 = vmatpush3.bf16.msra.mxu1 %v13768_v11 }
 0x71a   : > { %13770 = vmatprep.subr.bf16.mxu1 %v14348_v31 }
 0x71d   : > { %13773 = vmatpush3.bf16.msk.msra.mxu1 %vm13772_vm12, %v13771_v6 }
 0x71e   : > { %13786 = vmatprep.subr.bf16.mxu1 %v14348_v31 }
 0x720   : > { %13093 = vmatmul.mubr.msk.f32.vlgmr.msra.gmra.mrb[22].mxu1 %vm7239_vm13, %v7232_v34 }
 0x721   : > { %13095 = vmatprep.mubr.msk.f32.mxu1 %vm14347_vm0, %v20660_v26  ;;  %13788 = vmatpush3.bf16.msra.mxu1 %v13787_v30 }
 0x722   : > { %13789 = vmatprep.subr.bf16.mxu1 %v14348_v31 }
 0x724   : > { %13096 = vmatmul.mubr.msk.f32.gmra.mrb[24].mxu1 %vm7239_vm13, %v7233_v38 }
 0x725   : > { %13098 = vmatprep.mubr.msk.f32.mxu1 %vm14347_vm0, %v20660_v26  ;;  %13791 = vmatpush3.bf16.msra.mxu1 %v13790_v42 }
 0x726   : > { %13792 = vmatprep.subr.bf16.mxu1 %v14348_v31 }
 0x728   : > { %13099 = vmatmul.mubr.msk.f32.gmra.mrb[26].mxu1 %vm7239_vm13, %v7234_v63 }
 0x729   : > { %13101 = vmatprep.mubr.msk.f32.mxu1 %vm14347_vm0, %v20660_v26  ;;  %13794 = vmatpush3.bf16.msra.mxu1 %v13793_v52 }
 0x72a   : > { %13795 = vmatprep.subr.bf16.mxu1 %v14348_v31 }
 0x72c   : > { %13102 = vmatmul.mubr.msk.f32.gmra.mrb[28].mxu1 %vm7239_vm13, %v7235_v32 }
 0x72d   : > { %13104 = vmatprep.mubr.msk.f32.mxu1 %vm14347_vm0, %v20660_v26  ;;  %13797 = vmatpush3.bf16.msra.mxu1 %v13796_v1  ;;  %v13808_v1 = vpack.c.bf16 %v10378_v44, %v10377_v14 }
 0x72e   : > { %13810 = vmatprep.subr.bf16.mxu1 %v14348_v31 }
 0x730   : > { %13105 = vmatmul.mubr.msk.f32.gmra.mrb[30].mxu1 %vm7239_vm13, %v7236_v4  ;;  %v13820_v4 = vpack.c.bf16 %v10391_v17, %v10390_v36 }
 0x731   : > { %13107 = vmatprep.mubr.msk.f32.mxu1 %vm14347_vm0, %v20660_v26 }
 0x734   : > { %13108 = vmatmul.mubr.msk.f32.gmra.mrb[32].mxu1 %vm7239_vm13, %v7237_v22 }
 0x735   : > { %13110 = vmatprep.mubr.msk.f32.mxu1 %vm14347_vm0, %v20660_v26 }
 0x738   : > { %13111 = vmatmul.mubr.msk.f32.gmra.mrb[34].mxu1 %vm7239_vm13, %v7238_v45 }
 0x739   : > { %13160 = vmatprep.mubr.msk.f32.mxu1 %vm14347_vm0, %v20660_v26 }
 0x7f3   : > { %v7330_v62 = vpop.f32.mrb[22].mxu1 }
 0x7f4   : > { %v13094_v5 = vpop.f32.mrb[23].mxu1  ;;  %13161 = vmatmul.mubr.msk.f32.vlgmr.msra.gmra.mrb[36].mxu1 %vm5423_vm10, %v7330_v62  ;;  %v7386_v8 = vrot.slane %v7330_v62, 1  ;;  %v7604_v59 = vrot.slane %v7330_v62, 2  ;;  %v7728_v48 = vrot.slane %v7330_v62, 6  ;;  %v7853_v35 = vrot.slane %v7330_v62, 7  ;;  %v10411_v62 = vld [vmem:[%s20570_s7 + $0x148] sm:$0xff] }
 0x7f5   : > { %13163 = vmatprep.mubr.msk.f32.mxu1 %vm14347_vm0, %v20660_v26  ;;  %13812 = vmatpush3.bf16.msra.mxu1 %v13811_v58 }
 0x7f6   : > { %13813 = vmatprep.subr.bf16.mxu1 %v14348_v31 }
 0x7f7   : > { %v19873_v10 = vpop.f32.mrb[24].mxu1 }
 0x7f8   : > { %v7387_v41 = vrot.slane %v19873_v10, 1  ;;  %v7605_v24 = vrot.slane %v19873_v10, 2  ;;  %v7729_v55 = vrot.slane %v19873_v10, 6  ;;  %v7854_v60 = vrot.slane %v19873_v10, 7  ;;  %v13097_v47 = vpop.f32.mrb[25].mxu1  ;;  %13164 = vmatmul.mubr.msk.f32.gmra.mrb[38].mxu1 %vm5423_vm10, %v19873_v10 }
 0x7f9   : > { %13166 = vmatprep.mubr.msk.f32.mxu1 %vm14347_vm0, %v20660_v26  ;;  %13815 = vmatpush3.bf16.msra.mxu1 %v13814_v43  ;;  %v8084_v39 = vrot.slane %v19873_v10, 4  ;;  %v8208_v32 = vrot.slane %v19873_v10, 5 }
 0x7fa   : > { %v7388_v7 = vsel %vm634_vm2, %v7386_v8, %v7387_v41  ;;  %v19895_v3 = vsel %vm1430_vm4, %v7604_v59, %v7605_v24  ;;  %13816 = vmatprep.subr.bf16.mxu1 %v14348_v31  ;;  %v19905_v27 = vsel %vm4008_vm7, %v7728_v48, %v7729_v55  ;;  %v19908_v40 = vsel %vm5074_vm8, %v7853_v35, %v7854_v60 }
 0x7fb   : > { %v19911_v12 = vpop.f32.mrb[26].mxu1  ;;  %13130 = vmatmul.mubr.msk.f32.vlgmr.msra.gmra.mrb[230].mxu0 %vm5423_vm10, %v7388_v7  ;;  %v13835_v59 = vpack.c.bf16 %v10411_v62, %v10410_v15  ;;  %v10402_v15 = vld [vmem:[%s20570_s7 + $0x128] sm:$0xff] }
 0x7fc   : > { %v8085_v6 = vrot.slane %v19911_v12, 4  ;;  %v8209_v11 = vrot.slane %v19911_v12, 5  ;;  %v13100_v34 = vpop.f32.mrb[27].mxu1  ;;  %13132 = vmatprep.mubr.msk.f32.mxu0 %vm14347_vm0, %v20660_v26  ;;  %v7389_v38 = vrot.slane %v19911_v12, 1  ;;  %13800 = vmatpush3.bf16.msra.mxu0 %v13799_v16  ;;  %v7607_v63 = vrot.slane %v19911_v12, 2 }
 0x7fd   : > { %13801 = vmatprep.subr.bf16.mxu0 %v14348_v31  ;;  %13167 = vmatmul.mubr.msk.f32.gmra.mrb[40].mxu1 %vm5423_vm10, %v19911_v12  ;;  %v7731_v22 = vrot.slane %v19911_v12, 6  ;;  %v7856_v45 = vrot.slane %v19911_v12, 7 }
 0x7fe   : > { %v7390_v57 = vsel %vm634_vm2, %v7387_v41, %v7389_v38  ;;  %v19936_v21 = vsel %vm1430_vm4, %v7605_v24, %v7607_v63  ;;  %13169 = vmatprep.mubr.msk.f32.mxu1 %vm14347_vm0, %v20660_v26  ;;  %13818 = vmatpush3.bf16.msra.mxu1 %v13817_v28  ;;  %v19941_v13 = vsel %vm2718_vm6, %v8084_v39, %v8085_v6  ;;  %v10412_v24 = vld [vmem:[%s20570_s7 + $0x150] sm:$0xff] }
 0x7ff   : > { %v19943_v30 = vpop.f32.mrb[28].mxu1  ;;  %13133 = vmatmul.mubr.msk.f32.gmra.mrb[232].mxu0 %vm5423_vm10, %v7390_v57  ;;  %13819 = vmatprep.subr.bf16.mxu1 %v14348_v31  ;;  %v19948_v18 = vsel %vm4008_vm7, %v7729_v55, %v7731_v22  ;;  %v19951_v29 = vsel %vm5074_vm8, %v7854_v60, %v7856_v45  ;;  %v19954_v42 = vsel %vm799_vm1, %v8208_v32, %v8209_v11  ;;  %v10413_v55 = vld [vmem:[%s20570_s7 + $0x158] sm:$0xff] }
 0x800   : > { %v13103_v0 = vpop.f32.mrb[29].mxu1  ;;  %13135 = vmatprep.mubr.msk.f32.mxu0 %vm14347_vm0, %v20660_v26  ;;  %v7391_v23 = vrot.slane %v19943_v30, 1  ;;  %13803 = vmatpush3.bf16.msra.mxu0 %v13802_v51  ;;  %v7609_v52 = vrot.slane %v19943_v30, 2  ;;  %v7733_v9 = vrot.slane %v19943_v30, 6  ;;  %v7858_v61 = vrot.slane %v19943_v30, 7 }
 0x801   : > { %13804 = vmatprep.subr.bf16.mxu0 %v14348_v31  ;;  %13170 = vmatmul.mubr.msk.f32.gmra.mrb[42].mxu1 %vm5423_vm10, %v19943_v30  ;;  %v8087_v56 = vrot.slane %v19943_v30, 4  ;;  %v8211_v19 = vrot.slane %v19943_v30, 5  ;;  %v13838_v34 = vpack.c.bf16 %v10413_v55, %v10412_v24  ;;  %v10440_v55 = vld [vmem:[%s20570_s7 + $0x1e0] sm:$0xff] }
 0x802   : > { %v7392_v58 = vsel %vm634_vm2, %v7389_v38, %v7391_v23  ;;  %v19969_v54 = vsel %vm1430_vm4, %v7607_v63, %v7609_v52  ;;  %13172 = vmatprep.mubr.msk.f32.mxu1 %vm14347_vm0, %v20660_v26  ;;  %13821 = vmatpush3.bf16.msra.mxu1 %v13820_v4  ;;  %v19980_v49 = vsel %vm4008_vm7, %v7731_v22, %v7733_v9  ;;  %v10415_v4 = vld [vmem:[%s20570_s7 + $0x168] sm:$0xff] }
 0x803   : > { %v19982_v37 = vpop.f32.mrb[30].mxu1  ;;  %13136 = vmatmul.mubr.msk.f32.gmra.mrb[234].mxu0 %vm5423_vm10, %v7392_v58  ;;  %13834 = vmatprep.subr.bf16.mxu1 %v14348_v31  ;;  %v19987_v5 = vsel %vm5074_vm8, %v7856_v45, %v7858_v61  ;;  %v19990_v43 = vsel %vm2718_vm6, %v8085_v6, %v8087_v56  ;;  %v19993_v16 = vsel %vm799_vm1, %v8209_v11, %v8211_v19  ;;  %v10397_v6 = vld [vmem:[%s20570_s7 + $0x100] sm:$0xff]  ;;  %v10398_v11 = vld [vmem:[%s20570_s7 + $0x108] sm:$0xff] }
 0x804   : > { %13138 = vmatprep.mubr.msk.f32.mxu0 %vm14347_vm0, %v20660_v26  ;;  %v7393_v25 = vrot.slane %v19982_v37, 1  ;;  %13806 = vmatpush3.bf16.msra.mxu0 %v13805_v33  ;;  %v7611_v20 = vrot.slane %v19982_v37, 2  ;;  %v13106_v50 = vpop.f32.mrb[31].mxu1  ;;  %v7735_v2 = vrot.slane %v19982_v37, 6  ;;  %v7860_v8 = vrot.slane %v19982_v37, 7 }
 0x805   : > { %13807 = vmatprep.subr.bf16.mxu0 %v14348_v31  ;;  %13173 = vmatmul.mubr.msk.f32.gmra.mrb[44].mxu1 %vm5423_vm10, %v19982_v37  ;;  %v8089_v48 = vrot.slane %v19982_v37, 4  ;;  %v8213_v35 = vrot.slane %v19982_v37, 5  ;;  %v13823_v57 = vpack.c.bf16 %v10398_v11, %v10397_v6  ;;  %v10403_v50 = vld [vmem:[%s20570_s7 + $0x130] sm:$0xff]  ;;  %v10443_v6 = vld [vmem:[%s20570_s7 + $0x1f8] sm:$0xff]  ;;  %v10428_v11 = vld [vmem:[%s20570_s7 + $0x1a8] sm:$0xff] }
 0x806   : > { %v7394_v53 = vsel %vm634_vm2, %v7391_v23, %v7393_v25  ;;  %v20010_v41 = vsel %vm1430_vm4, %v7609_v52, %v7611_v20  ;;  %13222 = vmatprep.mubr.msk.f32.mxu1 %vm14347_vm0, %v20660_v26  ;;  %v20021_v60 = vsel %vm4008_vm7, %v7733_v9, %v7735_v2  ;;  %v20024_v47 = vsel %vm5074_vm8, %v7858_v61, %v7860_v8  ;;  %v10399_v23 = vld [vmem:[%s20570_s7 + $0x110] sm:$0xff]  ;;  %v10400_v52 = vld [vmem:[%s20570_s7 + $0x118] sm:$0xff] }
 0x807   : > { %13139 = vmatmul.mubr.msk.f32.gmra.mrb[236].mxu0 %vm5423_vm10, %v7394_v53  ;;  %v20027_v46 = vpop.f32.mrb[32].mxu1  ;;  %v20030_v28 = vsel %vm2718_vm6, %v8087_v56, %v8089_v48  ;;  %v20033_v7 = vsel %vm799_vm1, %v8211_v19, %v8213_v35  ;;  %v10416_v56 = vld [vmem:[%s20570_s7 + $0x170] sm:$0xff]  ;;  %v10417_v19 = vld [vmem:[%s20570_s7 + $0x178] sm:$0xff]  ;;  %v13826_v58 = vpack.c.bf16 %v10400_v52, %v10399_v23  ;;  %v10423_v53 = vld [vmem:[%s20570_s7 + $0x180] sm:$0xff] }
 0x808   : > { %13141 = vmatprep.mubr.msk.f32.mxu0 %vm14347_vm0, %v20660_v26  ;;  %13809 = vmatpush3.bf16.msra.mxu0 %v13808_v1  ;;  %v7737_v36 = vrot.slane %v20027_v46, 6  ;;  %v7862_v17 = vrot.slane %v20027_v46, 7  ;;  %v8091_v39 = vrot.slane %v20027_v46, 4  ;;  %v8215_v51 = vrot.slane %v20027_v46, 5  ;;  %v13109_v33 = vpop.f32.mrb[33].mxu1  ;;  %v8616_v23 = vld [vmem:[#allocation2 + $0x68] sm:$0xff] }
 0x809   : > { %13822 = vmatprep.subr.bf16.mxu0 %v14348_v31  ;;  %13223 = vmatmul.mubr.msk.f32.vlgmr.msra.gmra.mrb[46].mxu1 %vm5423_vm10, %v19905_v27  ;;  %v10414_v27 = vld [vmem:[%s20570_s7 + $0x160] sm:$0xff]  ;;  %v13844_v62 = vpack.c.bf16 %v10417_v19, %v10416_v56  ;;  %v10442_v33 = vld [vmem:[%s20570_s7 + $0x1f0] sm:$0xff] }
 0x80a   : > { %13225 = vmatprep.mubr.msk.f32.mxu1 %vm14347_vm0, %v20660_v26  ;;  %13836 = vmatpush3.bf16.msra.mxu1 %v13835_v59  ;;  %v20053_v38 = vsel %vm4008_vm7, %v7735_v2, %v7737_v36  ;;  %v20056_v63 = vsel %vm5074_vm8, %v7860_v8, %v7862_v17  ;;  %v20061_v32 = vsel %vm2718_vm6, %v8089_v48, %v8091_v39  ;;  %v10404_v2 = vld [vmem:[%s20570_s7 + $0x138] sm:$0xff]  ;;  %v10437_v8 = vld [vmem:[%s20570_s7 + $0x1c8] sm:$0xff]  ;;  %v10438_v48 = vld [vmem:[%s20570_s7 + $0x1d0] sm:$0xff] }
 0x80b   : > { %13142 = vmatmul.mubr.msk.f32.gmra.mrb[238].mxu0 %vm5423_vm10, %v7393_v25  ;;  %13837 = vmatprep.subr.bf16.mxu1 %v14348_v31  ;;  %v7360_v22 = vpop.f32.mrb[34].mxu1  ;;  %v20072_v45 = vsel %vm799_vm1, %v8213_v35, %v8215_v51  ;;  %v13841_v9 = vpack.c.bf16 %v10415_v4, %v10414_v27  ;;  %v13832_v59 = vpack.c.bf16 %v10404_v2, %v10403_v50  ;;  %v10439_v35 = vld [vmem:[%s20570_s7 + $0x1d8] sm:$0xff]  ;;  %v10425_v17 = vld [vmem:[%s20570_s7 + $0x190] sm:$0xff] }
 0x80c   : > { %13191 = vmatprep.mubr.msk.f32.mxu0 %vm14347_vm0, %v20660_v26  ;;  %v8217_v14 = vrot.slane %v7360_v22, 5  ;;  %v8333_v44 = vrot.slane %v7360_v22, 6  ;;  %v13112_v0 = vpop.f32.mrb[35].mxu1  ;;  %v13862_v24 = vpack.c.bf16 %v10439_v35, %v10438_v48  ;;  %v10430_v4 = vld [vmem:[%s20570_s7 + $0x1b8] sm:$0xff]  ;;  %v10451_v22 = vld [vmem:[%s20570_s7 + $0x210] sm:$0xff] }
 0x80d   : > { %13226 = vmatmul.mubr.msk.f32.gmra.mrb[48].mxu1 %vm5423_vm10, %v19948_v18  ;;  %v8615_v0 = vld [vmem:[#allocation2 + $0x60] sm:$0xff] }
 0x80e   : > { %13228 = vmatprep.mubr.msk.f32.mxu1 %vm14347_vm0, %v20660_v26  ;;  %13839 = vmatpush3.bf16.msra.mxu1 %v13838_v34  ;;  %v20087_v61 = vsel %vm799_vm1, %v8215_v51, %v8217_v14  ;;  %v20090_v1 = vsel %vm4008_vm7, %v7737_v36, %v8333_v44  ;;  %v10441_v36 = vld [vmem:[%s20570_s7 + $0x1e8] sm:$0xff]  ;;  %v13868_v34 = vpack.c.bf16 %v10443_v6, %v10442_v33  ;;  %v10455_v14 = vld [vmem:[%s20570_s7 + $0x230] sm:$0xff] }
 0x80f   : > { %13192 = vmatmul.mubr.msk.f32.vlgmr.msra.gmra.mrb[240].mxu0 %vm5423_vm10, %v19895_v3  ;;  %13840 = vmatprep.subr.bf16.mxu1 %v14348_v31  ;;  %v10401_v3 = vld [vmem:[%s20570_s7 + $0x120] sm:$0xff]  ;;  %v13865_v51 = vpack.c.bf16 %v10441_v36, %v10440_v55 }
 0x810   : > { %13194 = vmatprep.mubr.msk.f32.mxu0 %vm14347_vm0, %v20660_v26  ;;  %13824 = vmatpush3.bf16.msra.mxu0 %v13823_v57  ;;  %v13829_v25 = vpack.c.bf16 %v10402_v15, %v10401_v3  ;;  %v10452_v57 = vld [vmem:[%s20570_s7 + $0x218] sm:$0xff] }
 0x811   : > { %13825 = vmatprep.subr.bf16.mxu0 %v14348_v31  ;;  %13229 = vmatmul.mubr.msk.f32.gmra.mrb[50].mxu1 %vm5423_vm10, %v19980_v49 }
 0x812   : > { %13231 = vmatprep.mubr.msk.f32.mxu1 %vm14347_vm0, %v20660_v26  ;;  %13842 = vmatpush3.bf16.msra.mxu1 %v13841_v9 }
 0x813   : > { %13195 = vmatmul.mubr.msk.f32.gmra.mrb[242].mxu0 %vm5423_vm10, %v19936_v21  ;;  %13843 = vmatprep.subr.bf16.mxu1 %v14348_v31  ;;  %v10436_v21 = vld [vmem:[%s20570_s7 + $0x1c0] sm:$0xff] }
 0x814   : > { %13197 = vmatprep.mubr.msk.f32.mxu0 %vm14347_vm0, %v20660_v26  ;;  %13827 = vmatpush3.bf16.msra.mxu0 %v13826_v58 }
 0x815   : > { %13828 = vmatprep.subr.bf16.mxu0 %v14348_v31  ;;  %13232 = vmatmul.mubr.msk.f32.gmra.mrb[52].mxu1 %vm5423_vm10, %v20021_v60 }
 0x816   : > { %13234 = vmatprep.mubr.msk.f32.mxu1 %vm14347_vm0, %v20660_v26  ;;  %13845 = vmatpush3.bf16.msra.mxu1 %v13844_v62 }
 0x817   : > { %13198 = vmatmul.mubr.msk.f32.gmra.mrb[244].mxu0 %vm5423_vm10, %v19969_v54  ;;  %13858 = vmatprep.subr.bf16.mxu1 %v14348_v31  ;;  %v13859_v54 = vpack.c.bf16 %v10437_v8, %v10436_v21 }
 0x818   : > { %13200 = vmatprep.mubr.msk.f32.mxu0 %vm14347_vm0, %v20660_v26  ;;  %13830 = vmatpush3.bf16.msra.mxu0 %v13829_v25 }
 0x819   : > { %13831 = vmatprep.subr.bf16.mxu0 %v14348_v31  ;;  %13235 = vmatmul.mubr.msk.f32.gmra.mrb[54].mxu1 %vm5423_vm10, %v20053_v38 }
 0x81a   : > { %13284 = vmatprep.mubr.msk.f32.mxu1 %vm14347_vm0, %v20660_v26 }
 0x81b   : > { %13201 = vmatmul.mubr.msk.f32.gmra.mrb[246].mxu0 %vm5423_vm10, %v20010_v41  ;;  %v10424_v41 = vld [vmem:[%s20570_s7 + $0x188] sm:$0xff] }
 0x81c   : > { %13203 = vmatprep.mubr.msk.f32.mxu0 %vm14347_vm0, %v20660_v26  ;;  %13833 = vmatpush3.bf16.msra.mxu0 %v13832_v59 }
 0x81d   : > { %13846 = vmatprep.subr.bf16.mxu0 %v14348_v31  ;;  %13285 = vmatmul.mubr.msk.f32.vlgmr.msra.gmra.mrb[56].mxu1 %vm5423_vm10, %v19873_v10  ;;  %v13847_v10 = vpack.c.bf16 %v10424_v41, %v10423_v53 }
 0x81e   : > { %13287 = vmatprep.mubr.msk.f32.mxu1 %vm14347_vm0, %v20660_v26  ;;  %13860 = vmatpush3.bf16.msra.mxu1 %v13859_v54 }
 0x81f   : > { %13204 = vmatmul.mubr.msk.f32.gmra.mrb[248].mxu0 %vm5423_vm10, %v7611_v20  ;;  %13861 = vmatprep.subr.bf16.mxu1 %v14348_v31  ;;  %v10426_v20 = vld [vmem:[%s20570_s7 + $0x198] sm:$0xff] }
 0x820   : > { %13253 = vmatprep.mubr.msk.f32.mxu0 %vm14347_vm0, %v20660_v26 }
 0x821   : > { %13288 = vmatmul.mubr.msk.f32.gmra.mrb[58].mxu1 %vm5423_vm10, %v19911_v12  ;;  %v13850_v12 = vpack.c.bf16 %v10426_v20, %v10425_v17 }
 0x822   : > { %13290 = vmatprep.mubr.msk.f32.mxu1 %vm14347_vm0, %v20660_v26  ;;  %13863 = vmatpush3.bf16.msra.mxu1 %v13862_v24 }
 0x823   : > { %13254 = vmatmul.mubr.msk.f32.vlgmr.msra.gmra.mrb[250].mxu0 %vm5423_vm10, %v19908_v40  ;;  %13864 = vmatprep.subr.bf16.mxu1 %v14348_v31  ;;  %v10427_v40 = vld [vmem:[%s20570_s7 + $0x1a0] sm:$0xff] }
 0x824   : > { %13256 = vmatprep.mubr.msk.f32.mxu0 %vm14347_vm0, %v20660_v26  ;;  %13848 = vmatpush3.bf16.msra.mxu0 %v13847_v10  ;;  %v13853_v27 = vpack.c.bf16 %v10428_v11, %v10427_v40 }
 0x825   : > { %13849 = vmatprep.subr.bf16.mxu0 %v14348_v31  ;;  %13291 = vmatmul.mubr.msk.f32.gmra.mrb[60].mxu1 %vm5423_vm10, %v19943_v30  ;;  %v10429_v30 = vld [vmem:[%s20570_s7 + $0x1b0] sm:$0xff] }
 0x826   : > { %13293 = vmatprep.mubr.msk.f32.mxu1 %vm14347_vm0, %v20660_v26  ;;  %13866 = vmatpush3.bf16.msra.mxu1 %v13865_v51 }
 0x827   : > { %13257 = vmatmul.mubr.msk.f32.gmra.mrb[252].mxu0 %vm5423_vm10, %v19951_v29  ;;  %13867 = vmatprep.subr.bf16.mxu1 %v14348_v31  ;;  %v13856_v29 = vpack.c.bf16 %v10430_v4, %v10429_v30 }
 0x828   : > { %13259 = vmatprep.mubr.msk.f32.mxu0 %vm14347_vm0, %v20660_v26  ;;  %13851 = vmatpush3.bf16.msra.mxu0 %v13850_v12 }
 0x829   : > { %13852 = vmatprep.subr.bf16.mxu0 %v14348_v31  ;;  %13294 = vmatmul.mubr.msk.f32.gmra.mrb[62].mxu1 %vm5423_vm10, %v19982_v37  ;;  %v10449_v37 = vld [vmem:[%s20570_s7 + $0x200] sm:$0xff] }
 0x82a   : > { %13296 = vmatprep.mubr.msk.f32.mxu1 %vm14347_vm0, %v20660_v26  ;;  %13869 = vmatpush3.bf16.msra.mxu1 %v13868_v34 }
 0x82b   : > { %13260 = vmatmul.mubr.msk.f32.gmra.mrb[254].mxu0 %vm5423_vm10, %v19987_v5  ;;  %v10450_v5 = vld [vmem:[%s20570_s7 + $0x208] sm:$0xff] }
 0x82c   : > { %13262 = vmatprep.mubr.msk.f32.mxu0 %vm14347_vm0, %v20660_v26  ;;  %13854 = vmatpush3.bf16.msra.mxu0 %v13853_v27 }
 0x82d   : > { %13855 = vmatprep.subr.bf16.mxu0 %v14348_v31  ;;  %13297 = vmatmul.mubr.msk.f32.gmra.mrb[64].mxu1 %vm5423_vm10, %v20027_v46  ;;  %v8611_v46 = vld [vmem:[#allocation2 + $0x40] sm:$0xff] }
 0x82e   : > { %13346 = vmatprep.mubr.msk.f32.mxu1 %vm14347_vm0, %v20660_v26 }
 0x82f   : > { %13263 = vmatmul.mubr.msk.f32.gmra.mrb[0].mxu0 %vm5423_vm10, %v20024_v47  ;;  %v13871_v47 = vpack.c.bf16 %v10450_v5, %v10449_v37 }
 0x830   : > { %13265 = vmatprep.mubr.msk.f32.mxu0 %vm14347_vm0, %v20660_v26  ;;  %13857 = vmatpush3.bf16.msra.mxu0 %v13856_v29 }
 0x831   : > { %13870 = vmatprep.subr.bf16.mxu0 %v14348_v31  ;;  %13347 = vmatmul.mubr.msk.f32.vlgmr.msra.gmra.mrb[66].mxu1 %vm5423_vm10, %v19954_v42  ;;  %v13874_v42 = vpack.c.bf16 %v10452_v57, %v10451_v22 }
 0x832   : > { %13349 = vmatprep.mubr.msk.f32.mxu1 %vm14347_vm0, %v20660_v26 }
 0x833   : > { %13266 = vmatmul.mubr.msk.f32.gmra.mrb[2].mxu0 %vm5423_vm10, %v20056_v63  ;;  %v10453_v63 = vld [vmem:[%s20570_s7 + $0x220] sm:$0xff] }
 0x834   : > { %13315 = vmatprep.mubr.msk.f32.mxu0 %vm14347_vm0, %v20660_v26 }
 0x835   : > { %13350 = vmatmul.mubr.msk.f32.gmra.mrb[68].mxu1 %vm5423_vm10, %v19993_v16  ;;  %v10454_v16 = vld [vmem:[%s20570_s7 + $0x228] sm:$0xff] }
 0x836   : > { %13352 = vmatprep.mubr.msk.f32.mxu1 %vm14347_vm0, %v20660_v26 }
 0x837   : > { %13316 = vmatmul.mubr.msk.f32.vlgmr.msra.gmra.mrb[4].mxu0 %vm5423_vm10, %v19941_v13  ;;  %v13877_v13 = vpack.c.bf16 %v10454_v16, %v10453_v63 }
 0x838   : > { %13318 = vmatprep.mubr.msk.f32.mxu0 %vm14347_vm0, %v20660_v26  ;;  %13872 = vmatpush3.bf16.msra.mxu0 %v13871_v47 }
 0x839   : > { %13873 = vmatprep.subr.bf16.mxu0 %v14348_v31  ;;  %13353 = vmatmul.mubr.msk.f32.gmra.mrb[70].mxu1 %vm5423_vm10, %v20033_v7  ;;  %v10456_v7 = vld [vmem:[%s20570_s7 + $0x238] sm:$0xff] }
 0x83a   : > { %13355 = vmatprep.mubr.msk.f32.mxu1 %vm14347_vm0, %v20660_v26 }
 0x83b   : > { %13319 = vmatmul.mubr.msk.f32.gmra.mrb[6].mxu0 %vm5423_vm10, %v19990_v43  ;;  %v13880_v43 = vpack.c.bf16 %v10456_v7, %v10455_v14 }
 0x83c   : > { %13321 = vmatprep.mubr.msk.f32.mxu0 %vm14347_vm0, %v20660_v26  ;;  %13875 = vmatpush3.bf16.msra.mxu0 %v13874_v42 }
 0x83d   : > { %13876 = vmatprep.subr.bf16.mxu0 %v14348_v31  ;;  %13356 = vmatmul.mubr.msk.f32.gmra.mrb[72].mxu1 %vm5423_vm10, %v20072_v45 }
 0x83e   : > { %13358 = vmatprep.mubr.msk.f32.mxu1 %vm14347_vm0, %v20660_v26 }
 0x83f   : > { %13322 = vmatmul.mubr.msk.f32.gmra.mrb[8].mxu0 %vm5423_vm10, %v20030_v28  ;;  %v8612_v28 = vld [vmem:[#allocation2 + $0x48] sm:$0xff] }
 0x840   : > { %13324 = vmatprep.mubr.msk.f32.mxu0 %vm14347_vm0, %v20660_v26  ;;  %13878 = vmatpush3.bf16.msra.mxu0 %v13877_v13 }
 0x841   : > { %13879 = vmatprep.subr.bf16.mxu0 %v14348_v31  ;;  %13359 = vmatmul.mubr.msk.f32.gmra.mrb[74].mxu1 %vm5423_vm10, %v20087_v61  ;;  %v13900_v61 = vpack.c.bf16 %v8616_v23, %v8615_v0 }
 0x843   : > { %13325 = vmatmul.mubr.msk.f32.gmra.mrb[10].mxu0 %vm5423_vm10, %v20061_v32  ;;  %v13892_v32 = vpack.c.bf16 %v8612_v28, %v8611_v46 }
 0x844   : > { %13327 = vmatprep.mubr.msk.f32.mxu0 %vm14347_vm0, %v20660_v26  ;;  %13881 = vmatpush3.bf16.msra.mxu0 %v13880_v43 }
 0x845   : > { %13893 = vmatprep.subr.bf16.mxu0 %v13892_v32 }
 0x847   : > { %13328 = vmatmul.mubr.msk.f32.gmra.mrb[12].mxu0 %vm5423_vm10, %v8091_v39  ;;  %v8613_v39 = vld [vmem:[#allocation2 + $0x50] sm:$0xff] }
 0x848   : > { %13377 = vmatprep.mubr.msk.f32.mxu0 %vm14347_vm0, %v20660_v26 }
 0x84b   : > { %13378 = vmatmul.mubr.msk.f32.vlgmr.msra.gmra.mrb[14].mxu0 %vm5423_vm10, %v19948_v18  ;;  %v8497_v18 = vld [vmem:[%s20572_s9] sm:$0xff] }
 0x84c   : > { %13380 = vmatprep.mubr.msk.f32.mxu0 %vm14347_vm0, %v20660_v26  ;;  %13400 = vmatprep.mubr.msk.f32.mxu1 %vm8501_vm14, %v8497_v18 }
 0x84d   : > { %13895 = vmatpush3.bf16.msra.mxu0 %v13892_v32 }
 0x84f   : > { %13381 = vmatmul.mubr.msk.f32.gmra.mrb[16].mxu0 %vm5423_vm10, %v19980_v49 }
 0x850   : > { %13383 = vmatprep.mubr.msk.f32.mxu0 %vm14347_vm0, %v20660_v26 }
 0x853   : > { %13384 = vmatmul.mubr.msk.f32.gmra.mrb[18].mxu0 %vm5423_vm10, %v20021_v60 }
 0x854   : > { %13386 = vmatprep.mubr.msk.f32.mxu0 %vm14347_vm0, %v20660_v26 }
 0x857   : > { %13387 = vmatmul.mubr.msk.f32.gmra.mrb[20].mxu0 %vm5423_vm10, %v20053_v38  ;;  %v8614_v38 = vld [vmem:[#allocation2 + $0x58] sm:$0xff] }
 0x858   : > { %13389 = vmatprep.mubr.msk.f32.mxu0 %vm14347_vm0, %v20660_v26  ;;  %v13896_v44 = vpack.c.bf16 %v8614_v38, %v8613_v39 }
 0x85a   : > { %13897 = vmatprep.subr.bf16.mxu0 %v13896_v44 }
 0x85b   : > { %13390 = vmatmul.mubr.msk.f32.gmra.mrb[22].mxu0 %vm5423_vm10, %v20090_v1 }
 0x85c   : > { %13899 = vmatpush3.bf16.msra.mxu0 %v13896_v44 }
 0x85d   : > { %13901 = vmatprep.subr.bf16.mxu0 %v13900_v61 }
 0x860   : > { %13903 = vmatpush3.bf16.msra.mxu0 %v13900_v61 }
 0x8c7   : > { %v7571_v49 = vpop.f32.mrb[36].mxu1 }
 0x8c8   : > { %v13162_v60 = vpop.f32.mrb[37].mxu1 }
 0x8cb   : > { %v7576_v45 = vpop.f32.mrb[38].mxu1 }
 0x8cc   : > { %v13165_v52 = vpop.f32.mrb[39].mxu1 }
 0x8ce   : > { %v7471_v9 = vpop.f32.mrb[230].mxu0 }
 0x8cf   : > { %v13131_v1 = vpop.f32.mrb[231].mxu0  ;;  %v7572_v56 = vadd.f32 %v7571_v49, %v7471_v9 }
 0x8d0   : > { %v7581_v19 = vpop.f32.mrb[40].mxu1 }
 0x8d1   : > { %v13168_v58 = vpop.f32.mrb[41].mxu1 }
 0x8d2   : > { %v7476_v3 = vpop.f32.mrb[232].mxu0 }
 0x8d3   : > { %v13134_v15 = vpop.f32.mrb[233].mxu0  ;;  %v7577_v62 = vadd.f32 %v7576_v45, %v7476_v3 }
 0x8d4   : > { %v7586_v25 = vpop.f32.mrb[42].mxu1 }
 0x8d5   : > { %v13171_v50 = vpop.f32.mrb[43].mxu1 }
 0x8d6   : > { %v7481_v2 = vpop.f32.mrb[234].mxu0 }
 0x8d7   : > { %v13137_v21 = vpop.f32.mrb[235].mxu0  ;;  %v7582_v8 = vadd.f32 %v7581_v19, %v7481_v2 }
 0x8d8   : > { %v7591_v59 = vpop.f32.mrb[44].mxu1 }
 0x8d9   : > { %v13174_v54 = vpop.f32.mrb[45].mxu1 }
 0x8da   : > { %v7486_v48 = vpop.f32.mrb[236].mxu0 }
 0x8db   : > { %v13140_v35 = vpop.f32.mrb[237].mxu0  ;;  %v7587_v53 = vadd.f32 %v7586_v25, %v7486_v48 }
 0x8dc   : > { %v7815_v41 = vpop.f32.mrb[46].mxu1 }
 0x8dd   : > { %v13224_v24 = vpop.f32.mrb[47].mxu1 }
 0x8de   : > { %v7491_v55 = vpop.f32.mrb[238].mxu0 }
 0x8df   : > { %v13143_v36 = vpop.f32.mrb[239].mxu0  ;;  %v7592_v10 = vadd.f32 %v7591_v59, %v7491_v55 }
 0x8e0   : > { %v7820_v17 = vpop.f32.mrb[48].mxu1 }
 0x8e1   : > { %v13227_v20 = vpop.f32.mrb[49].mxu1 }
 0x8e2   : > { %v7689_v51 = vpop.f32.mrb[240].mxu0 }
 0x8e3   : > { %v7713_v33 = vadd.f32 %v7689_v51, %v7572_v56  ;;  %v13193_v6 = vpop.f32.mrb[241].mxu0 }
 0x8e4   : > { %v7825_v12 = vpop.f32.mrb[50].mxu1 }
 0x8e5   : > { %v7839_v40 = vadd.f32 %v7815_v41, %v7713_v33  ;;  %v13230_v11 = vpop.f32.mrb[51].mxu1 }
 0x8e6   : > { %v7694_v34 = vpop.f32.mrb[242].mxu0 }
 0x8e7   : > { %v7714_v27 = vadd.f32 %v7694_v34, %v7577_v62  ;;  %v13196_v30 = vpop.f32.mrb[243].mxu0 }
 0x8e8   : > { %v7830_v4 = vpop.f32.mrb[52].mxu1 }
 0x8e9   : > { %v7840_v29 = vadd.f32 %v7820_v17, %v7714_v27  ;;  %v13233_v37 = vpop.f32.mrb[53].mxu1 }
 0x8ea   : > { %v7699_v5 = vpop.f32.mrb[244].mxu0 }
 0x8eb   : > { %v7715_v47 = vadd.f32 %v7699_v5, %v7582_v8  ;;  %v13199_v22 = vpop.f32.mrb[245].mxu0 }
 0x8ec   : > { %v7835_v57 = vpop.f32.mrb[54].mxu1 }
 0x8ed   : > { %v7841_v42 = vadd.f32 %v7825_v12, %v7715_v47  ;;  %v13236_v63 = vpop.f32.mrb[55].mxu1 }
 0x8ee   : > { %v7704_v16 = vpop.f32.mrb[246].mxu0 }
 0x8ef   : > { %v7716_v13 = vadd.f32 %v7704_v16, %v7587_v53  ;;  %v13202_v14 = vpop.f32.mrb[247].mxu0 }
 0x8f0   : > { %v8046_v7 = vpop.f32.mrb[56].mxu1 }
 0x8f1   : > { %v7842_v43 = vadd.f32 %v7830_v4, %v7716_v13  ;;  %v13286_v18 = vpop.f32.mrb[57].mxu1 }
 0x8f2   : > { %v7709_v49 = vpop.f32.mrb[248].mxu0 }
 0x8f3   : > { %v7717_v60 = vadd.f32 %v7709_v49, %v7592_v10  ;;  %v13205_v46 = vpop.f32.mrb[249].mxu0 }
 0x8f4   : > { %v8051_v28 = vpop.f32.mrb[58].mxu1 }
 0x8f5   : > { %v7843_v39 = vadd.f32 %v7835_v57, %v7717_v60  ;;  %v13289_v32 = vpop.f32.mrb[59].mxu1  ;;  %v10462_v60 = vld [vmem:[%s20571_s8] ss:$0 sm:$0xff] }
 0x8f6   : > { %v7940_v38 = vpop.f32.mrb[250].mxu0 }
 0x8f7   : > { %v7964_v45 = vadd.f32 %v7940_v38, %v7839_v40  ;;  %v13255_v44 = vpop.f32.mrb[251].mxu0 }
 0x8f8   : > { %v8056_v0 = vpop.f32.mrb[60].mxu1 }
 0x8f9   : > { %v8070_v23 = vadd.f32 %v8046_v7, %v7964_v45  ;;  %v13292_v52 = vpop.f32.mrb[61].mxu1 }
 0x8fa   : > { %v7945_v9 = vpop.f32.mrb[252].mxu0 }
 0x8fb   : > { %v7965_v61 = vadd.f32 %v7945_v9, %v7840_v29  ;;  %v13258_v1 = vpop.f32.mrb[253].mxu0 }
 0x8fc   : > { %v8061_v56 = vpop.f32.mrb[62].mxu1 }
 0x8fd   : > { %v8071_v19 = vadd.f32 %v8051_v28, %v7965_v61  ;;  %v13295_v58 = vpop.f32.mrb[63].mxu1 }
 0x8fe   : > { %v7950_v3 = vpop.f32.mrb[254].mxu0 }
 0x8ff   : > { %v7966_v15 = vadd.f32 %v7950_v3, %v7841_v42  ;;  %v13261_v62 = vpop.f32.mrb[255].mxu0 }
 0x900   : > { %v8066_v25 = vpop.f32.mrb[64].mxu1 }
 0x901   : > { %v8072_v50 = vadd.f32 %v8056_v0, %v7966_v15  ;;  %v13298_v2 = vpop.f32.mrb[65].mxu1 }
 0x902   : > { %v7955_v21 = vpop.f32.mrb[0].mxu0 }
 0x903   : > { %v7967_v8 = vadd.f32 %v7955_v21, %v7842_v43  ;;  %v13264_v59 = vpop.f32.mrb[1].mxu0 }
 0x904   : > { %v8295_v54 = vpop.f32.mrb[66].mxu1 }
 0x905   : > { %v8073_v48 = vadd.f32 %v8061_v56, %v7967_v8  ;;  %v13348_v35 = vpop.f32.mrb[67].mxu1 }
 0x906   : > { %v7960_v53 = vpop.f32.mrb[2].mxu0 }
 0x907   : > { %v7968_v41 = vadd.f32 %v7960_v53, %v7843_v39  ;;  %v13267_v24 = vpop.f32.mrb[3].mxu0 }
 0x908   : > { %v8300_v55 = vpop.f32.mrb[68].mxu1 }
 0x909   : > { %v8074_v36 = vadd.f32 %v8066_v25, %v7968_v41  ;;  %v13351_v10 = vpop.f32.mrb[69].mxu1 }
 0x90a   : > { %v8169_v17 = vpop.f32.mrb[4].mxu0 }
 0x90b   : > { %v8193_v20 = vadd.f32 %v8169_v17, %v8070_v23  ;;  %v13317_v51 = vpop.f32.mrb[5].mxu0 }
 0x90c   : > { %v8305_v33 = vpop.f32.mrb[70].mxu1 }
 0x90d   : > { %v8319_v6 = vadd.f32 %v8295_v54, %v8193_v20  ;;  %v13354_v12 = vpop.f32.mrb[71].mxu1 }
 0x90e   : > { %v8174_v40 = vpop.f32.mrb[6].mxu0 }
 0x90f   : > { %v8194_v11 = vadd.f32 %v8174_v40, %v8071_v19  ;;  %v13320_v34 = vpop.f32.mrb[7].mxu0 }
 0x910   : > { %v8310_v27 = vpop.f32.mrb[72].mxu1 }
 0x911   : > { %v8320_v30 = vadd.f32 %v8300_v55, %v8194_v11  ;;  %v13357_v4 = vpop.f32.mrb[73].mxu1 }
 0x912   : > { %v8179_v29 = vpop.f32.mrb[8].mxu0 }
 0x913   : > { %v8195_v37 = vadd.f32 %v8179_v29, %v8072_v50  ;;  %v13323_v5 = vpop.f32.mrb[9].mxu0 }
 0x914   : > { %v8315_v47 = vpop.f32.mrb[74].mxu1 }
 0x915   : > { %v8321_v22 = vadd.f32 %v8305_v33, %v8195_v37  ;;  %v13360_v57 = vpop.f32.mrb[75].mxu1 }
 0x916   : > { %v8184_v42 = vpop.f32.mrb[10].mxu0 }
 0x917   : > { %v8196_v63 = vadd.f32 %v8184_v42, %v8073_v48  ;;  %v13326_v16 = vpop.f32.mrb[11].mxu0 }
 0x918   : > { %v8498_v16 = vld [vmem:[%s20572_s9 + $0x8] sm:$0xff] }
 0x919   : > { %v8322_v13 = vadd.f32 %v8310_v27, %v8196_v63 }
 0x91a   : > { %v8189_v14 = vpop.f32.mrb[12].mxu0 }
 0x91b   : > { %v8197_v7 = vadd.f32 %v8189_v14, %v8074_v36  ;;  %v13329_v43 = vpop.f32.mrb[13].mxu0  ;;  %v8500_v14 = vld [vmem:[%s20572_s9 + $0x18] sm:$0x3] }
 0x91c   : > { %v8618_v43 = vld [vmem:[#allocation2 + $0x78] sm:$0xff] }
 0x91d   : > { %v8323_v18 = vadd.f32 %v8315_v47, %v8197_v7  ;;  %v8617_v7 = vld [vmem:[#allocation2 + $0x70] sm:$0xff] }
 0x91e   : > { %v8403_v49 = vpop.f32.mrb[14].mxu0 }
 0x91f   : > { %v8427_v46 = vadd.f32 %v8403_v49, %v8319_v6  ;;  %v13379_v28 = vpop.f32.mrb[15].mxu0  ;;  %v8602_v49 = vld [vmem:[#allocation2] sm:$0xff] }
 0x921   : > { %v8439_v39 = vadd.f32 %v10462_v60, %v8427_v46 }
 0x922   : > { %v8408_v32 = vpop.f32.mrb[16].mxu0 }
 0x923   : > { %v8428_v38 = vadd.f32 %v8408_v32, %v8320_v30  ;;  %v13382_v45 = vpop.f32.mrb[17].mxu0  ;;  %v8444_v44 = vmax.f32 %v8439_v39, 0.0 }
 0x925   : > { %v8440_v0 = vadd.f32 %v10462_v60, %v8428_v38  ;;  %v8453_v1 = vrot.slane %v8444_v44, 1 }
 0x926   : > { %v8413_v23 = vpop.f32.mrb[18].mxu0 }
 0x927   : > { %v8445_v52 = vmax.f32 %v8440_v0, 0.0  ;;  %v8429_v9 = vadd.f32 %v8413_v23, %v8321_v22  ;;  %v13385_v61 = vpop.f32.mrb[19].mxu0 }
 0x929   : > { %v8454_v56 = vrot.slane %v8445_v52, 1  ;;  %v8441_v19 = vadd.f32 %v10462_v60, %v8429_v9 }
 0x92a   : > { %v8418_v58 = vpop.f32.mrb[20].mxu0 }
 0x92b   : > { %v8446_v3 = vmax.f32 %v8441_v19, 0.0  ;;  %v8430_v15 = vadd.f32 %v8418_v58, %v8322_v13  ;;  %v13388_v62 = vpop.f32.mrb[21].mxu0  ;;  %v8455_v25 = vsel %vm634_vm2, %v8453_v1, %v8454_v56  ;;  %v8499_v13 = vld [vmem:[%s20572_s9 + $0x10] sm:$0xff] }
 0x92c   : > { %v8464_v50 = vmax.f32 %v8444_v44, %v8455_v25  ;;  %v8604_v58 = vld [vmem:[#allocation2 + $0x10] sm:$0xff] }
 0x92d   : > { %v8456_v2 = vrot.slane %v8446_v3, 1  ;;  %v8442_v21 = vadd.f32 %v10462_v60, %v8430_v15 }
 0x92e   : > { %v8423_v8 = vpop.f32.mrb[22].mxu0  ;;  %v8480_v55 = vrot.slane %v8464_v50, 6 }
 0x92f   : > { %v8447_v59 = vmax.f32 %v8442_v21, 0.0  ;;  %v8431_v54 = vadd.f32 %v8423_v8, %v8323_v18  ;;  %v8457_v48 = vsel %vm634_vm2, %v8454_v56, %v8456_v2  ;;  %v13391_v35 = vpop.f32.mrb[23].mxu0  ;;  %v13904_v18 = vpack.c.bf16 %v8618_v43, %v8617_v7  ;;  %v8883_v43 = vld [vmem:[#allocation2 + $0xd0] sm:$0xff] }
 0x930   : > { %v8465_v53 = vmax.f32 %v8445_v52, %v8457_v48 }
 0x931   : > { %v8458_v41 = vrot.slane %v8447_v59, 1  ;;  %v8443_v24 = vadd.f32 %v10462_v60, %v8431_v54  ;;  %13905 = vmatprep.subr.bf16.mxu0 %v13904_v18  ;;  %v8603_v60 = vld [vmem:[#allocation2 + $0x8] sm:$0xff] }
 0x932   : > { %v8481_v36 = vrot.slane %v8465_v53, 6  ;;  %13907 = vmatpush3.bf16.msra.mxu0 %v13904_v18  ;;  %v13908_v46 = vpack.c.bf16 %v8603_v60, %v8602_v49  ;;  %v8884_v18 = vld [vmem:[#allocation2 + $0xd8] sm:$0xff]  ;;  %v8885_v60 = vld [vmem:[#allocation2 + $0xe0] sm:$0xff] }
 0x933   : > { %v8459_v10 = vsel %vm634_vm2, %v8456_v2, %v8458_v41  ;;  %v8448_v17 = vmax.f32 %v8443_v24, 0.0  ;;  %v8467_v37 = vmax.f32 %v8447_v59, %v8458_v41  ;;  %v13944_v49 = vpack.c.bf16 %v8884_v18, %v8883_v43  ;;  %v9345_v43 = vld [vmem:[#allocation2 + $0x200] sm:$0xff]  ;;  %v9346_v18 = vld [vmem:[#allocation2 + $0x208] sm:$0xff] }
 0x934   : > { %v8466_v20 = vmax.f32 %v8446_v3, %v8459_v10  ;;  %v8482_v51 = vsel %vm4008_vm7, %v8480_v55, %v8481_v36  ;;  %13909 = vmatprep.subr.bf16.mxu0 %v13908_v46  ;;  %v8605_v3 = vld [vmem:[#allocation2 + $0x18] sm:$0xff]  ;;  %v8606_v55 = vld [vmem:[#allocation2 + $0x20] sm:$0xff] }
 0x935   : > { %v8469_v33 = vrot.slane %v8448_v17, 1  ;;  %v8493_v6 = vmax.f32 %v8464_v50, %v8482_v51 }
 0x936   : > { %v8483_v12 = vrot.slane %v8466_v20, 6 }
 0x937   : > { %v8470_v40 = vsel %vm634_vm2, %v8458_v41, %v8469_v33  ;;  %v8474_v11 = vmax.f32 %v8448_v17, %v8469_v33  ;;  %v13912_v41 = vpack.c.bf16 %v8605_v3, %v8604_v58  ;;  %v8982_v58 = vld [vmem:[#allocation2 + $0x130] sm:$0xff]  ;;  %v8983_v3 = vld [vmem:[#allocation2 + $0x138] sm:$0xff] }
 0x938   : > { %v8473_v34 = vmax.f32 %v8447_v59, %v8470_v40  ;;  %v8484_v27 = vsel %vm4008_vm7, %v8481_v36, %v8483_v12  ;;  %v8607_v36 = vld [vmem:[#allocation2 + $0x28] sm:$0xff]  ;;  %v8608_v40 = vld [vmem:[#allocation2 + $0x30] sm:$0xff] }
 0x939   : > { %v8487_v30 = vrot.slane %v8474_v11, 6  ;;  %v8494_v4 = vmax.f32 %v8465_v53, %v8484_v27  ;;  %v8609_v11 = vld [vmem:[#allocation2 + $0x38] sm:$0xff]  ;;  %v8786_v27 = vld [vmem:[#allocation2 + $0x80] sm:$0xff] }
 0x93a   : > { %v8485_v29 = vrot.slane %v8473_v34, 6  ;;  %v13920_v34 = vpack.c.bf16 %v8609_v11, %v8608_v40  ;;  %v9168_v11 = vld [vmem:[#allocation2 + $0x190] sm:$0xff] }
 0x93b   : > { %v13882_v5 = vpack.c.bf16 %v8494_v4, %v8493_v6 }
 0x93c   : > { %v8488_v47 = vsel %vm4008_vm7, %v8485_v29, %v8487_v30  ;;  %v8486_v22 = vsel %vm4008_vm7, %v8483_v12, %v8485_v29  ;;  %v13916_v12 = vpack.c.bf16 %v8607_v36, %v8606_v55  ;;  %v8787_v30 = vld [vmem:[#allocation2 + $0x88] sm:$0xff]  ;;  %v8788_v29 = vld [vmem:[#allocation2 + $0x90] sm:$0xff]  ;;  %v9078_v55 = vld [vmem:[#allocation2 + $0x178] sm:$0xff] }
 0x93d   : > { %13883 = vmatprep.subr.bf16.mxu1 %v13882_v5  ;;  %v8495_v57 = vmax.f32 %v8466_v20, %v8486_v22  ;;  %v8496_v42 = vmax.f32 %v8467_v37, %v8488_v47  ;;  %v13924_v4 = vpack.c.bf16 %v8787_v30, %v8786_v27  ;;  %v8789_v37 = vld [vmem:[#allocation2 + $0x98] sm:$0xff]  ;;  %v8790_v47 = vld [vmem:[#allocation2 + $0xa0] sm:$0xff]  ;;  %v8791_v22 = vld [vmem:[#allocation2 + $0xa8] sm:$0xff] }
 0x93e   : > { %13885 = vmatpush3.bf16.msra.mxu1 %v13882_v5  ;;  %v13928_v5 = vpack.c.bf16 %v8789_v37, %v8788_v29  ;;  %v9170_v27 = vld [vmem:[#allocation2 + $0x1a0] sm:$0xff]  ;;  %v9171_v30 = vld [vmem:[#allocation2 + $0x1a8] sm:$0xff]  ;;  %v9173_v29 = vld [vmem:[#allocation2 + $0x1b8] sm:$0xff] }
 0x93f   : > { %v13886_v63 = vpack.c.bf16 %v8496_v42, %v8495_v57  ;;  %v13932_v57 = vpack.c.bf16 %v8791_v22, %v8790_v47  ;;  %v8792_v42 = vld [vmem:[#allocation2 + $0xb0] sm:$0xff]  ;;  %v9255_v47 = vld [vmem:[#allocation2 + $0x1c8] sm:$0xff] }
 0x941   : > { %13888 = vmatprep.subr.msk.bf16.mxu1 %vm13887_vm15, %v13886_v63 }
 0x942   : > { %13891 = vmatpush3.bf16.msk.msra.mxu1 %vm13887_vm15, %v13886_v63  ;;  %v8793_v63 = vld [vmem:[#allocation2 + $0xb8] sm:$0xff] }
 0x943   : > { %14036 = vmatprep.subr.bf16.mxu1 %v14348_v31 }
 0x945   : > { %13401 = vmatmul.mubr.msk.f32.vlgmr.msra.gmra.mrb[76].mxu1 %vm8501_vm14, %v8498_v16  ;;  %v13936_v16 = vpack.c.bf16 %v8793_v63, %v8792_v42  ;;  %v9257_v42 = vld [vmem:[#allocation2 + $0x1d8] sm:$0xff]  ;;  %v9258_v63 = vld [vmem:[#allocation2 + $0x1e0] sm:$0xff] }
 0x946   : > { %13403 = vmatprep.mubr.msk.f32.mxu1 %vm8501_vm14, %v8499_v13  ;;  %v8881_v13 = vld [vmem:[#allocation2 + $0xc0] sm:$0xff] }
 0x949   : > { %13404 = vmatmul.mubr.msk.f32.gmra.mrb[78].mxu1 %vm8501_vm14, %v8500_v14  ;;  %v8882_v14 = vld [vmem:[#allocation2 + $0xc8] sm:$0xff] }
 0x94a   : > { %13581 = vmatprep.mubr.msk.f32.mxu1 %vm14347_vm0, %v20660_v26  ;;  %v13940_v7 = vpack.c.bf16 %v8882_v14, %v8881_v13  ;;  %v9260_v13 = vld [vmem:[#allocation2 + $0x1f0] sm:$0xff]  ;;  %v9261_v14 = vld [vmem:[#allocation2 + $0x1f8] sm:$0xff] }
 0xa18   : > { %v20361_v28 = vpop.f32.mrb[76].mxu1 }
 0xa19   : > { %v8583_v39 = vpop.f32.mrb[77].mxu1  ;;  %v8623_v32 = vrot.slane %v20361_v28, 1  ;;  %v8795_v38 = vrot.slane %v20361_v28, 2  ;;  %v8890_v45 = vrot.slane %v20361_v28, 4  ;;  %v8985_v44 = vrot.slane %v20361_v28, 5 }
 0xa1a   : > { %v8622_v0 = vrot.slane %v8583_v39, 1  ;;  %v8794_v23 = vrot.slane %v8583_v39, 2  ;;  %v8889_v52 = vrot.slane %v8583_v39, 4  ;;  %v8984_v9 = vrot.slane %v8583_v39, 5 }
 0xa1b   : > { %v9079_v61 = vrot.slane %v8583_v39, 6  ;;  %v9080_v1 = vrot.slane %v20361_v28, 6 }
 0xa1c   : > { %v13405_v56 = vpop.f32.mrb[78].mxu1  ;;  %v8624_v19 = vsel %vm634_vm2, %v8622_v0, %v8623_v32  ;;  %v8796_v15 = vsel %vm1430_vm4, %v8794_v23, %v8795_v38  ;;  %v20371_v62 = vsel %vm2718_vm6, %v8889_v52, %v8890_v45  ;;  %v20374_v25 = vsel %vm799_vm1, %v8984_v9, %v8985_v44  ;;  %v8977_v0 = vld [vmem:[#allocation2 + $0x108] sm:$0xff]  ;;  %v8978_v52 = vld [vmem:[#allocation2 + $0x110] sm:$0xff]  ;;  %v8979_v9 = vld [vmem:[#allocation2 + $0x118] sm:$0xff] }
 0xa1d   : > { %v9263_v50 = vrot.slane %v13405_v56, 1  ;;  %v9353_v2 = vrot.slane %v13405_v56, 2  ;;  %v20376_v21 = vpop.f32.mrb[79].mxu1  ;;  %13422 = vmatprep.mubr.msk.f32.mxu0 %vm5423_vm10, %v8624_v19  ;;  %v20380_v8 = vsel %vm4008_vm7, %v9079_v61, %v9080_v1  ;;  %v13960_v61 = vpack.c.bf16 %v8979_v9, %v8978_v52  ;;  %v8981_v56 = vld [vmem:[#allocation2 + $0x128] sm:$0xff] }
 0xa1e   : > { %v8625_v59 = vrot.slane %v20376_v21, 1  ;;  %v8797_v54 = vrot.slane %v20376_v21, 2  ;;  %v8892_v48 = vrot.slane %v20376_v21, 4  ;;  %v8987_v35 = vrot.slane %v20376_v21, 5 }
 0xa1f   : > { %v9082_v53 = vrot.slane %v20376_v21, 6 }
 0xa20   : > { %v20388_v24 = vsel %vm634_vm2, %v8623_v32, %v8625_v59  ;;  %v20391_v10 = vsel %vm1430_vm4, %v8795_v38, %v8797_v54  ;;  %v20394_v17 = vsel %vm2718_vm6, %v8890_v45, %v8892_v48  ;;  %v20397_v20 = vsel %vm799_vm1, %v8985_v44, %v8987_v35  ;;  %v8887_v32 = vld [vmem:[#allocation2 + $0xf0] sm:$0xff]  ;;  %v8888_v38 = vld [vmem:[#allocation2 + $0xf8] sm:$0xff]  ;;  %v8976_v44 = vld [vmem:[#allocation2 + $0x100] sm:$0xff] }
 0xa21   : > { %13423 = vmatmul.mubr.msk.f32.vlgmr.msra.gmra.mrb[24].mxu0 %vm5423_vm10, %v20388_v24  ;;  %v20402_v51 = vsel %vm4008_vm7, %v9080_v1, %v9082_v53  ;;  %v20405_v33 = vsel %vm634_vm2, %v8625_v59, %v9263_v50  ;;  %v20408_v6 = vsel %vm1430_vm4, %v8797_v54, %v9353_v2  ;;  %v13952_v45 = vpack.c.bf16 %v8888_v38, %v8887_v32  ;;  %v8980_v1 = vld [vmem:[#allocation2 + $0x120] sm:$0xff]  ;;  %v9072_v50 = vld [vmem:[#allocation2 + $0x148] sm:$0xff]  ;;  %v9073_v59 = vld [vmem:[#allocation2 + $0x150] sm:$0xff] }
 0xa22   : > { %13911 = vmatpush3.bf16.msra.mxu0 %v13908_v46  ;;  %13441 = vmatprep.mubr.msk.f32.mxu0 %vm5423_vm10, %v8583_v39  ;;  %v8886_v46 = vld [vmem:[#allocation2 + $0xe8] sm:$0xff]  ;;  %v13956_v23 = vpack.c.bf16 %v8977_v0, %v8976_v44  ;;  %v13964_v19 = vpack.c.bf16 %v8981_v56, %v8980_v1  ;;  %v9074_v54 = vld [vmem:[#allocation2 + $0x158] sm:$0xff]  ;;  %v9075_v35 = vld [vmem:[#allocation2 + $0x160] sm:$0xff] }
 0xa23   : > { %13913 = vmatprep.subr.bf16.mxu0 %v13912_v41  ;;  %v13948_v39 = vpack.c.bf16 %v8886_v46, %v8885_v60  ;;  %v13976_v48 = vpack.c.bf16 %v9074_v54, %v9073_v59  ;;  %v9076_v53 = vld [vmem:[#allocation2 + $0x168] sm:$0xff]  ;;  %v9347_v60 = vld [vmem:[#allocation2 + $0x210] sm:$0xff]  ;;  %v9348_v46 = vld [vmem:[#allocation2 + $0x218] sm:$0xff] }
 0xa24   : > { %v9350_v32 = vld [vmem:[#allocation2 + $0x228] sm:$0xff]  ;;  %v9351_v38 = vld [vmem:[#allocation2 + $0x230] sm:$0xff]  ;;  %v9543_v59 = vld [vmem:[%s20576_s13] sm:$0xff] }
 0xa25   : > { %v9544_v54 = vld [vmem:[%s20576_s13 + $0x8] sm:$0xff] }
 0xa26   : > { %13915 = vmatpush3.bf16.msra.mxu0 %v13912_v41  ;;  %v9077_v41 = vld [vmem:[#allocation2 + $0x170] sm:$0xff] }
 0xa27   : > { %13917 = vmatprep.subr.bf16.mxu0 %v13916_v12  ;;  %v13984_v36 = vpack.c.bf16 %v9078_v55, %v9077_v41  ;;  %v9546_v41 = vld [vmem:[%s20576_s13 + $0x18] sm:$0xff] }
 0xa2a   : > { %13919 = vmatpush3.bf16.msra.mxu0 %v13916_v12  ;;  %v9167_v12 = vld [vmem:[#allocation2 + $0x188] sm:$0xff] }
 0xa2b   : > { %13921 = vmatprep.subr.bf16.mxu0 %v13920_v34 }
 0xa2e   : > { %13923 = vmatpush3.bf16.msra.mxu0 %v13920_v34  ;;  %v9169_v34 = vld [vmem:[#allocation2 + $0x198] sm:$0xff] }
 0xa2f   : > { %13925 = vmatprep.subr.bf16.mxu0 %v13924_v4 }
 0xa31   : > { %13442 = vmatmul.mubr.msk.f32.vlgmr.msra.gmra.mrb[24].mxu0 %vm5423_vm10, %v20361_v28 }
 0xa32   : > { %13927 = vmatpush3.bf16.msra.mxu0 %v13924_v4  ;;  %13460 = vmatprep.mubr.msk.f32.mxu0 %vm5423_vm10, %v8796_v15  ;;  %v13968_v15 = vpack.c.bf16 %v8983_v3, %v8982_v58  ;;  %v9172_v4 = vld [vmem:[#allocation2 + $0x1b0] sm:$0xff] }
 0xa33   : > { %13929 = vmatprep.subr.bf16.mxu0 %v13928_v5  ;;  %v14000_v37 = vpack.c.bf16 %v9173_v29, %v9172_v4 }
 0xa36   : > { %13931 = vmatpush3.bf16.msra.mxu0 %v13928_v5  ;;  %v9254_v5 = vld [vmem:[#allocation2 + $0x1c0] sm:$0xff] }
 0xa37   : > { %13933 = vmatprep.subr.bf16.mxu0 %v13932_v57  ;;  %v14004_v22 = vpack.c.bf16 %v9255_v47, %v9254_v5 }
 0xa3a   : > { %13935 = vmatpush3.bf16.msra.mxu0 %v13932_v57  ;;  %v9256_v57 = vld [vmem:[#allocation2 + $0x1d0] sm:$0xff] }
 0xa3b   : > { %13937 = vmatprep.subr.bf16.mxu0 %v13936_v16 }
 0xa3e   : > { %13939 = vmatpush3.bf16.msra.mxu0 %v13936_v16  ;;  %v9259_v16 = vld [vmem:[#allocation2 + $0x1e8] sm:$0xff] }
 0xa3f   : > { %13941 = vmatprep.subr.bf16.mxu0 %v13940_v7 }
 0xa41   : > { %13461 = vmatmul.mubr.msk.f32.vlgmr.msra.gmra.mrb[24].mxu0 %vm5423_vm10, %v20391_v10 }
 0xa42   : > { %13943 = vmatpush3.bf16.msra.mxu0 %v13940_v7  ;;  %13479 = vmatprep.mubr.msk.f32.mxu0 %vm5423_vm10, %v20371_v62  ;;  %v9071_v62 = vld [vmem:[#allocation2 + $0x140] sm:$0xff]  ;;  %v14016_v7 = vpack.c.bf16 %v9261_v14, %v9260_v13 }
 0xa43   : > { %13945 = vmatprep.subr.bf16.mxu0 %v13944_v49  ;;  %v13972_v2 = vpack.c.bf16 %v9072_v50, %v9071_v62 }
 0xa46   : > { %13947 = vmatpush3.bf16.msra.mxu0 %v13944_v49  ;;  %v14020_v49 = vpack.c.bf16 %v9346_v18, %v9345_v43 }
 0xa47   : > { %13949 = vmatprep.subr.bf16.mxu0 %v13948_v39 }
 0xa4a   : > { %13951 = vmatpush3.bf16.msra.mxu0 %v13948_v39  ;;  %v9349_v39 = vld [vmem:[#allocation2 + $0x220] sm:$0xff] }
 0xa4b   : > { %13953 = vmatprep.subr.bf16.mxu0 %v13952_v45 }
 0xa4e   : > { %13955 = vmatpush3.bf16.msra.mxu0 %v13952_v45  ;;  %v9352_v45 = vld [vmem:[#allocation2 + $0x238] sm:$0xff] }
 0xa4f   : > { %13957 = vmatprep.subr.bf16.mxu0 %v13956_v23  ;;  %v14032_v44 = vpack.c.bf16 %v9352_v45, %v9351_v38 }
 0xa51   : > { %13480 = vmatmul.mubr.msk.f32.vlgmr.msra.gmra.mrb[24].mxu0 %vm5423_vm10, %v20394_v17  ;;  %v9166_v17 = vld [vmem:[#allocation2 + $0x180] sm:$0xff] }
 0xa52   : > { %13959 = vmatpush3.bf16.msra.mxu0 %v13956_v23  ;;  %13498 = vmatprep.mubr.msk.f32.mxu0 %vm5423_vm10, %v20374_v25  ;;  %v13980_v25 = vpack.c.bf16 %v9076_v53, %v9075_v35  ;;  %v13988_v40 = vpack.c.bf16 %v9167_v12, %v9166_v17  ;;  %v9463_v35 = vld [vmem:[%s20575_s12] sm:$0x1]  ;;  %v14041_v53 = vpack.c.bf16 %v9544_v54, %v9543_v59  ;;  %v9548_v17 = vld [vmem:[%s20576_s13 + $0x28] sm:$0xff] }
 0xa53   : > { %13961 = vmatprep.subr.bf16.mxu0 %v13960_v61 }
 0xa56   : > { %13963 = vmatpush3.bf16.msra.mxu0 %v13960_v61 }
 0xa57   : > { %13965 = vmatprep.subr.bf16.mxu0 %v13964_v19 }
 0xa5a   : > { %13967 = vmatpush3.bf16.msra.mxu0 %v13964_v19 }
 0xa5b   : > { %13969 = vmatprep.subr.bf16.mxu0 %v13968_v15 }
 0xa5e   : > { %13971 = vmatpush3.bf16.msra.mxu0 %v13968_v15 }
 0xa5f   : > { %13973 = vmatprep.subr.bf16.mxu0 %v13972_v2 }
 0xa61   : > { %13499 = vmatmul.mubr.msk.f32.vlgmr.msra.gmra.mrb[24].mxu0 %vm5423_vm10, %v20397_v20  ;;  %v13992_v20 = vpack.c.bf16 %v9169_v34, %v9168_v11 }
 0xa62   : > { %13975 = vmatpush3.bf16.msra.mxu0 %v13972_v2  ;;  %13517 = vmatprep.mubr.msk.f32.mxu0 %vm5423_vm10, %v20380_v8  ;;  %v13996_v8 = vpack.c.bf16 %v9171_v30, %v9170_v27 }
 0xa63   : > { %13977 = vmatprep.subr.bf16.mxu0 %v13976_v48 }
 0xa66   : > { %13979 = vmatpush3.bf16.msra.mxu0 %v13976_v48 }
 0xa67   : > { %13981 = vmatprep.subr.bf16.mxu0 %v13980_v25 }
 0xa6a   : > { %13983 = vmatpush3.bf16.msra.mxu0 %v13980_v25  ;;  %v9545_v25 = vld [vmem:[%s20576_s13 + $0x10] sm:$0xff] }
 0xa6b   : > { %13985 = vmatprep.subr.bf16.mxu0 %v13984_v36  ;;  %v14044_v55 = vpack.c.bf16 %v9546_v41, %v9545_v25 }
 0xa6e   : > { %13987 = vmatpush3.bf16.msra.mxu0 %v13984_v36  ;;  %v9547_v36 = vld [vmem:[%s20576_s13 + $0x20] sm:$0xff] }
 0xa6f   : > { %13989 = vmatprep.subr.bf16.mxu0 %v13988_v40  ;;  %v14047_v12 = vpack.c.bf16 %v9548_v17, %v9547_v36 }
 0xa71   : > { %13518 = vmatmul.mubr.msk.f32.vlgmr.msra.gmra.mrb[24].mxu0 %vm5423_vm10, %v20402_v51  ;;  %v14008_v51 = vpack.c.bf16 %v9257_v42, %v9256_v57 }
 0xa72   : > { %13991 = vmatpush3.bf16.msra.mxu0 %v13988_v40  ;;  %13536 = vmatprep.mubr.msk.f32.mxu0 %vm5423_vm10, %v20361_v28  ;;  %v14012_v28 = vpack.c.bf16 %v9259_v16, %v9258_v63  ;;  %v9550_v40 = vld [vmem:[%s20576_s13 + $0x38] sm:$0xff] }
 0xa73   : > { %13993 = vmatprep.subr.bf16.mxu0 %v13992_v20 }
 0xa76   : > { %13995 = vmatpush3.bf16.msra.mxu0 %v13992_v20 }
 0xa77   : > { %13997 = vmatprep.subr.bf16.mxu0 %v13996_v8 }
 0xa7a   : > { %13999 = vmatpush3.bf16.msra.mxu0 %v13996_v8 }
 0xa7b   : > { %14001 = vmatprep.subr.bf16.mxu0 %v14000_v37 }
 0xa7e   : > { %14003 = vmatpush3.bf16.msra.mxu0 %v14000_v37 }
 0xa7f   : > { %14005 = vmatprep.subr.bf16.mxu0 %v14004_v22 }
 0xa81   : > { %13537 = vmatmul.mubr.msk.f32.vlgmr.msra.gmra.mrb[24].mxu0 %vm5423_vm10, %v20376_v21  ;;  %v14024_v21 = vpack.c.bf16 %v9348_v46, %v9347_v60 }
 0xa82   : > { %14007 = vmatpush3.bf16.msra.mxu0 %v14004_v22  ;;  %13555 = vmatprep.mubr.msk.f32.mxu0 %vm5423_vm10, %v20388_v24  ;;  %v14028_v24 = vpack.c.bf16 %v9350_v32, %v9349_v39 }
 0xa83   : > { %14009 = vmatprep.subr.bf16.mxu0 %v14008_v51 }
 0xa86   : > { %14011 = vmatpush3.bf16.msra.mxu0 %v14008_v51 }
 0xa87   : > { %14013 = vmatprep.subr.bf16.mxu0 %v14012_v28 }
 0xa8a   : > { %14015 = vmatpush3.bf16.msra.mxu0 %v14012_v28 }
 0xa8b   : > { %14017 = vmatprep.subr.bf16.mxu0 %v14016_v7 }
 0xa8e   : > { %14019 = vmatpush3.bf16.msra.mxu0 %v14016_v7 }
 0xa8f   : > { %14021 = vmatprep.subr.bf16.mxu0 %v14020_v49 }
 0xa91   : > { %13556 = vmatmul.mubr.msk.f32.vlgmr.msra.gmra.mrb[24].mxu0 %vm5423_vm10, %v20405_v33  ;;  %v10486_v33 = vld [vmem:[%s20574_s11] ss:$0 sm:$0xff] }
 0xa92   : > { %14023 = vmatpush3.bf16.msra.mxu0 %v14020_v49  ;;  %13574 = vmatprep.mubr.msk.f32.mxu0 %vm5423_vm10, %v20391_v10 }
 0xa93   : > { %14025 = vmatprep.subr.bf16.mxu0 %v14024_v21 }
 0xa96   : > { %14027 = vmatpush3.bf16.msra.mxu0 %v14024_v21 }
 0xa97   : > { %14029 = vmatprep.subr.bf16.mxu0 %v14028_v24 }
 0xa9a   : > { %14031 = vmatpush3.bf16.msra.mxu0 %v14028_v24 }
 0xa9b   : > { %14033 = vmatprep.subr.bf16.mxu0 %v14032_v44 }
 0xa9e   : > { %14035 = vmatpush3.bf16.msra.mxu0 %v14032_v44 }
 0xaa1   : > { %13575 = vmatmul.mubr.msk.f32.vlgmr.msra.gmra.mrb[24].mxu0 %vm5423_vm10, %v20408_v6 }
 0xb74   : > { %v13576_v0 = vpop.f32.mrb[24].mxu0 }
 0xb75   : > { %v9442_v23 = vadd.f32 %v13576_v0, %v10486_v33  ;;  %v9423_v10 = vpop.f32.mrb[25].mxu0 }
 0xb76   : > { %v9441_v52 = vadd.f32 %v10486_v33, %v9423_v10 }
 0xb77   : > { %v9444_v9 = vmax.f32 %v9442_v23, 0.0 }
 0xb78   : > { %v9443_v61 = vmax.f32 %v9441_v52, 0.0 }
 0xb79   : > { %v9448_v1 = vrot.slane %v9444_v9, 1 }
 0xb7a   : > { %v9447_v56 = vrot.slane %v9443_v61, 1 }
 0xb7b   : > { %v9453_v19 = vmax.f32 %v9444_v9, %v9448_v1 }
 0xb7c   : > { %v9449_v58 = vsel %vm634_vm2, %v9447_v56, %v9448_v1  ;;  %vm9464_vm2 = vcmask 89088  }
 0xb7d   : > { %v9452_v3 = vmax.f32 %v9443_v61, %v9449_v58  ;;  %v9457_v15 = vrot.slane %v9453_v19, 4 }
 0xb7f   : > { %v9456_v62 = vrot.slane %v9452_v3, 4  ;;  %v9462_v50 = vmax.f32 %v9453_v19, %v9457_v15 }
 0xb81   : > { %v9458_v6 = vsel %vm2718_vm6, %v9456_v62, %v9457_v15 }
 0xb82   : > { %v9461_v2 = vmax.f32 %v9452_v3, %v9458_v6 }
 0xb84   : > { %v14037_v48 = vpack.c.bf16 %v9462_v50, %v9461_v2 }
 0xb86   : > { %14039 = vmatpush3.bf16.msk.msra.mxu1 %vm14038_vm3, %v14037_v48 }
 0xb87   : > { %14040 = vmatprep.subr.bf16.mxu1 %v14348_v31 }
 0xb89   : > { %13582 = vmatmul.mubr.msk.f32.vlgmr.msra.gmra.mrb[80].mxu1 %vm9464_vm2, %v9463_v35 }
 0xb8a   : > { %14042 = vmatpush3.bf16.msra.mxu1 %v14041_v53  ;;  %13600 = vmatprep.mubr.msk.f32.mxu1 %vm14347_vm0, %v20660_v26  ;;  %v9549_v26 = vld [vmem:[%s20576_s13 + $0x30] sm:$0xff]  ;;  %vm9541_vm0 = vcmask 516096  }
 0xb8b   : > { %14043 = vmatprep.subr.bf16.mxu1 %v14348_v31  ;;  %v14050_v11 = vpack.c.bf16 %v9550_v40, %v9549_v26 }
 0xb8e   : > { %14045 = vmatpush3.bf16.msra.mxu1 %v14044_v55 }
 0xb8f   : > { %14046 = vmatprep.subr.bf16.mxu1 %v14348_v31 }
 0xb92   : > { %14048 = vmatpush3.bf16.msra.mxu1 %v14047_v12 }
 0xb93   : > { %14049 = vmatprep.subr.bf16.mxu1 %v14348_v31 }
 0xb96   : > { %14051 = vmatpush3.bf16.msra.mxu1 %v14050_v11 }
 0xc5c   : > { %v9537_v34 = vpop.f32.mrb[80].mxu1 }
 0xc5d   : > { %9542 = vst.msk [vmem:[%s532_s28] sm:$0x1] %vm9541_vm0, %v9537_v34  ;;  %v13583_v20 = vpop.f32.mrb[81].mxu1  ;;  %13601 = vmatmul.mubr.msk.f32.vlgmr.msra.gmra.mrb[82].mxu1 %vm5423_vm10, %v9537_v34 }
 0xc5e   : > { %14256 = shalt.err (!%p14253_p7)
}
 0xc5f   : > { %s14257_s28 = scalar_lea.hbm %s20491_s17, 16  ;;  %s14261_s19 = scalar_lea.hbm %s20578_s15, 32 }
 0xc60   : > { %p14258_p8 = scmp.ne.s32.totalorder %s20491_s17, %s14257_s28  ;;  %p14262_p1 = scmp.lt.u32.totalorder %s20491_s17, %s20578_s15 }
 0xc61   : > { %p14263_p0 = scmp.lt.u32.totalorder %s14261_s19, %s14257_s28  ;;  %p14265_p6 = scmp.lt.u32.totalorder %s14257_s28, %s20491_s17 }
 0xc62   : > { %p14259_p11 = pnand %p14258_p8, %p20738_p9 }
 0xc63   : > { %p14264_p5 = por %p14263_p0, %p14262_p1 }
 0xc64   : > { %p14260_p13 = pneg %p14259_p11 }
 0xc65   : > { %p14266_p10 = por %p14265_p6, %p14264_p5 }
 0xc67   : > { %p14267_p12 = pnand %p14266_p10, %p14260_p13 }
 0xc69   : > { %14270 = shalt.err (!%p14267_p12)
}
 0xc6a   : > { %14075 = dma.vmem_to_hbm [thread:$0]  (%p20738_p9), %s9645_s26, 16, %s20491_s17, %s9628_s18   ;;  %v9551_v31 = vld [vmem:[%s20577_s14] sm:$0x1]  ;;  %vm9625_vm1 = vcmask 73728  }
 0xc6b   : > { %s538_s29 = scalar_lea.vmem [#allocation6], %s20481_s27  ;;  %s20739_s28 = sshll.u32 %s14458_s25, 4 }
 0xc6c   : > { %s9657_s21 = sshll.u32 %s538_s29, 4  ;;  %s20520_s23 = scalar_lea.hbm %s20579_s16, %s20739_s28  ;;  %s20522_s21 = int_to_ptr.vmem [resolvable:$true] %s9657_s21 }
 0xc6d   : > { %s9632_s17 = scalar_lea.sflag [#allocation7], %s20481_s27  ;;  %s14271_s26 = scalar_lea.vmem %s20522_s21, 16 }
 0xc6e   : > { %p14272_p2 = scmp.ne.s32.totalorder %s20522_s21, %s14271_s26  ;;  %s14351_s18 = smov [#allocation6]  }
 0xc6f   : > { %s14275_s1 = sshll.u32 %s14351_s18, 4  ;;  %s14276_s1 = int_to_ptr.vmem [resolvable:$false] %s14275_s1 }
 0xc70   : > { %p14273_p3 = pnand %p14272_p2, %p20738_p9  ;;  %s14277_s25 = scalar_lea.vmem %s14276_s1, 32 }
 0xc71   : > { %p14278_p7 = scmp.lt.s32.totalorder %s20522_s21, %s14276_s1  ;;  %p14279_p8 = scmp.lt.s32.totalorder %s14277_s25, %s14271_s26 }
 0xc72   : > { %p14274_p4 = pneg %p14273_p3 }
 0xc73   : > { %p14280_p11 = por %p14279_p8, %p14278_p7 }
 0xc75   : > { %p14281_p13 = pnand %p14280_p11, %p14274_p4 }
 0xd30   : > { %v9621_v27 = vpop.f32.mrb[82].mxu1 }
 0xd31   : > { %v9622_v30 = vadd.f32 %v9621_v27, %v9551_v31  ;;  %v13602_v8 = vpop.f32.mrb[83].mxu1 }
 0xd33   : > { %9626 = vst.msk [vmem:[%s538_s29] sm:$0x1] %vm9625_vm1, %v9622_v30 }
 0xd34   : > { %14284 = shalt.err (!%p14281_p13)
}
 0xd35   : > { %s14285_s27 = scalar_lea.hbm %s20520_s23, 16  ;;  %s14289_s28 = scalar_lea.hbm %s20579_s16, 32 }
 0xd36   : > { %p14286_p1 = scmp.ne.s32.totalorder %s20520_s23, %s14285_s27  ;;  %p14290_p6 = scmp.lt.u32.totalorder %s20520_s23, %s20579_s16 }
 0xd37   : > { %p14291_p10 = scmp.lt.u32.totalorder %s14289_s28, %s14285_s27  ;;  %p14293_p2 = scmp.lt.u32.totalorder %s14285_s27, %s20520_s23 }
 0xd38   : > { %p14287_p0 = pnand %p14286_p1, %p20738_p9 }
 0xd39   : > { %p14292_p12 = por %p14291_p10, %p14290_p6 }
 0xd3a   : > { %p14288_p5 = pneg %p14287_p0 }
 0xd3b   : > { %p14294_p3 = por %p14293_p2, %p14292_p12 }
 0xd3d   : > { %p14295_p4 = pnand %p14294_p3, %p14288_p5 }
 0xd3f   : > { %14298 = shalt.err (!%p14295_p4)
}
 0xd40   : > { %14076 = dma.vmem_to_hbm [thread:$0]  (%p20738_p9), %s20522_s21, 16, %s20520_s23, %s9632_s17  }
 0xd41 PF: > { %s20740_s26 = sld [smem:[#allocation11_spill]]  ;;  %s20741_s18 = sld [smem:[#allocation15_spill]] }
 0xd42   : > { %p14092_p7 = scmp.ge.s32.totalorder %s14341_s24, 2 }
 0xd47   : > { %s9669_s1 = sand.u32 1, %s20740_s26   ;;  %p20742_p8 = scmp.ne.s32.totalorder %s20741_s18, 0 }
 0xd48   : > { %s9670_s25 = scalar_lea.sflag [#allocation4], %s9669_s1 }
 0xd49   : > { %p14084_p11 = pnand %p14092_p7, %p20742_p8 }
 0xd4b   : > { %14320 = dma.done.wait (!%p14084_p11), %s9670_s25, 16  }
 0xd4c   : > { %14322 = vsyncadd (!%p14084_p11), %s9670_s25, 4294967280  ;;  %s9678_s27 = scalar_lea.sflag [#allocation7], %s9669_s1 }
 0xd4d   : > { %14324 = dma.done.wait (!%p14084_p11), %s9678_s27, 16  }
 0xd4e   : > { %14326 = vsyncadd (!%p14084_p11), %s9678_s27, 4294967280  ;;  %s20743_s24 = sld [smem:[#allocation13_spill]]  ;;  %s20744_s0 = sld [smem:[#allocation12_spill]] }
 0xd4f   : > { %s20745_s23 = sld [smem:[#allocation14_spill]]  ;;  %s20746_s21 = smov %s14333_s22 }
 0xd54   : > { %p31_p9 = scmp.ge.s32.totalorder %s20743_s24, 4   ;;  %s20747_s22 = smov %s20744_s0 }
 0xd56   :  { %33 = sbr.rel (!%p31_p9) target bundleno = 9 (0x9), region = 169 }
 0xd5d   :  { %9682 = vsyncpa [#allocation3], 1 }
 0xd5e   :  { %9684 = vsyncpa [#allocation3 + $0x1], 1 }
 0xd5f   :  { %9685 = vsyncpa [#allocation4], 1 }
 0xd60   :  { %9687 = vsyncpa [#allocation4 + $0x1], 1 }
 0xd61   :  { %9688 = vsyncpa [#allocation7], 1 }
 0xd62   :  { %9690 = vsyncpa [#allocation7 + $0x1], 1 }

</bundles_post_ra>
